<compile_context>
chip_gen: v6e
topology: v6e:2x2x1
jax: 0.10.0
libtpu: 0.0.40
codegen_flags: <defaults>
</compile_context>

<pallas_src>
import functools
import math

import jax
import jax.numpy as jnp
from jax import lax
from jax.experimental import pallas as pl
from jax.experimental.pallas import tpu as pltpu


# ---------------------------------------------------------------------------
# helpers
# ---------------------------------------------------------------------------
@functools.lru_cache(maxsize=None)
def _vmem_limit_bytes():
    # ~75% of physical VMEM (v5e/v6e: 128 MiB, v7x: 64 MiB); conservative
    # fallback that is safe on every generation.
    try:
        return int(0.75 * pltpu.get_tpu_info().vmem_capacity_bytes)
    except Exception:
        return 48 * 1024 * 1024


def _choose_tile_h(H, W, K, cin_tile, cout, *, max_rows=2048,
                   vmem_budget=12 * 1024 * 1024):
    """Largest divisor of H whose (th*W)-row tile fits the row / VMEM budget."""
    best = 1
    for th in range(1, H + 1):
        if H % th:
            continue
        rows = th * W
        est = (2 * (th + K - 1) * (W + K - 1) * cin_tile * 2  # dbl-buffered bf16 input
               + rows * K * cin_tile * 2                      # im2col patch (bf16)
               + rows * cout * 4                              # f32 accumulator scratch
               + 2 * rows * cout * 2                          # dbl-buffered output
               + 2 * rows * cout * 2)                         # optional residual input
        if rows <= max_rows and est <= vmem_budget:
            best = th
    return best


# ---------------------------------------------------------------------------
# fused conv kernel
# ---------------------------------------------------------------------------
def _conv_kernel(*refs, K, TH, W, activation, has_residual, prefolded):
    """Fused conv2d (stride 1, 'same') + bias + activation + optional residual.

    x_ref:   (1, TH+K-1, Wk, Ck) bf16  padded input row-tile (with halo).
             prefolded: Wk=W,     Ck=K*Cin (kx taps pre-folded into channels)
             otherwise: Wk=W+K-1, Ck=Cin
    w_ref:   (K, K*Cin, Cout) bf16     BN already folded in
    b_ref:   (1, Cout) f32             BN already folded in
    a_ref:   (1,) f32 in SMEM          PReLU slope
    res_ref: (1, TH, W, Cout) bf16     optional residual tile
    o_ref:   (1, TH, W, Cout)
    acc_ref: (TH*W, Cout) f32 VMEM scratch accumulator
    """
    if has_residual:
        x_ref, w_ref, b_ref, a_ref, res_ref, o_ref, acc_ref = refs
    else:
        x_ref, w_ref, b_ref, a_ref, o_ref, acc_ref = refs
        res_ref = None

    cout = o_ref.shape[-1]
    rows = TH * W

    x = x_ref[0]                                    # (TH+K-1, Wk, Ck)
    for ky in range(K):                             # K MXU matmuls, depth K*Cin
        xk = x[ky:ky + TH]                          # (TH, Wk, Ck)
        if prefolded:
            patch = xk                              # kx already folded in
        else:
            patch = jnp.concatenate(
                [xk[:, kx:kx + W, :] for kx in range(K)], axis=-1)
        contrib = jnp.dot(patch.reshape(rows, -1), w_ref[ky],
                          preferred_element_type=jnp.float32)
        if ky == 0:
            acc_ref[...] = contrib
        else:
            acc_ref[...] += contrib

    acc = acc_ref[...] + b_ref[...]                 # f32 epilogue
    if activation == "prelu":
        slope = a_ref[0]
        acc = jnp.where(acc >= 0.0, acc, slope * acc)
    elif activation == "tanh":
        acc = jnp.tanh(acc)

    out = acc.reshape(TH, W, cout)
    if has_residual:
        out = out + res_ref[0].astype(jnp.float32)  # fused skip add
    # TODO(synk): for Cout=3 (conv3) the store uses 3/128 lanes; a lane-dense
    # transposed output layout (fusing the NHWC->NCHW transpose) would speed
    # up the store path further.
    o_ref[0] = out.astype(o_ref.dtype)


def conv2d_fused(x, w, b, *, bn_scale=None, bn_shift=None, alpha=None,
                 activation=None, residual=None, out_dtype=jnp.bfloat16):
    """x: (N,H,W,Cin); w: (K,K,Cin,Cout) HWIO; b: (Cout,) -> (N,H,W,Cout)."""
    N, H, W, Cin = x.shape
    K = w.shape[0]
    Cout = w.shape[-1]
    pad = K // 2

    # Fold eval-mode BatchNorm into the weights / bias (keeps the kernel
    # epilogue to a single bias add).
    w = w.astype(jnp.float32)
    b = b.astype(jnp.float32)
    if bn_scale is not None:
        w = w * bn_scale[None, None, None, :]
        b = b * bn_scale + bn_shift

    x = x.astype(jnp.bfloat16)
    xp = jnp.pad(x, ((0, 0), (pad, pad), (pad, pad), (0, 0)))

    # Tiny channel counts (conv1: Cin=3): fold the kx taps into the channel
    # axis in plain XLA so the kernel does no lane-axis concatenation at all.
    prefold = Cin < 16
    if prefold:
        xp = jnp.concatenate([xp[:, :, kx:kx + W, :] for kx in range(K)],
                             axis=-1)
        wk, ck = W, K * Cin
    else:
        wk, ck = W + 2 * pad, Cin

    th = _choose_tile_h(H, W, K, ck, Cout)
    nt = H // th
    rows = th * W

    # Overlapping row tiles with a (K-1)-row halo, flattened over (batch, tile).
    # TODO(synk): the halo duplication (and the jnp.pad HBM pass) could be
    # removed with element-indexed BlockSpecs or a manual halo DMA.
    tiles = jnp.stack([xp[:, t * th:t * th + th + K - 1] for t in range(nt)],
                      axis=1).reshape(N * nt, th + K - 1, wk, ck)

    w_packed = w.reshape(K, K * Cin, Cout).astype(jnp.bfloat16)
    b_packed = b.reshape(1, Cout)
    if alpha is None:
        alpha = 0.0
    alpha = jnp.asarray(alpha, jnp.float32).reshape(1)

    kern = functools.partial(
        _conv_kernel, K=K, TH=th, W=W, activation=activation,
        has_residual=residual is not None, prefolded=prefold)

    in_specs = [
        pl.BlockSpec((1, th + K - 1, wk, ck),
                     lambda n, t, nt=nt: (n * nt + t, 0, 0, 0)),
        pl.BlockSpec((K, K * Cin, Cout), lambda n, t: (0, 0, 0)),
        pl.BlockSpec((1, Cout), lambda n, t: (0, 0)),
        pl.BlockSpec(memory_space=pltpu.MemorySpace.SMEM),   # PReLU slope
    ]
    args = [tiles, w_packed, b_packed, alpha]
    if residual is not None:
        in_specs.append(pl.BlockSpec((1, th, W, Cout),
                                     lambda n, t: (n, t, 0, 0)))
        args.append(residual.astype(jnp.bfloat16))

    return pl.pallas_call(
        kern,
        out_shape=jax.ShapeDtypeStruct((N, H, W, Cout), out_dtype),
        grid=(N, nt),
        in_specs=in_specs,
        out_specs=pl.BlockSpec((1, th, W, Cout), lambda n, t: (n, t, 0, 0)),
        scratch_shapes=[pltpu.VMEM((rows, Cout), jnp.float32)],
        compiler_params=pltpu.CompilerParams(
            dimension_semantics=("parallel", "parallel"),
            vmem_limit_bytes=_vmem_limit_bytes()),
    )(*args)


def pixel_shuffle_nhwc(x, r):
    """PyTorch nn.PixelShuffle semantics, NHWC layout (pure data movement)."""
    N, H, W, Crr = x.shape
    C = Crr // (r * r)
    x = x.reshape(N, H, W, C, r, r)
    x = x.transpose(0, 1, 4, 2, 5, 3)          # (N, H, r, W, r, C)
    return x.reshape(N, H * r, W * r, C)


# ---------------------------------------------------------------------------
# Generator parameters (deterministic, synthetic) and forward pass
# ---------------------------------------------------------------------------
_BN_EPS = 1e-5


def _bn_eval_scale_shift(c):
    # Fresh BatchNorm2d in eval(): gamma=1, beta=0, running_mean=0, running_var=1.
    scale = jnp.full((c,), 1.0 / math.sqrt(1.0 + _BN_EPS), jnp.float32)
    shift = jnp.zeros((c,), jnp.float32)
    return scale, shift


def init_generator_params(key, *, kernel_one=9, kernel_two=3, n_channels=64,
                          n_blocks=16, scaling_factor=4):
    n_up = int(math.log2(scaling_factor))
    keys = iter(jax.random.split(key, 3 + 2 * n_blocks + n_up))

    def conv_init(k, ksize, cin, cout):
        kw, kb = jax.random.split(k)
        fan_in = ksize * ksize * cin
        w = jax.random.normal(kw, (ksize, ksize, cin, cout),
                              jnp.float32) / math.sqrt(fan_in)
        b = 0.01 * jax.random.normal(kb, (cout,), jnp.float32)
        return w, b

    params = {}
    w, b = conv_init(next(keys), kernel_one, 3, n_channels)
    params["conv1"] = {"w": w, "b": b, "alpha": jnp.float32(0.25)}  # PReLU init

    res_blocks = []
    for _ in range(n_blocks):
        w1, b1 = conv_init(next(keys), kernel_two, n_channels, n_channels)
        w2, b2 = conv_init(next(keys), kernel_two, n_channels, n_channels)
        s1, sh1 = _bn_eval_scale_shift(n_channels)
        s2, sh2 = _bn_eval_scale_shift(n_channels)
        res_blocks.append({"w1": w1, "b1": b1, "bn1_scale": s1, "bn1_shift": sh1,
                           "alpha": jnp.float32(0.25),
                           "w2": w2, "b2": b2, "bn2_scale": s2, "bn2_shift": sh2})
    params["res_blocks"] = res_blocks

    w, b = conv_init(next(keys), kernel_two, n_channels, n_channels)
    s, sh = _bn_eval_scale_shift(n_channels)
    params["conv2"] = {"w": w, "b": b, "bn_scale": s, "bn_shift": sh}

    subpixel = []
    for _ in range(n_up):
        w, b = conv_init(next(keys), kernel_two, n_channels, n_channels * 4)
        subpixel.append({"w": w, "b": b, "alpha": jnp.float32(0.25)})
    params["subpixel"] = subpixel

    w, b = conv_init(next(keys), kernel_one, n_channels, 3)
    params["conv3"] = {"w": w, "b": b}
    return params


def generator_forward(params, x_nchw):
    # TODO(synk): BatchNorm is reproduced in inference mode (running stats);
    # training-mode batch-statistic normalization is not computed here.
    x = jnp.transpose(x_nchw, (0, 2, 3, 1)).astype(jnp.bfloat16)  # NCHW -> NHWC

    # conv_block1: 9x9 conv + PReLU
    out = conv2d_fused(x, params["conv1"]["w"], params["conv1"]["b"],
                       alpha=params["conv1"]["alpha"], activation="prelu")
    long_skip = out

    # residual blocks: (conv3x3 + BN + PReLU) -> (conv3x3 + BN + skip) fused
    for blk in params["res_blocks"]:
        skip = out
        out = conv2d_fused(out, blk["w1"], blk["b1"],
                           bn_scale=blk["bn1_scale"], bn_shift=blk["bn1_shift"],
                           alpha=blk["alpha"], activation="prelu")
        out = conv2d_fused(out, blk["w2"], blk["b2"],
                           bn_scale=blk["bn2_scale"], bn_shift=blk["bn2_shift"],
                           residual=skip)

    # conv_block2: 3x3 conv + BN with the long skip fused into the epilogue
    out = conv2d_fused(out, params["conv2"]["w"], params["conv2"]["b"],
                       bn_scale=params["conv2"]["bn_scale"],
                       bn_shift=params["conv2"]["bn_shift"],
                       residual=long_skip)

    # subpixel blocks: conv3x3 (C -> 4C) + PixelShuffle(2) + PReLU
    # (scalar PReLU commutes with the PixelShuffle permutation, so it is fused
    #  into the conv kernel before the shuffle)
    for sp in params["subpixel"]:
        out = conv2d_fused(out, sp["w"], sp["b"],
                           alpha=sp["alpha"], activation="prelu")
        out = pixel_shuffle_nhwc(out, 2)

    # conv_block3: 9x9 conv + tanh (f32 output)
    out = conv2d_fused(out, params["conv3"]["w"], params["conv3"]["b"],
                       activation="tanh", out_dtype=jnp.float32)

    return jnp.transpose(out, (0, 3, 1, 2))  # NHWC -> NCHW


# ---------------------------------------------------------------------------
# reference (for lightweight correctness checks of the fused kernel)
# ---------------------------------------------------------------------------
def _reference_conv(x, w, b, *, bn_scale=None, bn_shift=None, alpha=None,
                    activation=None, residual=None):
    y = lax.conv_general_dilated(
        x.astype(jnp.float32), w.astype(jnp.float32), (1, 1), "SAME",
        dimension_numbers=("NHWC", "HWIO", "NHWC"),
        precision=lax.Precision.HIGHEST)
    y = y + b[None, None, None, :].astype(jnp.float32)
    if bn_scale is not None:
        y = y * bn_scale + bn_shift
    if activation == "prelu":
        y = jnp.where(y >= 0, y, alpha * y)
    elif activation == "tanh":
        y = jnp.tanh(y)
    if residual is not None:
        y = y + residual.astype(jnp.float32)
    return y


# ---------------------------------------------------------------------------
if __name__ == "__main__":
    key = jax.random.PRNGKey(0)
    pkey, xkey, ukey = jax.random.split(key, 3)
    k1, k2, k3, k4, k5 = jax.random.split(ukey, 5)

    # ---- unit checks of the fused conv kernel against lax.conv ------------
    # (a) 3x3 conv + BN + residual, tiled grid (nt=2), in-kernel im2col path.
    xa = jax.random.normal(k1, (1, 64, 64, 32), jnp.float32)
    wa = jax.random.normal(k2, (3, 3, 32, 48), jnp.float32) / math.sqrt(3 * 3 * 32)
    ba = 0.1 * jax.random.normal(k3, (48,), jnp.float32)
    ra = jax.random.normal(k4, (1, 64, 64, 48), jnp.float32)
    sc = jnp.linspace(0.5, 1.5, 48).astype(jnp.float32)
    sh = 0.05 * jnp.ones((48,), jnp.float32)
    got = conv2d_fused(xa, wa, ba, bn_scale=sc, bn_shift=sh,
                       residual=ra).astype(jnp.float32)
    want = _reference_conv(xa, wa, ba, bn_scale=sc, bn_shift=sh,
                           residual=ra.astype(jnp.bfloat16))
    assert bool(jnp.allclose(got, want, atol=5e-2, rtol=5e-2)), "conv3x3 mismatch"

    # (b) 9x9 conv + PReLU, Cin=3 (pre-folded kx taps), tiled grid.
    xb = jax.random.normal(k5, (2, 64, 64, 3), jnp.float32)
    wb = jax.random.normal(k1, (9, 9, 3, 16), jnp.float32) / math.sqrt(9 * 9 * 3)
    bb = 0.1 * jax.random.normal(k2, (16,), jnp.float32)
    got = conv2d_fused(xb, wb, bb, alpha=0.25,
                       activation="prelu").astype(jnp.float32)
    want = _reference_conv(xb, wb, bb, alpha=0.25, activation="prelu")
    assert bool(jnp.allclose(got, want, atol=5e-2, rtol=5e-2)), "conv9x9 mismatch"

    # ---- full generator (small hyper-parameters, PyTorch-style NCHW input) -
    n_channels, n_blocks, scaling_factor = 32, 2, 4
    params = init_generator_params(pkey, kernel_one=9, kernel_two=3,
                                   n_channels=n_channels, n_blocks=n_blocks,
                                   scaling_factor=scaling_factor)
    x = jax.random.normal(xkey, (2, 3, 32, 32), jnp.float32)

    fwd = jax.jit(generator_forward)
    out = jax.block_until_ready(fwd(params, x))

    assert out.shape == (2, 3, 32 * scaling_factor, 32 * scaling_factor), out.shape
    assert out.dtype == jnp.float32
    assert bool(jnp.all(jnp.isfinite(out)))
    assert bool(jnp.all(jnp.abs(out) <= 1.0))  # tanh output range
    print("KERNEL_OK")
</pallas_src>

<mosaic_0001>
module attributes {stable_mosaic.version = 11 : i64} {
  func.func @_conv_kernel(%arg0: i32, %arg1: i32, %arg2: memref<1x34x66x32xbf16, #tpu.memory_space<vmem>>, %arg3: memref<3x96x48xbf16, #tpu.memory_space<vmem>>, %arg4: memref<1x48xf32, #tpu.memory_space<vmem>>, %arg5: memref<1xf32, #tpu.memory_space<smem>>, %arg6: memref<1x32x64x48xbf16, #tpu.memory_space<vmem>>, %arg7: memref<1x32x64x48xbf16, #tpu.memory_space<vmem>>, %arg8: memref<2048x48xf32, #tpu.memory_space<vmem>>) attributes {dimension_semantics = [#tpu.dimension_semantics<parallel>, #tpu.dimension_semantics<parallel>], iteration_bounds = array<i64: 1, 2>, scalar_prefetch = 0 : i64, scratch_operands = 1 : i64, tpu.core_type = #tpu.core_type<tc>, window_params = [{transform_indices = @transform_0, window_bounds = array<i64: 1, 34, 66, 32>}, {pipeline_mode = #tpu.pipeline_mode<synchronous>, transform_indices = @transform_1, window_bounds = array<i64: 3, 96, 48>}, {pipeline_mode = #tpu.pipeline_mode<synchronous>, transform_indices = @transform_2, window_bounds = array<i64: 1, 48>}, {transform_indices = @transform_3, window_bounds = array<i64: 1>}, {transform_indices = @transform_4, window_bounds = array<i64: 1, 32, 64, 48>}, {transform_indices = @transform_5, window_bounds = array<i64: 1, 32, 64, 48>}]} {
    %c0 = arith.constant 0 : index
    %c0_0 = arith.constant 0 : index
    %c0_1 = arith.constant 0 : index
    %c0_2 = arith.constant 0 : index
    %0 = vector.load %arg2[%c0, %c0_0, %c0_1, %c0_2] : memref<1x34x66x32xbf16, #tpu.memory_space<vmem>>, vector<1x34x66x32xbf16>
    %1 = vector.shape_cast %0 : vector<1x34x66x32xbf16> to vector<34x66x32xbf16>
    %2 = vector.extract_strided_slice %1 {offsets = [0, 0, 0], sizes = [32, 66, 32], strides = [1, 1, 1]} : vector<34x66x32xbf16> to vector<32x66x32xbf16>
    %3 = vector.extract_strided_slice %2 {offsets = [0, 0, 0], sizes = [32, 64, 32], strides = [1, 1, 1]} : vector<32x66x32xbf16> to vector<32x64x32xbf16>
    %4 = vector.extract_strided_slice %2 {offsets = [0, 1, 0], sizes = [32, 64, 32], strides = [1, 1, 1]} : vector<32x66x32xbf16> to vector<32x64x32xbf16>
    %5 = vector.extract_strided_slice %2 {offsets = [0, 2, 0], sizes = [32, 64, 32], strides = [1, 1, 1]} : vector<32x66x32xbf16> to vector<32x64x32xbf16>
    %6 = tpu.concatenate %3, %4, %5 in 2 : vector<32x64x32xbf16>, vector<32x64x32xbf16>, vector<32x64x32xbf16> -> vector<32x64x96xbf16>
    %7 = vector.shape_cast %6 : vector<32x64x96xbf16> to vector<2048x96xbf16>
    %c0_3 = arith.constant 0 : index
    %c0_4 = arith.constant 0 : index
    %c0_5 = arith.constant 0 : index
    %8 = vector.load %arg3[%c0_3, %c0_4, %c0_5] : memref<3x96x48xbf16, #tpu.memory_space<vmem>>, vector<1x96x48xbf16>
    %9 = vector.shape_cast %8 : vector<1x96x48xbf16> to vector<96x48xbf16>
    %cst = arith.constant dense<0.000000e+00> : vector<2048x48xf32>
    %10 = tpu.matmul %7, %9, %cst {dimension_numbers = #tpu.dot_dimension_numbers<[1], [0], [0], [1], [0, 0, 1, 1], [], []>} : vector<2048x96xbf16>, vector<96x48xbf16>, vector<2048x48xf32> -> vector<2048x48xf32>
    %c0_6 = arith.constant 0 : index
    %c0_7 = arith.constant 0 : index
    %11 = vector.load %arg8[%c0_6, %c0_7] : memref<2048x48xf32, #tpu.memory_space<vmem>>, vector<2048x48xf32>
    tpu.vector_store %arg8[%c0_6, %c0_7], %10 {strides = array<i32>} : memref<2048x48xf32, #tpu.memory_space<vmem>>, vector<2048x48xf32>,
    %12 = vector.extract_strided_slice %1 {offsets = [1, 0, 0], sizes = [32, 66, 32], strides = [1, 1, 1]} : vector<34x66x32xbf16> to vector<32x66x32xbf16>
    %13 = vector.extract_strided_slice %12 {offsets = [0, 0, 0], sizes = [32, 64, 32], strides = [1, 1, 1]} : vector<32x66x32xbf16> to vector<32x64x32xbf16>
    %14 = vector.extract_strided_slice %12 {offsets = [0, 1, 0], sizes = [32, 64, 32], strides = [1, 1, 1]} : vector<32x66x32xbf16> to vector<32x64x32xbf16>
    %15 = vector.extract_strided_slice %12 {offsets = [0, 2, 0], sizes = [32, 64, 32], strides = [1, 1, 1]} : vector<32x66x32xbf16> to vector<32x64x32xbf16>
    %16 = tpu.concatenate %13, %14, %15 in 2 : vector<32x64x32xbf16>, vector<32x64x32xbf16>, vector<32x64x32xbf16> -> vector<32x64x96xbf16>
    %17 = vector.shape_cast %16 : vector<32x64x96xbf16> to vector<2048x96xbf16>
    %c1 = arith.constant 1 : index
    %c0_8 = arith.constant 0 : index
    %c0_9 = arith.constant 0 : index
    %18 = vector.load %arg3[%c1, %c0_8, %c0_9] : memref<3x96x48xbf16, #tpu.memory_space<vmem>>, vector<1x96x48xbf16>
    %19 = vector.shape_cast %18 : vector<1x96x48xbf16> to vector<96x48xbf16>
    %cst_10 = arith.constant dense<0.000000e+00> : vector<2048x48xf32>
    %20 = tpu.matmul %17, %19, %cst_10 {dimension_numbers = #tpu.dot_dimension_numbers<[1], [0], [0], [1], [0, 0, 1, 1], [], []>} : vector<2048x96xbf16>, vector<96x48xbf16>, vector<2048x48xf32> -> vector<2048x48xf32>
    %c0_11 = arith.constant 0 : index
    %c0_12 = arith.constant 0 : index
    %21 = vector.load %arg8[%c0_11, %c0_12] : memref<2048x48xf32, #tpu.memory_space<vmem>>, vector<2048x48xf32>
    %22 = arith.addf %21, %20 : vector<2048x48xf32>
    %c0_13 = arith.constant 0 : index
    %c0_14 = arith.constant 0 : index
    %23 = vector.load %arg8[%c0_13, %c0_14] : memref<2048x48xf32, #tpu.memory_space<vmem>>, vector<2048x48xf32>
    tpu.vector_store %arg8[%c0_13, %c0_14], %22 {strides = array<i32>} : memref<2048x48xf32, #tpu.memory_space<vmem>>, vector<2048x48xf32>,
    %24 = vector.extract_strided_slice %1 {offsets = [2, 0, 0], sizes = [32, 66, 32], strides = [1, 1, 1]} : vector<34x66x32xbf16> to vector<32x66x32xbf16>
    %25 = vector.extract_strided_slice %24 {offsets = [0, 0, 0], sizes = [32, 64, 32], strides = [1, 1, 1]} : vector<32x66x32xbf16> to vector<32x64x32xbf16>
    %26 = vector.extract_strided_slice %24 {offsets = [0, 1, 0], sizes = [32, 64, 32], strides = [1, 1, 1]} : vector<32x66x32xbf16> to vector<32x64x32xbf16>
    %27 = vector.extract_strided_slice %24 {offsets = [0, 2, 0], sizes = [32, 64, 32], strides = [1, 1, 1]} : vector<32x66x32xbf16> to vector<32x64x32xbf16>
    %28 = tpu.concatenate %25, %26, %27 in 2 : vector<32x64x32xbf16>, vector<32x64x32xbf16>, vector<32x64x32xbf16> -> vector<32x64x96xbf16>
    %29 = vector.shape_cast %28 : vector<32x64x96xbf16> to vector<2048x96xbf16>
    %c2 = arith.constant 2 : index
    %c0_15 = arith.constant 0 : index
    %c0_16 = arith.constant 0 : index
    %30 = vector.load %arg3[%c2, %c0_15, %c0_16] : memref<3x96x48xbf16, #tpu.memory_space<vmem>>, vector<1x96x48xbf16>
    %31 = vector.shape_cast %30 : vector<1x96x48xbf16> to vector<96x48xbf16>
    %cst_17 = arith.constant dense<0.000000e+00> : vector<2048x48xf32>
    %32 = tpu.matmul %29, %31, %cst_17 {dimension_numbers = #tpu.dot_dimension_numbers<[1], [0], [0], [1], [0, 0, 1, 1], [], []>} : vector<2048x96xbf16>, vector<96x48xbf16>, vector<2048x48xf32> -> vector<2048x48xf32>
    %c0_18 = arith.constant 0 : index
    %c0_19 = arith.constant 0 : index
    %33 = vector.load %arg8[%c0_18, %c0_19] : memref<2048x48xf32, #tpu.memory_space<vmem>>, vector<2048x48xf32>
    %34 = arith.addf %33, %32 : vector<2048x48xf32>
    %c0_20 = arith.constant 0 : index
    %c0_21 = arith.constant 0 : index
    %35 = vector.load %arg8[%c0_20, %c0_21] : memref<2048x48xf32, #tpu.memory_space<vmem>>, vector<2048x48xf32>
    tpu.vector_store %arg8[%c0_20, %c0_21], %34 {strides = array<i32>} : memref<2048x48xf32, #tpu.memory_space<vmem>>, vector<2048x48xf32>,
    %c0_22 = arith.constant 0 : index
    %c0_23 = arith.constant 0 : index
    %36 = vector.load %arg8[%c0_22, %c0_23] : memref<2048x48xf32, #tpu.memory_space<vmem>>, vector<2048x48xf32>
    %c0_24 = arith.constant 0 : index
    %c0_25 = arith.constant 0 : index
    %37 = vector.load %arg4[%c0_24, %c0_25] : memref<1x48xf32, #tpu.memory_space<vmem>>, vector<1x48xf32>
    %38 = vector.broadcast %37 : vector<1x48xf32> to vector<2048x48xf32>
    %39 = arith.addf %36, %38 : vector<2048x48xf32>
    %40 = vector.shape_cast %39 : vector<2048x48xf32> to vector<32x64x48xf32>
    %c0_26 = arith.constant 0 : index
    %c0_27 = arith.constant 0 : index
    %c0_28 = arith.constant 0 : index
    %c0_29 = arith.constant 0 : index
    %41 = vector.load %arg6[%c0_26, %c0_27, %c0_28, %c0_29] : memref<1x32x64x48xbf16, #tpu.memory_space<vmem>>, vector<1x32x64x48xbf16>
    %42 = vector.shape_cast %41 : vector<1x32x64x48xbf16> to vector<32x64x48xbf16>
    %43 = arith.extf %42 : vector<32x64x48xbf16> to vector<32x64x48xf32>
    %44 = arith.addf %40, %43 : vector<32x64x48xf32>
    %45 = arith.truncf %44 : vector<32x64x48xf32> to vector<32x64x48xbf16>
    %c0_30 = arith.constant 0 : index
    %c0_31 = arith.constant 0 : index
    %c0_32 = arith.constant 0 : index
    %c0_33 = arith.constant 0 : index
    %46 = vector.load %arg7[%c0_30, %c0_31, %c0_32, %c0_33] : memref<1x32x64x48xbf16, #tpu.memory_space<vmem>>, vector<1x32x64x48xbf16>
    %47 = vector.shape_cast %46 : vector<1x32x64x48xbf16> to vector<32x64x48xbf16>
    %48 = vector.shape_cast %45 : vector<32x64x48xbf16> to vector<1x32x64x48xbf16>
    tpu.vector_store %arg7[%c0_30, %c0_31, %c0_32, %c0_33], %48 {strides = array<i32>} : memref<1x32x64x48xbf16, #tpu.memory_space<vmem>>, vector<1x32x64x48xbf16>,
    return
  }
  func.func @transform_0(%arg0: i32, %arg1: i32) -> (i32, i32, i32, i32) {
    %c2_i32 = arith.constant 2 : i32
    %0 = arith.muli %arg0, %c2_i32 : i32
    %1 = arith.addi %0, %arg1 : i32
    %c0_i32 = arith.constant 0 : i32
    %c0_i32_0 = arith.constant 0 : i32
    %c0_i32_1 = arith.constant 0 : i32
    %c0_i32_2 = arith.constant 0 : i32
    return %1, %c0_i32, %c0_i32_0, %c0_i32_1 : i32, i32, i32, i32
  }
  func.func @transform_1(%arg0: i32, %arg1: i32) -> (i32, i32, i32) {
    %c0_i32 = arith.constant 0 : i32
    %c0_i32_0 = arith.constant 0 : i32
    %c0_i32_1 = arith.constant 0 : i32
    %c0_i32_2 = arith.constant 0 : i32
    return %c0_i32, %c0_i32_0, %c0_i32_1 : i32, i32, i32
  }
  func.func @transform_2(%arg0: i32, %arg1: i32) -> (i32, i32) {
    %c0_i32 = arith.constant 0 : i32
    %c0_i32_0 = arith.constant 0 : i32
    %c0_i32_1 = arith.constant 0 : i32
    return %c0_i32, %c0_i32_0 : i32, i32
  }
  func.func @transform_3(%arg0: i32, %arg1: i32) -> i32 {
    %c0_i32 = arith.constant 0 : i32
    %c0_i32_0 = arith.constant 0 : i32
    return %c0_i32 : i32
  }
  func.func @transform_4(%arg0: i32, %arg1: i32) -> (i32, i32, i32, i32) {
    %c0_i32 = arith.constant 0 : i32
    %c0_i32_0 = arith.constant 0 : i32
    %c0_i32_1 = arith.constant 0 : i32
    return %arg0, %arg1, %c0_i32, %c0_i32_0 : i32, i32, i32, i32
  }
  func.func @transform_5(%arg0: i32, %arg1: i32) -> (i32, i32, i32, i32) {
    %c0_i32 = arith.constant 0 : i32
    %c0_i32_0 = arith.constant 0 : i32
    %c0_i32_1 = arith.constant 0 : i32
    return %arg0, %arg1, %c0_i32, %c0_i32_0 : i32, i32, i32, i32
  }
}

</mosaic_0001>

<bundles_post_ra>
// kernel: tpu_custom_call.1
= control target key start
LH: loop header
LB: loop body
LE: loop exit
PB: predicated region body
PF: predicated region fallthrough
CT: control target
= control target key end

     0   :  { %s15456_s18 = smov 0   ;;  %s15458_s19 = smov 0   ;;  %s20808_s0 = inlined_call_operand.vmem [shape: bf16[2,34,66,32], index: 0, kind: input, shape index: {}]   ;;  %s20809_s1 = inlined_call_operand.vmem [shape: bf16[3,96,48], index: 1, kind: input, shape index: {}]   ;;  %s20810_s2 = inlined_call_operand.vmem [shape: f32[1,48], index: 2, kind: input, shape index: {}]   ;;  %s20811_s3 = inlined_call_operand.<no memory space> [shape: f32[1], index: 3, kind: input, shape index: {}]   ;;  %s20812_s4 = inlined_call_operand.vmem [shape: bf16[1,64,64,48], index: 4, kind: input, shape index: {}]   ;;  %s20813_s5 = inlined_call_operand.vmem [shape: bf16[1,64,64,48], index: 5, kind: output, shape index: {}]  }
   0x1   :  { %s15460_s20 = smov 0  }
   0x2 LB: > { %s25_s3 = sadd.s32 1, %s15418_s19  ;;  %p12078_p0 = scmp.ge.s32.totalorder %s15422_s20, 1  ;;  %s15422_s20 = sphi %s15460_s20, %s16_s20   ;;  %s15418_s19 = sphi %s15458_s19, %s21128_s19   ;;  %s15414_s18 = sphi %s15456_s18, %s21127_s18  }
   0x3   : > { %p26_p1 = scmp.ge.s32.totalorder %s25_s3, 2  ;;  %p228_p2 = scmp.lt.s32.totalorder %s15422_s20, 3 }
   0x5   : > { %s21130_s3 = smov (%p26_p1, %s25_s3), 0  ;;  %p229_p3 = pnand %p12078_p0, %p228_p2 }
   0x7   : > { %232 = sbr.rel (%p229_p3) target bundleno = 1381 (0x565), region = 40 }
   0xc   : > { %p275_p4 = scmp.lt.s32.totalorder %s15414_s18, 1  ;;  %v15118_v0 = vld [vmem:[%s20809_s1 + $0x28] sm:$0xff]   ;;  %v15121_v1 = vld [vmem:[%s20809_s1 + $0x20] sm:$0xff]   ;;  %v15123_v2 = vld [vmem:[%s20809_s1 + $0x18] sm:$0xff]   ;;  %vm2756_vm0 = vcmask 1046528   ;;  %s15424_s11 = smov 64  }
   0xd   : > { %15044 = vmatprep.subr.bf16.mxu1 %v15118_v0  ;;  %14240 = vmatprep.subr.bf16.mxu0 %v15118_v0  ;;  %v15124_v3 = vld [vmem:[%s20809_s1 + $0x10] sm:$0xff]   ;;  %vm1347_vm1 = vsmask.f32 7424  ;;  %v15128_v10 = vld [vmem:[%s20809_s1 + $0x8] sm:$0xff]   ;;  %s15425_s12 = smov 32   ;;  %vm3301_vm2 = vcmask 261120  }
   0xe   : > { %s276_s25 = scalar_select %p275_p4, %s15414_s18, 1  ;;  %15050 = vmatpush3.bf16.msra.mxu1 %v15118_v0  ;;  %14241 = vmatpush3.bf16.msra.mxu0 %v15118_v0  ;;  %vm3558_vm3 = vcmask 523264   ;;  %vm3863_vm4 = vcmask 785408   ;;  %vm5177_vm5 = vcmask 392192   ;;  %vm11709_vm6 = vcmask 388096  }
   0xf   : > { %15045 = vmatprep.subr.bf16.mxu1 %v15121_v1  ;;  %14242 = vmatprep.subr.bf16.mxu0 %v15121_v1  ;;  %s12080_s23 = sshll.u32 %s15414_s18, 5 }
  0x10   : > { %s15056_s26 = smul.u32 1224, %s276_s25  ;;  %p18311_p5 = scmp.lt.s32.totalorder %s12080_s23, 63 }
  0x12   : > { %s15490_s6 = scalar_lea.vmem %s20808_s0, %s15056_s26  ;;  %15051 = vmatpush3.bf16.msra.mxu1 %v15121_v1  ;;  %14243 = vmatpush3.bf16.msra.mxu0 %v15121_v1  ;;  %s21132_s23 = smov (!%p18311_p5, %s12080_s23), 63 }
  0x13   : > { %v15496_v4 = vld [vmem:[%s15490_s6 + $0x250] sm:$0xff]   ;;  %v15084_v5 = vld [vmem:[%s15490_s6 + $0x258] sm:$0xff]   ;;  %15046 = vmatprep.subr.bf16.mxu1 %v15123_v2  ;;  %14244 = vmatprep.subr.bf16.mxu0 %v15123_v2  ;;  %v15085_v8 = vld [vmem:[%s15490_s6 + $0x240] sm:$0xff]   ;;  %s12941_s18 = sshll.u32 %s21132_s23, 5 }
  0x14   : > { %v2904_v6 = vrot.slane %v15496_v4, 1  ;;  %v2906_v7 = vrot.slane %v15084_v5, 1  ;;  %v15086_v9 = vld [vmem:[%s15490_s6 + $0x248] sm:$0xff]   ;;  %v15087_v11 = vld [vmem:[%s15490_s6 + $0x260] ss:$0 sps:$4 sm:$0x11]   ;;  %s18346_s27 = scalar_lea.vmem %s20812_s4, %s12941_s18  ;;  %s18394_s8 = scalar_lea.vmem %s20813_s5, %s12941_s18 }
  0x15   : > { %v1948_v12 = vshll.u32 %v15084_v5, 16  ;;  %v2901_v14 = vrot.slane %v15085_v8, 1  ;;  %v2902_v15 = vrot.slane %v15086_v9, 1  ;;  %v1952_v16 = vshrl.u32 %v15084_v5, 16  ;;  %v15508_v17 = vld [vmem:[%s15490_s6] sm:$0xff]   ;;  %v15089_v29 = vld [vmem:[%s15490_s6 + $0x8] sm:$0xff]  }
  0x16   : > { %15052 = vmatpush3.bf16.msra.mxu1 %v15123_v2  ;;  %14245 = vmatpush3.bf16.msra.mxu0 %v15123_v2  ;;  %v2907_v13 = vsel %vm2756_vm0, %v2904_v6, %v2906_v7  ;;  %v2908_v18 = vrot.slane %v15087_v11, 1  ;;  %v1956_v20 = vshll.u32 %v15087_v11, 16  ;;  %v1925_v21 = vshrl.u32 %v15085_v8, 16  ;;  %v15518_v34 = vld [vmem:[%s15490_s6 + $0x10] sm:$0xff]   ;;  %v15091_v42 = vld [vmem:[%s15490_s6 + $0x264] sm:$0xff]   ;;  %v15094_v2 = vld [vmem:[%s15490_s6 + $0x18] sm:$0xff]  }
  0x17   : > { %15047 = vmatprep.subr.bf16.mxu1 %v15124_v3  ;;  %14246 = vmatprep.subr.bf16.mxu0 %v15124_v3  ;;  %v1950_v19 = vrot.slane %v1948_v12, 1  ;;  %v2903_v22 = vsel %vm2756_vm0, %v2901_v14, %v2902_v15  ;;  %v1927_v23 = vshll.u32 %v15085_v8, 16  ;;  %v1932_v24 = vshll.u32 %v15086_v9, 16  ;;  %v15092_v49 = vld [vmem:[%s15490_s6 + $0x26c] sm:$0xff]   ;;  %v15535_v58 = vld [vmem:[%s15490_s6 + $0x274] sm:$0xff]  }
  0x18   : > { %3177 = vrot.lane.b32.xlu0 %v2907_v13, %s15424_s11  ;;  %3173 = vrot.lane.b32.xlu1 %v2903_v22, %s15424_s11  ;;  %v2909_v25 = vsel %vm2756_vm0, %v2906_v7, %v2908_v18  ;;  %v2905_v26 = vsel %vm2756_vm0, %v2902_v15, %v2904_v6  ;;  %v1958_v27 = vrot.slane %v1956_v20, 1  ;;  %v1936_v28 = vshrl.u32 %v15086_v9, 16  ;;  %v15095_v9 = vld [vmem:[%s15490_s6 + $0x20] ss:$0 sps:$4 sm:$0x11]  }
  0x19   : > { %v1954_v30 = vor.u32 %v1952_v16, %v1950_v19  ;;  %v1929_v31 = vrot.slane %v1927_v23, 1  ;;  %v1934_v32 = vrot.slane %v1932_v24, 1  ;;  %v1940_v33 = vshll.u32 %v15496_v4, 16  ;;  %v15096_v22 = vld [vmem:[%s15490_s6 + $0x27c] sm:$0xff]  }
  0x1a   : > { %15053 = vmatpush3.bf16.msra.mxu1 %v15124_v3  ;;  %14247 = vmatpush3.bf16.msra.mxu0 %v15124_v3  ;;  %v1349_v35 = vshrl.u32 %v15508_v17, 16  ;;  %v1351_v36 = vshll.u32 %v15508_v17, 16  ;;  %v1356_v37 = vshll.u32 %v15089_v29, 16  ;;  %v1944_v38 = vshrl.u32 %v15496_v4, 16 }
  0x1b   : > { %15048 = vmatprep.subr.bf16.mxu1 %v15128_v10  ;;  %14248 = vmatprep.subr.bf16.mxu0 %v15128_v10  ;;  %v1930_v39 = vor.u32 %v1929_v31, %v1925_v21  ;;  %v1938_v40 = vor.u32 %v1936_v28, %v1934_v32  ;;  %v1942_v41 = vrot.slane %v1940_v33, 1  ;;  %v1360_v45 = vshrl.u32 %v15089_v29, 16 }
  0x1c   : > { %3179 = vrot.lane.b32.xlu0 %v2909_v25, %s15424_s11  ;;  %3175 = vrot.lane.b32.xlu1 %v2905_v26, %s15424_s11  ;;  %v1353_v43 = vrot.slane %v1351_v36, 1  ;;  %v1358_v44 = vrot.slane %v1356_v37, 1  ;;  %v1959_v46 = vsel %vm1347_vm1, %v1954_v30, %v1958_v27  ;;  %v1364_v48 = vshll.u32 %v15518_v34, 16  ;;  %v15097_v25 = vld [vmem:[%s15490_s6 + $0x284] ss:$0 sps:$4 sm:$0x11]  }
  0x1d   : > { %v1935_v47 = vsel %vm1347_vm1, %v1930_v39, %v1934_v32  ;;  %v1943_v51 = vsel %vm1347_vm1, %v1938_v40, %v1942_v41  ;;  %v1946_v52 = vor.u32 %v1944_v38, %v1942_v41  ;;  %v1963_v53 = vshll.u32 %v15091_v42, 16  ;;  %v15098_v30 = vld [vmem:[%s15490_s6 + $0x24] sm:$0xff]   ;;  %v15099_v37 = vld [vmem:[%s15490_s6 + $0x2c] sm:$0xff]  }
  0x1e   : > { %15054 = vmatpush3.bf16.msra.mxu1 %v15128_v10  ;;  %14249 = vmatpush3.bf16.msra.mxu0 %v15128_v10  ;;  %v1354_v50 = vor.u32 %v1353_v43, %v1349_v35  ;;  %v1362_v55 = vor.u32 %v1360_v45, %v1358_v44  ;;  %v1366_v56 = vrot.slane %v1364_v48, 1  ;;  %v1968_v57 = vshll.u32 %v15092_v49, 16 }
  0x1f   : > { %v2757_v59 = vrot.slane %v15508_v17, 1  ;;  %v1951_v60 = vsel %vm1347_vm1, %v1946_v52, %v1950_v19  ;;  %v2758_v61 = vrot.slane %v15089_v29, 1  ;;  %v1961_v62 = vshrl.u32 %v15091_v42, 16  ;;  %v15101_v52 = vld [vmem:[%s15490_s6 + $0x288] sm:$0xff]  }
  0x20   : > { %2628 = vrot.lane.b32.xlu0 %v1935_v47, %s15425_s12  ;;  %2634 = vrot.lane.b32.xlu1 %v1959_v46, %s15425_s12  ;;  %v1359_v54 = vsel %vm1347_vm1, %v1354_v50, %v1358_v44  ;;  %v1965_v63 = vrot.slane %v1963_v53, 1  ;;  %v2760_v0 = vrot.slane %v15518_v34, 1  ;;  %v1972_v1 = vshrl.u32 %v15092_v49, 16 }
  0x21   : > { %v1367_v3 = vsel %vm1347_vm1, %v1362_v55, %v1366_v56  ;;  %v1970_v4 = vrot.slane %v1968_v57, 1  ;;  %v1976_v5 = vshll.u32 %v15535_v58, 16  ;;  %v2759_v6 = vsel %vm2756_vm0, %v2757_v59, %v2758_v61 }
  0x22   : > { %v1966_v7 = vor.u32 %v1965_v63, %v1961_v62  ;;  %v1368_v8 = vshrl.u32 %v15518_v34, 16  ;;  %v2761_v10 = vsel %vm2756_vm0, %v2758_v61, %v2760_v0  ;;  %v1372_v13 = vshll.u32 %v15094_v2, 16 }
  0x23   : > { %v1974_v11 = vor.u32 %v1972_v1, %v1970_v4  ;;  %v1978_v12 = vrot.slane %v1976_v5, 1  ;;  %v2910_v15 = vrot.slane %v15091_v42, 1  ;;  %v2911_v16 = vrot.slane %v15092_v49, 1  ;;  %v15574_v49 = vld [vmem:[%s15490_s6 + $0x34] sm:$0xff]  }
  0x24   : > { %2630 = vrot.lane.b32.xlu0 %v1943_v51, %s15425_s12  ;;  %2500 = vrot.lane.b32.xlu1 %v1359_v54, %s15425_s12  ;;  %v1971_v14 = vsel %vm1347_vm1, %v1966_v7, %v1970_v4  ;;  %v1376_v17 = vshrl.u32 %v15094_v2, 16  ;;  %v1370_v19 = vor.u32 %v1368_v8, %v1366_v56  ;;  %v1374_v20 = vrot.slane %v1372_v13, 1 }
  0x25   : > { %v1979_v18 = vsel %vm1347_vm1, %v1974_v11, %v1978_v12  ;;  %v1380_v21 = vshll.u32 %v15095_v9, 16  ;;  %v2912_v23 = vsel %vm2756_vm0, %v2910_v15, %v2911_v16  ;;  %v2913_v24 = vrot.slane %v15535_v58, 1 }
  0x26   : > { %v1375_v26 = vsel %vm1347_vm1, %v1370_v19, %v1374_v20  ;;  %v1378_v27 = vor.u32 %v1376_v17, %v1374_v20  ;;  %v1984_v29 = vshll.u32 %v15096_v22, 16  ;;  %v2762_v32 = vrot.slane %v15094_v2, 1  ;;  %v15591_v2 = vld [vmem:[%s15490_s6 + $0x298] sm:$0xff]  }
  0x27   : > { %v1382_v28 = vrot.slane %v1380_v21, 1  ;;  %v2914_v31 = vsel %vm2756_vm0, %v2911_v16, %v2913_v24  ;;  %v1980_v33 = vshrl.u32 %v15535_v58, 16  ;;  %v2764_v34 = vrot.slane %v15095_v9, 1  ;;  %v15583_v58 = vld [vmem:[%s15490_s6 + $0x290] sm:$0xff]  }
  0x28   : > { %2632 = vrot.lane.b32.xlu0 %v1951_v60, %s15425_s12  ;;  %2502 = vrot.lane.b32.xlu1 %v1367_v3, %s15425_s12  ;;  %v1988_v35 = vshrl.u32 %v15096_v22, 16  ;;  %v1992_v36 = vshll.u32 %v15097_v25, 16  ;;  %v1986_v39 = vrot.slane %v1984_v29, 1  ;;  %v1387_v40 = vshll.u32 %v15098_v30, 16 }
  0x29   : > { %v1383_v38 = vsel %vm1347_vm1, %v1378_v27, %v1382_v28  ;;  %v2763_v41 = vsel %vm2756_vm0, %v2760_v0, %v2762_v32  ;;  %v1982_v42 = vor.u32 %v1980_v33, %v1978_v12  ;;  %v2765_v43 = vsel %vm2756_vm0, %v2762_v32, %v2764_v34  ;;  %v15105_v16 = vld [vmem:[%s15490_s6 + $0x44] ss:$0 sps:$4 sm:$0x11]   ;;  %v15107_v34 = vld [vmem:[%s15490_s6 + $0x2a8] ss:$0 sps:$4 sm:$0x11]  }
  0x2a   : > { %v1385_v44 = vshrl.u32 %v15098_v30, 16  ;;  %v1990_v45 = vor.u32 %v1988_v35, %v1986_v39  ;;  %v1994_v46 = vrot.slane %v1992_v36, 1  ;;  %v1389_v47 = vrot.slane %v1387_v40, 1  ;;  %v15615_v27 = vld [vmem:[%s15490_s6 + $0x2a0] sm:$0xff]  }
  0x2b   : > { %v1392_v48 = vshll.u32 %v15099_v37, 16  ;;  %v1987_v50 = vsel %vm1347_vm1, %v1982_v42, %v1986_v39  ;;  %v2915_v51 = vrot.slane %v15096_v22, 1  ;;  %v1396_v53 = vshrl.u32 %v15099_v37, 16  ;;  %v15130_v22 = vld [vmem:[%s20809_s1] sm:$0xff]   ;;  %v15108_v39 = vld [vmem:[%s15490_s6 + $0x48] sm:$0xff]  }
  0x2c   : > { %3045 = vrot.lane.b32.xlu0 %v2759_v6, %s15424_s11  ;;  %3047 = vrot.lane.b32.xlu1 %v2761_v10, %s15424_s11  ;;  %v1995_v54 = vsel %vm1347_vm1, %v1990_v45, %v1994_v46  ;;  %v1390_v55 = vor.u32 %v1389_v47, %v1385_v44  ;;  %v1400_v57 = vshll.u32 %v15574_v49, 16  ;;  %v2917_v60 = vrot.slane %v15097_v25, 1  ;;  %v15104_v10 = vld [vmem:[%s15490_s6 + $0x3c] sm:$0xff]   ;;  %v15109_v44 = vld [vmem:[%s15490_s6 + $0x50] sm:$0xff]  }
  0x2d   : > { %v1394_v56 = vrot.slane %v1392_v48, 1  ;;  %v2916_v59 = vsel %vm2756_vm0, %v2913_v24, %v2915_v51  ;;  %v1999_v61 = vshll.u32 %v15101_v52, 16  ;;  %v2004_v1 = vshll.u32 %v15583_v58, 16  ;;  %15049 = vmatprep.subr.bf16.mxu1 %v15130_v22  ;;  %14250 = vmatprep.subr.bf16.mxu0 %v15130_v22 }
  0x2e   : > { %v1402_v0 = vrot.slane %v1400_v57, 1  ;;  %v2766_v3 = vrot.slane %v15098_v30, 1  ;;  %v2767_v4 = vrot.slane %v15099_v37, 1  ;;  %v2769_v5 = vrot.slane %v15574_v49, 1  ;;  %15055 = vmatpush3.bf16.msra.mxu1 %v15130_v22  ;;  %14251 = vmatpush3.bf16.msra.mxu0 %v15130_v22 }
  0x2f   : > { %v1395_v62 = vsel %vm1347_vm1, %v1390_v55, %v1394_v56  ;;  %v1398_v63 = vor.u32 %v1396_v53, %v1394_v56  ;;  %v2918_v6 = vsel %vm2756_vm0, %v2915_v51, %v2917_v60  ;;  %v1997_v7 = vshrl.u32 %v15101_v52, 16 }
  0x30   : > { %2636 = vrot.lane.b32.xlu0 %v1971_v14, %s15425_s12  ;;  %2638 = vrot.lane.b32.xlu1 %v1979_v18, %s15425_s12  ;;  %v2001_v8 = vrot.slane %v1999_v61, 1  ;;  %v2008_v9 = vshrl.u32 %v15583_v58, 16  ;;  %v2006_v12 = vrot.slane %v2004_v1, 1  ;;  %v2012_v13 = vshll.u32 %v15591_v2, 16  ;;  %v15111_v61 = vld [vmem:[%s15490_s6 + $0x2ac] sm:$0xff]  }
  0x31   : > { %v1403_v11 = vsel %vm1347_vm1, %v1398_v63, %v1402_v0  ;;  %v2768_v14 = vsel %vm2756_vm0, %v2766_v3, %v2767_v4  ;;  %v2770_v17 = vsel %vm2756_vm0, %v2767_v4, %v2769_v5  ;;  %v1404_v20 = vshrl.u32 %v15574_v49, 16  ;;  %v15112_v63 = vld [vmem:[%s15490_s6 + $0x2b4] sm:$0xff]  }
  0x32   : > { %v2002_v15 = vor.u32 %v2001_v8, %v1997_v7  ;;  %v2010_v18 = vor.u32 %v2008_v9, %v2006_v12  ;;  %v2014_v19 = vrot.slane %v2012_v13, 1  ;;  %v1408_v21 = vshll.u32 %v15104_v10, 16 }
  0x33   : > { %v2919_v24 = vrot.slane %v15101_v52, 1  ;;  %v2920_v25 = vrot.slane %v15583_v58, 1  ;;  %v1406_v29 = vor.u32 %v1404_v20, %v1402_v0  ;;  %v2922_v33 = vrot.slane %v15591_v2, 1  ;;  %v15638_v58 = vld [vmem:[%s15490_s6 + $0x58] sm:$0xff]  }
  0x34   : > { %3181 = vrot.lane.b32.xlu0 %v2912_v23, %s15424_s11  ;;  %2504 = vrot.lane.b32.xlu1 %v1375_v26, %s15425_s12  ;;  %v2007_v23 = vsel %vm1347_vm1, %v2002_v15, %v2006_v12  ;;  %v1412_v26 = vshrl.u32 %v15104_v10, 16  ;;  %v2015_v28 = vsel %vm1347_vm1, %v2010_v18, %v2014_v19  ;;  %v1410_v30 = vrot.slane %v1408_v21, 1 }
  0x35   : > { %v2921_v32 = vsel %vm2756_vm0, %v2919_v24, %v2920_v25  ;;  %v2923_v40 = vsel %vm2756_vm0, %v2920_v25, %v2922_v33  ;;  %v2773_v42 = vrot.slane %v15105_v16, 1  ;;  %v2024_v45 = vshrl.u32 %v15615_v27, 16 }
  0x36   : > { %v1411_v35 = vsel %vm1347_vm1, %v1406_v29, %v1410_v30  ;;  %v1414_v36 = vor.u32 %v1412_v26, %v1410_v30  ;;  %v2028_v46 = vshll.u32 %v15107_v34, 16  ;;  %v1423_v49 = vshll.u32 %v15108_v39, 16  ;;  %v15115_v26 = vld [vmem:[%s15490_s6 + $0x68] ss:$0 sps:$4 sm:$0x11]  }
  0x37   : > { %v1421_v53 = vshrl.u32 %v15108_v39, 16  ;;  %v1428_v57 = vshll.u32 %v15109_v44, 16  ;;  %v2924_v60 = vrot.slane %v15615_v27, 1  ;;  %v1436_v3 = vshll.u32 %v15638_v58, 16 }
  0x38   : > { %3183 = vrot.lane.b32.xlu0 %v2914_v31, %s15424_s11  ;;  %2506 = vrot.lane.b32.xlu1 %v1383_v38, %s15425_s12  ;;  %v1416_v31 = vshll.u32 %v15105_v16, 16  ;;  %v2020_v38 = vshll.u32 %v15615_v27, 16  ;;  %v2030_v55 = vrot.slane %v2028_v46, 1  ;;  %v1425_v56 = vrot.slane %v1423_v49, 1 }
  0x39   : > { %v2926_v4 = vrot.slane %v15107_v34, 1  ;;  %v1438_v9 = vrot.slane %v1436_v3, 1  ;;  %v2775_v13 = vrot.slane %v15108_v39, 1  ;;  %v2033_v15 = vshrl.u32 %v15111_v61, 16  ;;  %v15116_v39 = vld [vmem:[%s15490_s6 + $0x2c4] sm:$0xff]  }
  0x3a   : > { %v1418_v37 = vrot.slane %v1416_v31, 1  ;;  %v2022_v48 = vrot.slane %v2020_v38, 1  ;;  %v1426_v1 = vor.u32 %v1425_v56, %v1421_v53  ;;  %v2778_v18 = vrot.slane %v15638_v58, 1  ;;  %v15120_v56 = vld [vmem:[%s15490_s6 + $0x74] sm:$0xff]  }
  0x3b   : > { %v2927_v12 = vsel %vm2756_vm0, %v2924_v60, %v2926_v4  ;;  %v1440_v29 = vshrl.u32 %v15638_v58, 16  ;;  %v1452_v38 = vshll.u32 %v15115_v26, 16  ;;  %v2056_v46 = vshll.u32 %v15116_v39, 16 }
  0x3c   : > { %3049 = vrot.lane.b32.xlu0 %v2763_v41, %s15424_s11  ;;  %3051 = vrot.lane.b32.xlu1 %v2765_v43, %s15424_s11  ;;  %v2771_v41 = vrot.slane %v15104_v10, 1  ;;  %v2016_v43 = vshrl.u32 %v15591_v2, 16  ;;  %v1419_v47 = vsel %vm1347_vm1, %v1414_v36, %v1418_v37  ;;  %v1430_v2 = vrot.slane %v1428_v57, 1 }
  0x3d   : > { %v2040_v10 = vshll.u32 %v15112_v63, 16  ;;  %v1442_v36 = vor.u32 %v1440_v29, %v1438_v9  ;;  %v2933_v4 = vrot.slane %v15116_v39, 1 }
  0x3e   : > { %v2018_v51 = vor.u32 %v2016_v43, %v2014_v19  ;;  %v2774_v52 = vsel %vm2756_vm0, %v2771_v41, %v2773_v42  ;;  %v1431_v7 = vsel %vm1347_vm1, %v1426_v1, %v1430_v2  ;;  %v2044_v19 = vshrl.u32 %v15112_v63, 16  ;;  %v15117_v42 = vld [vmem:[%s15490_s6 + $0x2cc] ss:$0 sps:$4 sm:$0x11]  }
  0x3f   : > { %v2042_v21 = vrot.slane %v2040_v10, 1  ;;  %v1464_v1 = vshll.u32 %v15120_v56, 16 }
  0x40   : > { %2640 = vrot.lane.b32.xlu0 %v1987_v50, %s15425_s12  ;;  %2642 = vrot.lane.b32.xlu1 %v1995_v54, %s15425_s12  ;;  %v2772_v50 = vsel %vm2756_vm0, %v2769_v5, %v2771_v41  ;;  %v2026_v54 = vor.u32 %v2024_v45, %v2022_v48  ;;  %v2925_v5 = vsel %vm2756_vm0, %v2922_v33, %v2924_v60  ;;  %v2929_v33 = vrot.slane %v15112_v63, 1 }
  0x41   : > { %v2046_v27 = vor.u32 %v2044_v19, %v2042_v21  ;;  %v1454_v45 = vrot.slane %v1452_v38, 1 }
  0x42   : > { %v2031_v0 = vsel %vm1347_vm1, %v2026_v54, %v2030_v55  ;;  %v2058_v54 = vrot.slane %v2056_v46, 1  ;;  %v2064_v55 = vshll.u32 %v15117_v42, 16 }
  0x44   : > { %3185 = vrot.lane.b32.xlu0 %v2916_v59, %s15424_s11  ;;  %2508 = vrot.lane.b32.xlu1 %v1395_v62, %s15425_s12  ;;  %v2023_v59 = vsel %vm1347_vm1, %v2018_v51, %v2022_v48  ;;  %v1432_v62 = vshrl.u32 %v15109_v44, 16  ;;  %v2782_v51 = vrot.slane %v15115_v26, 1  ;;  %v2066_v63 = vrot.slane %v2064_v55, 1 }
  0x46   : > { %v1434_v8 = vor.u32 %v1432_v62, %v1430_v2  ;;  %v15691_v2 = vld [vmem:[%s15490_s6 + $0x7c] sm:$0xff]  }
  0x47   : > { %v1472_v10 = vshll.u32 %v15691_v2, 16  ;;  %v2787_v26 = vrot.slane %v15691_v2, 1 }
  0x48   : > { %3187 = vrot.lane.b32.xlu0 %v2918_v6, %s15424_s11  ;;  %2510 = vrot.lane.b32.xlu1 %v1403_v11, %s15425_s12  ;;  %v2035_v6 = vshll.u32 %v15111_v61, 16  ;;  %v15653_v11 = vld [vmem:[%s15490_s6 + $0x2bc] sm:$0xff]   ;;  %v1439_v20 = vsel %vm1347_vm1, %v1434_v8, %v1438_v9  ;;  %v1466_v9 = vrot.slane %v1464_v1, 1 }
  0x49   : > { %v2048_v22 = vshll.u32 %v15653_v11, 16  ;;  %v2931_v41 = vrot.slane %v15653_v11, 1 }
  0x4a   : > { %v2037_v16 = vrot.slane %v2035_v6, 1  ;;  %v1468_v6 = vshrl.u32 %v15120_v56, 16 }
  0x4b   : > { %v2932_v48 = vsel %vm2756_vm0, %v2929_v33, %v2931_v41 }
  0x4c   : > { %3053 = vrot.lane.b32.xlu0 %v2768_v14, %s15424_s11  ;;  %3055 = vrot.lane.b32.xlu1 %v2770_v17, %s15424_s11  ;;  %v2776_v14 = vrot.slane %v15109_v44, 1  ;;  %v15114_v17 = vld [vmem:[%s15490_s6 + $0x60] sm:$0xff]   ;;  %v2038_v24 = vor.u32 %v2037_v16, %v2033_v15 }
  0x4d   : > { %v1444_v30 = vshll.u32 %v15114_v17, 16  ;;  %v1448_v34 = vshrl.u32 %v15114_v17, 16  ;;  %v2780_v49 = vrot.slane %v15114_v17, 1  ;;  %v15706_v15 = vld [vmem:[%s15490_s6 + $0x2e0] sm:$0xff]   ;;  %v1470_v17 = vor.u32 %v1468_v6, %v1466_v9 }
  0x4e   : > { %v2779_v25 = vsel %vm2756_vm0, %v2776_v14, %v2778_v18  ;;  %v2043_v31 = vsel %vm1347_vm1, %v2038_v24, %v2042_v21  ;;  %v2785_v21 = vrot.slane %v15120_v56, 1  ;;  %v2088_v6 = vshrl.u32 %v15706_v15, 16 }
  0x4f   : > { %v1446_v37 = vrot.slane %v1444_v30, 1  ;;  %v2781_v58 = vsel %vm2756_vm0, %v2778_v18, %v2780_v49  ;;  %v2783_v60 = vsel %vm2756_vm0, %v2780_v49, %v2782_v51  ;;  %v1474_v18 = vrot.slane %v1472_v10, 1  ;;  %v15272_v10 = vld [vmem:[%s15490_s6 + $0x248] sm:$0xff]  }
  0x50   : > { %2644 = vrot.lane.b32.xlu0 %v2007_v23, %s15425_s12  ;;  %2646 = vrot.lane.b32.xlu1 %v2015_v28, %s15425_s12  ;;  %v2777_v23 = vsel %vm2756_vm0, %v2775_v13, %v2776_v14  ;;  %v2050_v28 = vrot.slane %v2048_v22, 1  ;;  %v2935_v13 = vrot.slane %v15117_v42, 1  ;;  %v15712_v22 = vld [vmem:[%s15490_s6 + $0x84] sm:$0xff]   ;;  %v2084_v30 = vshll.u32 %v15706_v15, 16 }
  0x51   : > { %v1447_v43 = vsel %vm1347_vm1, %v1442_v36, %v1446_v37  ;;  %v1450_v44 = vor.u32 %v1448_v34, %v1446_v37  ;;  %v1476_v34 = vshrl.u32 %v15691_v2, 16  ;;  %v2788_v36 = vsel %vm2756_vm0, %v2785_v21, %v2787_v26 }
  0x52   : > { %v2086_v38 = vrot.slane %v2084_v30, 1  ;;  %v2789_v1 = vrot.slane %v15712_v22, 1 }
  0x53   : > { %v1455_v53 = vsel %vm1347_vm1, %v1450_v44, %v1454_v45  ;;  %v1478_v45 = vor.u32 %v1476_v34, %v1474_v18 }
  0x54   : > { %3189 = vrot.lane.b32.xlu0 %v2921_v32, %s15424_s11  ;;  %2512 = vrot.lane.b32.xlu1 %v1411_v35, %s15425_s12  ;;  %v2928_v32 = vrot.slane %v15111_v61, 1  ;;  %v2051_v35 = vsel %vm1347_vm1, %v2046_v27, %v2050_v28 }
  0x58   : > { %3191 = vrot.lane.b32.xlu0 %v2923_v40, %s15424_s11  ;;  %2514 = vrot.lane.b32.xlu1 %v1419_v47, %s15425_s12  ;;  %v2930_v40 = vsel %vm2756_vm0, %v2928_v32, %v2929_v33  ;;  %v15119_v47 = vld [vmem:[%s15490_s6 + $0x6c] sm:$0xff]  }
  0x59   : > { %v1459_v57 = vshll.u32 %v15119_v47, 16  ;;  %v1457_v61 = vshrl.u32 %v15119_v47, 16 }
  0x5c   : > { %3057 = vrot.lane.b32.xlu0 %v2772_v50, %s15424_s11  ;;  %3059 = vrot.lane.b32.xlu1 %v2774_v52, %s15424_s11  ;;  %v2052_v50 = vshrl.u32 %v15653_v11, 16  ;;  %v2060_v52 = vshrl.u32 %v15116_v39, 16  ;;  %v15700_v11 = vld [vmem:[%s15490_s6 + $0x2d8] sm:$0xff]   ;;  %v15131_v39 = vld [vmem:[%s15490_s6 + $0x8c] ss:$0 sps:$4 sm:$0x11]  }
  0x5d   : > { %v2076_v19 = vshll.u32 %v15700_v11, 16  ;;  %v2080_v27 = vshrl.u32 %v15700_v11, 16  ;;  %v1488_v49 = vshll.u32 %v15131_v39, 16 }
  0x5e   : > { %v2062_v62 = vor.u32 %v2060_v52, %v2058_v54  ;;  %v15744_v52 = vld [vmem:[%s15490_s6 + $0x2f0] ss:$0 sps:$4 sm:$0x11]  }
  0x5f   : > { %v2078_v29 = vrot.slane %v2076_v19, 1  ;;  %v2090_v19 = vor.u32 %v2088_v6, %v2086_v38  ;;  %v15277_v6 = vld [vmem:[%s15490_s6 + $0x264] sm:$0xff]  }
  0x60   : > { %2648 = vrot.lane.b32.xlu0 %v2023_v59, %s15425_s12  ;;  %2650 = vrot.lane.b32.xlu1 %v2031_v0, %s15425_s12  ;;  %v2054_v59 = vor.u32 %v2052_v50, %v2050_v28  ;;  %v1461_v0 = vrot.slane %v1459_v57, 1  ;;  %v1475_v28 = vsel %vm1347_vm1, %v1470_v17, %v1474_v18  ;;  %v15740_v50 = vld [vmem:[%s15490_s6 + $0x2e8] sm:$0xff]   ;;  %v15271_v57 = vld [vmem:[%s15490_s6 + $0x240] sm:$0xff]   ;;  %v2790_v18 = vsel %vm2756_vm0, %v2787_v26, %v2789_v1 }
  0x61   : > { %v2082_v37 = vor.u32 %v2080_v27, %v2078_v29  ;;  %v15793_v26 = vld [vmem:[%s15490_s6 + $0xa0] sm:$0xff]  }
  0x62   : > { %v2059_v3 = vsel %vm1347_vm1, %v2054_v59, %v2058_v54  ;;  %v1462_v8 = vor.u32 %v1461_v0, %v1457_v61  ;;  %v2940_v54 = vrot.slane %v15706_v15, 1  ;;  %v2092_v61 = vshll.u32 %v15740_v50, 16 }
  0x64   : > { %3193 = vrot.lane.b32.xlu0 %v2925_v5, %s15424_s11  ;;  %2516 = vrot.lane.b32.xlu1 %v1431_v7, %s15425_s12  ;;  %v15125_v5 = vld [vmem:[%s15490_s6 + $0x2d0] sm:$0xff]   ;;  %v2067_v7 = vsel %vm1347_vm1, %v2062_v62, %v2066_v63  ;;  %v1467_v16 = vsel %vm1347_vm1, %v1462_v8, %v1466_v9  ;;  %v2096_v8 = vshrl.u32 %v15740_v50, 16  ;;  %v2100_v9 = vshll.u32 %v15744_v52, 16 }
  0x65   : > { %v2071_v14 = vshll.u32 %v15125_v5, 16  ;;  %v2069_v24 = vshrl.u32 %v15125_v5, 16  ;;  %v2937_v42 = vrot.slane %v15125_v5, 1  ;;  %v15754_v62 = vld [vmem:[%s15490_s6 + $0x90] sm:$0xff]   ;;  %v2791_v5 = vrot.slane %v15131_v39, 1 }
  0x66   : > { %v2102_v2 = vrot.slane %v2100_v9, 1 }
  0x68   : > { %3195 = vrot.lane.b32.xlu0 %v2927_v12, %s15424_s11  ;;  %2518 = vrot.lane.b32.xlu1 %v1439_v20, %s15425_s12  ;;  %v2934_v12 = vsel %vm2756_vm0, %v2931_v41, %v2933_v4  ;;  %v2784_v20 = vrot.slane %v15119_v47, 1  ;;  %v2087_v47 = vsel %vm1347_vm1, %v2082_v37, %v2086_v38  ;;  %v15275_v37 = vld [vmem:[%s15490_s6] sm:$0xff]  }
  0x6c   : > { %3061 = vrot.lane.b32.xlu0 %v2777_v23, %s15424_s11  ;;  %3063 = vrot.lane.b32.xlu1 %v2779_v25, %s15424_s11  ;;  %v2936_v23 = vsel %vm2756_vm0, %v2933_v4, %v2935_v13  ;;  %v2073_v25 = vrot.slane %v2071_v14, 1  ;;  %v2094_v13 = vrot.slane %v2092_v61, 1  ;;  %v1495_v14 = vshll.u32 %v15754_v62, 16 }
  0x6e   : > { %v2074_v32 = vor.u32 %v2073_v25, %v2069_v24  ;;  %v15273_v24 = vld [vmem:[%s15490_s6 + $0x250] sm:$0xff]   ;;  %v2098_v27 = vor.u32 %v2096_v8, %v2094_v13  ;;  %v2095_v34 = vsel %vm1347_vm1, %v2090_v19, %v2094_v13 }
  0x6f   : > { %v15866_v19 = vld [vmem:[%s15490_s6 + $0xb0] ss:$0 sps:$4 sm:$0x11]  }
  0x70   : > { %2652 = vrot.lane.b32.xlu0 %v2043_v31, %s15425_s12  ;;  %2654 = vrot.lane.b32.xlu1 %v2051_v35, %s15425_s12  ;;  %v2786_v31 = vsel %vm2756_vm0, %v2784_v20, %v2785_v21  ;;  %v1480_v35 = vshll.u32 %v15712_v22, 16  ;;  %v2079_v41 = vsel %vm1347_vm1, %v2074_v32, %v2078_v29  ;;  %v1493_v20 = vshrl.u32 %v15754_v62, 16 }
  0x72   : > { %v1482_v46 = vrot.slane %v1480_v35, 1  ;;  %v2942_v35 = vrot.slane %v15740_v50, 1 }
  0x74   : > { %3197 = vrot.lane.b32.xlu0 %v2930_v40, %s15424_s11  ;;  %2520 = vrot.lane.b32.xlu1 %v1447_v43, %s15425_s12  ;;  %v2938_v43 = vrot.slane %v15700_v11, 1  ;;  %v1483_v56 = vsel %vm1347_vm1, %v1478_v45, %v1482_v46  ;;  %v1508_v45 = vshll.u32 %v15793_v26, 16 }
  0x76   : > { %v2941_v4 = vsel %vm2756_vm0, %v2938_v43, %v2940_v54 }
  0x78   : > { %3199 = vrot.lane.b32.xlu0 %v2932_v48, %s15424_s11  ;;  %2522 = vrot.lane.b32.xlu1 %v1455_v53, %s15425_s12  ;;  %v1484_v48 = vshrl.u32 %v15712_v22, 16  ;;  %v2939_v53 = vsel %vm2756_vm0, %v2937_v42, %v2938_v43 }
  0x7a   : > { %v1486_v59 = vor.u32 %v1484_v48, %v1482_v46  ;;  %v15817_v46 = vld [vmem:[%s15490_s6 + $0x2fc] sm:$0xff]  }
  0x7c   : > { %3065 = vrot.lane.b32.xlu0 %v2781_v58, %s15424_s11  ;;  %3067 = vrot.lane.b32.xlu1 %v2783_v60, %s15424_s11  ;;  %v1490_v60 = vrot.slane %v1488_v49, 1 }
  0x80   : > { %2656 = vrot.lane.b32.xlu0 %v2059_v3, %s15425_s12  ;;  %2658 = vrot.lane.b32.xlu1 %v2067_v7, %s15425_s12  ;;  %v15762_v3 = vld [vmem:[%s15490_s6 + $0x98] sm:$0xff]  }
  0x81   : > { %v1500_v21 = vshll.u32 %v15762_v3, 16 }
  0x83   : > { %v1502_v39 = vrot.slane %v1500_v21, 1 }
  0x84   : > { %3201 = vrot.lane.b32.xlu0 %v2934_v12, %s15424_s11  ;;  %2524 = vrot.lane.b32.xlu1 %v1467_v16, %s15425_s12  ;;  %v1491_v12 = vsel %vm1347_vm1, %v1486_v59, %v1490_v60  ;;  %v2794_v59 = vrot.slane %v15762_v3, 1  ;;  %v1510_v60 = vrot.slane %v1508_v45, 1  ;;  %v15280_v45 = vld [vmem:[%s15490_s6 + $0x18] sm:$0xff]  }
  0x88   : > { %3203 = vrot.lane.b32.xlu0 %v2936_v23, %s15424_s11  ;;  %2526 = vrot.lane.b32.xlu1 %v1475_v28, %s15425_s12  ;;  %v2792_v23 = vsel %vm2756_vm0, %v2789_v1, %v2791_v5  ;;  %v1497_v28 = vrot.slane %v1495_v14, 1 }
  0x8a   : > { %v15723_v33 = vpop.permute.xlu0 %3177  ;;  %v3174_v40 = vpop.permute.xlu1 %3173  ;;  %v1498_v43 = vor.u32 %v1497_v28, %v1493_v20  ;;  %v15278_v20 = vld [vmem:[%s15490_s6 + $0x26c] sm:$0xff]  }
  0x8c   : > { %3069 = vrot.lane.b32.xlu0 %v2786_v31, %s15424_s11  ;;  %3071 = vrot.lane.b32.xlu1 %v2788_v36, %s15424_s11  ;;  %v15274_v31 = vld [vmem:[%s15490_s6 + $0x258] sm:$0xff]   ;;  %v1503_v15 = vsel %vm1347_vm1, %v1498_v43, %v1502_v39  ;;  %v15895_v43 = vld [vmem:[%s15490_s6 + $0x314] ss:$0 sps:$4 sm:$0x11]  }
  0x8d   : > { %v15807_v36 = vld [vmem:[%s15490_s6 + $0x2f4] sm:$0xff]  }
  0x8e   : > { %v15735_v44 = vpop.permute.xlu0 %3179  ;;  %v3176_v51 = vpop.permute.xlu1 %3175  ;;  %v2105_v1 = vshrl.u32 %v15807_v36, 16 }
  0x90   : > { %2660 = vrot.lane.b32.xlu0 %v2079_v41, %s15425_s12  ;;  %2662 = vrot.lane.b32.xlu1 %v2087_v47, %s15425_s12  ;;  %v2103_v41 = vsel %vm1347_vm1, %v2098_v27, %v2102_v2  ;;  %v15276_v47 = vld [vmem:[%s15490_s6 + $0x8] sm:$0xff]  }
  0x92   : > { %v2629_v55 = vpop.permute.xlu0 %2628  ;;  %v2635_v63 = vpop.permute.xlu1 %2634 }
  0x93   : > { %v3431_v58 = vsel %vm3301_vm2, %v15271_v57, %v2629_v55  ;;  %v3437_v32 = vsel %vm3301_vm2, %v15274_v31, %v2635_v63  ;;  %v2944_v55 = vrot.slane %v15744_v52, 1  ;;  %v15836_v57 = vld [vmem:[%s15490_s6 + $0x304] sm:$0xff]   ;;  %v2112_v52 = vshll.u32 %v15817_v46, 16 }
  0x94   : > { %3205 = vrot.lane.b32.xlu0 %v2939_v53, %s15424_s11  ;;  %v15758_v0 = vsel %vm3558_vm3, %v3431_v58, %v3174_v40  ;;  %2528 = vrot.lane.b32.xlu1 %v1483_v56, %s15425_s12  ;;  %v1504_v40 = vshrl.u32 %v15762_v3, 16  ;;  %v15825_v50 = vsel %vm3558_vm3, %v3437_v32, %v15735_v44  ;;  %v2943_v53 = vsel %vm2756_vm0, %v2940_v54, %v2942_v35  ;;  %v15850_v3 = vld [vmem:[%s15490_s6 + $0xa8] sm:$0xff]  }
  0x95   : > { %20964 = vst [vmem:[#allocation4_spill] sm:$0xff] %v15758_v0  ;;  %14380 = vmatprep.mubr.msk.bf16.mxu1 %vm3863_vm4, %v15758_v0  ;;  %20967 = vst [vmem:[#allocation7_spill] sm:$0xff] %v15825_v50  ;;  %v2107_v56 = vshll.u32 %v15807_v36, 16  ;;  %v2793_v58 = vrot.slane %v15754_v62, 1  ;;  %v2796_v63 = vrot.slane %v15793_v26, 1  ;;  %v2116_v62 = vshrl.u32 %v15817_v46, 16 }
  0x96   : > { %v2631_v7 = vpop.permute.xlu0 %2630  ;;  %v2501_v16 = vpop.permute.xlu1 %2500  ;;  %v1506_v54 = vor.u32 %v1504_v40, %v1502_v39  ;;  %v1516_v2 = vshll.u32 %v15850_v3, 16  ;;  %v2946_v31 = vrot.slane %v15807_v36, 1  ;;  %v2947_v32 = vrot.slane %v15817_v46, 1  ;;  %v15889_v39 = vld [vmem:[%s15490_s6 + $0x30c] sm:$0xff]   ;;  %v17439_v0 = vld [vmem:[%s15490_s6 + $0x200] sm:$0xff]  }
  0x97   : > { %v3433_v11 = vsel %vm3301_vm2, %v15272_v10, %v2631_v7  ;;  %v3303_v38 = vsel %vm3301_vm2, %v15275_v37, %v2501_v16  ;;  %v2109_v5 = vrot.slane %v2107_v56, 1  ;;  %v2795_v14 = vsel %vm2756_vm0, %v2793_v58, %v2794_v59 }
  0x98   : > { %3207 = vrot.lane.b32.xlu0 %v2941_v4, %s15424_s11  ;;  %v15779_v17 = vsel %vm3558_vm3, %v3433_v11, %v3176_v51  ;;  %2530 = vrot.lane.b32.xlu1 %v1491_v12, %s15425_s12  ;;  %v2945_v4 = vsel %vm2756_vm0, %v2942_v35, %v2944_v55  ;;  %v1511_v10 = vsel %vm1347_vm1, %v1506_v54, %v1510_v60  ;;  %v2114_v11 = vrot.slane %v2112_v52, 1  ;;  %v15913_v54 = vld [vmem:[%s15490_s6 + $0xbc] sm:$0xff]  }
  0x99   : > { %20965 = vst [vmem:[#allocation5_spill] sm:$0xff] %v15779_v17  ;;  %14381 = vmatmul.mubr.msk.bf16.vlgmr.msra.gmra.mxu1 %vm3863_vm4, %v15779_v17  ;;  %v2120_v12 = vshll.u32 %v15836_v57, 16  ;;  %v2110_v16 = vor.u32 %v2109_v5, %v2105_v1  ;;  %v1524_v36 = vshll.u32 %v15866_v19, 16  ;;  %v2800_v52 = vrot.slane %v15866_v19, 1  ;;  %v15282_v19 = vld [vmem:[%s15490_s6 + $0x27c] sm:$0xff]  }
  0x9a   : > { %v2633_v22 = vpop.permute.xlu0 %2632  ;;  %v2503_v29 = vpop.permute.xlu1 %2502  ;;  %v2136_v5 = vshll.u32 %v15895_v43, 16 }
  0x9b   : > { %v3435_v25 = vsel %vm3301_vm2, %v15273_v24, %v2633_v22  ;;  %v3305_v48 = vsel %vm3301_vm2, %v15276_v47, %v2503_v29  ;;  %v2122_v27 = vrot.slane %v2120_v12, 1  ;;  %v2115_v29 = vsel %vm1347_vm1, %v2110_v16, %v2114_v11 }
  0x9c   : > { %3073 = vrot.lane.b32.xlu0 %v2790_v18, %s15424_s11  ;;  %v15798_v30 = vsel %vm3558_vm3, %v3435_v25, %v15723_v33  ;;  %3075 = vrot.lane.b32.xlu1 %v2792_v23, %s15424_s11  ;;  %v1512_v18 = vshrl.u32 %v15793_v26, 16  ;;  %v2797_v23 = vsel %vm2756_vm0, %v2794_v59, %v2796_v63  ;;  %v2118_v25 = vor.u32 %v2116_v62, %v2114_v11  ;;  %v15281_v62 = vld [vmem:[%s15490_s6 + $0x274] sm:$0xff]  }
  0x9d   : > { %20966 = vst [vmem:[#allocation6_spill] sm:$0xff] %v15798_v30  ;;  %14384 = vmatprep.mubr.msk.bf16.mxu1 %vm3863_vm4, %v15798_v30  ;;  %v1526_v58 = vrot.slane %v1524_v36, 1  ;;  %v2128_v59 = vshll.u32 %v15889_v39, 16  ;;  %v15284_v36 = vld [vmem:[%s15490_s6 + $0x2c] sm:$0xff]  }
  0x9e   : > { %v3046_v33 = vpop.permute.xlu0 %3045  ;;  %v3048_v49 = vpop.permute.xlu1 %3047 }
  0x9f   : > { %v3560_v42 = vsel %vm3558_vm3, %v3303_v38, %v3046_v33  ;;  %v3562_v51 = vsel %vm3558_vm3, %v3305_v48, %v3048_v49  ;;  %v1514_v38 = vor.u32 %v1512_v18, %v1510_v60  ;;  %v1520_v33 = vshrl.u32 %v15850_v3, 16 }
  0xa0   : > { %2664 = vrot.lane.b32.xlu0 %v2095_v34, %s15425_s12  ;;  %14252 = vmatprep.mubr.msk.bf16.mxu0 %vm3863_vm4, %v3560_v42  ;;  %v15279_v34 = vld [vmem:[%s15490_s6 + $0x10] sm:$0xff]   ;;  %v1518_v42 = vrot.slane %v1516_v2, 1  ;;  %v2948_v49 = vsel %vm2756_vm0, %v2946_v31, %v2947_v32  ;;  %v1536_v18 = vshll.u32 %v15913_v54, 16  ;;  %v15955_v31 = vld [vmem:[%s15490_s6 + $0x318] sm:$0xff]  }
  0xa1   : > { %14385 = vmatmul.mubr.msk.bf16.gmra.mxu1 %vm3863_vm4, %v15825_v50  ;;  %2666 = vrot.lane.b32.xlu1 %v2103_v41, %s15425_s12  ;;  %v2123_v41 = vsel %vm1347_vm1, %v2118_v25, %v2122_v27 }
  0xa2   : > { %14253 = vmatmul.mubr.msk.bf16.vlgmr.msra.gmra.mxu0 %vm3863_vm4, %v3562_v51  ;;  %v2637_v44 = vpop.permute.xlu0 %2636  ;;  %v2639_v61 = vpop.permute.xlu1 %2638  ;;  %v2949_v51 = vrot.slane %v15836_v57, 1  ;;  %v1519_v56 = vsel %vm1347_vm1, %v1514_v38, %v1518_v42  ;;  %v1540_v38 = vshrl.u32 %v15913_v54, 16 }
  0xa3   : > { %v3439_v7 = vsel %vm3301_vm2, %v15277_v6, %v2637_v44  ;;  %v3441_v21 = vsel %vm3301_vm2, %v15278_v20, %v2639_v61  ;;  %v1522_v44 = vor.u32 %v1520_v33, %v1518_v42  ;;  %v2124_v61 = vshrl.u32 %v15836_v57, 16  ;;  %v15967_v42 = vld [vmem:[%s15490_s6 + $0x320] sm:$0xff]  }
  0xa4   : > { %3209 = vrot.lane.b32.xlu0 %v2943_v53, %s15424_s11  ;;  %v2798_v53 = vrot.slane %v15850_v3, 1  ;;  %v2950_v1 = vsel %vm2756_vm0, %v2947_v32, %v2949_v51  ;;  %v15283_v32 = vld [vmem:[%s15490_s6 + $0x24] sm:$0xff]   ;;  %v2803_v57 = vrot.slane %v15913_v54, 1  ;;  %v15998_v54 = vld [vmem:[%s15490_s6 + $0xcc] sm:$0xff]  }
  0xa5   : > { %2532 = vrot.lane.b32.xlu1 %v1503_v15, %s15425_s12  ;;  %v15910_v15 = vld [vmem:[%s15490_s6 + $0xb4] sm:$0xff]  }
  0xa6   : > { %v3182_v8 = vpop.permute.xlu0 %3181  ;;  %v2505_v13 = vpop.permute.xlu1 %2504  ;;  %v1531_v11 = vshll.u32 %v15910_v15, 16  ;;  %v1529_v16 = vshrl.u32 %v15910_v15, 16 }
  0xa7   : > { %v15856_v9 = vsel %vm3558_vm3, %v3439_v7, %v3182_v8  ;;  %v3307_v35 = vsel %vm3301_vm2, %v15279_v34, %v2505_v13  ;;  %v1527_v8 = vsel %vm1347_vm1, %v1522_v44, %v1526_v58  ;;  %v2799_v13 = vsel %vm2756_vm0, %v2796_v63, %v2798_v53 }
  0xa8   : > { %20968 = vst [vmem:[#allocation8_spill] sm:$0xff] %v15856_v9  ;;  %3211 = vrot.lane.b32.xlu0 %v2945_v4, %s15424_s11  ;;  %14388 = vmatprep.mubr.msk.bf16.mxu1 %vm3863_vm4, %v15856_v9  ;;  %v2132_v4 = vshrl.u32 %v15889_v39, 16  ;;  %v2138_v63 = vrot.slane %v2136_v5, 1  ;;  %v1533_v25 = vrot.slane %v1531_v11, 1  ;;  %v2802_v44 = vrot.slane %v15910_v15, 1  ;;  %v15285_v5 = vld [vmem:[%s15490_s6 + $0x288] sm:$0xff]  }
  0xa9   : > { %2534 = vrot.lane.b32.xlu1 %v1511_v10, %s15425_s12  ;;  %v2130_v10 = vrot.slane %v2128_v59, 1  ;;  %v2148_v59 = vshll.u32 %v15967_v42, 16  ;;  %v2152_v15 = vshrl.u32 %v15967_v42, 16 }
  0xaa   : > { %v3184_v22 = vpop.permute.xlu0 %3183  ;;  %v2507_v28 = vpop.permute.xlu1 %2506 }
  0xab   : > { %v15875_v24 = vsel %vm3558_vm3, %v3441_v21, %v3184_v22  ;;  %v3309_v46 = vsel %vm3301_vm2, %v15280_v45, %v2507_v28  ;;  %v2801_v22 = vsel %vm2756_vm0, %v2798_v53, %v2800_v52  ;;  %v2134_v26 = vor.u32 %v2132_v4, %v2130_v10 }
  0xac   : > { %20969 = vst [vmem:[#allocation9_spill] sm:$0xff] %v15875_v24  ;;  %3077 = vrot.lane.b32.xlu0 %v2795_v14, %s15424_s11  ;;  %14389 = vmatmul.mubr.msk.bf16.gmra.mxu1 %vm3863_vm4, %v15875_v24  ;;  %v2126_v14 = vor.u32 %v2124_v61, %v2122_v27  ;;  %v15947_v27 = vld [vmem:[%s15490_s6 + $0xc4] sm:$0xff]   ;;  %v2143_v53 = vshll.u32 %v15955_v31, 16  ;;  %v2141_v61 = vshrl.u32 %v15955_v31, 16 }
  0xad   : > { %3079 = vrot.lane.b32.xlu1 %v2797_v23, %s15424_s11  ;;  %v2805_v52 = vrot.slane %v15947_v27, 1 }
  0xae   : > { %v3050_v37 = vpop.permute.xlu0 %3049  ;;  %v3052_v47 = vpop.permute.xlu1 %3051  ;;  %v2131_v28 = vsel %vm1347_vm1, %v2126_v14, %v2130_v10  ;;  %v2145_v4 = vrot.slane %v2143_v53, 1  ;;  %v2150_v10 = vrot.slane %v2148_v59, 1 }
  0xaf   : > { %v3564_v40 = vsel %vm3558_vm3, %v3307_v35, %v3050_v37  ;;  %v3566_v48 = vsel %vm3558_vm3, %v3309_v46, %v3052_v47  ;;  %v1538_v37 = vrot.slane %v1536_v18, 1  ;;  %v16014_v18 = vld [vmem:[%s15490_s6 + $0xd4] ss:$0 sps:$4 sm:$0x11]  }
  0xb0   : > { %2668 = vrot.lane.b32.xlu0 %v2115_v29, %s15425_s12  ;;  %14256 = vmatprep.mubr.msk.bf16.mxu0 %vm3863_vm4, %v3564_v40  ;;  %v2951_v29 = vrot.slane %v15889_v39, 1  ;;  %v2139_v40 = vsel %vm1347_vm1, %v2134_v26, %v2138_v63  ;;  %v1544_v39 = vshll.u32 %v15947_v27, 16  ;;  %v2146_v14 = vor.u32 %v2145_v4, %v2141_v61 }
  0xb1   : > { %2670 = vrot.lane.b32.xlu1 %v2123_v41, %s15425_s12  ;;  %14257 = vmatmul.mubr.msk.bf16.gmra.mxu0 %vm3863_vm4, %v3566_v48  ;;  %v1534_v41 = vor.u32 %v1533_v25, %v1529_v16  ;;  %v1542_v58 = vor.u32 %v1540_v38, %v1538_v37  ;;  %v1548_v16 = vshrl.u32 %v15947_v27, 16  ;;  %v2154_v63 = vor.u32 %v2152_v15, %v2150_v10 }
  0xb2   : > { %v2641_v55 = vpop.permute.xlu0 %2640  ;;  %v2643_v60 = vpop.permute.xlu1 %2642  ;;  %v2952_v48 = vsel %vm2756_vm0, %v2949_v51, %v2951_v29  ;;  %v2809_v15 = vrot.slane %v16014_v18, 1 }
  0xb3   : > { %v3443_v3 = vsel %vm3301_vm2, %v15281_v62, %v2641_v55  ;;  %v3445_v20 = vsel %vm3301_vm2, %v15282_v19, %v2643_v60  ;;  %v15983_v55 = vld [vmem:[%s15490_s6 + $0x328] sm:$0xff]   ;;  %v1539_v51 = vsel %vm1347_vm1, %v1534_v41, %v1538_v37  ;;  %v15286_v19 = vld [vmem:[%s15490_s6 + $0x290] sm:$0xff]   ;;  %v1556_v41 = vshrl.u32 %v15998_v54, 16 }
  0xb4   : > { %3213 = vrot.lane.b32.xlu0 %v2948_v49, %s15424_s11  ;;  %v2953_v49 = vrot.slane %v15895_v43, 1  ;;  %v1546_v43 = vrot.slane %v1544_v39, 1  ;;  %v2156_v11 = vshll.u32 %v15983_v55, 16  ;;  %v16037_v39 = vld [vmem:[%s15490_s6 + $0x330] sm:$0xff]  }
  0xb5   : > { %2536 = vrot.lane.b32.xlu1 %v1519_v56, %s15425_s12  ;;  %v2164_v61 = vshll.u32 %v16037_v39, 16 }
  0xb6   : > { %v3186_v6 = vpop.permute.xlu0 %3185  ;;  %v2509_v12 = vpop.permute.xlu1 %2508  ;;  %v2158_v25 = vrot.slane %v2156_v11, 1 }
  0xb7   : > { %v15927_v7 = vsel %vm3558_vm3, %v3443_v3, %v3186_v6  ;;  %v3311_v34 = vsel %vm3301_vm2, %v15283_v32, %v2509_v12  ;;  %v2955_v32 = vrot.slane %v15955_v31, 1  ;;  %v1560_v31 = vshll.u32 %v16014_v18, 16 }
  0xb8   : > { %20970 = vst [vmem:[#allocation10_spill] sm:$0xff] %v15927_v7  ;;  %3215 = vrot.lane.b32.xlu0 %v2950_v1, %s15424_s11  ;;  %14392 = vmatprep.mubr.msk.bf16.mxu1 %vm3863_vm4, %v15927_v7  ;;  %v2954_v1 = vsel %vm2756_vm0, %v2951_v29, %v2953_v49  ;;  %v2151_v29 = vsel %vm1347_vm1, %v2146_v14, %v2150_v10  ;;  %v15289_v10 = vld [vmem:[%s15490_s6 + $0x298] sm:$0xff]  }
  0xb9   : > { %2538 = vrot.lane.b32.xlu1 %v1527_v8, %s15425_s12  ;;  %v1547_v8 = vsel %vm1347_vm1, %v1542_v58, %v1546_v43 }
  0xba   : > { %v3188_v21 = vpop.permute.xlu0 %3187  ;;  %v2511_v2 = vpop.permute.xlu1 %2510 }
  0xbb   : > { %v15944_v23 = vsel %vm3558_vm3, %v3445_v20, %v3188_v21  ;;  %v3313_v45 = vsel %vm3301_vm2, %v15284_v36, %v2511_v2  ;;  %v1552_v2 = vshll.u32 %v15998_v54, 16 }
  0xbc   : > { %20971 = vst [vmem:[#allocation11_spill] sm:$0xff] %v15944_v23  ;;  %3081 = vrot.lane.b32.xlu0 %v2799_v13, %s15424_s11  ;;  %14393 = vmatmul.mubr.msk.bf16.gmra.mxu1 %vm3863_vm4, %v15944_v23  ;;  %v2804_v13 = vsel %vm2756_vm0, %v2802_v44, %v2803_v57 }
  0xbd   : > { %3083 = vrot.lane.b32.xlu1 %v2801_v22, %s15424_s11  ;;  %v2806_v22 = vsel %vm2756_vm0, %v2803_v57, %v2805_v52  ;;  %v2958_v57 = vrot.slane %v15983_v55, 1 }
  0xbe   : > { %v3054_v35 = vpop.permute.xlu0 %3053  ;;  %v3056_v46 = vpop.permute.xlu1 %3055 }
  0xbf   : > { %v15962_v33 = vsel %vm3558_vm3, %v3311_v34, %v3054_v35  ;;  %v15975_v47 = vsel %vm3558_vm3, %v3313_v45, %v3056_v46  ;;  %v2956_v34 = vrot.slane %v15967_v42, 1  ;;  %v15287_v35 = vld [vmem:[%s15490_s6 + $0x34] sm:$0xff]   ;;  %v2159_v45 = vsel %vm1347_vm1, %v2154_v63, %v2158_v25 }
  0xc0   : > { %2672 = vrot.lane.b32.xlu0 %v2131_v28, %s15425_s12  ;;  %14260 = vmatprep.mubr.msk.bf16.mxu0 %vm3863_vm4, %v15962_v33  ;;  %v1554_v46 = vrot.slane %v1552_v2, 1  ;;  %v16045_v42 = vld [vmem:[%s15490_s6 + $0x338] ss:$0 sps:$4 sm:$0x11]  }
  0xc1   : > { %2674 = vrot.lane.b32.xlu1 %v2139_v40, %s15425_s12  ;;  %14261 = vmatmul.mubr.msk.bf16.gmra.mxu0 %vm3863_vm4, %v15975_v47  ;;  %v1550_v40 = vor.u32 %v1548_v16, %v1546_v43  ;;  %v2957_v44 = vsel %vm2756_vm0, %v2955_v32, %v2956_v34  ;;  %v2166_v16 = vrot.slane %v2164_v61, 1 }
  0xc2   : > { %v2645_v56 = vpop.permute.xlu0 %2644  ;;  %v2647_v60 = vpop.permute.xlu1 %2646  ;;  %v1558_v59 = vor.u32 %v1556_v41, %v1554_v46  ;;  %v16109_v41 = vld [vmem:[%s15490_s6 + $0x33c] sm:$0xff]  }
  0xc3   : > { %v3447_v62 = vsel %vm3301_vm2, %v15285_v5, %v2645_v56  ;;  %v3449_v20 = vsel %vm3301_vm2, %v15286_v19, %v2647_v60  ;;  %v1555_v43 = vsel %vm1347_vm1, %v1550_v40, %v1554_v46  ;;  %v1562_v60 = vrot.slane %v1560_v31, 1  ;;  %v16070_v5 = vld [vmem:[%s15490_s6 + $0xe0] sm:$0xff]  }
  0xc4   : > { %3217 = vrot.lane.b32.xlu0 %v2952_v48, %s15424_s11  ;;  %v15288_v48 = vld [vmem:[%s15490_s6 + $0x3c] sm:$0xff]   ;;  %v1572_v32 = vshll.u32 %v16070_v5, 16  ;;  %v2960_v40 = vrot.slane %v16037_v39, 1 }
  0xc5   : > { %2540 = vrot.lane.b32.xlu1 %v1539_v51, %s15425_s12  ;;  %v2807_v51 = vrot.slane %v15998_v54, 1  ;;  %v2160_v54 = vshrl.u32 %v15983_v55, 16  ;;  %v1563_v14 = vsel %vm1347_vm1, %v1558_v59, %v1562_v60 }
  0xc6   : > { %v3190_v3 = vpop.permute.xlu0 %3189  ;;  %v2513_v12 = vpop.permute.xlu1 %2512 }
  0xc7   : > { %v16004_v6 = vsel %vm3558_vm3, %v3447_v62, %v3190_v3  ;;  %v3315_v37 = vsel %vm3301_vm2, %v15287_v35, %v2513_v12  ;;  %v2959_v62 = vsel %vm2756_vm0, %v2956_v34, %v2958_v57  ;;  %v2168_v3 = vshrl.u32 %v16037_v39, 16  ;;  %v16101_v35 = vld [vmem:[%s15490_s6 + $0xe8] sm:$0xff]  }
  0xc8   : > { %20972 = vst [vmem:[#allocation12_spill] sm:$0xff] %v16004_v6  ;;  %3219 = vrot.lane.b32.xlu0 %v2954_v1, %s15424_s11  ;;  %14396 = vmatprep.mubr.msk.bf16.mxu1 %vm3863_vm4, %v16004_v6  ;;  %v16064_v1 = vld [vmem:[%s15490_s6 + $0xd8] sm:$0xff]   ;;  %v1580_v39 = vshll.u32 %v16101_v35, 16 }
  0xc9   : > { %2542 = vrot.lane.b32.xlu1 %v1547_v8, %s15425_s12  ;;  %v2172_v8 = vshll.u32 %v16045_v42, 16  ;;  %v1567_v18 = vshll.u32 %v16064_v1, 16  ;;  %v2170_v27 = vor.u32 %v2168_v3, %v2166_v16  ;;  %v16140_v3 = vld [vmem:[%s15490_s6 + $0x34c] sm:$0xff]  }
  0xca   : > { %v3192_v21 = vpop.permute.xlu0 %3191  ;;  %v2515_v28 = vpop.permute.xlu1 %2514 }
  0xcb   : > { %v16023_v26 = vsel %vm3558_vm3, %v3449_v20, %v3192_v21  ;;  %v3317_v49 = vsel %vm3301_vm2, %v15288_v48, %v2515_v28  ;;  %v2808_v20 = vsel %vm2756_vm0, %v2805_v52, %v2807_v51  ;;  %v2162_v21 = vor.u32 %v2160_v54, %v2158_v25 }
  0xcc   : > { %20973 = vst [vmem:[#allocation13_spill] sm:$0xff] %v16023_v26  ;;  %3085 = vrot.lane.b32.xlu0 %v2804_v13, %s15424_s11  ;;  %14397 = vmatmul.mubr.msk.bf16.gmra.mxu1 %vm3863_vm4, %v16023_v26  ;;  %v2810_v28 = vsel %vm2756_vm0, %v2807_v51, %v2809_v15  ;;  %v2174_v52 = vrot.slane %v2172_v8, 1  ;;  %v1569_v25 = vrot.slane %v1567_v18, 1  ;;  %v1574_v48 = vrot.slane %v1572_v32, 1 }
  0xcd   : > { %3087 = vrot.lane.b32.xlu1 %v2806_v22, %s15424_s11  ;;  %v15290_v22 = vld [vmem:[%s15490_s6 + $0x2a0] sm:$0xff]   ;;  %v2962_v15 = vrot.slane %v16045_v42, 1  ;;  %v2179_v54 = vshll.u32 %v16109_v41, 16  ;;  %v2811_v42 = vrot.slane %v16064_v1, 1 }
  0xce   : > { %v3058_v38 = vpop.permute.xlu0 %3057  ;;  %v3060_v53 = vpop.permute.xlu1 %3059 }
  0xcf   : > { %v16040_v36 = vsel %vm3558_vm3, %v3315_v37, %v3058_v38  ;;  %v16053_v56 = vsel %vm3558_vm3, %v3317_v49, %v3060_v53  ;;  %v2167_v38 = vsel %vm1347_vm1, %v2162_v21, %v2166_v16  ;;  %v1576_v49 = vshrl.u32 %v16070_v5, 16 }
  0xd0   : > { %2676 = vrot.lane.b32.xlu0 %v2151_v29, %s15425_s12  ;;  %14264 = vmatprep.mubr.msk.bf16.mxu0 %vm3863_vm4, %v16040_v36  ;;  %v1565_v29 = vshrl.u32 %v16064_v1, 16  ;;  %v2177_v16 = vshrl.u32 %v16109_v41, 16  ;;  %v2181_v18 = vrot.slane %v2179_v54, 1 }
  0xd1   : > { %2678 = vrot.lane.b32.xlu1 %v2159_v45, %s15425_s12  ;;  %14265 = vmatmul.mubr.msk.bf16.gmra.mxu0 %vm3863_vm4, %v16053_v56  ;;  %v15291_v45 = vld [vmem:[%s15490_s6 + $0x48] sm:$0xff]  }
  0xd2   : > { %v2649_v58 = vpop.permute.xlu0 %2648  ;;  %v2651_v4 = vpop.permute.xlu1 %2650  ;;  %v1570_v51 = vor.u32 %v1569_v25, %v1565_v29  ;;  %v16160_v29 = vld [vmem:[%s15490_s6 + $0xf0] sm:$0xff]  }
  0xd3   : > { %v3451_v11 = vsel %vm3301_vm2, %v15289_v10, %v2649_v58  ;;  %v3453_v63 = vsel %vm3301_vm2, %v15290_v22, %v2651_v4  ;;  %v16121_v58 = vld [vmem:[%s15490_s6 + $0x344] sm:$0xff]   ;;  %v2961_v4 = vsel %vm2756_vm0, %v2958_v57, %v2960_v40  ;;  %v1578_v10 = vor.u32 %v1576_v49, %v1574_v48  ;;  %v15294_v25 = vld [vmem:[%s15490_s6 + $0x2b4] sm:$0xff]  }
  0xd4   : > { %3221 = vrot.lane.b32.xlu0 %v2957_v44, %s15424_s11  ;;  %v2175_v44 = vsel %vm1347_vm1, %v2170_v27, %v2174_v52  ;;  %v1575_v8 = vsel %vm1347_vm1, %v1570_v51, %v1574_v48  ;;  %v2184_v55 = vshll.u32 %v16121_v58, 16  ;;  %v2814_v22 = vrot.slane %v16101_v35, 1 }
  0xd5   : > { %2544 = vrot.lane.b32.xlu1 %v1555_v43, %s15425_s12  ;;  %v15292_v43 = vld [vmem:[%s15490_s6 + $0x50] sm:$0xff]   ;;  %v2182_v52 = vor.u32 %v2181_v18, %v2177_v16  ;;  %v1584_v49 = vshrl.u32 %v16101_v35, 16  ;;  %v1592_v54 = vshrl.u32 %v16160_v29, 16 }
  0xd6   : > { %v3194_v12 = vpop.permute.xlu0 %3193  ;;  %v2517_v19 = vpop.permute.xlu1 %2516 }
  0xd7   : > { %v16081_v13 = vsel %vm3558_vm3, %v3451_v11, %v3194_v12  ;;  %v3319_v46 = vsel %vm3301_vm2, %v15291_v45, %v2517_v19  ;;  %v1582_v11 = vrot.slane %v1580_v39, 1  ;;  %v2963_v12 = vsel %vm2756_vm0, %v2960_v40, %v2962_v15  ;;  %v15293_v19 = vld [vmem:[%s15490_s6 + $0x2ac] sm:$0xff]  }
  0xd8   : > { %20974 = vst [vmem:[#allocation14_spill] sm:$0xff] %v16081_v13  ;;  %3223 = vrot.lane.b32.xlu0 %v2959_v62, %s15424_s11  ;;  %14400 = vmatprep.mubr.msk.bf16.mxu1 %vm3863_vm4, %v16081_v13 }
  0xd9   : > { %2546 = vrot.lane.b32.xlu1 %v1563_v14, %s15425_s12  ;;  %v2812_v14 = vrot.slane %v16070_v5, 1  ;;  %v1583_v5 = vsel %vm1347_vm1, %v1578_v10, %v1582_v11 }
  0xda   : > { %v3196_v2 = vpop.permute.xlu0 %3195  ;;  %v2519_v37 = vpop.permute.xlu1 %2518 }
  0xdb   : > { %v16098_v34 = vsel %vm3558_vm3, %v3453_v63, %v3196_v2  ;;  %v3321_v59 = vsel %vm3301_vm2, %v15292_v43, %v2519_v37  ;;  %v2192_v63 = vshll.u32 %v16140_v3, 16  ;;  %v2186_v2 = vrot.slane %v2184_v55, 1 }
  0xdc   : > { %20975 = vst [vmem:[#allocation15_spill] sm:$0xff] %v16098_v34  ;;  %3089 = vrot.lane.b32.xlu0 %v2808_v20, %s15424_s11  ;;  %14401 = vmatmul.mubr.msk.bf16.gmra.mxu1 %vm3863_vm4, %v16098_v34  ;;  %v2813_v27 = vsel %vm2756_vm0, %v2811_v42, %v2812_v14  ;;  %v2815_v40 = vsel %vm2756_vm0, %v2812_v14, %v2814_v22  ;;  %v2964_v43 = vrot.slane %v16109_v41, 1  ;;  %v16196_v41 = vld [vmem:[%s15490_s6 + $0x354] sm:$0xff]  }
  0xdd   : > { %3091 = vrot.lane.b32.xlu1 %v2810_v28, %s15424_s11  ;;  %v2188_v28 = vshrl.u32 %v16121_v58, 16  ;;  %v2194_v45 = vrot.slane %v2192_v63, 1  ;;  %v2187_v39 = vsel %vm1347_vm1, %v2182_v52, %v2186_v2  ;;  %v1586_v55 = vor.u32 %v1584_v49, %v1582_v11 }
  0xde   : > { %v3062_v31 = vpop.permute.xlu0 %3061  ;;  %v3064_v60 = vpop.permute.xlu1 %3063  ;;  %v2967_v11 = vrot.slane %v16140_v3, 1  ;;  %v2200_v63 = vshll.u32 %v16196_v41, 16  ;;  %v2196_v52 = vshrl.u32 %v16140_v3, 16  ;;  %v2204_v49 = vshrl.u32 %v16196_v41, 16 }
  0xdf   : > { %v16116_v53 = vsel %vm3558_vm3, %v3319_v46, %v3062_v31  ;;  %v16129_v61 = vsel %vm3558_vm3, %v3321_v59, %v3064_v60  ;;  %v16173_v46 = vld [vmem:[%s15490_s6 + $0xf8] ss:$0 sps:$4 sm:$0x11]   ;;  %v2190_v48 = vor.u32 %v2188_v28, %v2186_v2  ;;  %v2965_v59 = vrot.slane %v16121_v58, 1  ;;  %v15296_v58 = vld [vmem:[%s15490_s6 + $0x60] sm:$0xff]  }
  0xe0   : > { %2680 = vrot.lane.b32.xlu0 %v2167_v38, %s15425_s12  ;;  %14268 = vmatprep.mubr.msk.bf16.mxu0 %vm3863_vm4, %v16116_v53  ;;  %v15295_v60 = vld [vmem:[%s15490_s6 + $0x58] sm:$0xff]  }
  0xe1   : > { %2682 = vrot.lane.b32.xlu1 %v2175_v44, %s15425_s12  ;;  %14269 = vmatmul.mubr.msk.bf16.gmra.mxu0 %vm3863_vm4, %v16129_v61  ;;  %v1588_v44 = vshll.u32 %v16160_v29, 16  ;;  %v2195_v10 = vsel %vm1347_vm1, %v2190_v48, %v2194_v45  ;;  %v2966_v16 = vsel %vm2756_vm0, %v2964_v43, %v2965_v59  ;;  %v16217_v2 = vld [vmem:[%s15490_s6 + $0xfc] sm:$0xff]   ;;  %v2818_v48 = vrot.slane %v16173_v46, 1 }
  0xe2   : > { %v2653_v62 = vpop.permute.xlu0 %2652  ;;  %v2655_v57 = vpop.permute.xlu1 %2654  ;;  %v1603_v43 = vshll.u32 %v16217_v2, 16 }
  0xe3   : > { %v3455_v20 = vsel %vm3301_vm2, %v15293_v19, %v2653_v62  ;;  %v3457_v37 = vsel %vm3301_vm2, %v15294_v25, %v2655_v57  ;;  %v1596_v62 = vshll.u32 %v16173_v46, 16  ;;  %v1590_v57 = vrot.slane %v1588_v44, 1  ;;  %v15297_v25 = vld [vmem:[%s15490_s6 + $0x2bc] sm:$0xff]   ;;  %v16232_v44 = vld [vmem:[%s15490_s6 + $0x104] sm:$0xff]  }
  0xe4   : > { %3225 = vrot.lane.b32.xlu0 %v2961_v4, %s15424_s11 }
  0xe5   : > { %2548 = vrot.lane.b32.xlu1 %v1575_v8, %s15425_s12  ;;  %v1594_v19 = vor.u32 %v1592_v54, %v1590_v57 }
  0xe6   : > { %v3198_v21 = vpop.permute.xlu0 %3197  ;;  %v2521_v32 = vpop.permute.xlu1 %2520 }
  0xe7   : > { %v16155_v1 = vsel %vm3558_vm3, %v3455_v20, %v3198_v21  ;;  %v3323_v4 = vsel %vm3301_vm2, %v15295_v60, %v2521_v32  ;;  %v1598_v20 = vrot.slane %v1596_v62, 1  ;;  %v1591_v21 = vsel %vm1347_vm1, %v1586_v55, %v1590_v57 }
  0xe8   : > { %20976 = vst [vmem:[#allocation16_spill] sm:$0xff] %v16155_v1  ;;  %3227 = vrot.lane.b32.xlu0 %v2963_v12, %s15424_s11  ;;  %14404 = vmatprep.mubr.msk.bf16.mxu1 %vm3863_vm4, %v16155_v1  ;;  %v2968_v32 = vsel %vm2756_vm0, %v2965_v59, %v2967_v11  ;;  %v2198_v60 = vor.u32 %v2196_v52, %v2194_v45  ;;  %v1608_v55 = vshll.u32 %v16232_v44, 16  ;;  %v1605_v45 = vrot.slane %v1603_v43, 1 }
  0xe9   : > { %2550 = vrot.lane.b32.xlu1 %v1583_v5, %s15425_s12  ;;  %v16214_v5 = vld [vmem:[%s15490_s6 + $0x35c] ss:$0 sps:$4 sm:$0x11]  }
  0xea   : > { %v3200_v38 = vpop.permute.xlu0 %3199  ;;  %v2523_v51 = vpop.permute.xlu1 %2522 }
  0xeb   : > { %v16176_v31 = vsel %vm3558_vm3, %v3457_v37, %v3200_v38  ;;  %v3325_v42 = vsel %vm3301_vm2, %v15296_v58, %v2523_v51  ;;  %v16255_v58 = vld [vmem:[%s15490_s6 + $0x10c] sm:$0xff]  }
  0xec   : > { %20977 = vst [vmem:[#allocation17_spill] sm:$0xff] %v16176_v31  ;;  %3093 = vrot.lane.b32.xlu0 %v2813_v27, %s15424_s11  ;;  %14405 = vmatmul.mubr.msk.bf16.gmra.mxu1 %vm3863_vm4, %v16176_v31  ;;  %v2816_v27 = vrot.slane %v16160_v29, 1  ;;  %v2202_v29 = vrot.slane %v2200_v63, 1  ;;  %v1610_v63 = vrot.slane %v1608_v55, 1  ;;  %v15301_v55 = vld [vmem:[%s15490_s6 + $0x2d0] sm:$0xff]  }
  0xed   : > { %3095 = vrot.lane.b32.xlu1 %v2815_v40, %s15424_s11  ;;  %v1599_v40 = vsel %vm1347_vm1, %v1594_v19, %v1598_v20  ;;  %v15299_v19 = vld [vmem:[%s15490_s6 + $0x6c] sm:$0xff]   ;;  %v16905_v31 = vld [vmem:[%s15490_s6 + $0x194] sm:$0xff]  }
  0xee   : > { %v3066_v15 = vpop.permute.xlu0 %3065  ;;  %v3068_v12 = vpop.permute.xlu1 %3067  ;;  %v2817_v46 = vsel %vm2756_vm0, %v2814_v22, %v2816_v27  ;;  %v2819_v62 = vsel %vm2756_vm0, %v2816_v27, %v2818_v48  ;;  %v2206_v35 = vor.u32 %v2204_v49, %v2202_v29  ;;  %v2971_v48 = vrot.slane %v16214_v5, 1 }
  0xef   : > { %v16192_v8 = vsel %vm3558_vm3, %v3323_v4, %v3066_v15  ;;  %v16204_v14 = vsel %vm3558_vm3, %v3325_v42, %v3068_v12  ;;  %v15298_v4 = vld [vmem:[%s15490_s6 + $0x2c4] sm:$0xff]   ;;  %v2203_v12 = vsel %vm1347_vm1, %v2198_v60, %v2202_v29 }
  0xf0   : > { %2684 = vrot.lane.b32.xlu0 %v2187_v39, %s15425_s12  ;;  %14272 = vmatprep.mubr.msk.bf16.mxu0 %vm3863_vm4, %v16192_v8  ;;  %v2208_v39 = vshll.u32 %v16214_v5, 16 }
  0xf1   : > { %2686 = vrot.lane.b32.xlu1 %v2195_v10, %s15425_s12  ;;  %14273 = vmatmul.mubr.msk.bf16.gmra.mxu0 %vm3863_vm4, %v16204_v14  ;;  %v1601_v10 = vshrl.u32 %v16217_v2, 16 }
  0xf2   : > { %v2657_v18 = vpop.permute.xlu0 %2656  ;;  %v2659_v28 = vpop.permute.xlu1 %2658  ;;  %v2210_v22 = vrot.slane %v2208_v39, 1 }
  0xf3   : > { %v3459_v37 = vsel %vm3301_vm2, %v15297_v25, %v2657_v18  ;;  %v3461_v15 = vsel %vm3301_vm2, %v15298_v4, %v2659_v28  ;;  %v16263_v18 = vld [vmem:[%s15490_s6 + $0x360] sm:$0xff]   ;;  %v1612_v28 = vshrl.u32 %v16232_v44, 16  ;;  %v1606_v52 = vor.u32 %v1605_v45, %v1601_v10  ;;  %v16296_v4 = vld [vmem:[%s15490_s6 + $0x370] sm:$0xff]  }
  0xf4   : > { %3229 = vrot.lane.b32.xlu0 %v2966_v16, %s15424_s11  ;;  %v2969_v16 = vrot.slane %v16196_v41, 1  ;;  %v2211_v27 = vsel %vm1347_vm1, %v2206_v35, %v2210_v22  ;;  %v1616_v25 = vshll.u32 %v16255_v58, 16  ;;  %v16275_v41 = vld [vmem:[%s15490_s6 + $0x368] sm:$0xff]   ;;  %v2215_v39 = vshll.u32 %v16263_v18, 16 }
  0xf5   : > { %2552 = vrot.lane.b32.xlu1 %v1591_v21, %s15425_s12  ;;  %v2220_v60 = vshll.u32 %v16275_v41, 16  ;;  %v2823_v45 = vrot.slane %v16255_v58, 1 }
  0xf6   : > { %v3202_v38 = vpop.permute.xlu0 %3201  ;;  %v2525_v59 = vpop.permute.xlu1 %2524  ;;  %v2970_v29 = vsel %vm2756_vm0, %v2967_v11, %v2969_v16  ;;  %v1618_v5 = vrot.slane %v1616_v25, 1  ;;  %v2972_v11 = vsel %vm2756_vm0, %v2969_v16, %v2971_v48  ;;  %v2217_v10 = vrot.slane %v2215_v39, 1 }
  0xf7   : > { %v16235_v51 = vsel %vm3558_vm3, %v3459_v37, %v3202_v38  ;;  %v3327_v20 = vsel %vm3301_vm2, %v15299_v19, %v2525_v59  ;;  %v15300_v37 = vld [vmem:[%s15490_s6 + $0x74] sm:$0xff]   ;;  %v1611_v59 = vsel %vm1347_vm1, %v1606_v52, %v1610_v63  ;;  %v2222_v16 = vrot.slane %v2220_v60, 1 }
  0xf8   : > { %20978 = vst [vmem:[#allocation18_spill] sm:$0xff] %v16235_v51  ;;  %3231 = vrot.lane.b32.xlu0 %v2968_v32, %s15424_s11  ;;  %14408 = vmatprep.mubr.msk.bf16.mxu1 %vm3863_vm4, %v16235_v51  ;;  %v2228_v19 = vshll.u32 %v16296_v4, 16  ;;  %v2973_v60 = vrot.slane %v16263_v18, 1 }
  0xf9   : > { %2554 = vrot.lane.b32.xlu1 %v1599_v40, %s15425_s12 }
  0xfa   : > { %v3204_v54 = vpop.permute.xlu0 %3203  ;;  %v2527_v42 = vpop.permute.xlu1 %2526  ;;  %v2230_v39 = vrot.slane %v2228_v19, 1 }
  0xfb   : > { %v16252_v57 = vsel %vm3558_vm3, %v3461_v15, %v3204_v54  ;;  %v3329_v38 = vsel %vm3301_vm2, %v15300_v37, %v2527_v42  ;;  %v2820_v15 = vrot.slane %v16217_v2, 1  ;;  %v2821_v54 = vrot.slane %v16232_v44, 1 }
  0xfc   : > { %20979 = vst [vmem:[#allocation19_spill] sm:$0xff] %v16252_v57  ;;  %3097 = vrot.lane.b32.xlu0 %v2817_v46, %s15424_s11  ;;  %14409 = vmatmul.mubr.msk.bf16.gmra.mxu1 %vm3863_vm4, %v16252_v57  ;;  %v1614_v46 = vor.u32 %v1612_v28, %v1610_v63  ;;  %v2224_v42 = vshrl.u32 %v16275_v41, 16  ;;  %v1620_v37 = vshrl.u32 %v16255_v58, 16 }
  0xfd   : > { %3099 = vrot.lane.b32.xlu1 %v2819_v62, %s15424_s11  ;;  %v2213_v62 = vshrl.u32 %v16263_v18, 16  ;;  %v2822_v63 = vsel %vm2756_vm0, %v2820_v15, %v2821_v54  ;;  %v2824_v48 = vsel %vm2756_vm0, %v2821_v54, %v2823_v45  ;;  %v15303_v15 = vld [vmem:[%s15490_s6 + $0x7c] sm:$0xff]  }
  0xfe   : > { %v3070_v21 = vpop.permute.xlu0 %3069  ;;  %v3072_v40 = vpop.permute.xlu1 %3071  ;;  %v1619_v44 = vsel %vm1347_vm1, %v1614_v46, %v1618_v5 }
  0xff   : > { %v16270_v32 = vsel %vm3558_vm3, %v3327_v20, %v3070_v21  ;;  %v16284_v49 = vsel %vm3558_vm3, %v3329_v38, %v3072_v40  ;;  %v15206_v20 = vld [vmem:[%s20809_s1 + $0x58] sm:$0xff]   ;;  %v2218_v28 = vor.u32 %v2217_v10, %v2213_v62  ;;  %v1622_v10 = vor.u32 %v1620_v37, %v1618_v5 }
 0x100   : > { %2688 = vrot.lane.b32.xlu0 %v2203_v12, %s15425_s12  ;;  %14276 = vmatprep.mubr.msk.bf16.mxu0 %vm3863_vm4, %v16270_v32  ;;  %v16309_v12 = vld [vmem:[%s15490_s6 + $0x114] sm:$0xff]   ;;  %v2976_v5 = vrot.slane %v16296_v4, 1 }
 0x101   : > { %2690 = vrot.lane.b32.xlu1 %v2211_v27, %s15425_s12  ;;  %14277 = vmatmul.mubr.msk.bf16.gmra.mxu0 %vm3863_vm4, %v16284_v49  ;;  %v15302_v27 = vld [vmem:[%s15490_s6 + $0x2d8] sm:$0xff]   ;;  %v1624_v38 = vshll.u32 %v16309_v12, 16  ;;  %v2223_v46 = vsel %vm1347_vm1, %v2218_v28, %v2222_v16  ;;  %v1628_v18 = vshrl.u32 %v16309_v12, 16 }
 0x102   : > { %v2661_v43 = vpop.permute.xlu0 %2660  ;;  %v2663_v3 = vpop.permute.xlu1 %2662  ;;  %14508 = vmatprep.subr.bf16.mxu1 %v15206_v20 }
 0x103   : > { %v3463_v35 = vsel %vm3301_vm2, %v15301_v55, %v2661_v43  ;;  %v3465_v52 = vsel %vm3301_vm2, %v15302_v27, %v2663_v3  ;;  %14509 = vmatpush3.bf16.msra.mxu1 %v15206_v20  ;;  %v16335_v43 = vld [vmem:[%s15490_s6 + $0x11c] ss:$0 sps:$4 sm:$0x11]   ;;  %v2974_v3 = vrot.slane %v16275_v41, 1  ;;  %v1626_v55 = vrot.slane %v1624_v38, 1 }
 0x104   : > { %3233 = vrot.lane.b32.xlu0 %v2970_v29, %s15424_s11  ;;  %v2226_v29 = vor.u32 %v2224_v42, %v2222_v16  ;;  %v1632_v41 = vshll.u32 %v16335_v43, 16  ;;  %v15304_v42 = vld [vmem:[%s15490_s6 + $0x84] sm:$0xff]   ;;  %v16373_v27 = vld [vmem:[%s15490_s6 + $0x380] ss:$0 sps:$4 sm:$0x11]  }
 0x105   : > { %2556 = vrot.lane.b32.xlu1 %v1611_v59, %s15425_s12  ;;  %v2975_v20 = vsel %vm2756_vm0, %v2973_v60, %v2974_v3  ;;  %v1630_v37 = vor.u32 %v1628_v18, %v1626_v55  ;;  %v2827_v18 = vrot.slane %v16335_v43, 1 }
 0x106   : > { %v3206_v22 = vpop.permute.xlu0 %3205  ;;  %v2529_v21 = vpop.permute.xlu1 %2528  ;;  %v1634_v38 = vrot.slane %v1632_v41, 1  ;;  %v16397_v41 = vld [vmem:[%s15490_s6 + $0x128] sm:$0xff]  }
 0x107   : > { %v16312_v2 = vsel %vm3558_vm3, %v3463_v35, %v3206_v22  ;;  %v3331_v54 = vsel %vm3301_vm2, %v15303_v15, %v2529_v21  ;;  %v2231_v22 = vsel %vm1347_vm1, %v2226_v29, %v2230_v39  ;;  %v2977_v29 = vsel %vm2756_vm0, %v2974_v3, %v2976_v5 }
 0x108   : > { %20980 = vst [vmem:[#allocation20_spill] sm:$0xff] %v16312_v2  ;;  %3235 = vrot.lane.b32.xlu0 %v2972_v11, %s15424_s11  ;;  %14412 = vmatprep.mubr.msk.bf16.mxu1 %vm3863_vm4, %v16312_v2  ;;  %v16344_v11 = vld [vmem:[%s15490_s6 + $0x378] sm:$0xff]  }
 0x109   : > { %2558 = vrot.lane.b32.xlu1 %v1619_v44, %s15425_s12  ;;  %v2236_v21 = vshll.u32 %v16344_v11, 16  ;;  %v2240_v15 = vshrl.u32 %v16344_v11, 16 }
 0x10a   : > { %v3208_v25 = vpop.permute.xlu0 %3207  ;;  %v2531_v59 = vpop.permute.xlu1 %2530 }
 0x10b   : > { %v16329_v40 = vsel %vm3558_vm3, %v3465_v52, %v3208_v25  ;;  %v3333_v44 = vsel %vm3301_vm2, %v15304_v42, %v2531_v59  ;;  %v16376_v52 = vld [vmem:[%s15490_s6 + $0x120] sm:$0xff]   ;;  %v1627_v25 = vsel %vm1347_vm1, %v1622_v10, %v1626_v55  ;;  %v2825_v59 = vrot.slane %v16309_v12, 1 }
 0x10c   : > { %20981 = vst [vmem:[#allocation21_spill] sm:$0xff] %v16329_v40  ;;  %3101 = vrot.lane.b32.xlu0 %v2822_v63, %s15424_s11  ;;  %14413 = vmatmul.mubr.msk.bf16.gmra.mxu1 %vm3863_vm4, %v16329_v40  ;;  %v15208_v63 = vld [vmem:[%s20809_s1 + $0x88] sm:$0xff]   ;;  %v2238_v60 = vrot.slane %v2236_v21, 1  ;;  %v2244_v55 = vshll.u32 %v16373_v27, 16  ;;  %v1635_v12 = vsel %vm1347_vm1, %v1630_v37, %v1634_v38 }
 0x10d   : > { %3103 = vrot.lane.b32.xlu1 %v2824_v48, %s15424_s11  ;;  %14776 = vmatprep.subr.bf16.mxu0 %v15208_v63  ;;  %v15306_v21 = vld [vmem:[%s15490_s6 + $0x2e8] sm:$0xff]   ;;  %v2828_v58 = vsel %vm2756_vm0, %v2825_v59, %v2827_v18 }
 0x10e   : > { %v3074_v62 = vpop.permute.xlu0 %3073  ;;  %v3076_v16 = vpop.permute.xlu1 %3075  ;;  %14777 = vmatpush3.bf16.msra.mxu0 %v15208_v63  ;;  %v15321_v40 = vld [vmem:[%s15490_s6 + $0x328] sm:$0xff]  }
 0x10f   : > { %v16350_v35 = vsel %vm3558_vm3, %v3331_v54, %v3074_v62  ;;  %v16362_v19 = vsel %vm3558_vm3, %v3333_v44, %v3076_v16  ;;  %v15305_v54 = vld [vmem:[%s15490_s6 + $0x2e0] sm:$0xff]   ;;  %v2826_v44 = vsel %vm2756_vm0, %v2823_v45, %v2825_v59  ;;  %v1644_v45 = vshll.u32 %v16397_v41, 16 }
 0x110   : > { %2692 = vrot.lane.b32.xlu0 %v2223_v46, %s15425_s12  ;;  %14280 = vmatprep.mubr.msk.bf16.mxu0 %vm3863_vm4, %v16350_v35  ;;  %v2232_v46 = vshrl.u32 %v16296_v4, 16 }
 0x111   : > { %2694 = vrot.lane.b32.xlu1 %v2231_v22, %s15425_s12  ;;  %14281 = vmatmul.mubr.msk.bf16.gmra.mxu0 %vm3863_vm4, %v16362_v19  ;;  %v1639_v22 = vshll.u32 %v16376_v52, 16  ;;  %v1646_v18 = vrot.slane %v1644_v45, 1 }
 0x112   : > { %v2665_v28 = vpop.permute.xlu0 %2664  ;;  %v2234_v16 = vor.u32 %v2232_v46, %v2230_v39  ;;  %v16415_v39 = vld [vmem:[%s15490_s6 + $0x130] sm:$0xff]   ;;  %v2978_v46 = vrot.slane %v16344_v11, 1  ;;  %v1648_v11 = vshrl.u32 %v16397_v41, 16 }
 0x113   : > { %v2667_v48 = vpop.permute.xlu1 %2666  ;;  %v3467_v62 = vsel %vm3301_vm2, %v15305_v54, %v2665_v28  ;;  %v2246_v28 = vrot.slane %v2244_v55, 1  ;;  %v1641_v37 = vrot.slane %v1639_v22, 1  ;;  %v15307_v54 = vld [vmem:[%s15490_s6 + $0x90] sm:$0xff]  }
 0x114   : > { %3237 = vrot.lane.b32.xlu0 %v2975_v20, %s15424_s11  ;;  %v2242_v20 = vor.u32 %v2240_v15, %v2238_v60  ;;  %v3469_v63 = vsel %vm3301_vm2, %v15306_v21, %v2667_v48  ;;  %v2239_v48 = vsel %vm1347_vm1, %v2234_v16, %v2238_v60  ;;  %v16423_v15 = vld [vmem:[%s15490_s6 + $0x384] sm:$0xff]   ;;  %v16430_v22 = vld [vmem:[%s15490_s6 + $0x38c] sm:$0xff]   ;;  %v1652_v60 = vshll.u32 %v16415_v39, 16 }
 0x115   : > { %2560 = vrot.lane.b32.xlu1 %v1627_v25, %s15425_s12  ;;  %v1637_v25 = vshrl.u32 %v16376_v52, 16 }
 0x116   : > { %v3210_v10 = vpop.permute.xlu0 %3209  ;;  %v1654_v45 = vrot.slane %v1652_v60, 1 }
 0x117   : > { %v16392_v3 = vsel %vm3558_vm3, %v3467_v62, %v3210_v10  ;;  %v2533_v42 = vpop.permute.xlu1 %2532  ;;  %v2247_v10 = vsel %vm1347_vm1, %v2242_v20, %v2246_v28  ;;  %v1642_v55 = vor.u32 %v1641_v37, %v1637_v25  ;;  %v2980_v20 = vrot.slane %v16373_v27, 1  ;;  %v16455_v37 = vld [vmem:[%s15490_s6 + $0x394] sm:$0xff]  }
 0x118   : > { %20982 = vst [vmem:[#allocation22_spill] sm:$0xff] %v16392_v3  ;;  %3239 = vrot.lane.b32.xlu0 %v2977_v29, %s15424_s11  ;;  %14416 = vmatprep.mubr.msk.bf16.mxu1 %vm3863_vm4, %v16392_v3  ;;  %v3335_v59 = vsel %vm3301_vm2, %v15307_v54, %v2533_v42  ;;  %v2256_v25 = vshll.u32 %v16430_v22, 16  ;;  %v2249_v54 = vshrl.u32 %v16423_v15, 16  ;;  %v2264_v60 = vshll.u32 %v16455_v37, 16 }
 0x119   : > { %2562 = vrot.lane.b32.xlu1 %v1635_v12, %s15425_s12  ;;  %v1647_v27 = vsel %vm1347_vm1, %v1642_v55, %v1646_v18 }
 0x11a   : > { %v3212_v43 = vpop.permute.xlu0 %3211 }
 0x11b   : > { %v16410_v38 = vsel %vm3558_vm3, %v3469_v63, %v3212_v43  ;;  %v2535_v29 = vpop.permute.xlu1 %2534  ;;  %v2979_v63 = vsel %vm2756_vm0, %v2976_v5, %v2978_v46  ;;  %v2251_v43 = vshll.u32 %v16423_v15, 16  ;;  %v2981_v5 = vsel %vm2756_vm0, %v2978_v46, %v2980_v20 }
 0x11c   : > { %20983 = vst [vmem:[#allocation23_spill] sm:$0xff] %v16410_v38  ;;  %3105 = vrot.lane.b32.xlu0 %v2826_v44, %s15424_s11  ;;  %14417 = vmatmul.mubr.msk.bf16.gmra.mxu1 %vm3863_vm4, %v16410_v38  ;;  %v15308_v44 = vld [vmem:[%s15490_s6 + $0x98] sm:$0xff]  }
 0x11d   : > { %3107 = vrot.lane.b32.xlu1 %v2828_v58, %s15424_s11  ;;  %v3337_v42 = vsel %vm3301_vm2, %v15308_v44, %v2535_v29  ;;  %v1650_v58 = vor.u32 %v1648_v11, %v1646_v18  ;;  %v2829_v29 = vrot.slane %v16376_v52, 1  ;;  %v2258_v18 = vrot.slane %v2256_v25, 1  ;;  %v16474_v44 = vld [vmem:[%s15490_s6 + $0x138] sm:$0xff]  }
 0x11e   : > { %v3078_v62 = vpop.permute.xlu0 %3077  ;;  %v2260_v11 = vshrl.u32 %v16430_v22, 16 }
 0x11f   : > { %v16433_v12 = vsel %vm3558_vm3, %v3335_v59, %v3078_v62  ;;  %v3080_v16 = vpop.permute.xlu1 %3079  ;;  %v2253_v59 = vrot.slane %v2251_v43, 1  ;;  %v15309_v62 = vld [vmem:[%s15490_s6 + $0x2f4] sm:$0xff]   ;;  %v1655_v52 = vsel %vm1347_vm1, %v1650_v58, %v1654_v45  ;;  %v1656_v58 = vshrl.u32 %v16415_v39, 16 }
 0x120   : > { %2696 = vrot.lane.b32.xlu0 %v2239_v48, %s15425_s12  ;;  %14284 = vmatprep.mubr.msk.bf16.mxu0 %vm3863_vm4, %v16433_v12  ;;  %v16444_v21 = vsel %vm3558_vm3, %v3337_v42, %v3080_v16  ;;  %v2830_v48 = vrot.slane %v16397_v41, 1  ;;  %v20814_v41 = vrot.slane %v16415_v39, 1  ;;  %v2262_v25 = vor.u32 %v2260_v11, %v2258_v18  ;;  %v16503_v11 = vld [vmem:[%s15490_s6 + $0x39c] sm:$0xff]  }
 0x121   : > { %2698 = vrot.lane.b32.xlu1 %v2247_v10, %s15425_s12  ;;  %14285 = vmatmul.mubr.msk.bf16.gmra.mxu0 %vm3863_vm4, %v16444_v21  ;;  %v2254_v20 = vor.u32 %v2253_v59, %v2249_v54  ;;  %v1660_v54 = vshll.u32 %v16474_v44, 16 }
 0x122   : > { %v2669_v28 = vpop.permute.xlu0 %2668  ;;  %v2831_v16 = vsel %vm2756_vm0, %v2829_v29, %v2830_v48  ;;  %v2833_v29 = vsel %vm2756_vm0, %v2830_v48, %v20814_v41  ;;  %v15311_v48 = vld [vmem:[%s15490_s6 + $0xa0] sm:$0xff]  }
 0x123   : > { %v2671_v4 = vpop.permute.xlu1 %2670  ;;  %v3471_v10 = vsel %vm3301_vm2, %v15309_v62, %v2669_v28  ;;  %v2259_v62 = vsel %vm1347_vm1, %v2254_v20, %v2258_v18  ;;  %v1662_v18 = vrot.slane %v1660_v54, 1  ;;  %v15312_v20 = vld [vmem:[%s15490_s6 + $0xa8] sm:$0xff]  }
 0x124   : > { %3241 = vrot.lane.b32.xlu0 %v2979_v63, %s15424_s11  ;;  %v15310_v63 = vld [vmem:[%s15490_s6 + $0x2fc] sm:$0xff]  }
 0x125   : > { %2564 = vrot.lane.b32.xlu1 %v1647_v27, %s15425_s12  ;;  %v3473_v43 = vsel %vm3301_vm2, %v15310_v63, %v2671_v4  ;;  %v16483_v27 = vrot.slane %v2264_v60, 1  ;;  %v16494_v4 = vld [vmem:[%s15490_s6 + $0x140] ss:$0 sps:$4 sm:$0x11]   ;;  %v1658_v63 = vor.u32 %v1656_v58, %v1654_v45  ;;  %v20815_v45 = vrot.slane %v16455_v37, 1 }
 0x126   : > { %v3214_v55 = vpop.permute.xlu0 %3213 }
 0x127   : > { %v16469_v46 = vsel %vm3558_vm3, %v3471_v10, %v3214_v55  ;;  %v2537_v42 = vpop.permute.xlu1 %2536  ;;  %v2982_v10 = vrot.slane %v16423_v15, 1  ;;  %v2983_v55 = vrot.slane %v16430_v22, 1  ;;  %v1664_v15 = vshrl.u32 %v16474_v44, 16 }
 0x128   : > { %20984 = vst [vmem:[#allocation24_spill] sm:$0xff] %v16469_v46  ;;  %3243 = vrot.lane.b32.xlu0 %v2981_v5, %s15424_s11  ;;  %14420 = vmatprep.mubr.msk.bf16.mxu1 %vm3863_vm4, %v16469_v46  ;;  %v3339_v60 = vsel %vm3301_vm2, %v15311_v48, %v2537_v42  ;;  %v1668_v22 = vshll.u32 %v16494_v4, 16  ;;  %v1663_v48 = vsel %vm1347_vm1, %v1658_v63, %v1662_v18  ;;  %v2276_v63 = vshrl.u32 %v16503_v11, 16 }
 0x129   : > { %2566 = vrot.lane.b32.xlu1 %v1655_v52, %s15425_s12  ;;  %v2984_v58 = vsel %vm2756_vm0, %v2982_v10, %v2983_v55  ;;  %v15222_v10 = vld [vmem:[%s20809_s1 + $0x50] sm:$0xff]  }
 0x12a   : > { %v3216_v28 = vpop.permute.xlu0 %3215  ;;  %14510 = vmatprep.subr.bf16.mxu1 %v15222_v10 }
 0x12b   : > { %v16487_v5 = vsel %vm3558_vm3, %v3473_v43, %v3216_v28  ;;  %v2539_v59 = vpop.permute.xlu1 %2538  ;;  %14511 = vmatpush3.bf16.msra.mxu1 %v15222_v10 }
 0x12c   : > { %20985 = vst [vmem:[#allocation25_spill] sm:$0xff] %v16487_v5  ;;  %3109 = vrot.lane.b32.xlu0 %v2831_v16, %s15424_s11  ;;  %14421 = vmatmul.mubr.msk.bf16.gmra.mxu1 %vm3863_vm4, %v16487_v5  ;;  %v2267_v16 = vsel %vm1347_vm1, %v2262_v25, %v16483_v27  ;;  %v3341_v42 = vsel %vm3301_vm2, %v15312_v20, %v2539_v59  ;;  %v16530_v59 = vld [vmem:[%s15490_s6 + $0x3a4] ss:$0 sps:$4 sm:$0x11]   ;;  %v16557_v5 = vld [vmem:[%s15490_s6 + $0x14c] sm:$0xff]  }
 0x12d   : > { %3111 = vrot.lane.b32.xlu1 %v2833_v29, %s15424_s11  ;;  %v2272_v29 = vshll.u32 %v16503_v11, 16 }
 0x12e   : > { %v3082_v52 = vpop.permute.xlu0 %3081 }
 0x12f   : > { %v16511_v43 = vsel %vm3558_vm3, %v3339_v60, %v3082_v52  ;;  %v3084_v28 = vpop.permute.xlu1 %3083  ;;  %v1666_v60 = vor.u32 %v1664_v15, %v1662_v18  ;;  %v1670_v52 = vrot.slane %v1668_v22, 1  ;;  %v2274_v41 = vrot.slane %v2272_v29, 1  ;;  %v15313_v18 = vld [vmem:[%s15490_s6 + $0x304] sm:$0xff]  }
 0x130   : > { %2700 = vrot.lane.b32.xlu0 %v2259_v62, %s15425_s12  ;;  %14288 = vmatprep.mubr.msk.bf16.mxu0 %vm3863_vm4, %v16511_v43  ;;  %v16522_v25 = vsel %vm3558_vm3, %v3341_v42, %v3084_v28  ;;  %v16533_v62 = vld [vmem:[%s15490_s6 + $0x144] sm:$0xff]   ;;  %v2834_v42 = vrot.slane %v16474_v44, 1  ;;  %v2268_v28 = vshrl.u32 %v16455_v37, 16 }
 0x131   : > { %2702 = vrot.lane.b32.xlu1 %v2267_v16, %s15425_s12  ;;  %14289 = vmatmul.mubr.msk.bf16.gmra.mxu0 %vm3863_vm4, %v16522_v25  ;;  %v2986_v16 = vsel %vm2756_vm0, %v2983_v55, %v20815_v45  ;;  %v1675_v55 = vshll.u32 %v16533_v62, 16  ;;  %v1671_v29 = vsel %vm1347_vm1, %v1666_v60, %v1670_v52  ;;  %v2836_v45 = vrot.slane %v16494_v4, 1 }
 0x132   : > { %v2673_v54 = vpop.permute.xlu0 %2672  ;;  %v2270_v10 = vor.u32 %v2268_v28, %v16483_v27  ;;  %v1680_v27 = vshll.u32 %v16557_v5, 16  ;;  %v16576_v28 = vld [vmem:[%s15490_s6 + $0x154] sm:$0xff]  }
 0x133   : > { %v2675_v20 = vpop.permute.xlu1 %2674  ;;  %v3475_v15 = vsel %vm3301_vm2, %v15313_v18, %v2673_v54  ;;  %v20987_v54 = vrot.slane %v16415_v39, 1  ;;  %v2278_v18 = vor.u32 %v2276_v63, %v2274_v41  ;;  %v2837_v39 = vsel %vm2756_vm0, %v2834_v42, %v2836_v45  ;;  %v15225_v45 = vld [vmem:[%s20809_s1 + $0x80] sm:$0xff]  }
 0x134   : > { %3245 = vrot.lane.b32.xlu0 %v2984_v58, %s15424_s11  ;;  %v2280_v58 = vshll.u32 %v16530_v59, 16  ;;  %14778 = vmatprep.subr.bf16.mxu0 %v15225_v45 }
 0x135   : > { %2568 = vrot.lane.b32.xlu1 %v1663_v48, %s15425_s12  ;;  %v2835_v48 = vsel %vm2756_vm0, %v20987_v54, %v2834_v42  ;;  %v15315_v42 = vld [vmem:[%s15490_s6 + $0xb4] sm:$0xff]   ;;  %14779 = vmatpush3.bf16.msra.mxu0 %v15225_v45 }
 0x136   : > { %v3218_v22 = vpop.permute.xlu0 %3217  ;;  %v2282_v52 = vrot.slane %v2280_v58, 1  ;;  %v2987_v58 = vrot.slane %v16503_v11, 1  ;;  %v1682_v11 = vrot.slane %v1680_v27, 1 }
 0x137   : > { %v16552_v44 = vsel %vm3558_vm3, %v3475_v15, %v3218_v22  ;;  %v2541_v46 = vpop.permute.xlu1 %2540  ;;  %v15314_v15 = vld [vmem:[%s15490_s6 + $0x30c] sm:$0xff]   ;;  %v1677_v22 = vrot.slane %v1675_v55, 1 }
 0x138   : > { %20986 = vst [vmem:[#allocation26_spill] sm:$0xff] %v16552_v44  ;;  %3247 = vrot.lane.b32.xlu0 %v2986_v16, %s15424_s11  ;;  %14424 = vmatprep.mubr.msk.bf16.mxu1 %vm3863_vm4, %v16552_v44  ;;  %v3477_v4 = vsel %vm3301_vm2, %v15314_v15, %v2675_v20  ;;  %v1673_v16 = vshrl.u32 %v16533_v62, 16  ;;  %v2275_v20 = vsel %vm1347_vm1, %v2270_v10, %v2274_v41  ;;  %v16584_v55 = vld [vmem:[%s15490_s6 + $0x3a8] sm:$0xff]   ;;  %v1684_v10 = vshrl.u32 %v16557_v5, 16 }
 0x139   : > { %2570 = vrot.lane.b32.xlu1 %v1671_v29, %s15425_s12  ;;  %v3343_v29 = vsel %vm3301_vm2, %v15315_v42, %v2541_v46  ;;  %v2287_v27 = vshll.u32 %v16584_v55, 16 }
 0x13a   : > { %v3220_v60 = vpop.permute.xlu0 %3219  ;;  %v1678_v15 = vor.u32 %v1677_v22, %v1673_v16  ;;  %v20989_v16 = vrot.slane %v16455_v37, 1  ;;  %v1686_v42 = vor.u32 %v1684_v10, %v1682_v11 }
 0x13b   : > { %v16571_v44 = vsel %vm3558_vm3, %v3477_v4, %v3220_v60  ;;  %v2543_v63 = vpop.permute.xlu1 %2542  ;;  %v16594_v4 = vld [vmem:[%s15490_s6 + $0x3b0] sm:$0xff]   ;;  %v1688_v60 = vshll.u32 %v16576_v28, 16 }
 0x13c   : > { %20988 = vst [vmem:[#allocation27_spill] sm:$0xff] %v16571_v44  ;;  %3113 = vrot.lane.b32.xlu0 %v2835_v48, %s15424_s11  ;;  %14425 = vmatmul.mubr.msk.bf16.gmra.mxu1 %vm3863_vm4, %v16571_v44  ;;  %v2283_v48 = vsel %vm1347_vm1, %v2278_v18, %v2282_v52  ;;  %v15316_v44 = vld [vmem:[%s15490_s6 + $0xbc] sm:$0xff]   ;;  %v2989_v18 = vrot.slane %v16530_v59, 1  ;;  %v2988_v22 = vsel %vm2756_vm0, %v20989_v16, %v2987_v58  ;;  %v2296_v10 = vshrl.u32 %v16594_v4, 16 }
 0x13d   : > { %3115 = vrot.lane.b32.xlu1 %v2837_v39, %s15424_s11  ;;  %v3345_v46 = vsel %vm3301_vm2, %v15316_v44, %v2543_v63  ;;  %v2292_v63 = vshll.u32 %v16594_v4, 16  ;;  %v16619_v59 = vld [vmem:[%s15490_s6 + $0x3b8] sm:$0xff]   ;;  %v1690_v37 = vrot.slane %v1688_v60, 1 }
 0x13e   : > { %v3086_v54 = vpop.permute.xlu0 %3085  ;;  %v2990_v45 = vsel %vm2756_vm0, %v2987_v58, %v2989_v18  ;;  %v15317_v16 = vld [vmem:[%s15490_s6 + $0x318] sm:$0xff]   ;;  %v2300_v60 = vshll.u32 %v16619_v59, 16 }
 0x13f   : > { %v16597_v41 = vsel %vm3558_vm3, %v3343_v29, %v3086_v54  ;;  %v3088_v39 = vpop.permute.xlu1 %3087  ;;  %v2838_v54 = vrot.slane %v16533_v62, 1  ;;  %v20826_v62 = vrot.slane %v16576_v28, 1  ;;  %v16638_v18 = vld [vmem:[%s15490_s6 + $0x15c] sm:$0xff]  }
 0x140   : > { %2704 = vrot.lane.b32.xlu0 %v2275_v20, %s15425_s12  ;;  %14292 = vmatprep.mubr.msk.bf16.mxu0 %vm3863_vm4, %v16597_v41  ;;  %v16608_v52 = vsel %vm3558_vm3, %v3345_v46, %v3088_v39  ;;  %v1683_v20 = vsel %vm1347_vm1, %v1678_v15, %v1682_v11  ;;  %v2285_v46 = vshrl.u32 %v16584_v55, 16  ;;  %v2289_v39 = vrot.slane %v2287_v27, 1 }
 0x141   : > { %2706 = vrot.lane.b32.xlu1 %v2283_v48, %s15425_s12  ;;  %14293 = vmatmul.mubr.msk.bf16.gmra.mxu0 %vm3863_vm4, %v16608_v52  ;;  %v2839_v48 = vrot.slane %v16557_v5, 1  ;;  %v2294_v11 = vrot.slane %v2292_v63, 1  ;;  %v1691_v5 = vsel %vm1347_vm1, %v1686_v42, %v1690_v37  ;;  %v15318_v63 = vld [vmem:[%s15490_s6 + $0x320] sm:$0xff]  }
 0x142   : > { %v2677_v44 = vpop.permute.xlu0 %2676 }
 0x143   : > { %v2679_v29 = vpop.permute.xlu1 %2678  ;;  %v3479_v38 = vsel %vm3301_vm2, %v15317_v16, %v2677_v44  ;;  %v2840_v27 = vsel %vm2756_vm0, %v2838_v54, %v2839_v48  ;;  %v2290_v44 = vor.u32 %v2289_v39, %v2285_v46  ;;  %v2298_v42 = vor.u32 %v2296_v10, %v2294_v11 }
 0x144   : > { %3249 = vrot.lane.b32.xlu0 %v2988_v22, %s15424_s11  ;;  %v16647_v16 = vrot.slane %v2300_v60, 1  ;;  %v2842_v54 = vsel %vm2756_vm0, %v2839_v48, %v20826_v62  ;;  %v1696_v46 = vshll.u32 %v16638_v18, 16  ;;  %v2991_v60 = vrot.slane %v16584_v55, 1  ;;  %v15319_v48 = vld [vmem:[%s15490_s6 + $0xc4] sm:$0xff]  }
 0x145   : > { %2572 = vrot.lane.b32.xlu1 %v1683_v20, %s15425_s12  ;;  %v2295_v10 = vsel %vm1347_vm1, %v2290_v44, %v2294_v11  ;;  %v1700_v55 = vshrl.u32 %v16638_v18, 16  ;;  %v15320_v44 = vld [vmem:[%s15490_s6 + $0xcc] sm:$0xff]  }
 0x146   : > { %v3222_v15 = vpop.permute.xlu0 %3221  ;;  %v1698_v11 = vrot.slane %v1696_v46, 1 }
 0x147   : > { %v16633_v58 = vsel %vm3558_vm3, %v3479_v38, %v3222_v15  ;;  %v2545_v22 = vpop.permute.xlu1 %2544  ;;  %v3481_v38 = vsel %vm3301_vm2, %v15318_v63, %v2679_v29  ;;  %v1692_v15 = vshrl.u32 %v16576_v28, 16  ;;  %v16658_v29 = vld [vmem:[%s15490_s6 + $0x164] ss:$0 sps:$4 sm:$0x11]  }
 0x148   : > { %20990 = vst [vmem:[#allocation28_spill] sm:$0xff] %v16633_v58  ;;  %3251 = vrot.lane.b32.xlu0 %v2990_v45, %s15424_s11  ;;  %14428 = vmatprep.mubr.msk.bf16.mxu1 %vm3863_vm4, %v16633_v58  ;;  %v16667_v63 = vld [vmem:[%s15490_s6 + $0x3c0] sm:$0xff]  }
 0x149   : > { %2574 = vrot.lane.b32.xlu1 %v1691_v5, %s15425_s12  ;;  %v2992_v5 = vrot.slane %v16594_v4, 1  ;;  %v1694_v62 = vor.u32 %v1692_v15, %v1690_v37  ;;  %v1704_v4 = vshll.u32 %v16658_v29, 16  ;;  %v20835_v37 = vrot.slane %v16619_v59, 1 }
 0x14a   : > { %v3224_v20 = vpop.permute.xlu0 %3223  ;;  %v2312_v3 = vshrl.u32 %v16667_v63, 16 }
 0x14b   : > { %v16651_v45 = vsel %vm3558_vm3, %v3481_v38, %v3224_v20  ;;  %v2547_v39 = vpop.permute.xlu1 %2546  ;;  %v3347_v38 = vsel %vm3301_vm2, %v15319_v48, %v2545_v22  ;;  %v2993_v15 = vsel %vm2756_vm0, %v2991_v60, %v2992_v5  ;;  %v2995_v60 = vsel %vm2756_vm0, %v2992_v5, %v20835_v37 }
 0x14c   : > { %20991 = vst [vmem:[#allocation29_spill] sm:$0xff] %v16651_v45  ;;  %3117 = vrot.lane.b32.xlu0 %v2840_v27, %s15424_s11  ;;  %14429 = vmatmul.mubr.msk.bf16.gmra.mxu1 %vm3863_vm4, %v16651_v45  ;;  %v2303_v27 = vsel %vm1347_vm1, %v2298_v42, %v16647_v16  ;;  %v3349_v22 = vsel %vm3301_vm2, %v15320_v44, %v2547_v39  ;;  %v16694_v39 = vld [vmem:[%s15490_s6 + $0x3c8] ss:$0 sps:$4 sm:$0x11]   ;;  %v1706_v44 = vrot.slane %v1704_v4, 1 }
 0x14d   : > { %3119 = vrot.lane.b32.xlu1 %v2842_v54, %s15424_s11  ;;  %v2308_v54 = vshll.u32 %v16667_v63, 16 }
 0x14e   : > { %v3090_v20 = vpop.permute.xlu0 %3089 }
 0x14f   : > { %v16675_v45 = vsel %vm3558_vm3, %v3347_v38, %v3090_v20  ;;  %v3092_v48 = vpop.permute.xlu1 %3091  ;;  %v1699_v38 = vsel %vm1347_vm1, %v1694_v62, %v1698_v11  ;;  %v1702_v20 = vor.u32 %v1700_v55, %v1698_v11  ;;  %v2310_v58 = vrot.slane %v2308_v54, 1  ;;  %v16718_v54 = vld [vmem:[%s15490_s6 + $0x170] sm:$0xff]  }
 0x150   : > { %2708 = vrot.lane.b32.xlu0 %v2295_v10, %s15425_s12  ;;  %14296 = vmatprep.mubr.msk.bf16.mxu0 %vm3863_vm4, %v16675_v45  ;;  %v16686_v42 = vsel %vm3558_vm3, %v3349_v22, %v3092_v48  ;;  %v16697_v10 = vld [vmem:[%s15490_s6 + $0x168] sm:$0xff]   ;;  %v2304_v48 = vshrl.u32 %v16619_v59, 16  ;;  %v2316_v55 = vshll.u32 %v16694_v39, 16 }
 0x151   : > { %2710 = vrot.lane.b32.xlu1 %v2303_v27, %s15425_s12  ;;  %14297 = vmatmul.mubr.msk.bf16.gmra.mxu0 %vm3863_vm4, %v16686_v42  ;;  %v2843_v27 = vrot.slane %v16638_v18, 1  ;;  %v1711_v4 = vshll.u32 %v16697_v10, 16  ;;  %v1707_v18 = vsel %vm1347_vm1, %v1702_v20, %v1706_v44  ;;  %v2314_v20 = vor.u32 %v2312_v3, %v2310_v58  ;;  %v15322_v44 = vld [vmem:[%s15490_s6 + $0x330] sm:$0xff]  }
 0x152   : > { %v2681_v46 = vpop.permute.xlu0 %2680 }
 0x153   : > { %v2683_v22 = vpop.permute.xlu1 %2682  ;;  %v3483_v62 = vsel %vm3301_vm2, %v15321_v40, %v2681_v46  ;;  %v20993_v46 = vrot.slane %v16576_v28, 1  ;;  %v1713_v28 = vrot.slane %v1711_v4, 1 }
 0x154   : > { %3253 = vrot.lane.b32.xlu0 %v2993_v15, %s15424_s11  ;;  %v2845_v15 = vrot.slane %v16658_v29, 1  ;;  %v3485_v29 = vsel %vm3301_vm2, %v15322_v44, %v2683_v22  ;;  %v16738_v22 = vld [vmem:[%s15490_s6 + $0x178] sm:$0xff]  }
 0x155   : > { %2576 = vrot.lane.b32.xlu1 %v1699_v38, %s15425_s12  ;;  %v2844_v38 = vsel %vm2756_vm0, %v20993_v46, %v2843_v27  ;;  %v1724_v57 = vshll.u32 %v16738_v22, 16 }
 0x156   : > { %v3226_v11 = vpop.permute.xlu0 %3225  ;;  %v2846_v3 = vsel %vm2756_vm0, %v2843_v27, %v2845_v15  ;;  %v15236_v27 = vld [vmem:[%s20809_s1 + $0x48] sm:$0xff]   ;;  %v15323_v15 = vld [vmem:[%s15490_s6 + $0xd8] sm:$0xff]  }
 0x157   : > { %v16713_v5 = vsel %vm3558_vm3, %v3483_v62, %v3226_v11  ;;  %v2549_v37 = vpop.permute.xlu1 %2548  ;;  %v2306_v62 = vor.u32 %v2304_v48, %v16647_v16  ;;  %v2318_v11 = vrot.slane %v2316_v55, 1  ;;  %v1716_v16 = vshll.u32 %v16718_v54, 16  ;;  %14512 = vmatprep.subr.bf16.mxu1 %v15236_v27 }
 0x158   : > { %20992 = vst [vmem:[#allocation30_spill] sm:$0xff] %v16713_v5  ;;  %3255 = vrot.lane.b32.xlu0 %v2995_v60, %s15424_s11  ;;  %14432 = vmatprep.mubr.msk.bf16.mxu1 %vm3863_vm4, %v16713_v5  ;;  %v1709_v5 = vshrl.u32 %v16697_v10, 16  ;;  %v3351_v44 = vsel %vm3301_vm2, %v15323_v15, %v2549_v37  ;;  %v15324_v37 = vld [vmem:[%s15490_s6 + $0xe0] sm:$0xff]  }
 0x159   : > { %v14382_v40 = vpop.f32.mrf.mxu1  ;;  %2578 = vrot.lane.b32.xlu1 %v1707_v18, %s15425_s12  ;;  %v2311_v4 = vsel %vm1347_vm1, %v2306_v62, %v2310_v58  ;;  %v2996_v18 = vrot.slane %v16667_v63, 1  ;;  %v16758_v62 = vld [vmem:[%s15490_s6 + $0x3d4] sm:$0xff]   ;;  %14513 = vmatpush3.bf16.msra.mxu1 %v15236_v27 }
 0x15a   : > { %5308 = vst.msk [vmem:[#allocation2 + $0x410] sm:$0xff] %vm5177_vm5, %v14382_v40  ;;  %v3228_v60 = vpop.permute.xlu0 %3227  ;;  %v16747_v40 = vld [vmem:[%s15490_s6 + $0x3cc] sm:$0xff]   ;;  %v1714_v58 = vor.u32 %v1713_v28, %v1709_v5  ;;  %v2998_v5 = vrot.slane %v16694_v39, 1  ;;  %v20995_v28 = vrot.slane %v16619_v59, 1 }
 0x15b   : > { %v16733_v2 = vsel %vm3558_vm3, %v3485_v29, %v3228_v60  ;;  %v4666_v46 = vpop.f32.mrf.mxu1  ;;  %v2551_v48 = vpop.permute.xlu1 %2550  ;;  %v2319_v29 = vsel %vm1347_vm1, %v2314_v20, %v2318_v11 }
 0x15c   : > { %20994 = vst [vmem:[#allocation31_spill] sm:$0xff] %v16733_v2  ;;  %5306 = vst.msk [vmem:[#allocation2 + $0x400] sm:$0xff] %vm5177_vm5, %v4666_v46  ;;  %3121 = vrot.lane.b32.xlu0 %v2844_v38, %s15424_s11  ;;  %14433 = vmatmul.mubr.msk.bf16.gmra.mxu1 %vm3863_vm4, %v16733_v2  ;;  %v1718_v46 = vrot.slane %v1716_v16, 1  ;;  %v1720_v2 = vshrl.u32 %v16718_v54, 16  ;;  %v2997_v16 = vsel %vm2756_vm0, %v20995_v28, %v2996_v18  ;;  %v2848_v28 = vrot.slane %v16718_v54, 1 }
 0x15d   : > { %v14383_v55 = vpop.f32.mrf.mxu1  ;;  %3123 = vrot.lane.b32.xlu1 %v2846_v3, %s15424_s11  ;;  %v3353_v3 = vsel %vm3301_vm2, %v15324_v37, %v2551_v48  ;;  %v2323_v48 = vshll.u32 %v16747_v40, 16 }
 0x15e   : > { %5309 = vst.msk [vmem:[#allocation2 + $0x418] sm:$0xff] %vm5177_vm5, %v14383_v55  ;;  %v3094_v38 = vpop.permute.xlu0 %3093  ;;  %v1722_v27 = vor.u32 %v1720_v2, %v1718_v46  ;;  %v15325_v2 = vld [vmem:[%s15490_s6 + $0x33c] sm:$0xff]  }
 0x15f   : > { %v16761_v63 = vsel %vm3558_vm3, %v3351_v44, %v3094_v38  ;;  %v4669_v60 = vpop.f32.mrf.mxu1  ;;  %v3096_v55 = vpop.permute.xlu1 %3095  ;;  %v16785_v44 = vld [vmem:[%s15490_s6 + $0x3dc] sm:$0xff]   ;;  %v1719_v38 = vsel %vm1347_vm1, %v1714_v58, %v1718_v46  ;;  %v2321_v58 = vshrl.u32 %v16747_v40, 16 }
 0x160   : > { %5307 = vst.msk [vmem:[#allocation2 + $0x408] sm:$0xff] %vm5177_vm5, %v4669_v60  ;;  %2712 = vrot.lane.b32.xlu0 %v2311_v4, %s15425_s12  ;;  %14300 = vmatprep.mubr.msk.bf16.mxu0 %vm3863_vm4, %v16761_v63  ;;  %v16773_v20 = vsel %vm3558_vm3, %v3353_v3, %v3096_v55  ;;  %v2328_v4 = vshll.u32 %v16758_v62, 16  ;;  %v16789_v60 = vrot.slane %v1724_v57, 1  ;;  %v2999_v3 = vsel %vm2756_vm0, %v2996_v18, %v2998_v5 }
 0x161   : > { %v14386_v11 = vpop.f32.mrf.mxu1  ;;  %2714 = vrot.lane.b32.xlu1 %v2319_v29, %s15425_s12  ;;  %14301 = vmatmul.mubr.msk.bf16.gmra.mxu0 %vm3863_vm4, %v16773_v20  ;;  %v2325_v57 = vrot.slane %v2323_v48, 1  ;;  %v2340_v51 = vshrl.u32 %v16785_v44, 16 }
 0x162   : > { %v14254_v15 = vpop.f32.mrf.mxu0  ;;  %5312 = vst.msk [vmem:[#allocation2 + $0x430] sm:$0xff] %vm5177_vm5, %v14386_v11  ;;  %v2685_v39 = vpop.permute.xlu0 %2684  ;;  %v2847_v11 = vrot.slane %v16697_v10, 1  ;;  %v2330_v5 = vrot.slane %v2328_v4, 1  ;;  %v2336_v10 = vshll.u32 %v16785_v44, 16  ;;  %v15241_v4 = vld [vmem:[%s20809_s1 + $0x78] sm:$0xff]  }
 0x163   : > { %5180 = vst.msk [vmem:[#allocation2 + $0x10] sm:$0xff] %vm5177_vm5, %v14254_v15  ;;  %v4682_v59 = vpop.f32.mrf.mxu1  ;;  %v2687_v29 = vpop.permute.xlu1 %2686  ;;  %v3487_v46 = vsel %vm3301_vm2, %v15325_v2, %v2685_v39  ;;  %v1727_v39 = vsel %vm1347_vm1, %v1722_v27, %v16789_v60  ;;  %v2326_v2 = vor.u32 %v2325_v57, %v2321_v58  ;;  %14780 = vmatprep.subr.bf16.mxu0 %v15241_v4  ;;  %v16837_v57 = vld [vmem:[%s15490_s6 + $0x188] ss:$0 sps:$4 sm:$0x11]  }
 0x164   : > { %v4154_v37 = vpop.f32.mrf.mxu0  ;;  %5310 = vst.msk [vmem:[#allocation2 + $0x420] sm:$0xff] %vm5177_vm5, %v4682_v59  ;;  %3257 = vrot.lane.b32.xlu0 %v2997_v16, %s15424_s11  ;;  %v2332_v16 = vshrl.u32 %v16758_v62, 16  ;;  %v2849_v27 = vsel %vm2756_vm0, %v2847_v11, %v2848_v28  ;;  %14781 = vmatpush3.bf16.msra.mxu0 %v15241_v4  ;;  %v20998_v11 = vrot.slane %v16738_v22, 1  ;;  %v3000_v4 = vrot.slane %v16747_v40, 1 }
 0x165   : > { %5178 = vst.msk [vmem:[#allocation2] sm:$0xff] %vm5177_vm5, %v4154_v37  ;;  %v14387_v55 = vpop.f32.mrf.mxu1  ;;  %2580 = vrot.lane.b32.xlu1 %v1719_v38, %s15425_s12  ;;  %v16812_v38 = vld [vmem:[%s15490_s6 + $0x180] sm:$0xff]  }
 0x166   : > { %v14255_v15 = vpop.f32.mrf.mxu0  ;;  %5313 = vst.msk [vmem:[#allocation2 + $0x438] sm:$0xff] %vm5177_vm5, %v14387_v55  ;;  %v3230_v18 = vpop.permute.xlu0 %3229  ;;  %v2334_v59 = vor.u32 %v2332_v16, %v2330_v5  ;;  %v2851_v58 = vsel %vm2756_vm0, %v2848_v28, %v20998_v11  ;;  %v3001_v28 = vrot.slane %v16758_v62, 1  ;;  %v1736_v62 = vshrl.u32 %v16812_v38, 16 }
 0x167   : > { %5181 = vst.msk [vmem:[#allocation2 + $0x18] sm:$0xff] %vm5177_vm5, %v14255_v15  ;;  %v16806_v54 = vsel %vm3558_vm3, %v3487_v46, %v3230_v18  ;;  %v4685_v48 = vpop.f32.mrf.mxu1  ;;  %v2553_v37 = vpop.permute.xlu1 %2552  ;;  %v15326_v46 = vld [vmem:[%s15490_s6 + $0x344] sm:$0xff]  }
 0x168   : > { %20996 = vst [vmem:[#allocation32_spill] sm:$0xff] %v16806_v54  ;;  %v4157_v55 = vpop.f32.mrf.mxu0  ;;  %5311 = vst.msk [vmem:[#allocation2 + $0x428] sm:$0xff] %vm5177_vm5, %v4685_v48  ;;  %3259 = vrot.lane.b32.xlu0 %v2999_v3, %s15424_s11  ;;  %14436 = vmatprep.mubr.msk.bf16.mxu1 %vm3863_vm4, %v16806_v54  ;;  %v3489_v15 = vsel %vm3301_vm2, %v15326_v46, %v2687_v29  ;;  %v16826_v48 = vrot.slane %v2336_v10, 1  ;;  %v1728_v3 = vshrl.u32 %v16738_v22, 16  ;;  %v1732_v29 = vshll.u32 %v16812_v38, 16  ;;  %v16847_v46 = vld [vmem:[%s15490_s6 + $0x3e4] sm:$0xff]  }
 0x169   : > { %5179 = vst.msk [vmem:[#allocation2 + $0x8] sm:$0xff] %vm5177_vm5, %v4157_v55  ;;  %2582 = vrot.lane.b32.xlu1 %v1727_v39, %s15425_s12  ;;  %v2331_v10 = vsel %vm1347_vm1, %v2326_v2, %v2330_v5  ;;  %v1740_v2 = vshll.u32 %v16837_v57, 16 }
 0x16a   : > { %v3232_v18 = vpop.permute.xlu0 %3231  ;;  %v1734_v40 = vrot.slane %v1732_v29, 1  ;;  %v3002_v29 = vsel %vm2756_vm0, %v3000_v4, %v3001_v28 }
 0x16b   : > { %v16830_v55 = vsel %vm3558_vm3, %v3489_v15, %v3232_v18  ;;  %v2555_v39 = vpop.permute.xlu1 %2554  ;;  %v15327_v15 = vld [vmem:[%s15490_s6 + $0xe8] sm:$0xff]  }
 0x16c   : > { %20997 = vst [vmem:[#allocation33_spill] sm:$0xff] %v16830_v55  ;;  %3125 = vrot.lane.b32.xlu0 %v2849_v27, %s15424_s11  ;;  %v14390_v16 = vpop.f32.mrf.mxu1  ;;  %14437 = vmatmul.mubr.msk.bf16.gmra.mxu1 %vm3863_vm4, %v16830_v55  ;;  %v3355_v18 = vsel %vm3301_vm2, %v15327_v15, %v2553_v37  ;;  %v2339_v55 = vsel %vm1347_vm1, %v2334_v59, %v16826_v48  ;;  %v15328_v37 = vld [vmem:[%s15490_s6 + $0xf0] sm:$0xff]  }
 0x16d   : > { %5316 = vst.msk [vmem:[#allocation2 + $0x450] sm:$0xff] %vm5177_vm5, %v14390_v16  ;;  %3127 = vrot.lane.b32.xlu1 %v2851_v58, %s15424_s11  ;;  %v1730_v16 = vor.u32 %v1728_v3, %v16789_v60  ;;  %v3357_v58 = vsel %vm3301_vm2, %v15328_v37, %v2555_v39  ;;  %v20850_v60 = vrot.slane %v16785_v44, 1  ;;  %v1738_v4 = vor.u32 %v1736_v62, %v1734_v40  ;;  %v15329_v62 = vld [vmem:[%s15490_s6 + $0x34c] sm:$0xff]  }
 0x16e   : > { %v3098_v27 = vpop.permute.xlu0 %3097  ;;  %v4698_v11 = vpop.f32.mrf.mxu1 }
 0x16f   : > { %v16856_v5 = vsel %vm3558_vm3, %v3355_v18, %v3098_v27  ;;  %5314 = vst.msk [vmem:[#allocation2 + $0x440] sm:$0xff] %vm5177_vm5, %v4698_v11  ;;  %v3100_v15 = vpop.permute.xlu1 %3099  ;;  %v2344_v18 = vshll.u32 %v16847_v46, 16  ;;  %v16877_v27 = vld [vmem:[%s15490_s6 + $0x3ec] ss:$0 sps:$4 sm:$0x11]   ;;  %v3004_v54 = vsel %vm2756_vm0, %v3001_v28, %v20850_v60  ;;  %v2854_v60 = vrot.slane %v16837_v57, 1 }
 0x170   : > { %2716 = vrot.lane.b32.xlu0 %v2331_v10, %s15425_s12  ;;  %v14391_v59 = vpop.f32.mrf.mxu1  ;;  %14304 = vmatprep.mubr.msk.bf16.mxu0 %vm3863_vm4, %v16856_v5  ;;  %v16868_v3 = vsel %vm3558_vm3, %v3357_v58, %v3100_v15  ;;  %v16880_v11 = vld [vmem:[%s15490_s6 + $0x18c] sm:$0xff]   ;;  %v1735_v58 = vsel %vm1347_vm1, %v1730_v16, %v1734_v40  ;;  %v1742_v15 = vrot.slane %v1740_v2, 1  ;;  %v2348_v40 = vshrl.u32 %v16847_v46, 16  ;;  %v15330_v57 = vld [vmem:[%s15490_s6 + $0x354] sm:$0xff]  }
 0x171   : > { %5317 = vst.msk [vmem:[#allocation2 + $0x458] sm:$0xff] %vm5177_vm5, %v14391_v59  ;;  %2718 = vrot.lane.b32.xlu1 %v2339_v55, %s15425_s12  ;;  %v14258_v39 = vpop.f32.mrf.mxu0  ;;  %14305 = vmatmul.mubr.msk.bf16.gmra.mxu0 %vm3863_vm4, %v16868_v3  ;;  %v2346_v16 = vrot.slane %v2344_v18, 1  ;;  %v2352_v28 = vshll.u32 %v16877_v27, 16 }
 0x172   : > { %v2689_v10 = vpop.permute.xlu0 %2688  ;;  %5184 = vst.msk [vmem:[#allocation2 + $0x30] sm:$0xff] %vm5177_vm5, %v14258_v39  ;;  %v4701_v37 = vpop.f32.mrf.mxu1  ;;  %v2852_v39 = vrot.slane %v16812_v38, 1  ;;  %v1743_v18 = vsel %vm1347_vm1, %v1738_v4, %v1742_v15  ;;  %v2342_v4 = vor.u32 %v2340_v51, %v16826_v48  ;;  %v1752_v51 = vshll.u32 %v16905_v31, 16  ;;  %v16925_v48 = vld [vmem:[%s15490_s6 + $0x19c] sm:$0xff]  }
 0x173   : > { %5315 = vst.msk [vmem:[#allocation2 + $0x448] sm:$0xff] %vm5177_vm5, %v4701_v37  ;;  %v2691_v55 = vpop.permute.xlu1 %2690  ;;  %v4170_v59 = vpop.f32.mrf.mxu0  ;;  %v3491_v2 = vsel %vm3301_vm2, %v15329_v62, %v2689_v10  ;;  %v21000_v62 = vrot.slane %v16738_v22, 1  ;;  %v2350_v15 = vor.u32 %v2348_v40, %v2346_v16 }
 0x174   : > { %3261 = vrot.lane.b32.xlu0 %v3002_v29, %s15424_s11  ;;  %5182 = vst.msk [vmem:[#allocation2 + $0x20] sm:$0xff] %vm5177_vm5, %v4170_v59  ;;  %v1747_v59 = vshll.u32 %v16880_v11, 16  ;;  %v2855_v22 = vsel %vm2756_vm0, %v2852_v39, %v2854_v60  ;;  %v16934_v60 = vld [vmem:[%s15490_s6 + $0x3f0] sm:$0xff]  }
 0x175   : > { %2584 = vrot.lane.b32.xlu1 %v1735_v58, %s15425_s12  ;;  %v14259_v29 = vpop.f32.mrf.mxu0 }
 0x176   : > { %v3234_v37 = vpop.permute.xlu0 %3233  ;;  %5185 = vst.msk [vmem:[#allocation2 + $0x38] sm:$0xff] %vm5177_vm5, %v14259_v29  ;;  %v3493_v29 = vsel %vm3301_vm2, %v15330_v57, %v2691_v55  ;;  %v1749_v1 = vrot.slane %v1747_v59, 1  ;;  %v3005_v59 = vrot.slane %v16847_v46, 1  ;;  %v1754_v46 = vrot.slane %v1752_v51, 1 }
 0x177   : > { %v16900_v38 = vsel %vm3558_vm3, %v3491_v2, %v3234_v37  ;;  %v2557_v10 = vpop.permute.xlu1 %2556  ;;  %v4173_v58 = vpop.f32.mrf.mxu0  ;;  %v2853_v2 = vsel %vm2756_vm0, %v21000_v62, %v2852_v39  ;;  %v2354_v37 = vrot.slane %v2352_v28, 1  ;;  %v2347_v28 = vsel %vm1347_vm1, %v2342_v4, %v2346_v16  ;;  %v15331_v39 = vld [vmem:[%s15490_s6 + $0xfc] sm:$0xff]  }
 0x178   : > { %20999 = vst [vmem:[#allocation34_spill] sm:$0xff] %v16900_v38  ;;  %3263 = vrot.lane.b32.xlu0 %v3004_v54, %s15424_s11  ;;  %14440 = vmatprep.mubr.msk.bf16.mxu1 %vm3863_vm4, %v16900_v38  ;;  %5183 = vst.msk [vmem:[#allocation2 + $0x28] sm:$0xff] %vm5177_vm5, %v4173_v58  ;;  %v1745_v38 = vshrl.u32 %v16880_v11, 16  ;;  %v1756_v16 = vshrl.u32 %v16905_v31, 16  ;;  %v1760_v4 = vshll.u32 %v16925_v48, 16 }
 0x179   : > { %2586 = vrot.lane.b32.xlu1 %v1743_v18, %s15425_s12  ;;  %v3359_v18 = vsel %vm3301_vm2, %v15331_v39, %v2557_v10  ;;  %v2355_v57 = vsel %vm1347_vm1, %v2350_v15, %v2354_v37  ;;  %v15332_v10 = vld [vmem:[%s15490_s6 + $0x104] sm:$0xff]   ;;  %v21002_v37 = vrot.slane %v16785_v44, 1 }
 0x17a   : > { %v3236_v54 = vpop.permute.xlu0 %3235 }
 0x17b   : > { %v16920_v58 = vsel %vm3558_vm3, %v3493_v29, %v3236_v54  ;;  %v2559_v55 = vpop.permute.xlu1 %2558  ;;  %v1750_v29 = vor.u32 %v1749_v1, %v1745_v38  ;;  %v16941_v54 = vld [vmem:[%s15490_s6 + $0x3f8] sm:$0xff]   ;;  %v3007_v38 = vrot.slane %v16877_v27, 1  ;;  %v3006_v51 = vsel %vm2756_vm0, %v21002_v37, %v3005_v59 }
 0x17c   : > { %21001 = vst [vmem:[#allocation35_spill] sm:$0xff] %v16920_v58  ;;  %3129 = vrot.lane.b32.xlu0 %v2853_v2, %s15424_s11  ;;  %v14394_v40 = vpop.f32.mrf.mxu1  ;;  %14441 = vmatmul.mubr.msk.bf16.gmra.mxu1 %vm3863_vm4, %v16920_v58  ;;  %v2364_v27 = vshll.u32 %v16941_v54, 16  ;;  %v2856_v37 = vrot.slane %v16880_v11, 1  ;;  %v2357_v58 = vshrl.u32 %v16934_v60, 16 }
 0x17d   : > { %5320 = vst.msk [vmem:[#allocation2 + $0x470] sm:$0xff] %vm5177_vm5, %v14394_v40  ;;  %3131 = vrot.lane.b32.xlu1 %v2855_v22, %s15424_s11  ;;  %v3361_v22 = vsel %vm3301_vm2, %v15332_v10, %v2559_v55  ;;  %v2359_v55 = vshll.u32 %v16934_v60, 16  ;;  %v1755_v44 = vsel %vm1347_vm1, %v1750_v29, %v1754_v46  ;;  %v1758_v10 = vor.u32 %v1756_v16, %v1754_v46  ;;  %v15333_v46 = vld [vmem:[%s15490_s6 + $0x360] sm:$0xff]  }
 0x17e   : > { %v3102_v62 = vpop.permute.xlu0 %3101  ;;  %v4714_v2 = vpop.f32.mrf.mxu1 }
 0x17f   : > { %v16944_v40 = vsel %vm3558_vm3, %v3359_v18, %v3102_v62  ;;  %5318 = vst.msk [vmem:[#allocation2 + $0x460] sm:$0xff] %vm5177_vm5, %v4714_v2  ;;  %v3104_v39 = vpop.permute.xlu1 %3103  ;;  %v16968_v62 = vld [vmem:[%s15490_s6 + $0x400] sm:$0xff]   ;;  %v2361_v29 = vrot.slane %v2359_v55, 1 }
 0x180   : > { %2720 = vrot.lane.b32.xlu0 %v2347_v28, %s15425_s12  ;;  %v14395_v1 = vpop.f32.mrf.mxu1  ;;  %14308 = vmatprep.mubr.msk.bf16.mxu0 %vm3863_vm4, %v16944_v40  ;;  %v16956_v15 = vsel %vm3558_vm3, %v3361_v22, %v3104_v39  ;;  %v1762_v22 = vrot.slane %v1760_v4, 1 }
 0x181   : > { %5321 = vst.msk [vmem:[#allocation2 + $0x478] sm:$0xff] %vm5177_vm5, %v14395_v1  ;;  %2722 = vrot.lane.b32.xlu1 %v2355_v57, %s15425_s12  ;;  %v14262_v28 = vpop.f32.mrf.mxu0  ;;  %14309 = vmatmul.mubr.msk.bf16.gmra.mxu0 %vm3863_vm4, %v16956_v15  ;;  %v3008_v1 = vsel %vm2756_vm0, %v3005_v59, %v3007_v38  ;;  %v2368_v59 = vshrl.u32 %v16941_v54, 16  ;;  %v2372_v38 = vshll.u32 %v16968_v62, 16 }
 0x182   : > { %v2693_v18 = vpop.permute.xlu0 %2692  ;;  %5188 = vst.msk [vmem:[#allocation2 + $0x50] sm:$0xff] %vm5177_vm5, %v14262_v28  ;;  %v4717_v2 = vpop.f32.mrf.mxu1  ;;  %v2857_v28 = vrot.slane %v16905_v31, 1  ;;  %v1763_v11 = vsel %vm1347_vm1, %v1758_v10, %v1762_v22 }
 0x183   : > { %5319 = vst.msk [vmem:[#allocation2 + $0x468] sm:$0xff] %vm5177_vm5, %v4717_v2  ;;  %v2695_v57 = vpop.permute.xlu1 %2694  ;;  %v4186_v39 = vpop.f32.mrf.mxu0  ;;  %v3495_v16 = vsel %vm3301_vm2, %v15333_v46, %v2693_v18  ;;  %v16991_v18 = vld [vmem:[%s15490_s6 + $0x1a4] sm:$0xff]   ;;  %v2362_v46 = vor.u32 %v2361_v29, %v2357_v58  ;;  %v17004_v34 = vrot.slane %v2372_v38, 1  ;;  %v21005_v58 = vrot.slane %v16925_v48, 1 }
 0x184   : > { %3265 = vrot.lane.b32.xlu0 %v3006_v51, %s15424_s11  ;;  %5186 = vst.msk [vmem:[#allocation2 + $0x40] sm:$0xff] %vm5177_vm5, %v4186_v39  ;;  %v2366_v51 = vrot.slane %v2364_v27, 1  ;;  %v15252_v27 = vld [vmem:[%s20809_s1 + $0x40] sm:$0xff]   ;;  %v2858_v10 = vsel %vm2756_vm0, %v2856_v37, %v2857_v28  ;;  %v17015_v29 = vld [vmem:[%s15490_s6 + $0x1ac] ss:$0 sps:$4 sm:$0x11]  }
 0x185   : > { %2588 = vrot.lane.b32.xlu1 %v1755_v44, %s15425_s12  ;;  %v14263_v4 = vpop.f32.mrf.mxu0  ;;  %14514 = vmatprep.subr.bf16.mxu1 %v15252_v27  ;;  %v2860_v37 = vsel %vm2756_vm0, %v2857_v28, %v21005_v58  ;;  %v3010_v28 = vrot.slane %v16941_v54, 1  ;;  %v1772_v54 = vshrl.u32 %v16991_v18, 16 }
 0x186   : > { %v3238_v2 = vpop.permute.xlu0 %3237  ;;  %5189 = vst.msk [vmem:[#allocation2 + $0x58] sm:$0xff] %vm5177_vm5, %v14263_v4  ;;  %v2370_v55 = vor.u32 %v2368_v59, %v2366_v51  ;;  %14515 = vmatpush3.bf16.msra.mxu1 %v15252_v27  ;;  %v2367_v38 = vsel %vm1347_vm1, %v2362_v46, %v2366_v51  ;;  %v3009_v27 = vrot.slane %v16934_v60, 1  ;;  %v1776_v46 = vshll.u32 %v17015_v29, 16 }
 0x187   : > { %v16986_v31 = vsel %vm3558_vm3, %v3495_v16, %v3238_v2  ;;  %v2561_v44 = vpop.permute.xlu1 %2560  ;;  %v4189_v39 = vpop.f32.mrf.mxu0  ;;  %v15334_v16 = vld [vmem:[%s15490_s6 + $0x368] sm:$0xff]  }
 0x188   : > { %21003 = vst [vmem:[#allocation36_spill] sm:$0xff] %v16986_v31  ;;  %3267 = vrot.lane.b32.xlu0 %v3008_v1, %s15424_s11  ;;  %14444 = vmatprep.mubr.msk.bf16.mxu1 %vm3863_vm4, %v16986_v31  ;;  %5187 = vst.msk [vmem:[#allocation2 + $0x48] sm:$0xff] %vm5177_vm5, %v4189_v39  ;;  %v3497_v4 = vsel %vm3301_vm2, %v15334_v16, %v2695_v57  ;;  %v1764_v1 = vshrl.u32 %v16925_v48, 16  ;;  %v1768_v57 = vshll.u32 %v16991_v18, 16  ;;  %v17025_v16 = vld [vmem:[%s15490_s6 + $0x408] sm:$0xff]   ;;  %v15336_v31 = vld [vmem:[%s15490_s6 + $0x114] sm:$0xff]  }
 0x189   : > { %2590 = vrot.lane.b32.xlu1 %v1763_v11, %s15425_s12 }
 0x18a   : > { %v3240_v2 = vpop.permute.xlu0 %3239  ;;  %v1770_v60 = vrot.slane %v1768_v57, 1  ;;  %v3011_v57 = vsel %vm2756_vm0, %v3009_v27, %v3010_v28 }
 0x18b   : > { %v17008_v39 = vsel %vm3558_vm3, %v3497_v4, %v3240_v2  ;;  %v2563_v11 = vpop.permute.xlu1 %2562  ;;  %v15335_v4 = vld [vmem:[%s15490_s6 + $0x10c] sm:$0xff]  }
 0x18c   : > { %21004 = vst [vmem:[#allocation37_spill] sm:$0xff] %v17008_v39  ;;  %3133 = vrot.lane.b32.xlu0 %v2858_v10, %s15424_s11  ;;  %v14398_v59 = vpop.f32.mrf.mxu1  ;;  %14445 = vmatmul.mubr.msk.bf16.gmra.mxu1 %vm3863_vm4, %v17008_v39  ;;  %v3363_v2 = vsel %vm3301_vm2, %v15335_v4, %v2561_v44  ;;  %v2375_v39 = vsel %vm1347_vm1, %v2370_v55, %v17004_v34  ;;  %v2380_v4 = vshll.u32 %v17025_v16, 16 }
 0x18d   : > { %5324 = vst.msk [vmem:[#allocation2 + $0x490] sm:$0xff] %vm5177_vm5, %v14398_v59  ;;  %3135 = vrot.lane.b32.xlu1 %v2860_v37, %s15424_s11  ;;  %v1766_v59 = vor.u32 %v1764_v1, %v1762_v22  ;;  %v3365_v44 = vsel %vm3301_vm2, %v15336_v31, %v2563_v11  ;;  %v20869_v22 = vrot.slane %v16968_v62, 1  ;;  %v15255_v31 = vld [vmem:[%s20809_s1 + $0x70] sm:$0xff]  }
 0x18e   : > { %v3106_v10 = vpop.permute.xlu0 %3105  ;;  %v4730_v58 = vpop.f32.mrf.mxu1  ;;  %14782 = vmatprep.subr.bf16.mxu0 %v15255_v31 }
 0x18f   : > { %v17033_v51 = vsel %vm3558_vm3, %v3363_v2, %v3106_v10  ;;  %5322 = vst.msk [vmem:[#allocation2 + $0x480] sm:$0xff] %vm5177_vm5, %v4730_v58  ;;  %v3108_v37 = vpop.permute.xlu1 %3107  ;;  %v17057_v2 = vld [vmem:[%s15490_s6 + $0x410] ss:$0 sps:$4 sm:$0x11]   ;;  %v1771_v58 = vsel %vm1347_vm1, %v1766_v59, %v1770_v60  ;;  %v3013_v13 = vsel %vm2756_vm0, %v3010_v28, %v20869_v22  ;;  %14783 = vmatpush3.bf16.msra.mxu0 %v15255_v31  ;;  %v2376_v59 = vshrl.u32 %v16968_v62, 16  ;;  %v17085_v22 = vld [vmem:[%s15490_s6 + $0x1b8] sm:$0xff]  }
 0x190   : > { %2724 = vrot.lane.b32.xlu0 %v2367_v38, %s15425_s12  ;;  %v14399_v55 = vpop.f32.mrf.mxu1  ;;  %14312 = vmatprep.mubr.msk.bf16.mxu0 %vm3863_vm4, %v17033_v51  ;;  %v17045_v1 = vsel %vm3558_vm3, %v3365_v44, %v3108_v37  ;;  %v17060_v10 = vld [vmem:[%s15490_s6 + $0x1b0] sm:$0xff]   ;;  %v1774_v44 = vor.u32 %v1772_v54, %v1770_v60  ;;  %v1778_v37 = vrot.slane %v1776_v46, 1  ;;  %v2382_v60 = vrot.slane %v2380_v4, 1 }
 0x191   : > { %21006 = vst [vmem:[#allocation38_spill] sm:$0xff] %v17045_v1  ;;  %5325 = vst.msk [vmem:[#allocation2 + $0x498] sm:$0xff] %vm5177_vm5, %v14399_v55  ;;  %2726 = vrot.lane.b32.xlu1 %v2375_v39, %s15425_s12  ;;  %v14266_v11 = vpop.f32.mrf.mxu0  ;;  %14313 = vmatmul.mubr.msk.bf16.gmra.mxu0 %vm3863_vm4, %v17045_v1  ;;  %v2384_v54 = vshrl.u32 %v17025_v16, 16  ;;  %v15337_v46 = vld [vmem:[%s15490_s6 + $0x370] sm:$0xff]   ;;  %v2388_v28 = vshll.u32 %v17057_v2, 16  ;;  %v1783_v31 = vshll.u32 %v17060_v10, 16 }
 0x192   : > { %v2697_v38 = vpop.permute.xlu0 %2696  ;;  %5192 = vst.msk [vmem:[#allocation2 + $0x70] sm:$0xff] %vm5177_vm5, %v14266_v11  ;;  %v4733_v27 = vpop.f32.mrf.mxu1  ;;  %v2861_v11 = vrot.slane %v16991_v18, 1  ;;  %v1779_v4 = vsel %vm1347_vm1, %v1774_v44, %v1778_v37  ;;  %v2378_v44 = vor.u32 %v2376_v59, %v17004_v34  ;;  %v1788_v34 = vshll.u32 %v17085_v22, 16  ;;  %v17105_v59 = vld [vmem:[%s15490_s6 + $0x1c0] sm:$0xff]  }
 0x193   : > { %5323 = vst.msk [vmem:[#allocation2 + $0x488] sm:$0xff] %vm5177_vm5, %v4733_v27  ;;  %v2699_v39 = vpop.permute.xlu1 %2698  ;;  %v4202_v55 = vpop.f32.mrf.mxu0  ;;  %v3499_v27 = vsel %vm3301_vm2, %v15337_v46, %v2697_v38  ;;  %v21008_v46 = vrot.slane %v16925_v48, 1  ;;  %v2386_v37 = vor.u32 %v2384_v54, %v2382_v60  ;;  %v1785_v6 = vrot.slane %v1783_v31, 1 }
 0x194   : > { %3269 = vrot.lane.b32.xlu0 %v3011_v57, %s15424_s11  ;;  %5190 = vst.msk [vmem:[#allocation2 + $0x60] sm:$0xff] %vm5177_vm5, %v4202_v55  ;;  %v2863_v55 = vrot.slane %v17015_v29, 1  ;;  %v15338_v29 = vld [vmem:[%s15490_s6 + $0x378] sm:$0xff]   ;;  %v3014_v31 = vrot.slane %v17025_v16, 1  ;;  %v1790_v16 = vrot.slane %v1788_v34, 1 }
 0x195   : > { %2592 = vrot.lane.b32.xlu1 %v1771_v58, %s15425_s12  ;;  %v14267_v57 = vpop.f32.mrf.mxu0 }
 0x196   : > { %v3242_v26 = vpop.permute.xlu0 %3241  ;;  %5193 = vst.msk [vmem:[#allocation2 + $0x78] sm:$0xff] %vm5177_vm5, %v14267_v57  ;;  %v2390_v57 = vrot.slane %v2388_v28, 1  ;;  %v2864_v48 = vsel %vm2756_vm0, %v2861_v11, %v2863_v55  ;;  %v2383_v28 = vsel %vm1347_vm1, %v2378_v44, %v2382_v60  ;;  %v1792_v60 = vshrl.u32 %v17085_v22, 16 }
 0x197   : > { %v17080_v18 = vsel %vm3558_vm3, %v3499_v27, %v3242_v26  ;;  %v2565_v38 = vpop.permute.xlu1 %2564  ;;  %v4205_v58 = vpop.f32.mrf.mxu0  ;;  %v2862_v26 = vsel %vm2756_vm0, %v21008_v46, %v2861_v11  ;;  %v3501_v27 = vsel %vm3301_vm2, %v15338_v29, %v2699_v39  ;;  %v17114_v11 = vld [vmem:[%s15490_s6 + $0x414] sm:$0xff]   ;;  %v1796_v44 = vshll.u32 %v17105_v59, 16 }
 0x198   : > { %21007 = vst [vmem:[#allocation39_spill] sm:$0xff] %v17080_v18  ;;  %3271 = vrot.lane.b32.xlu0 %v3013_v13, %s15424_s11  ;;  %14448 = vmatprep.mubr.msk.bf16.mxu1 %vm3863_vm4, %v17080_v18  ;;  %5191 = vst.msk [vmem:[#allocation2 + $0x68] sm:$0xff] %vm5177_vm5, %v4205_v58  ;;  %v1781_v18 = vshrl.u32 %v17060_v10, 16  ;;  %v2391_v29 = vsel %vm1347_vm1, %v2386_v37, %v2390_v57  ;;  %v21012_v57 = vrot.slane %v16968_v62, 1 }
 0x199   : > { %2594 = vrot.lane.b32.xlu1 %v1779_v4, %s15425_s12  ;;  %v15339_v4 = vld [vmem:[%s15490_s6 + $0x120] sm:$0xff]  }
 0x19a   : > { %v3244_v13 = vpop.permute.xlu0 %3243  ;;  %v3367_v55 = vsel %vm3301_vm2, %v15339_v4, %v2565_v38  ;;  %v15340_v38 = vld [vmem:[%s15490_s6 + $0x128] sm:$0xff]   ;;  %v3015_v34 = vsel %vm2756_vm0, %v21012_v57, %v3014_v31  ;;  %v2865_v57 = vrot.slane %v17060_v10, 1 }
 0x19b   : > { %v17100_v58 = vsel %vm3558_vm3, %v3501_v27, %v3244_v13  ;;  %v2567_v39 = vpop.permute.xlu1 %2566  ;;  %v1786_v27 = vor.u32 %v1785_v6, %v1781_v18  ;;  %v17121_v13 = vld [vmem:[%s15490_s6 + $0x41c] sm:$0xff]   ;;  %v3016_v18 = vrot.slane %v17057_v2, 1 }
 0x19c   : > { %21009 = vst [vmem:[#allocation40_spill] sm:$0xff] %v17100_v58  ;;  %3137 = vrot.lane.b32.xlu0 %v2862_v26, %s15424_s11  ;;  %v14402_v54 = vpop.f32.mrf.mxu1  ;;  %14449 = vmatmul.mubr.msk.bf16.gmra.mxu1 %vm3863_vm4, %v17100_v58  ;;  %v2400_v2 = vshll.u32 %v17121_v13, 16  ;;  %v2393_v58 = vshrl.u32 %v17114_v11, 16 }
 0x19d   : > { %5328 = vst.msk [vmem:[#allocation2 + $0x4b0] sm:$0xff] %vm5177_vm5, %v14402_v54  ;;  %3139 = vrot.lane.b32.xlu1 %v2864_v48, %s15424_s11  ;;  %v3369_v48 = vsel %vm3301_vm2, %v15340_v38, %v2567_v39  ;;  %v2395_v39 = vshll.u32 %v17114_v11, 16  ;;  %v1791_v62 = vsel %vm1347_vm1, %v1786_v27, %v1790_v16  ;;  %v1794_v38 = vor.u32 %v1792_v60, %v1790_v16  ;;  %v15341_v16 = vld [vmem:[%s15490_s6 + $0x384] sm:$0xff]  }
 0x19e   : > { %v3110_v46 = vpop.permute.xlu0 %3109  ;;  %v4746_v26 = vpop.f32.mrf.mxu1 }
 0x19f   : > { %v17124_v54 = vsel %vm3558_vm3, %v3367_v55, %v3110_v46  ;;  %5326 = vst.msk [vmem:[#allocation2 + $0x4a0] sm:$0xff] %vm5177_vm5, %v4746_v26  ;;  %v3112_v4 = vpop.permute.xlu1 %3111  ;;  %v17148_v46 = vld [vmem:[%s15490_s6 + $0x424] sm:$0xff]   ;;  %v2397_v27 = vrot.slane %v2395_v39, 1 }
 0x1a0   : > { %21010 = vst [vmem:[#allocation41_spill] sm:$0xff] %v17124_v54  ;;  %2728 = vrot.lane.b32.xlu0 %v2383_v28, %s15425_s12  ;;  %v14403_v6 = vpop.f32.mrf.mxu1  ;;  %14316 = vmatprep.mubr.msk.bf16.mxu0 %vm3863_vm4, %v17124_v54  ;;  %v17136_v37 = vsel %vm3558_vm3, %v3369_v48, %v3112_v4  ;;  %v1798_v48 = vrot.slane %v1796_v44, 1  ;;  %v21018_v23 = vrot.slane %v17148_v46, 1 }
 0x1a1   : > { %21011 = vst [vmem:[#allocation42_spill] sm:$0xff] %v17136_v37  ;;  %5329 = vst.msk [vmem:[#allocation2 + $0x4b8] sm:$0xff] %vm5177_vm5, %v14403_v6  ;;  %2730 = vrot.lane.b32.xlu1 %v2391_v29, %s15425_s12  ;;  %v14270_v28 = vpop.f32.mrf.mxu0  ;;  %14317 = vmatmul.mubr.msk.bf16.gmra.mxu0 %vm3863_vm4, %v17136_v37  ;;  %v3017_v6 = vsel %vm2756_vm0, %v3014_v31, %v3016_v18  ;;  %v2404_v31 = vshrl.u32 %v17121_v13, 16  ;;  %v2408_v18 = vshll.u32 %v17148_v46, 16 }
 0x1a2   : > { %v2701_v55 = vpop.permute.xlu0 %2700  ;;  %5196 = vst.msk [vmem:[#allocation2 + $0x90] sm:$0xff] %vm5177_vm5, %v14270_v28  ;;  %v4749_v26 = vpop.f32.mrf.mxu1  ;;  %v2866_v28 = vrot.slane %v17085_v22, 1  ;;  %v1799_v10 = vsel %vm1347_vm1, %v1794_v38, %v1798_v48 }
 0x1a3   : > { %5327 = vst.msk [vmem:[#allocation2 + $0x4a8] sm:$0xff] %vm5177_vm5, %v4749_v26  ;;  %v2703_v29 = vpop.permute.xlu1 %2702  ;;  %v4218_v4 = vpop.f32.mrf.mxu0  ;;  %v3503_v60 = vsel %vm3301_vm2, %v15341_v16, %v2701_v55  ;;  %v17171_v55 = vld [vmem:[%s15490_s6 + $0x1c8] sm:$0xff]   ;;  %v2398_v16 = vor.u32 %v2397_v27, %v2393_v58  ;;  %v17181_v39 = vrot.slane %v2408_v18, 1 }
 0x1a4   : > { %3273 = vrot.lane.b32.xlu0 %v3015_v34, %s15424_s11  ;;  %5194 = vst.msk [vmem:[#allocation2 + $0x80] sm:$0xff] %vm5177_vm5, %v4218_v4  ;;  %v2402_v34 = vrot.slane %v2400_v2, 1  ;;  %v2867_v2 = vsel %vm2756_vm0, %v2865_v57, %v2866_v28  ;;  %v1804_v57 = vshll.u32 %v17171_v55, 16 }
 0x1a5   : > { %2596 = vrot.lane.b32.xlu1 %v1791_v62, %s15425_s12  ;;  %v14271_v44 = vpop.f32.mrf.mxu0 }
 0x1a6   : > { %v3246_v26 = vpop.permute.xlu0 %3245  ;;  %5197 = vst.msk [vmem:[#allocation2 + $0x98] sm:$0xff] %vm5177_vm5, %v14271_v44  ;;  %v2403_v18 = vsel %vm1347_vm1, %v2398_v16, %v2402_v34 }
 0x1a7   : > { %v17166_v22 = vsel %vm3558_vm3, %v3503_v60, %v3246_v26  ;;  %v2569_v62 = vpop.permute.xlu1 %2568  ;;  %v4221_v4 = vpop.f32.mrf.mxu0  ;;  %v15342_v60 = vld [vmem:[%s15490_s6 + $0x38c] sm:$0xff]   ;;  %v2406_v26 = vor.u32 %v2404_v31, %v2402_v34 }
 0x1a8   : > { %21013 = vst [vmem:[#allocation43_spill] sm:$0xff] %v17166_v22  ;;  %3275 = vrot.lane.b32.xlu0 %v3017_v6, %s15424_s11  ;;  %14452 = vmatprep.mubr.msk.bf16.mxu1 %vm3863_vm4, %v17166_v22  ;;  %5195 = vst.msk [vmem:[#allocation2 + $0x88] sm:$0xff] %vm5177_vm5, %v4221_v4  ;;  %v3505_v38 = vsel %vm3301_vm2, %v15342_v60, %v2703_v29  ;;  %v1800_v6 = vshrl.u32 %v17105_v59, 16  ;;  %v21015_v4 = vrot.slane %v17105_v59, 1  ;;  %v17202_v60 = vld [vmem:[%s15490_s6 + $0x42c] sm:$0xff]  }
 0x1a9   : > { %2598 = vrot.lane.b32.xlu1 %v1799_v10, %s15425_s12  ;;  %v17192_v29 = vld [vmem:[%s15490_s6 + $0x1d0] ss:$0 sps:$4 sm:$0x11]   ;;  %v3018_v10 = vrot.slane %v17114_v11, 1  ;;  %v1806_v11 = vrot.slane %v1804_v57, 1 }
 0x1aa   : > { %v3248_v44 = vpop.permute.xlu0 %3247  ;;  %v2869_v58 = vsel %vm2756_vm0, %v2866_v28, %v21015_v4  ;;  %v3019_v28 = vrot.slane %v17121_v13, 1  ;;  %v1808_v13 = vshrl.u32 %v17171_v55, 16  ;;  %v1812_v16 = vshll.u32 %v17192_v29, 16 }
 0x1ab   : > { %v17185_v22 = vsel %vm3558_vm3, %v3505_v38, %v3248_v44  ;;  %v2571_v27 = vpop.permute.xlu1 %2570  ;;  %v15343_v38 = vld [vmem:[%s15490_s6 + $0x130] sm:$0xff]  }
 0x1ac   : > { %21014 = vst [vmem:[#allocation44_spill] sm:$0xff] %v17185_v22  ;;  %3141 = vrot.lane.b32.xlu0 %v2867_v2, %s15424_s11  ;;  %v14406_v31 = vpop.f32.mrf.mxu1  ;;  %14453 = vmatmul.mubr.msk.bf16.gmra.mxu1 %vm3863_vm4, %v17185_v22  ;;  %v3371_v44 = vsel %vm3301_vm2, %v15343_v38, %v2569_v62  ;;  %v2411_v22 = vsel %vm1347_vm1, %v2406_v26, %v17181_v39  ;;  %v15344_v62 = vld [vmem:[%s15490_s6 + $0x138] sm:$0xff]  }
 0x1ad   : > { %5332 = vst.msk [vmem:[#allocation2 + $0x4d0] sm:$0xff] %vm5177_vm5, %v14406_v31  ;;  %3143 = vrot.lane.b32.xlu1 %v2869_v58, %s15424_s11  ;;  %v1802_v31 = vor.u32 %v1800_v6, %v1798_v48  ;;  %v3373_v58 = vsel %vm3301_vm2, %v15344_v62, %v2571_v27  ;;  %v3020_v57 = vsel %vm2756_vm0, %v3018_v10, %v3019_v28 }
 0x1ae   : > { %v3114_v2 = vpop.permute.xlu0 %3113  ;;  %v4762_v4 = vpop.f32.mrf.mxu1  ;;  %v1810_v10 = vor.u32 %v1808_v13, %v1806_v11 }
 0x1af   : > { %v17210_v34 = vsel %vm3558_vm3, %v3371_v44, %v3114_v2  ;;  %5330 = vst.msk [vmem:[#allocation2 + $0x4c0] sm:$0xff] %vm5177_vm5, %v4762_v4  ;;  %v3116_v38 = vpop.permute.xlu1 %3115  ;;  %v2416_v44 = vshll.u32 %v17202_v60, 16  ;;  %v17231_v2 = vld [vmem:[%s15490_s6 + $0x434] ss:$0 sps:$4 sm:$0x11]  }
 0x1b0   : > { %21016 = vst [vmem:[#allocation45_spill] sm:$0xff] %v17210_v34  ;;  %2732 = vrot.lane.b32.xlu0 %v2403_v18, %s15425_s12  ;;  %v14407_v26 = vpop.f32.mrf.mxu1  ;;  %14320 = vmatprep.mubr.msk.bf16.mxu0 %vm3863_vm4, %v17210_v34  ;;  %v17222_v6 = vsel %vm3558_vm3, %v3373_v58, %v3116_v38  ;;  %v17234_v4 = vld [vmem:[%s15490_s6 + $0x1d4] sm:$0xff]   ;;  %v1807_v58 = vsel %vm1347_vm1, %v1802_v31, %v1806_v11  ;;  %v1814_v38 = vrot.slane %v1812_v16, 1  ;;  %v2870_v31 = vrot.slane %v17171_v55, 1 }
 0x1b1   : > { %21017 = vst [vmem:[#allocation46_spill] sm:$0xff] %v17222_v6  ;;  %5333 = vst.msk [vmem:[#allocation2 + $0x4d8] sm:$0xff] %vm5177_vm5, %v14407_v26  ;;  %2734 = vrot.lane.b32.xlu1 %v2411_v22, %s15425_s12  ;;  %v14274_v27 = vpop.f32.mrf.mxu0  ;;  %14321 = vmatmul.mubr.msk.bf16.gmra.mxu0 %vm3863_vm4, %v17222_v6  ;;  %v15257_v22 = vld [vmem:[%s20809_s1 + $0x38] sm:$0xff]   ;;  %v2412_v11 = vshrl.u32 %v17148_v46, 16  ;;  %v2418_v13 = vrot.slane %v2416_v44, 1  ;;  %v2420_v16 = vshrl.u32 %v17202_v60, 16 }
 0x1b2   : > { %v2705_v18 = vpop.permute.xlu0 %2704  ;;  %5200 = vst.msk [vmem:[#allocation2 + $0xb0] sm:$0xff] %vm5177_vm5, %v14274_v27  ;;  %v4765_v62 = vpop.f32.mrf.mxu1  ;;  %v3022_v27 = vsel %vm2756_vm0, %v3019_v28, %v21018_v23  ;;  %14516 = vmatprep.subr.bf16.mxu1 %v15257_v22  ;;  %v2424_v23 = vshll.u32 %v17231_v2, 16  ;;  %v1819_v28 = vshll.u32 %v17234_v4, 16  ;;  %v2872_v44 = vrot.slane %v17192_v29, 1  ;;  %v15346_v29 = vld [vmem:[%s15490_s6 + $0x39c] sm:$0xff]  }
 0x1b3   : > { %5331 = vst.msk [vmem:[#allocation2 + $0x4c8] sm:$0xff] %vm5177_vm5, %v4765_v62  ;;  %v2707_v26 = vpop.permute.xlu1 %2706  ;;  %v4234_v48 = vpop.f32.mrf.mxu0  ;;  %v15345_v62 = vld [vmem:[%s15490_s6 + $0x394] sm:$0xff]   ;;  %14517 = vmatpush3.bf16.msra.mxu1 %v15257_v22  ;;  %v21020_v22 = vrot.slane %v17105_v59, 1 }
 0x1b4   : > { %3277 = vrot.lane.b32.xlu0 %v3020_v57, %s15424_s11  ;;  %5198 = vst.msk [vmem:[#allocation2 + $0xa0] sm:$0xff] %vm5177_vm5, %v4234_v48  ;;  %v3507_v7 = vsel %vm3301_vm2, %v15345_v62, %v2705_v18  ;;  %v1815_v48 = vsel %vm1347_vm1, %v1810_v10, %v1814_v38  ;;  %v17262_v18 = vld [vmem:[%s15490_s6 + $0x1dc] sm:$0xff]   ;;  %v2422_v10 = vor.u32 %v2420_v16, %v2418_v13  ;;  %v1821_v9 = vrot.slane %v1819_v28, 1 }
 0x1b5   : > { %2600 = vrot.lane.b32.xlu1 %v1807_v58, %s15425_s12  ;;  %v14275_v57 = vpop.f32.mrf.mxu0  ;;  %v3509_v38 = vsel %vm3301_vm2, %v15346_v29, %v2707_v26  ;;  %v2873_v59 = vsel %vm2756_vm0, %v2870_v31, %v2872_v44  ;;  %v3023_v28 = vrot.slane %v17202_v60, 1  ;;  %v15347_v44 = vld [vmem:[%s15490_s6 + $0x144] sm:$0xff]  }
 0x1b6   : > { %v3250_v24 = vpop.permute.xlu0 %3249  ;;  %5201 = vst.msk [vmem:[#allocation2 + $0xb8] sm:$0xff] %vm5177_vm5, %v14275_v57  ;;  %v2426_v57 = vrot.slane %v2424_v23, 1 }
 0x1b7   : > { %v17257_v55 = vsel %vm3558_vm3, %v3507_v7, %v3250_v24  ;;  %v2573_v58 = vpop.permute.xlu1 %2572  ;;  %v4237_v62 = vpop.f32.mrf.mxu0  ;;  %v2871_v24 = vsel %vm2756_vm0, %v21020_v22, %v2870_v31  ;;  %v2414_v7 = vor.u32 %v2412_v11, %v17181_v39  ;;  %v1824_v39 = vshll.u32 %v17262_v18, 16  ;;  %v17282_v11 = vld [vmem:[%s15490_s6 + $0x1e4] sm:$0xff]  }
 0x1b8   : > { %21019 = vst [vmem:[#allocation47_spill] sm:$0xff] %v17257_v55  ;;  %3279 = vrot.lane.b32.xlu0 %v3022_v27, %s15424_s11  ;;  %14456 = vmatprep.mubr.msk.bf16.mxu1 %vm3863_vm4, %v17257_v55  ;;  %5199 = vst.msk [vmem:[#allocation2 + $0xa8] sm:$0xff] %vm5177_vm5, %v4237_v62  ;;  %v1817_v55 = vshrl.u32 %v17234_v4, 16  ;;  %v15258_v31 = vld [vmem:[%s20809_s1 + $0x68] sm:$0xff]   ;;  %v3375_v22 = vsel %vm3301_vm2, %v15347_v44, %v2573_v58 }
 0x1b9   : > { %2602 = vrot.lane.b32.xlu1 %v1815_v48, %s15425_s12  ;;  %v2419_v23 = vsel %vm1347_vm1, %v2414_v7, %v2418_v13  ;;  %v17291_v48 = vld [vmem:[%s15490_s6 + $0x438] sm:$0xff]   ;;  %v17301_v13 = vld [vmem:[%s15490_s6 + $0x440] sm:$0xff]   ;;  %v1826_v7 = vrot.slane %v1824_v39, 1  ;;  %14784 = vmatprep.subr.bf16.mxu0 %v15258_v31  ;;  %v15348_v58 = vld [vmem:[%s15490_s6 + $0x14c] sm:$0xff]  }
 0x1ba   : > { %v3252_v27 = vpop.permute.xlu0 %3251  ;;  %14785 = vmatpush3.bf16.msra.mxu0 %v15258_v31 }
 0x1bb   : > { %v17277_v62 = vsel %vm3558_vm3, %v3509_v38, %v3252_v27  ;;  %v2575_v16 = vpop.permute.xlu1 %2574  ;;  %v2427_v38 = vsel %vm1347_vm1, %v2422_v10, %v2426_v57  ;;  %v1822_v27 = vor.u32 %v1821_v9, %v1817_v55  ;;  %v3025_v55 = vrot.slane %v17231_v2, 1 }
 0x1bc   : > { %21021 = vst [vmem:[#allocation48_spill] sm:$0xff] %v17277_v62  ;;  %3145 = vrot.lane.b32.xlu0 %v2871_v24, %s15424_s11  ;;  %v14410_v26 = vpop.f32.mrf.mxu1  ;;  %14457 = vmatmul.mubr.msk.bf16.gmra.mxu1 %vm3863_vm4, %v17277_v62  ;;  %v1832_v62 = vshll.u32 %v17282_v11, 16  ;;  %v21024_v57 = vrot.slane %v17148_v46, 1  ;;  %v2436_v2 = vshll.u32 %v17301_v13, 16 }
 0x1bd   : > { %5336 = vst.msk [vmem:[#allocation2 + $0x4f0] sm:$0xff] %vm5177_vm5, %v14410_v26  ;;  %3147 = vrot.lane.b32.xlu1 %v2873_v59, %s15424_s11  ;;  %v1828_v26 = vshrl.u32 %v17262_v18, 16  ;;  %v3377_v59 = vsel %vm3301_vm2, %v15348_v58, %v2575_v16  ;;  %v2431_v16 = vshll.u32 %v17291_v48, 16 }
 0x1be   : > { %v3118_v24 = vpop.permute.xlu0 %3117  ;;  %v4778_v29 = vpop.f32.mrf.mxu1  ;;  %v3024_v39 = vsel %vm2756_vm0, %v21024_v57, %v3023_v28  ;;  %v2875_v57 = vrot.slane %v17262_v18, 1 }
 0x1bf   : > { %v17304_v60 = vsel %vm3558_vm3, %v3375_v22, %v3118_v24  ;;  %5334 = vst.msk [vmem:[#allocation2 + $0x4e0] sm:$0xff] %vm5177_vm5, %v4778_v29  ;;  %v3120_v44 = vpop.permute.xlu1 %3119  ;;  %v17328_v24 = vld [vmem:[%s15490_s6 + $0x448] sm:$0xff]   ;;  %v1827_v29 = vsel %vm1347_vm1, %v1822_v27, %v1826_v7  ;;  %v1830_v58 = vor.u32 %v1828_v26, %v1826_v7  ;;  %v2433_v27 = vrot.slane %v2431_v16, 1 }
 0x1c0   : > { %21022 = vst [vmem:[#allocation49_spill] sm:$0xff] %v17304_v60  ;;  %2736 = vrot.lane.b32.xlu0 %v2419_v23, %s15425_s12  ;;  %v14411_v9 = vpop.f32.mrf.mxu1  ;;  %14324 = vmatprep.mubr.msk.bf16.mxu0 %vm3863_vm4, %v17304_v60  ;;  %v17316_v10 = vsel %vm3558_vm3, %v3377_v59, %v3120_v44  ;;  %v1834_v59 = vrot.slane %v1832_v62, 1  ;;  %v3026_v44 = vsel %vm2756_vm0, %v3023_v28, %v3025_v55  ;;  %v15349_v7 = vld [vmem:[%s15490_s6 + $0x3a8] sm:$0xff]   ;;  %v2440_v28 = vshrl.u32 %v17301_v13, 16 }
 0x1c1   : > { %21023 = vst [vmem:[#allocation50_spill] sm:$0xff] %v17316_v10  ;;  %5337 = vst.msk [vmem:[#allocation2 + $0x4f8] sm:$0xff] %vm5177_vm5, %v14411_v9  ;;  %2738 = vrot.lane.b32.xlu1 %v2427_v38, %s15425_s12  ;;  %v14278_v23 = vpop.f32.mrf.mxu0  ;;  %14325 = vmatmul.mubr.msk.bf16.gmra.mxu0 %vm3863_vm4, %v17316_v10  ;;  %v2874_v9 = vrot.slane %v17234_v4, 1  ;;  %v2444_v55 = vshll.u32 %v17328_v24, 16  ;;  %v2448_v30 = vshrl.u32 %v17328_v24, 16 }
 0x1c2   : > { %v2709_v22 = vpop.permute.xlu0 %2708  ;;  %5204 = vst.msk [vmem:[#allocation2 + $0xd0] sm:$0xff] %vm5177_vm5, %v14278_v23  ;;  %v4781_v46 = vpop.f32.mrf.mxu1  ;;  %v2429_v23 = vshrl.u32 %v17291_v48, 16  ;;  %v1835_v18 = vsel %vm1347_vm1, %v1830_v58, %v1834_v59 }
 0x1c3   : > { %5335 = vst.msk [vmem:[#allocation2 + $0x4e8] sm:$0xff] %vm5177_vm5, %v4781_v46  ;;  %v2711_v31 = vpop.permute.xlu1 %2710  ;;  %v4250_v38 = vpop.f32.mrf.mxu0  ;;  %v3511_v62 = vsel %vm3301_vm2, %v15349_v7, %v2709_v22  ;;  %v17351_v22 = vld [vmem:[%s15490_s6 + $0x1ec] sm:$0xff]   ;;  %v17361_v16 = vrot.slane %v2444_v55, 1 }
 0x1c4   : > { %3281 = vrot.lane.b32.xlu0 %v3024_v39, %s15424_s11  ;;  %5202 = vst.msk [vmem:[#allocation2 + $0xc0] sm:$0xff] %vm5177_vm5, %v4250_v38  ;;  %v2438_v39 = vrot.slane %v2436_v2, 1  ;;  %v2876_v2 = vsel %vm2756_vm0, %v2874_v9, %v2875_v57  ;;  %v2434_v7 = vor.u32 %v2433_v27, %v2429_v23  ;;  %v1840_v23 = vshll.u32 %v17351_v22, 16 }
 0x1c5   : > { %2604 = vrot.lane.b32.xlu1 %v1827_v29, %s15425_s12  ;;  %v14279_v26 = vpop.f32.mrf.mxu0 }
 0x1c6   : > { %v3254_v46 = vpop.permute.xlu0 %3253  ;;  %5205 = vst.msk [vmem:[#allocation2 + $0xd8] sm:$0xff] %vm5177_vm5, %v14279_v26  ;;  %v2439_v55 = vsel %vm1347_vm1, %v2434_v7, %v2438_v39 }
 0x1c7   : > { %v17346_v4 = vsel %vm3558_vm3, %v3511_v62, %v3254_v46  ;;  %v2577_v29 = vpop.permute.xlu1 %2576  ;;  %v4253_v38 = vpop.f32.mrf.mxu0  ;;  %v15350_v62 = vld [vmem:[%s15490_s6 + $0x3b0] sm:$0xff]   ;;  %v2442_v46 = vor.u32 %v2440_v28, %v2438_v39 }
 0x1c8   : > { %21025 = vst [vmem:[#allocation51_spill] sm:$0xff] %v17346_v4  ;;  %3283 = vrot.lane.b32.xlu0 %v3026_v44, %s15424_s11  ;;  %14460 = vmatprep.mubr.msk.bf16.mxu1 %vm3863_vm4, %v17346_v4  ;;  %5203 = vst.msk [vmem:[#allocation2 + $0xc8] sm:$0xff] %vm5177_vm5, %v4253_v38  ;;  %v3513_v58 = vsel %vm3301_vm2, %v15350_v62, %v2711_v31  ;;  %v1836_v44 = vshrl.u32 %v17282_v11, 16  ;;  %v21027_v38 = vrot.slane %v17282_v11, 1  ;;  %v17382_v62 = vld [vmem:[%s15490_s6 + $0x450] sm:$0xff]  }
 0x1c9   : > { %2606 = vrot.lane.b32.xlu1 %v1835_v18, %s15425_s12  ;;  %v17372_v31 = vld [vmem:[%s15490_s6 + $0x1f4] ss:$0 sps:$4 sm:$0x11]   ;;  %v3027_v18 = vrot.slane %v17291_v48, 1  ;;  %v1842_v48 = vrot.slane %v1840_v23, 1 }
 0x1ca   : > { %v3256_v26 = vpop.permute.xlu0 %3255  ;;  %v2878_v9 = vsel %vm2756_vm0, %v2875_v57, %v21027_v38  ;;  %v3028_v57 = vrot.slane %v17301_v13, 1  ;;  %v1844_v13 = vshrl.u32 %v17351_v22, 16  ;;  %v1848_v7 = vshll.u32 %v17372_v31, 16 }
 0x1cb   : > { %v17365_v4 = vsel %vm3558_vm3, %v3513_v58, %v3256_v26  ;;  %v2579_v27 = vpop.permute.xlu1 %2578  ;;  %v15351_v58 = vld [vmem:[%s15490_s6 + $0x154] sm:$0xff]   ;;  %v2881_v17 = vrot.slane %v17372_v31, 1  ;;  %v15354_v31 = vld [vmem:[%s15490_s6 + $0x3c0] sm:$0xff]  }
 0x1cc   : > { %21026 = vst [vmem:[#allocation52_spill] sm:$0xff] %v17365_v4  ;;  %3149 = vrot.lane.b32.xlu0 %v2876_v2, %s15424_s11  ;;  %v14414_v28 = vpop.f32.mrf.mxu1  ;;  %14461 = vmatmul.mubr.msk.bf16.gmra.mxu1 %vm3863_vm4, %v17365_v4  ;;  %v3379_v26 = vsel %vm3301_vm2, %v15351_v58, %v2577_v29  ;;  %v2447_v4 = vsel %vm1347_vm1, %v2442_v46, %v17361_v16  ;;  %v15352_v29 = vld [vmem:[%s15490_s6 + $0x15c] sm:$0xff]  }
 0x1cd   : > { %5340 = vst.msk [vmem:[#allocation2 + $0x510] sm:$0xff] %vm5177_vm5, %v14414_v28  ;;  %3151 = vrot.lane.b32.xlu1 %v2878_v9, %s15424_s11  ;;  %v1838_v28 = vor.u32 %v1836_v44, %v1834_v59  ;;  %v3381_v9 = vsel %vm3301_vm2, %v15352_v29, %v2579_v27  ;;  %v20900_v59 = vrot.slane %v17328_v24, 1  ;;  %v3029_v23 = vsel %vm2756_vm0, %v3027_v18, %v3028_v57 }
 0x1ce   : > { %v3122_v2 = vpop.permute.xlu0 %3121  ;;  %v4794_v38 = vpop.f32.mrf.mxu1  ;;  %v1846_v18 = vor.u32 %v1844_v13, %v1842_v48  ;;  %v15353_v13 = vld [vmem:[%s15490_s6 + $0x3b8] sm:$0xff]  }
 0x1cf   : > { %v17390_v39 = vsel %vm3558_vm3, %v3379_v26, %v3122_v2  ;;  %5338 = vst.msk [vmem:[#allocation2 + $0x500] sm:$0xff] %vm5177_vm5, %v4794_v38  ;;  %v3124_v58 = vpop.permute.xlu1 %3123  ;;  %v2452_v26 = vshll.u32 %v17382_v62, 16  ;;  %v17411_v2 = vld [vmem:[%s15490_s6 + $0x458] ss:$0 sps:$4 sm:$0x11]   ;;  %v3031_v50 = vsel %vm2756_vm0, %v3028_v57, %v20900_v59 }
 0x1d0   : > { %21028 = vst [vmem:[#allocation53_spill] sm:$0xff] %v17390_v39  ;;  %2740 = vrot.lane.b32.xlu0 %v2439_v55, %s15425_s12  ;;  %v14415_v46 = vpop.f32.mrf.mxu1  ;;  %14328 = vmatprep.mubr.msk.bf16.mxu0 %vm3863_vm4, %v17390_v39  ;;  %v17402_v44 = vsel %vm3558_vm3, %v3381_v9, %v3124_v58  ;;  %v17414_v38 = vld [vmem:[%s15490_s6 + $0x1f8] sm:$0xff]   ;;  %v1843_v9 = vsel %vm1347_vm1, %v1838_v28, %v1842_v48  ;;  %v1850_v58 = vrot.slane %v1848_v7, 1  ;;  %v2456_v48 = vshrl.u32 %v17382_v62, 16 }
 0x1d1   : > { %21029 = vst [vmem:[#allocation54_spill] sm:$0xff] %v17402_v44  ;;  %5341 = vst.msk [vmem:[#allocation2 + $0x518] sm:$0xff] %vm5177_vm5, %v14415_v46  ;;  %2742 = vrot.lane.b32.xlu1 %v2447_v4, %s15425_s12  ;;  %v14282_v27 = vpop.f32.mrf.mxu0  ;;  %14329 = vmatmul.mubr.msk.bf16.gmra.mxu0 %vm3863_vm4, %v17402_v44  ;;  %v2454_v28 = vrot.slane %v2452_v26, 1  ;;  %v2460_v57 = vshll.u32 %v17411_v2, 16 }
 0x1d2   : > { %v2713_v55 = vpop.permute.xlu0 %2712  ;;  %5208 = vst.msk [vmem:[#allocation2 + $0xf0] sm:$0xff] %vm5177_vm5, %v14282_v27  ;;  %v4797_v29 = vpop.f32.mrf.mxu1  ;;  %v2879_v27 = vrot.slane %v17351_v22, 1  ;;  %v1851_v26 = vsel %vm1347_vm1, %v1846_v18, %v1850_v58  ;;  %v2450_v18 = vor.u32 %v2448_v30, %v17361_v16  ;;  %v1860_v30 = vshll.u32 %v17439_v0, 16  ;;  %v17459_v16 = vld [vmem:[%s15490_s6 + $0x208] sm:$0xff]  }
 0x1d3   : > { %5339 = vst.msk [vmem:[#allocation2 + $0x508] sm:$0xff] %vm5177_vm5, %v4797_v29  ;;  %v2715_v4 = vpop.permute.xlu1 %2714  ;;  %v4266_v46 = vpop.f32.mrf.mxu0  ;;  %v3515_v7 = vsel %vm3301_vm2, %v15353_v13, %v2713_v55  ;;  %v21031_v13 = vrot.slane %v17282_v11, 1  ;;  %v2458_v58 = vor.u32 %v2456_v48, %v2454_v28  ;;  %v1868_v39 = vshll.u32 %v17459_v16, 16 }
 0x1d4   : > { %3285 = vrot.lane.b32.xlu0 %v3029_v23, %s15424_s11  ;;  %5206 = vst.msk [vmem:[#allocation2 + $0xe0] sm:$0xff] %vm5177_vm5, %v4266_v46  ;;  %v1855_v46 = vshll.u32 %v17414_v38, 16  ;;  %v2882_v11 = vsel %vm2756_vm0, %v2879_v27, %v2881_v17  ;;  %v15259_v17 = vld [vmem:[%s20809_s1 + $0x30] sm:$0xff]  }
 0x1d5   : > { %2608 = vrot.lane.b32.xlu1 %v1843_v9, %s15425_s12  ;;  %v14283_v23 = vpop.f32.mrf.mxu0  ;;  %14518 = vmatprep.subr.bf16.mxu1 %v15259_v17 }
 0x1d6   : > { %v3258_v29 = vpop.permute.xlu0 %3257  ;;  %5209 = vst.msk [vmem:[#allocation2 + $0xf8] sm:$0xff] %vm5177_vm5, %v14283_v23  ;;  %v3517_v23 = vsel %vm3301_vm2, %v15354_v31, %v2715_v4  ;;  %v1857_v44 = vrot.slane %v1855_v46, 1  ;;  %v3032_v46 = vrot.slane %v17382_v62, 1  ;;  %14519 = vmatpush3.bf16.msra.mxu1 %v15259_v17 }
 0x1d7   : > { %v17434_v59 = vsel %vm3558_vm3, %v3515_v7, %v3258_v29  ;;  %v2581_v55 = vpop.permute.xlu1 %2580  ;;  %v4269_v9 = vpop.f32.mrf.mxu0  ;;  %v2880_v7 = vsel %vm2756_vm0, %v21031_v13, %v2879_v27  ;;  %v2462_v29 = vrot.slane %v2460_v57, 1  ;;  %v2455_v57 = vsel %vm1347_vm1, %v2450_v18, %v2454_v28  ;;  %v15355_v27 = vld [vmem:[%s15490_s6 + $0x168] sm:$0xff]  }
 0x1d8   : > { %21030 = vst [vmem:[#allocation55_spill] sm:$0xff] %v17434_v59  ;;  %3287 = vrot.lane.b32.xlu0 %v3031_v50, %s15424_s11  ;;  %14464 = vmatprep.mubr.msk.bf16.mxu1 %vm3863_vm4, %v17434_v59  ;;  %5207 = vst.msk [vmem:[#allocation2 + $0xe8] sm:$0xff] %vm5177_vm5, %v4269_v9  ;;  %v1853_v59 = vshrl.u32 %v17414_v38, 16  ;;  %v3383_v13 = vsel %vm3301_vm2, %v15355_v27, %v2581_v55  ;;  %v17478_v28 = vld [vmem:[%s15490_s6 + $0x464] sm:$0xff]   ;;  %v15356_v55 = vld [vmem:[%s15490_s6 + $0x170] sm:$0xff]  }
 0x1d9   : > { %2610 = vrot.lane.b32.xlu1 %v1851_v26, %s15425_s12  ;;  %v17468_v26 = vld [vmem:[%s15490_s6 + $0x45c] sm:$0xff]  }
 0x1da   : > { %v3260_v50 = vpop.permute.xlu0 %3259 }
 0x1db   : > { %v17454_v9 = vsel %vm3558_vm3, %v3517_v23, %v3260_v50  ;;  %v2583_v48 = vpop.permute.xlu1 %2582  ;;  %v2463_v23 = vsel %vm1347_vm1, %v2458_v58, %v2462_v29  ;;  %v1858_v50 = vor.u32 %v1857_v44, %v1853_v59  ;;  %v3034_v44 = vrot.slane %v17411_v2, 1 }
 0x1dc   : > { %21032 = vst [vmem:[#allocation56_spill] sm:$0xff] %v17454_v9  ;;  %3153 = vrot.lane.b32.xlu0 %v2880_v7, %s15424_s11  ;;  %v14418_v4 = vpop.f32.mrf.mxu1  ;;  %14465 = vmatmul.mubr.msk.bf16.gmra.mxu1 %vm3863_vm4, %v17454_v9  ;;  %v1864_v9 = vshrl.u32 %v17439_v0, 16  ;;  %v21035_v29 = vrot.slane %v17328_v24, 1  ;;  %v2472_v2 = vshll.u32 %v17478_v28, 16 }
 0x1dd   : > { %5344 = vst.msk [vmem:[#allocation2 + $0x530] sm:$0xff] %vm5177_vm5, %v14418_v4  ;;  %3155 = vrot.lane.b32.xlu1 %v2882_v11, %s15424_s11  ;;  %v1862_v4 = vrot.slane %v1860_v30, 1  ;;  %v3385_v11 = vsel %vm3301_vm2, %v15356_v55, %v2583_v48  ;;  %v2467_v48 = vshll.u32 %v17468_v26, 16 }
 0x1de   : > { %v3126_v7 = vpop.permute.xlu0 %3125  ;;  %v4810_v31 = vpop.f32.mrf.mxu1  ;;  %v3033_v30 = vsel %vm2756_vm0, %v21035_v29, %v3032_v46  ;;  %v2884_v29 = vrot.slane %v17439_v0, 1 }
 0x1df   : > { %v17481_v18 = vsel %vm3558_vm3, %v3383_v13, %v3126_v7  ;;  %5342 = vst.msk [vmem:[#allocation2 + $0x520] sm:$0xff] %vm5177_vm5, %v4810_v31  ;;  %v3128_v27 = vpop.permute.xlu1 %3127  ;;  %v17505_v7 = vld [vmem:[%s15490_s6 + $0x46c] sm:$0xff]   ;;  %v1863_v31 = vsel %vm1347_vm1, %v1858_v50, %v1862_v4  ;;  %v1866_v55 = vor.u32 %v1864_v9, %v1862_v4  ;;  %v2469_v50 = vrot.slane %v2467_v48, 1 }
 0x1e0   : > { %21033 = vst [vmem:[#allocation57_spill] sm:$0xff] %v17481_v18  ;;  %2744 = vrot.lane.b32.xlu0 %v2455_v57, %s15425_s12  ;;  %v14419_v59 = vpop.f32.mrf.mxu1  ;;  %14332 = vmatprep.mubr.msk.bf16.mxu0 %vm3863_vm4, %v17481_v18  ;;  %v17493_v58 = vsel %vm3558_vm3, %v3385_v11, %v3128_v27  ;;  %v1870_v11 = vrot.slane %v1868_v39, 1  ;;  %v3035_v27 = vsel %vm2756_vm0, %v3032_v46, %v3034_v44  ;;  %v15357_v9 = vld [vmem:[%s15490_s6 + $0x3cc] sm:$0xff]   ;;  %v2476_v46 = vshrl.u32 %v17478_v28, 16 }
 0x1e1   : > { %21034 = vst [vmem:[#allocation58_spill] sm:$0xff] %v17493_v58  ;;  %5345 = vst.msk [vmem:[#allocation2 + $0x538] sm:$0xff] %vm5177_vm5, %v14419_v59  ;;  %2746 = vrot.lane.b32.xlu1 %v2463_v23, %s15425_s12  ;;  %v14286_v57 = vpop.f32.mrf.mxu0  ;;  %14333 = vmatmul.mubr.msk.bf16.gmra.mxu0 %vm3863_vm4, %v17493_v58  ;;  %v2883_v59 = vrot.slane %v17414_v38, 1  ;;  %v2480_v44 = vshll.u32 %v17505_v7, 16 }
 0x1e2   : > { %v2717_v13 = vpop.permute.xlu0 %2716  ;;  %5212 = vst.msk [vmem:[#allocation2 + $0x110] sm:$0xff] %vm5177_vm5, %v14286_v57  ;;  %v4813_v24 = vpop.f32.mrf.mxu1  ;;  %v2465_v57 = vshrl.u32 %v17468_v26, 16  ;;  %v1871_v48 = vsel %vm1347_vm1, %v1866_v55, %v1870_v11 }
 0x1e3   : > { %5343 = vst.msk [vmem:[#allocation2 + $0x528] sm:$0xff] %vm5177_vm5, %v4813_v24  ;;  %v2719_v17 = vpop.permute.xlu1 %2718  ;;  %v4282_v23 = vpop.f32.mrf.mxu0  ;;  %v3519_v39 = vsel %vm3301_vm2, %v15357_v9, %v2717_v13  ;;  %v17528_v13 = vld [vmem:[%s15490_s6 + $0x210] sm:$0xff]   ;;  %v2885_v55 = vsel %vm2756_vm0, %v2883_v59, %v2884_v29  ;;  %v17541_v10 = vrot.slane %v2480_v44, 1  ;;  %v21038_v59 = vrot.slane %v17459_v16, 1 }
 0x1e4   : > { %3289 = vrot.lane.b32.xlu0 %v3033_v30, %s15424_s11  ;;  %5210 = vst.msk [vmem:[#allocation2 + $0x100] sm:$0xff] %vm5177_vm5, %v4282_v23  ;;  %v2474_v30 = vrot.slane %v2472_v2, 1  ;;  %v15260_v2 = vld [vmem:[%s20809_s1 + $0x60] sm:$0xff]   ;;  %v3036_v44 = vrot.slane %v17468_v26, 1 }
 0x1e5   : > { %2612 = vrot.lane.b32.xlu1 %v1863_v31, %s15425_s12  ;;  %v14287_v4 = vpop.f32.mrf.mxu0  ;;  %14786 = vmatprep.subr.bf16.mxu0 %v15260_v2 }
 0x1e6   : > { %v3262_v24 = vpop.permute.xlu0 %3261  ;;  %5213 = vst.msk [vmem:[#allocation2 + $0x118] sm:$0xff] %vm5177_vm5, %v14287_v4  ;;  %v15358_v4 = vld [vmem:[%s15490_s6 + $0x3d4] sm:$0xff]   ;;  %v2478_v18 = vor.u32 %v2476_v46, %v2474_v30  ;;  %14787 = vmatpush3.bf16.msra.mxu0 %v15260_v2 }
 0x1e7   : > { %v17523_v23 = vsel %vm3558_vm3, %v3519_v39, %v3262_v24  ;;  %v2585_v31 = vpop.permute.xlu1 %2584  ;;  %v4285_v9 = vpop.f32.mrf.mxu0  ;;  %v2470_v39 = vor.u32 %v2469_v50, %v2465_v57  ;;  %v3521_v24 = vsel %vm3301_vm2, %v15358_v4, %v2719_v17  ;;  %v2887_v57 = vsel %vm2756_vm0, %v2884_v29, %v21038_v59  ;;  %v17552_v17 = vld [vmem:[%s15490_s6 + $0x218] ss:$0 sps:$4 sm:$0x11]  }
 0x1e8   : > { %21036 = vst [vmem:[#allocation59_spill] sm:$0xff] %v17523_v23  ;;  %3291 = vrot.lane.b32.xlu0 %v3035_v27, %s15424_s11  ;;  %14468 = vmatprep.mubr.msk.bf16.mxu1 %vm3863_vm4, %v17523_v23  ;;  %5211 = vst.msk [vmem:[#allocation2 + $0x108] sm:$0xff] %vm5177_vm5, %v4285_v9  ;;  %v1872_v27 = vshrl.u32 %v17459_v16, 16  ;;  %v1876_v50 = vshll.u32 %v17528_v13, 16  ;;  %v3037_v29 = vrot.slane %v17478_v28, 1  ;;  %v15359_v2 = vld [vmem:[%s15490_s6 + $0x178] sm:$0xff]  }
 0x1e9   : > { %2614 = vrot.lane.b32.xlu1 %v1871_v48, %s15425_s12  ;;  %v3387_v9 = vsel %vm3301_vm2, %v15359_v2, %v2585_v31  ;;  %v1884_v31 = vshll.u32 %v17552_v17, 16 }
 0x1ea   : > { %v3264_v58 = vpop.permute.xlu0 %3263  ;;  %v1874_v59 = vor.u32 %v1872_v27, %v1870_v11  ;;  %v3038_v27 = vsel %vm2756_vm0, %v3036_v44, %v3037_v29 }
 0x1eb   : > { %v17545_v23 = vsel %vm3558_vm3, %v3521_v24, %v3264_v58  ;;  %v2587_v48 = vpop.permute.xlu1 %2586  ;;  %v2475_v58 = vsel %vm1347_vm1, %v2470_v39, %v2474_v30  ;;  %v2483_v24 = vsel %vm1347_vm1, %v2478_v18, %v17541_v10  ;;  %v1878_v39 = vrot.slane %v1876_v50, 1 }
 0x1ec   : > { %21037 = vst [vmem:[#allocation60_spill] sm:$0xff] %v17545_v23  ;;  %3157 = vrot.lane.b32.xlu0 %v2885_v55, %s15424_s11  ;;  %v14422_v46 = vpop.f32.mrf.mxu1  ;;  %14469 = vmatmul.mubr.msk.bf16.gmra.mxu1 %vm3863_vm4, %v17545_v23  ;;  %v17567_v23 = vld [vmem:[%s15490_s6 + $0x474] sm:$0xff]   ;;  %v20931_v50 = vrot.slane %v17505_v7, 1 }
 0x1ed   : > { %5348 = vst.msk [vmem:[#allocation2 + $0x550] sm:$0xff] %vm5177_vm5, %v14422_v46  ;;  %3159 = vrot.lane.b32.xlu1 %v2887_v57, %s15424_s11  ;;  %v1880_v46 = vshrl.u32 %v17528_v13, 16  ;;  %v15360_v57 = vld [vmem:[%s15490_s6 + $0x180] sm:$0xff]  }
 0x1ee   : > { %v3130_v4 = vpop.permute.xlu0 %3129  ;;  %v4826_v55 = vpop.f32.mrf.mxu1  ;;  %v3389_v2 = vsel %vm3301_vm2, %v15360_v57, %v2587_v48  ;;  %v1886_v57 = vrot.slane %v1884_v31, 1 }
 0x1ef   : > { %v17570_v30 = vsel %vm3558_vm3, %v3387_v9, %v3130_v4  ;;  %5346 = vst.msk [vmem:[#allocation2 + $0x540] sm:$0xff] %vm5177_vm5, %v4826_v55  ;;  %v3132_v60 = vpop.permute.xlu1 %3131  ;;  %v2488_v9 = vshll.u32 %v17567_v23, 16  ;;  %v17591_v4 = vld [vmem:[%s15490_s6 + $0x47c] ss:$0 sps:$4 sm:$0x11]   ;;  %v1879_v55 = vsel %vm1347_vm1, %v1874_v59, %v1878_v39  ;;  %v1882_v44 = vor.u32 %v1880_v46, %v1878_v39 }
 0x1f0   : > { %21039 = vst [vmem:[#allocation61_spill] sm:$0xff] %v17570_v30  ;;  %2748 = vrot.lane.b32.xlu0 %v2475_v58, %s15425_s12  ;;  %v14423_v18 = vpop.f32.mrf.mxu1  ;;  %14336 = vmatprep.mubr.msk.bf16.mxu0 %vm3863_vm4, %v17570_v30  ;;  %v17581_v11 = vsel %vm3558_vm3, %v3389_v2, %v3132_v60  ;;  %v17596_v2 = vld [vmem:[%s15490_s6 + $0x21c] sm:$0xff]   ;;  %v2890_v59 = vrot.slane %v17552_v17, 1  ;;  %v2484_v39 = vshrl.u32 %v17505_v7, 16  ;;  %v2492_v30 = vshrl.u32 %v17567_v23, 16 }
 0x1f1   : > { %21040 = vst [vmem:[#allocation62_spill] sm:$0xff] %v17581_v11  ;;  %5349 = vst.msk [vmem:[#allocation2 + $0x558] sm:$0xff] %vm5177_vm5, %v14423_v18  ;;  %2750 = vrot.lane.b32.xlu1 %v2483_v24, %s15425_s12  ;;  %v14290_v48 = vpop.f32.mrf.mxu0  ;;  %14337 = vmatmul.mubr.msk.bf16.gmra.mxu0 %vm3863_vm4, %v17581_v11  ;;  %v2888_v11 = vrot.slane %v17528_v13, 1  ;;  %v15361_v46 = vld [vmem:[%s15490_s6 + $0x3dc] sm:$0xff]   ;;  %v2496_v6 = vshll.u32 %v17591_v4, 16  ;;  %v1887_v17 = vsel %vm1347_vm1, %v1882_v44, %v1886_v57  ;;  %v15362_v57 = vld [vmem:[%s15490_s6 + $0x3e4] sm:$0xff]  }
 0x1f2   : > { %v2721_v58 = vpop.permute.xlu0 %2720  ;;  %5216 = vst.msk [vmem:[#allocation2 + $0x130] sm:$0xff] %vm5177_vm5, %v14290_v48  ;;  %v4829_v60 = vpop.f32.mrf.mxu1  ;;  %v3040_v48 = vsel %vm2756_vm0, %v3037_v29, %v20931_v50  ;;  %v17618_v50 = vld [vmem:[%s15490_s6 + $0x224] sm:$0xff]   ;;  %v2486_v44 = vor.u32 %v2484_v39, %v17541_v10 }
 0x1f3   : > { %5347 = vst.msk [vmem:[#allocation2 + $0x548] sm:$0xff] %vm5177_vm5, %v4829_v60  ;;  %v2723_v24 = vpop.permute.xlu1 %2722  ;;  %v4298_v18 = vpop.f32.mrf.mxu0  ;;  %v3523_v31 = vsel %vm3301_vm2, %v15361_v46, %v2721_v58  ;;  %v1891_v58 = vshll.u32 %v17596_v2, 16  ;;  %v2498_v37 = vrot.slane %v2496_v6, 1  ;;  %v1896_v10 = vshll.u32 %v17618_v50, 16 }
 0x1f4   : > { %3293 = vrot.lane.b32.xlu0 %v3038_v27, %s15424_s11  ;;  %5214 = vst.msk [vmem:[#allocation2 + $0x120] sm:$0xff] %vm5177_vm5, %v4298_v18  ;;  %v2490_v18 = vrot.slane %v2488_v9, 1  ;;  %v21042_v9 = vrot.slane %v17459_v16, 1 }
 0x1f5   : > { %2616 = vrot.lane.b32.xlu1 %v1879_v55, %s15425_s12  ;;  %v14291_v60 = vpop.f32.mrf.mxu0  ;;  %v1893_v54 = vrot.slane %v1891_v58, 1 }
 0x1f6   : > { %v3266_v27 = vpop.permute.xlu0 %3265  ;;  %5217 = vst.msk [vmem:[#allocation2 + $0x138] sm:$0xff] %vm5177_vm5, %v14291_v60  ;;  %v3525_v60 = vsel %vm3301_vm2, %v15362_v57, %v2723_v24  ;;  %v2494_v34 = vor.u32 %v2492_v30, %v2490_v18  ;;  %v2491_v6 = vsel %vm1347_vm1, %v2486_v44, %v2490_v18  ;;  %v3041_v30 = vrot.slane %v17567_v23, 1 }
 0x1f7   : > { %v17614_v29 = vsel %vm3558_vm3, %v3523_v31, %v3266_v27  ;;  %v2589_v55 = vpop.permute.xlu1 %2588  ;;  %v4301_v46 = vpop.f32.mrf.mxu0  ;;  %v2889_v31 = vsel %vm2756_vm0, %v21042_v9, %v2888_v11  ;;  %v1889_v9 = vshrl.u32 %v17596_v2, 16 }
 0x1f8   : > { %21041 = vst [vmem:[#allocation63_spill] sm:$0xff] %v17614_v29  ;;  %3295 = vrot.lane.b32.xlu0 %v3040_v48, %s15424_s11  ;;  %14472 = vmatprep.mubr.msk.bf16.mxu1 %vm3863_vm4, %v17614_v29  ;;  %5215 = vst.msk [vmem:[#allocation2 + $0x128] sm:$0xff] %vm5177_vm5, %v4301_v46  ;;  %v2891_v48 = vsel %vm2756_vm0, %v2888_v11, %v2890_v59  ;;  %v17634_v29 = vld [vmem:[%s15490_s6 + $0x22c] sm:$0xff]   ;;  %v2499_v18 = vsel %vm1347_vm1, %v2494_v34, %v2498_v37  ;;  %v3043_v34 = vrot.slane %v17591_v4, 1 }
 0x1f9   : > { %2618 = vrot.lane.b32.xlu1 %v1887_v17, %s15425_s12  ;;  %v15363_v11 = vld [vmem:[%s15490_s6 + $0x18c] sm:$0xff]   ;;  %v1904_v57 = vshll.u32 %v17634_v29, 16  ;;  %v1894_v44 = vor.u32 %v1893_v54, %v1889_v9  ;;  %v21046_v54 = vrot.slane %v17505_v7, 1 }
 0x1fa   : > { %v3268_v27 = vpop.permute.xlu0 %3267  ;;  %v3391_v59 = vsel %vm3301_vm2, %v15363_v11, %v2589_v55  ;;  %v15364_v55 = vld [vmem:[%s15490_s6 + $0x194] sm:$0xff]  }
 0x1fb   : > { %v17637_v46 = vsel %vm3558_vm3, %v3525_v60, %v3268_v27  ;;  %v2591_v39 = vpop.permute.xlu1 %2590  ;;  %v1898_v27 = vrot.slane %v1896_v10, 1  ;;  %v3042_v37 = vsel %vm2756_vm0, %v21046_v54, %v3041_v30 }
 0x1fc   : > { %21043 = vst [vmem:[#allocation64_spill] sm:$0xff] %v17637_v46  ;;  %3161 = vrot.lane.b32.xlu0 %v2889_v31, %s15424_s11  ;;  %v14426_v24 = vpop.f32.mrf.mxu1  ;;  %14473 = vmatmul.mubr.msk.bf16.gmra.mxu1 %vm3863_vm4, %v17637_v46  ;;  %v1900_v31 = vshrl.u32 %v17618_v50, 16 }
 0x1fd   : > { %5352 = vst.msk [vmem:[#allocation2 + $0x570] sm:$0xff] %vm5177_vm5, %v14426_v24  ;;  %3163 = vrot.lane.b32.xlu1 %v2891_v48, %s15424_s11  ;;  %v17658_v24 = vld [vmem:[%s15490_s6 + $0x234] sm:$0xff]   ;;  %v3393_v48 = vsel %vm3301_vm2, %v15364_v55, %v2591_v39  ;;  %v17680_v55 = vld [vmem:[%s15490_s6 + $0x23c] ss:$0 sps:$4 sm:$0x11]  }
 0x1fe   : > { %v3134_v17 = vpop.permute.xlu0 %3133  ;;  %v4842_v58 = vpop.f32.mrf.mxu1  ;;  %v1902_v39 = vor.u32 %v1900_v31, %v1898_v27  ;;  %v3044_v31 = vsel %vm2756_vm0, %v3041_v30, %v3043_v34 }
 0x1ff   : > { %v17653_v60 = vsel %vm3558_vm3, %v3391_v59, %v3134_v17  ;;  %5350 = vst.msk [vmem:[#allocation2 + $0x560] sm:$0xff] %vm5177_vm5, %v4842_v58  ;;  %v3136_v11 = vpop.permute.xlu1 %3135  ;;  %v1912_v58 = vshll.u32 %v17658_v24, 16 }
 0x200   : > { %21044 = vst [vmem:[#allocation65_spill] sm:$0xff] %v17653_v60  ;;  %2752 = vrot.lane.b32.xlu0 %v2491_v6, %s15425_s12  ;;  %v14427_v46 = vpop.f32.mrf.mxu1  ;;  %14340 = vmatprep.mubr.msk.bf16.mxu0 %vm3863_vm4, %v17653_v60  ;;  %v17666_v59 = vsel %vm3558_vm3, %v3393_v48, %v3136_v11  ;;  %v1906_v6 = vrot.slane %v1904_v57, 1  ;;  %v2892_v57 = vrot.slane %v17596_v2, 1  ;;  %v2893_v48 = vrot.slane %v17618_v50, 1 }
 0x201   : > { %21045 = vst [vmem:[#allocation66_spill] sm:$0xff] %v17666_v59  ;;  %5353 = vst.msk [vmem:[#allocation2 + $0x578] sm:$0xff] %vm5177_vm5, %v14427_v46  ;;  %2754 = vrot.lane.b32.xlu1 %v2499_v18, %s15425_s12  ;;  %v14294_v9 = vpop.f32.mrf.mxu0  ;;  %14341 = vmatmul.mubr.msk.bf16.gmra.mxu0 %vm3863_vm4, %v17666_v59  ;;  %v1899_v46 = vsel %vm1347_vm1, %v1894_v44, %v1898_v27  ;;  %v1908_v44 = vshrl.u32 %v17634_v29, 16  ;;  %v15365_v27 = vld [vmem:[%s15490_s6 + $0x3f0] sm:$0xff]   ;;  %v1914_v34 = vrot.slane %v1912_v58, 1  ;;  %v1920_v59 = vshll.u32 %v17680_v55, 16 }
 0x202   : > { %v2725_v10 = vpop.permute.xlu0 %2724  ;;  %5220 = vst.msk [vmem:[#allocation2 + $0x150] sm:$0xff] %vm5177_vm5, %v14294_v9  ;;  %v4845_v17 = vpop.f32.mrf.mxu1 }
 0x203   : > { %5351 = vst.msk [vmem:[#allocation2 + $0x568] sm:$0xff] %vm5177_vm5, %v4845_v17  ;;  %v2727_v4 = vpop.permute.xlu1 %2726  ;;  %v4314_v18 = vpop.f32.mrf.mxu0  ;;  %v3527_v11 = vsel %vm3301_vm2, %v15365_v27, %v2725_v10  ;;  %v2895_v17 = vrot.slane %v17634_v29, 1  ;;  %v1922_v1 = vrot.slane %v1920_v59, 1 }
 0x204   : > { %3297 = vrot.lane.b32.xlu0 %v3042_v37, %s15424_s11  ;;  %5218 = vst.msk [vmem:[#allocation2 + $0x140] sm:$0xff] %vm5177_vm5, %v4314_v18  ;;  %v1907_v37 = vsel %vm1347_vm1, %v1902_v39, %v1906_v6  ;;  %v1916_v18 = vshrl.u32 %v17658_v24, 16  ;;  %v2894_v39 = vsel %vm2756_vm0, %v2892_v57, %v2893_v48 }
 0x205   : > { %2620 = vrot.lane.b32.xlu1 %v1899_v46, %s15425_s12  ;;  %v14295_v54 = vpop.f32.mrf.mxu0  ;;  %v1910_v46 = vor.u32 %v1908_v44, %v1906_v6  ;;  %v15367_v44 = vld [vmem:[%s15490_s6 + $0x19c] sm:$0xff]  }
 0x206   : > { %v3270_v9 = vpop.permute.xlu0 %3269  ;;  %5221 = vst.msk [vmem:[#allocation2 + $0x158] sm:$0xff] %vm5177_vm5, %v14295_v54  ;;  %v1918_v60 = vor.u32 %v1916_v18, %v1914_v34 }
 0x207   : > { %v17696_v30 = vsel %vm3558_vm3, %v3527_v11, %v3270_v9  ;;  %v2593_v10 = vpop.permute.xlu1 %2592  ;;  %v4317_v27 = vpop.f32.mrf.mxu0  ;;  %v15366_v11 = vld [vmem:[%s15490_s6 + $0x3f8] sm:$0xff]   ;;  %v1915_v6 = vsel %vm1347_vm1, %v1910_v46, %v1914_v34 }
 0x208   : > { %21047 = vst [vmem:[#allocation67_spill] sm:$0xff] %v17696_v30  ;;  %3299 = vrot.lane.b32.xlu0 %v3044_v31, %s15424_s11  ;;  %14476 = vmatprep.mubr.msk.bf16.mxu1 %vm3863_vm4, %v17696_v30  ;;  %5219 = vst.msk [vmem:[#allocation2 + $0x148] sm:$0xff] %vm5177_vm5, %v4317_v27  ;;  %v3529_v58 = vsel %vm3301_vm2, %v15366_v11, %v2727_v4  ;;  %v2896_v31 = vsel %vm2756_vm0, %v2893_v48, %v2895_v17  ;;  %v2897_v4 = vrot.slane %v17658_v24, 1  ;;  %v15368_v11 = vld [vmem:[%s15490_s6 + $0x1a4] sm:$0xff]  }
 0x209   : > { %2622 = vrot.lane.b32.xlu1 %v1907_v37, %s15425_s12  ;;  %v3395_v37 = vsel %vm3301_vm2, %v15367_v44, %v2593_v10  ;;  %v1923_v27 = vsel %vm1347_vm1, %v1918_v60, %v1922_v1 }
 0x20a   : > { %v3272_v54 = vpop.permute.xlu0 %3271  ;;  %v2898_v1 = vsel %vm2756_vm0, %v2895_v17, %v2897_v4  ;;  %v15369_v17 = vld [vmem:[%s15490_s6 + $0x400] sm:$0xff]  }
 0x20b   : > { %v17709_v9 = vsel %vm3558_vm3, %v3529_v58, %v3272_v54  ;;  %v2595_v30 = vpop.permute.xlu1 %2594 }
 0x20c   : > { %3165 = vrot.lane.b32.xlu0 %v2894_v39, %s15424_s11  ;;  %v14430_v57 = vpop.f32.mrf.mxu1  ;;  %14477 = vmatmul.mubr.msk.bf16.gmra.mxu1 %vm3863_vm4, %v17709_v9  ;;  %v2899_v39 = vrot.slane %v17680_v55, 1  ;;  %v3397_v34 = vsel %vm3301_vm2, %v15368_v11, %v2595_v30 }
 0x20d   : > { %5356 = vst.msk [vmem:[#allocation2 + $0x590] sm:$0xff] %vm5177_vm5, %v14430_v57  ;;  %3167 = vrot.lane.b32.xlu1 %v2896_v31, %s15424_s11 }
 0x20e   : > { %v3138_v59 = vpop.permute.xlu0 %3137  ;;  %v4858_v48 = vpop.f32.mrf.mxu1  ;;  %v2900_v54 = vsel %vm2756_vm0, %v2897_v4, %v2899_v39 }
 0x20f   : > { %v17722_v18 = vsel %vm3558_vm3, %v3395_v37, %v3138_v59  ;;  %5354 = vst.msk [vmem:[#allocation2 + $0x580] sm:$0xff] %vm5177_vm5, %v4858_v48  ;;  %v3140_v46 = vpop.permute.xlu1 %3139 }
 0x210   : > { %2624 = vrot.lane.b32.xlu0 %v1915_v6, %s15425_s12  ;;  %v14431_v10 = vpop.f32.mrf.mxu1  ;;  %14344 = vmatprep.mubr.msk.bf16.mxu0 %vm3863_vm4, %v17722_v18  ;;  %v17733_v58 = vsel %vm3558_vm3, %v3397_v34, %v3140_v46 }
 0x211   : > { %5357 = vst.msk [vmem:[#allocation2 + $0x598] sm:$0xff] %vm5177_vm5, %v14431_v10  ;;  %2626 = vrot.lane.b32.xlu1 %v1923_v27, %s15425_s12  ;;  %v14298_v60 = vpop.f32.mrf.mxu0  ;;  %14345 = vmatmul.mubr.msk.bf16.gmra.mxu0 %vm3863_vm4, %v17733_v58  ;;  %v15370_v27 = vld [vmem:[%s15490_s6 + $0x408] sm:$0xff]  }
 0x212   : > { %v2729_v55 = vpop.permute.xlu0 %2728  ;;  %5224 = vst.msk [vmem:[#allocation2 + $0x170] sm:$0xff] %vm5177_vm5, %v14298_v60  ;;  %v4861_v30 = vpop.f32.mrf.mxu1 }
 0x213   : > { %5355 = vst.msk [vmem:[#allocation2 + $0x588] sm:$0xff] %vm5177_vm5, %v4861_v30  ;;  %v2731_v31 = vpop.permute.xlu1 %2730  ;;  %v4330_v57 = vpop.f32.mrf.mxu0  ;;  %v3531_v6 = vsel %vm3301_vm2, %v15369_v17, %v2729_v55 }
 0x214   : > { %3169 = vrot.lane.b32.xlu0 %v2898_v1, %s15424_s11  ;;  %5222 = vst.msk [vmem:[#allocation2 + $0x160] sm:$0xff] %vm5177_vm5, %v4330_v57  ;;  %v3533_v39 = vsel %vm3301_vm2, %v15370_v27, %v2731_v31  ;;  %v15371_v1 = vld [vmem:[%s15490_s6 + $0x1b0] sm:$0xff]   ;;  %v15372_v31 = vld [vmem:[%s15490_s6 + $0x1b8] sm:$0xff]  }
 0x215   : > { %3171 = vrot.lane.b32.xlu1 %v2900_v54, %s15424_s11  ;;  %v14299_v44 = vpop.f32.mrf.mxu0 }
 0x216   : > { %v3274_v37 = vpop.permute.xlu0 %3273  ;;  %5225 = vst.msk [vmem:[#allocation2 + $0x178] sm:$0xff] %vm5177_vm5, %v14299_v44 }
 0x217   : > { %v17750_v4 = vsel %vm3558_vm3, %v3531_v6, %v3274_v37  ;;  %v2597_v59 = vpop.permute.xlu1 %2596  ;;  %v4333_v48 = vpop.f32.mrf.mxu0 }
 0x218   : > { %14480 = vmatprep.mubr.msk.bf16.mxu1 %vm3863_vm4, %v17750_v4  ;;  %5223 = vst.msk [vmem:[#allocation2 + $0x168] sm:$0xff] %vm5177_vm5, %v4333_v48  ;;  %v3399_v60 = vsel %vm3301_vm2, %v15371_v1, %v2597_v59 }
 0x21a   : > { %v3276_v11 = vpop.permute.xlu0 %3275 }
 0x21b   : > { %v17758_v34 = vsel %vm3558_vm3, %v3533_v39, %v3276_v11  ;;  %v2599_v46 = vpop.permute.xlu1 %2598  ;;  %v15373_v11 = vld [vmem:[%s15490_s6 + $0x414] sm:$0xff]  }
 0x21c   : > { %21048 = vst [vmem:[#allocation68_spill] sm:$0xff] %v17758_v34  ;;  %v14434_v10 = vpop.f32.mrf.mxu1  ;;  %14481 = vmatmul.mubr.msk.bf16.gmra.mxu1 %vm3863_vm4, %v17758_v34  ;;  %v3401_v57 = vsel %vm3301_vm2, %v15372_v31, %v2599_v46  ;;  %v15374_v31 = vld [vmem:[%s15490_s6 + $0x41c] sm:$0xff]  }
 0x21d   : > { %5360 = vst.msk [vmem:[#allocation2 + $0x5b0] sm:$0xff] %vm5177_vm5, %v14434_v10 }
 0x21e   : > { %v3142_v55 = vpop.permute.xlu0 %3141  ;;  %v4874_v30 = vpop.f32.mrf.mxu1 }
 0x21f   : > { %v17766_v54 = vsel %vm3558_vm3, %v3399_v60, %v3142_v55  ;;  %5358 = vst.msk [vmem:[#allocation2 + $0x5a0] sm:$0xff] %vm5177_vm5, %v4874_v30  ;;  %v3144_v17 = vpop.permute.xlu1 %3143 }
 0x220   : > { %14348 = vmatprep.mubr.msk.bf16.mxu0 %vm3863_vm4, %v17766_v54  ;;  %v14435_v6 = vpop.f32.mrf.mxu1  ;;  %v17774_v44 = vsel %vm3558_vm3, %v3401_v57, %v3144_v17 }
 0x221   : > { %5361 = vst.msk [vmem:[#allocation2 + $0x5b8] sm:$0xff] %vm5177_vm5, %v14435_v6  ;;  %v14302_v37 = vpop.f32.mrf.mxu0  ;;  %14349 = vmatmul.mubr.msk.bf16.gmra.mxu0 %vm3863_vm4, %v17774_v44 }
 0x222   : > { %v2733_v59 = vpop.permute.xlu0 %2732  ;;  %5228 = vst.msk [vmem:[#allocation2 + $0x190] sm:$0xff] %vm5177_vm5, %v14302_v37  ;;  %v4877_v48 = vpop.f32.mrf.mxu1 }
 0x223   : > { %5359 = vst.msk [vmem:[#allocation2 + $0x5a8] sm:$0xff] %vm5177_vm5, %v4877_v48  ;;  %v2735_v27 = vpop.permute.xlu1 %2734  ;;  %v4346_v39 = vpop.f32.mrf.mxu0  ;;  %v3535_v46 = vsel %vm3301_vm2, %v15373_v11, %v2733_v59  ;;  %v15375_v48 = vld [vmem:[%s15490_s6 + $0x1c0] sm:$0xff]  }
 0x224   : > { %5226 = vst.msk [vmem:[#allocation2 + $0x180] sm:$0xff] %vm5177_vm5, %v4346_v39  ;;  %v3537_v57 = vsel %vm3301_vm2, %v15374_v31, %v2735_v27  ;;  %v15376_v27 = vld [vmem:[%s15490_s6 + $0x1c8] sm:$0xff]  }
 0x225   : > { %v14303_v10 = vpop.f32.mrf.mxu0 }
 0x226   : > { %v3278_v1 = vpop.permute.xlu0 %3277  ;;  %5229 = vst.msk [vmem:[#allocation2 + $0x198] sm:$0xff] %vm5177_vm5, %v14303_v10 }
 0x227   : > { %v17786_v60 = vsel %vm3558_vm3, %v3535_v46, %v3278_v1  ;;  %v2601_v55 = vpop.permute.xlu1 %2600  ;;  %v4349_v30 = vpop.f32.mrf.mxu0 }
 0x228   : > { %21049 = vst [vmem:[#allocation69_spill] sm:$0xff] %v17786_v60  ;;  %14484 = vmatprep.mubr.msk.bf16.mxu1 %vm3863_vm4, %v17786_v60  ;;  %5227 = vst.msk [vmem:[#allocation2 + $0x188] sm:$0xff] %vm5177_vm5, %v4349_v30  ;;  %v3403_v39 = vsel %vm3301_vm2, %v15375_v48, %v2601_v55 }
 0x22a   : > { %v3280_v17 = vpop.permute.xlu0 %3279 }
 0x22b   : > { %v17794_v6 = vsel %vm3558_vm3, %v3537_v57, %v3280_v17  ;;  %v2603_v37 = vpop.permute.xlu1 %2602 }
 0x22c   : > { %21050 = vst [vmem:[#allocation70_spill] sm:$0xff] %v17794_v6  ;;  %v14438_v59 = vpop.f32.mrf.mxu1  ;;  %14485 = vmatmul.mubr.msk.bf16.gmra.mxu1 %vm3863_vm4, %v17794_v6  ;;  %v3405_v1 = vsel %vm3301_vm2, %v15376_v27, %v2603_v37 }
 0x22d   : > { %5364 = vst.msk [vmem:[#allocation2 + $0x5d0] sm:$0xff] %vm5177_vm5, %v14438_v59 }
 0x22e   : > { %v3146_v11 = vpop.permute.xlu0 %3145  ;;  %v4890_v46 = vpop.f32.mrf.mxu1 }
 0x22f   : > { %v17802_v10 = vsel %vm3558_vm3, %v3403_v39, %v3146_v11  ;;  %5362 = vst.msk [vmem:[#allocation2 + $0x5c0] sm:$0xff] %vm5177_vm5, %v4890_v46  ;;  %v3148_v30 = vpop.permute.xlu1 %3147  ;;  %v15377_v39 = vld [vmem:[%s15490_s6 + $0x424] sm:$0xff]  }
 0x230   : > { %14352 = vmatprep.mubr.msk.bf16.mxu0 %vm3863_vm4, %v17802_v10  ;;  %v14439_v31 = vpop.f32.mrf.mxu1  ;;  %v17810_v57 = vsel %vm3558_vm3, %v3405_v1, %v3148_v30 }
 0x231   : > { %5365 = vst.msk [vmem:[#allocation2 + $0x5d8] sm:$0xff] %vm5177_vm5, %v14439_v31  ;;  %v14306_v55 = vpop.f32.mrf.mxu0  ;;  %14353 = vmatmul.mubr.msk.bf16.gmra.mxu0 %vm3863_vm4, %v17810_v57 }
 0x232   : > { %v2737_v17 = vpop.permute.xlu0 %2736  ;;  %5232 = vst.msk [vmem:[#allocation2 + $0x1b0] sm:$0xff] %vm5177_vm5, %v14306_v55  ;;  %v4893_v59 = vpop.f32.mrf.mxu1  ;;  %v15378_v55 = vld [vmem:[%s15490_s6 + $0x42c] sm:$0xff]  }
 0x233   : > { %5363 = vst.msk [vmem:[#allocation2 + $0x5c8] sm:$0xff] %vm5177_vm5, %v4893_v59  ;;  %v2739_v37 = vpop.permute.xlu1 %2738  ;;  %v4362_v48 = vpop.f32.mrf.mxu0  ;;  %v3539_v11 = vsel %vm3301_vm2, %v15377_v39, %v2737_v17 }
 0x234   : > { %5230 = vst.msk [vmem:[#allocation2 + $0x1a0] sm:$0xff] %vm5177_vm5, %v4362_v48  ;;  %v3541_v59 = vsel %vm3301_vm2, %v15378_v55, %v2739_v37  ;;  %v15380_v37 = vld [vmem:[%s15490_s6 + $0x1dc] sm:$0xff]  }
 0x235   : > { %v14307_v46 = vpop.f32.mrf.mxu0 }
 0x236   : > { %v3282_v27 = vpop.permute.xlu0 %3281  ;;  %5233 = vst.msk [vmem:[#allocation2 + $0x1b8] sm:$0xff] %vm5177_vm5, %v14307_v46 }
 0x237   : > { %v17822_v1 = vsel %vm3558_vm3, %v3539_v11, %v3282_v27  ;;  %v2605_v30 = vpop.permute.xlu1 %2604  ;;  %v4365_v31 = vpop.f32.mrf.mxu0  ;;  %v15379_v11 = vld [vmem:[%s15490_s6 + $0x1d4] sm:$0xff]  }
 0x238   : > { %21051 = vst [vmem:[#allocation71_spill] sm:$0xff] %v17822_v1  ;;  %14488 = vmatprep.mubr.msk.bf16.mxu1 %vm3863_vm4, %v17822_v1  ;;  %5231 = vst.msk [vmem:[#allocation2 + $0x1a8] sm:$0xff] %vm5177_vm5, %v4365_v31  ;;  %v3407_v27 = vsel %vm3301_vm2, %v15379_v11, %v2605_v30 }
 0x23a   : > { %v3284_v17 = vpop.permute.xlu0 %3283 }
 0x23b   : > { %v17830_v48 = vsel %vm3558_vm3, %v3541_v59, %v3284_v17  ;;  %v2607_v39 = vpop.permute.xlu1 %2606 }
 0x23c   : > { %21052 = vst [vmem:[#allocation72_spill] sm:$0xff] %v17830_v48  ;;  %v14442_v46 = vpop.f32.mrf.mxu1  ;;  %14489 = vmatmul.mubr.msk.bf16.gmra.mxu1 %vm3863_vm4, %v17830_v48  ;;  %v3409_v55 = vsel %vm3301_vm2, %v15380_v37, %v2607_v39 }
 0x23d   : > { %5368 = vst.msk [vmem:[#allocation2 + $0x5f0] sm:$0xff] %vm5177_vm5, %v14442_v46 }
 0x23e   : > { %v3150_v1 = vpop.permute.xlu0 %3149  ;;  %v4906_v6 = vpop.f32.mrf.mxu1 }
 0x23f   : > { %v17838_v31 = vsel %vm3558_vm3, %v3407_v27, %v3150_v1  ;;  %5366 = vst.msk [vmem:[#allocation2 + $0x5e0] sm:$0xff] %vm5177_vm5, %v4906_v6  ;;  %v3152_v59 = vpop.permute.xlu1 %3151  ;;  %v15381_v27 = vld [vmem:[%s15490_s6 + $0x438] sm:$0xff]  }
 0x240   : > { %14356 = vmatprep.mubr.msk.bf16.mxu0 %vm3863_vm4, %v17838_v31  ;;  %v14443_v17 = vpop.f32.mrf.mxu1  ;;  %v17846_v46 = vsel %vm3558_vm3, %v3409_v55, %v3152_v59 }
 0x241   : > { %5369 = vst.msk [vmem:[#allocation2 + $0x5f8] sm:$0xff] %vm5177_vm5, %v14443_v17  ;;  %v14310_v30 = vpop.f32.mrf.mxu0  ;;  %14357 = vmatmul.mubr.msk.bf16.gmra.mxu0 %vm3863_vm4, %v17846_v46 }
 0x242   : > { %v2741_v1 = vpop.permute.xlu0 %2740  ;;  %5236 = vst.msk [vmem:[#allocation2 + $0x1d0] sm:$0xff] %vm5177_vm5, %v14310_v30  ;;  %v4909_v6 = vpop.f32.mrf.mxu1 }
 0x243   : > { %5367 = vst.msk [vmem:[#allocation2 + $0x5e8] sm:$0xff] %vm5177_vm5, %v4909_v6  ;;  %v2743_v39 = vpop.permute.xlu1 %2742  ;;  %v4378_v11 = vpop.f32.mrf.mxu0  ;;  %v3543_v37 = vsel %vm3301_vm2, %v15381_v27, %v2741_v1  ;;  %v15382_v6 = vld [vmem:[%s15490_s6 + $0x440] sm:$0xff]  }
 0x244   : > { %5234 = vst.msk [vmem:[#allocation2 + $0x1c0] sm:$0xff] %vm5177_vm5, %v4378_v11  ;;  %v3545_v11 = vsel %vm3301_vm2, %v15382_v6, %v2743_v39 }
 0x245   : > { %v14311_v55 = vpop.f32.mrf.mxu0 }
 0x246   : > { %v3286_v59 = vpop.permute.xlu0 %3285  ;;  %5237 = vst.msk [vmem:[#allocation2 + $0x1d8] sm:$0xff] %vm5177_vm5, %v14311_v55 }
 0x247   : > { %v17858_v17 = vsel %vm3558_vm3, %v3543_v37, %v3286_v59  ;;  %v2609_v30 = vpop.permute.xlu1 %2608  ;;  %v4381_v48 = vpop.f32.mrf.mxu0  ;;  %v15383_v37 = vld [vmem:[%s15490_s6 + $0x1e4] sm:$0xff]  }
 0x248   : > { %21053 = vst [vmem:[#allocation73_spill] sm:$0xff] %v17858_v17  ;;  %14492 = vmatprep.mubr.msk.bf16.mxu1 %vm3863_vm4, %v17858_v17  ;;  %5235 = vst.msk [vmem:[#allocation2 + $0x1c8] sm:$0xff] %vm5177_vm5, %v4381_v48  ;;  %v3411_v55 = vsel %vm3301_vm2, %v15383_v37, %v2609_v30  ;;  %v15384_v37 = vld [vmem:[%s15490_s6 + $0x448] sm:$0xff]  }
 0x24a   : > { %v3288_v60 = vpop.permute.xlu0 %3287 }
 0x24b   : > { %v17866_v1 = vsel %vm3558_vm3, %v3545_v11, %v3288_v60  ;;  %v2611_v27 = vpop.permute.xlu1 %2610 }
 0x24c   : > { %21054 = vst [vmem:[#allocation74_spill] sm:$0xff] %v17866_v1  ;;  %v14446_v34 = vpop.f32.mrf.mxu1  ;;  %14493 = vmatmul.mubr.msk.bf16.gmra.mxu1 %vm3863_vm4, %v17866_v1  ;;  %v3413_v60 = vsel %vm3301_vm2, %v17351_v22, %v2611_v27 }
 0x24d   : > { %5372 = vst.msk [vmem:[#allocation2 + $0x610] sm:$0xff] %vm5177_vm5, %v14446_v34 }
 0x24e   : > { %v3154_v59 = vpop.permute.xlu0 %3153  ;;  %v4922_v17 = vpop.f32.mrf.mxu1 }
 0x24f   : > { %v17874_v48 = vsel %vm3558_vm3, %v3411_v55, %v3154_v59  ;;  %5370 = vst.msk [vmem:[#allocation2 + $0x600] sm:$0xff] %vm5177_vm5, %v4922_v17  ;;  %v3156_v39 = vpop.permute.xlu1 %3155 }
 0x250   : > { %14360 = vmatprep.mubr.msk.bf16.mxu0 %vm3863_vm4, %v17874_v48  ;;  %v14447_v6 = vpop.f32.mrf.mxu1  ;;  %v17882_v34 = vsel %vm3558_vm3, %v3413_v60, %v3156_v39 }
 0x251   : > { %5373 = vst.msk [vmem:[#allocation2 + $0x618] sm:$0xff] %vm5177_vm5, %v14447_v6  ;;  %v14314_v30 = vpop.f32.mrf.mxu0  ;;  %14361 = vmatmul.mubr.msk.bf16.gmra.mxu0 %vm3863_vm4, %v17882_v34 }
 0x252   : > { %v2745_v11 = vpop.permute.xlu0 %2744  ;;  %5240 = vst.msk [vmem:[#allocation2 + $0x1f0] sm:$0xff] %vm5177_vm5, %v14314_v30  ;;  %v4925_v17 = vpop.f32.mrf.mxu1 }
 0x253   : > { %5371 = vst.msk [vmem:[#allocation2 + $0x608] sm:$0xff] %vm5177_vm5, %v4925_v17  ;;  %v2747_v22 = vpop.permute.xlu1 %2746  ;;  %v4394_v27 = vpop.f32.mrf.mxu0  ;;  %v3547_v55 = vsel %vm3301_vm2, %v15384_v37, %v2745_v11 }
 0x254   : > { %5238 = vst.msk [vmem:[#allocation2 + $0x1e0] sm:$0xff] %vm5177_vm5, %v4394_v27  ;;  %v3549_v30 = vsel %vm3301_vm2, %v17382_v62, %v2747_v22 }
 0x255   : > { %v14315_v59 = vpop.f32.mrf.mxu0 }
 0x256   : > { %v3290_v60 = vpop.permute.xlu0 %3289  ;;  %5241 = vst.msk [vmem:[#allocation2 + $0x1f8] sm:$0xff] %vm5177_vm5, %v14315_v59 }
 0x257   : > { %v17894_v39 = vsel %vm3558_vm3, %v3547_v55, %v3290_v60  ;;  %v2613_v6 = vpop.permute.xlu1 %2612  ;;  %v4397_v1 = vpop.f32.mrf.mxu0 }
 0x258   : > { %14496 = vmatprep.mubr.msk.bf16.mxu1 %vm3863_vm4, %v17894_v39  ;;  %5239 = vst.msk [vmem:[#allocation2 + $0x1e8] sm:$0xff] %vm5177_vm5, %v4397_v1  ;;  %v3415_v55 = vsel %vm3301_vm2, %v17414_v38, %v2613_v6 }
 0x25a   : > { %v3292_v17 = vpop.permute.xlu0 %3291 }
 0x25b   : > { %v17902_v11 = vsel %vm3558_vm3, %v3549_v30, %v3292_v17  ;;  %v2615_v27 = vpop.permute.xlu1 %2614 }
 0x25c   : > { %v14450_v37 = vpop.f32.mrf.mxu1  ;;  %14497 = vmatmul.mubr.msk.bf16.gmra.mxu1 %vm3863_vm4, %v17902_v11  ;;  %v3417_v62 = vsel %vm3301_vm2, %v17439_v0, %v2615_v27 }
 0x25d   : > { %5376 = vst.msk [vmem:[#allocation2 + $0x630] sm:$0xff] %vm5177_vm5, %v14450_v37 }
 0x25e   : > { %v3158_v59 = vpop.permute.xlu0 %3157  ;;  %v4938_v60 = vpop.f32.mrf.mxu1 }
 0x25f   : > { %v17910_v1 = vsel %vm3558_vm3, %v3415_v55, %v3158_v59  ;;  %5374 = vst.msk [vmem:[#allocation2 + $0x620] sm:$0xff] %vm5177_vm5, %v4938_v60  ;;  %v3160_v22 = vpop.permute.xlu1 %3159 }
 0x260   : > { %14364 = vmatprep.mubr.msk.bf16.mxu0 %vm3863_vm4, %v17910_v1  ;;  %v14451_v30 = vpop.f32.mrf.mxu1  ;;  %v17918_v17 = vsel %vm3558_vm3, %v3417_v62, %v3160_v22 }
 0x261   : > { %5377 = vst.msk [vmem:[#allocation2 + $0x638] sm:$0xff] %vm5177_vm5, %v14451_v30  ;;  %v14318_v38 = vpop.f32.mrf.mxu0  ;;  %14365 = vmatmul.mubr.msk.bf16.gmra.mxu0 %vm3863_vm4, %v17918_v17 }
 0x262   : > { %v2749_v6 = vpop.permute.xlu0 %2748  ;;  %5244 = vst.msk [vmem:[#allocation2 + $0x210] sm:$0xff] %vm5177_vm5, %v14318_v38  ;;  %v4941_v37 = vpop.f32.mrf.mxu1 }
 0x263   : > { %5375 = vst.msk [vmem:[#allocation2 + $0x628] sm:$0xff] %vm5177_vm5, %v4941_v37  ;;  %v2751_v0 = vpop.permute.xlu1 %2750  ;;  %v4410_v27 = vpop.f32.mrf.mxu0  ;;  %v3551_v55 = vsel %vm3301_vm2, %v17468_v26, %v2749_v6 }
 0x264   : > { %5242 = vst.msk [vmem:[#allocation2 + $0x200] sm:$0xff] %vm5177_vm5, %v4410_v27  ;;  %v3553_v38 = vsel %vm3301_vm2, %v17478_v28, %v2751_v0 }
 0x265   : > { %v14319_v59 = vpop.f32.mrf.mxu0 }
 0x266   : > { %v3294_v60 = vpop.permute.xlu0 %3293  ;;  %5245 = vst.msk [vmem:[#allocation2 + $0x218] sm:$0xff] %vm5177_vm5, %v14319_v59 }
 0x267   : > { %v17930_v62 = vsel %vm3558_vm3, %v3551_v55, %v3294_v60  ;;  %v2617_v22 = vpop.permute.xlu1 %2616  ;;  %v4413_v30 = vpop.f32.mrf.mxu0 }
 0x268   : > { %14500 = vmatprep.mubr.msk.bf16.mxu1 %vm3863_vm4, %v17930_v62  ;;  %5243 = vst.msk [vmem:[#allocation2 + $0x208] sm:$0xff] %vm5177_vm5, %v4413_v30  ;;  %v3419_v55 = vsel %vm3301_vm2, %v17459_v16, %v2617_v22 }
 0x26a   : > { %v3296_v37 = vpop.permute.xlu0 %3295 }
 0x26b   : > { %v17938_v26 = vsel %vm3558_vm3, %v3553_v38, %v3296_v37  ;;  %v2619_v6 = vpop.permute.xlu1 %2618 }
 0x26c   : > { %v14454_v27 = vpop.f32.mrf.mxu1  ;;  %14501 = vmatmul.mubr.msk.bf16.gmra.mxu1 %vm3863_vm4, %v17938_v26  ;;  %v3421_v28 = vsel %vm3301_vm2, %v17528_v13, %v2619_v6 }
 0x26d   : > { %5380 = vst.msk [vmem:[#allocation2 + $0x650] sm:$0xff] %vm5177_vm5, %v14454_v27 }
 0x26e   : > { %v3162_v59 = vpop.permute.xlu0 %3161  ;;  %v4954_v60 = vpop.f32.mrf.mxu1 }
 0x26f   : > { %v17946_v30 = vsel %vm3558_vm3, %v3419_v55, %v3162_v59  ;;  %5378 = vst.msk [vmem:[#allocation2 + $0x640] sm:$0xff] %vm5177_vm5, %v4954_v60  ;;  %v3164_v0 = vpop.permute.xlu1 %3163 }
 0x270   : > { %14368 = vmatprep.mubr.msk.bf16.mxu0 %vm3863_vm4, %v17946_v30  ;;  %v14455_v38 = vpop.f32.mrf.mxu1  ;;  %v17954_v37 = vsel %vm3558_vm3, %v3421_v28, %v3164_v0 }
 0x271   : > { %5381 = vst.msk [vmem:[#allocation2 + $0x658] sm:$0xff] %vm5177_vm5, %v14455_v38  ;;  %v14322_v16 = vpop.f32.mrf.mxu0  ;;  %14369 = vmatmul.mubr.msk.bf16.gmra.mxu0 %vm3863_vm4, %v17954_v37 }
 0x272   : > { %v2753_v22 = vpop.permute.xlu0 %2752  ;;  %5248 = vst.msk [vmem:[#allocation2 + $0x230] sm:$0xff] %vm5177_vm5, %v14322_v16  ;;  %v4957_v27 = vpop.f32.mrf.mxu1 }
 0x273   : > { %5379 = vst.msk [vmem:[#allocation2 + $0x648] sm:$0xff] %vm5177_vm5, %v4957_v27  ;;  %v2755_v13 = vpop.permute.xlu1 %2754  ;;  %v4426_v6 = vpop.f32.mrf.mxu0  ;;  %v3555_v55 = vsel %vm3301_vm2, %v17505_v7, %v2753_v22 }
 0x274   : > { %5246 = vst.msk [vmem:[#allocation2 + $0x220] sm:$0xff] %vm5177_vm5, %v4426_v6  ;;  %v3557_v16 = vsel %vm3301_vm2, %v17567_v23, %v2755_v13 }
 0x275   : > { %v14323_v59 = vpop.f32.mrf.mxu0 }
 0x276   : > { %v3298_v60 = vpop.permute.xlu0 %3297  ;;  %5249 = vst.msk [vmem:[#allocation2 + $0x238] sm:$0xff] %vm5177_vm5, %v14323_v59 }
 0x277   : > { %v17966_v28 = vsel %vm3558_vm3, %v3555_v55, %v3298_v60  ;;  %v2621_v0 = vpop.permute.xlu1 %2620  ;;  %v4429_v38 = vpop.f32.mrf.mxu0 }
 0x278   : > { %14504 = vmatprep.mubr.msk.bf16.mxu1 %vm3863_vm4, %v17966_v28  ;;  %5247 = vst.msk [vmem:[#allocation2 + $0x228] sm:$0xff] %vm5177_vm5, %v4429_v38  ;;  %v3423_v55 = vsel %vm3301_vm2, %v17596_v2, %v2621_v0 }
 0x27a   : > { %v3300_v27 = vpop.permute.xlu0 %3299 }
 0x27b   : > { %v17974_v7 = vsel %vm3558_vm3, %v3557_v16, %v3300_v27  ;;  %v2623_v22 = vpop.permute.xlu1 %2622 }
 0x27c   : > { %v14458_v6 = vpop.f32.mrf.mxu1  ;;  %14505 = vmatmul.mubr.msk.bf16.gmra.mxu1 %vm3863_vm4, %v17974_v7  ;;  %v3425_v13 = vsel %vm3301_vm2, %v17618_v50, %v2623_v22 }
 0x27d   : > { %5384 = vst.msk [vmem:[#allocation2 + $0x670] sm:$0xff] %vm5177_vm5, %v14458_v6  ;;  %14520 = vmatprep.mubr.msk.bf16.mxu1 %vm3863_vm4, %v15962_v33 }
 0x27e   : > { %v3166_v59 = vpop.permute.xlu0 %3165  ;;  %v4970_v60 = vpop.f32.mrf.mxu1 }
 0x27f   : > { %v17984_v23 = vsel %vm3558_vm3, %v3423_v55, %v3166_v59  ;;  %5382 = vst.msk [vmem:[#allocation2 + $0x660] sm:$0xff] %vm5177_vm5, %v4970_v60  ;;  %v3168_v38 = vpop.permute.xlu1 %3167 }
 0x280   : > { %14372 = vmatprep.mubr.msk.bf16.mxu0 %vm3863_vm4, %v17984_v23  ;;  %v14459_v16 = vpop.f32.mrf.mxu1  ;;  %v17992_v33 = vsel %vm3558_vm3, %v3425_v13, %v3168_v38 }
 0x281   : > { %5385 = vst.msk [vmem:[#allocation2 + $0x678] sm:$0xff] %vm5177_vm5, %v14459_v16  ;;  %v14326_v2 = vpop.f32.mrf.mxu0  ;;  %14373 = vmatmul.mubr.msk.bf16.gmra.mxu0 %vm3863_vm4, %v17992_v33 }
 0x282   : > { %v2625_v0 = vpop.permute.xlu0 %2624  ;;  %5252 = vst.msk [vmem:[#allocation2 + $0x250] sm:$0xff] %vm5177_vm5, %v14326_v2  ;;  %v4973_v27 = vpop.f32.mrf.mxu1 }
 0x283   : > { %5383 = vst.msk [vmem:[#allocation2 + $0x668] sm:$0xff] %vm5177_vm5, %v4973_v27  ;;  %v2627_v50 = vpop.permute.xlu1 %2626  ;;  %v4442_v22 = vpop.f32.mrf.mxu0  ;;  %v3427_v6 = vsel %vm3301_vm2, %v17634_v29, %v2625_v0 }
 0x284   : > { %14521 = vmatmul.mubr.msk.bf16.vlgmr.msra.gmra.mxu1 %vm3863_vm4, %v15975_v47  ;;  %5250 = vst.msk [vmem:[#allocation2 + $0x240] sm:$0xff] %vm5177_vm5, %v4442_v22  ;;  %v3429_v13 = vsel %vm3301_vm2, %v17658_v24, %v2627_v50 }
 0x285   : > { %14524 = vmatprep.mubr.msk.bf16.mxu1 %vm3863_vm4, %v16040_v36  ;;  %v14327_v55 = vpop.f32.mrf.mxu0 }
 0x286   : > { %v3170_v59 = vpop.permute.xlu0 %3169  ;;  %5253 = vst.msk [vmem:[#allocation2 + $0x258] sm:$0xff] %vm5177_vm5, %v14327_v55 }
 0x287   : > { %v18008_v60 = vsel %vm3558_vm3, %v3427_v6, %v3170_v59  ;;  %v3172_v38 = vpop.permute.xlu1 %3171  ;;  %v4445_v47 = vpop.f32.mrf.mxu0 }
 0x288   : > { %14376 = vmatprep.mubr.msk.bf16.mxu0 %vm3863_vm4, %v18008_v60  ;;  %v18015_v36 = vsel %vm3558_vm3, %v3429_v13, %v3172_v38  ;;  %5251 = vst.msk [vmem:[#allocation2 + $0x248] sm:$0xff] %vm5177_vm5, %v4445_v47 }
 0x289   : > { %14377 = vmatmul.mubr.msk.bf16.gmra.mxu0 %vm3863_vm4, %v18015_v36 }
 0x28a   : > { %14788 = vmatprep.mubr.msk.bf16.mxu0 %vm3863_vm4, %v16116_v53 }
 0x28c   : > { %v14462_v29 = vpop.f32.mrf.mxu1  ;;  %14525 = vmatmul.mubr.msk.bf16.gmra.mxu1 %vm3863_vm4, %v16053_v56 }
 0x28d   : > { %5388 = vst.msk [vmem:[#allocation2 + $0x690] sm:$0xff] %vm5177_vm5, %v14462_v29  ;;  %14528 = vmatprep.mubr.msk.bf16.mxu1 %vm3863_vm4, %v16116_v53 }
 0x28e   : > { %v4986_v24 = vpop.f32.mrf.mxu1 }
 0x28f   : > { %5386 = vst.msk [vmem:[#allocation2 + $0x680] sm:$0xff] %vm5177_vm5, %v4986_v24 }
 0x290   : > { %v14463_v16 = vpop.f32.mrf.mxu1 }
 0x291   : > { %5389 = vst.msk [vmem:[#allocation2 + $0x698] sm:$0xff] %vm5177_vm5, %v14463_v16  ;;  %v14330_v2 = vpop.f32.mrf.mxu0  ;;  %14789 = vmatmul.mubr.msk.bf16.vlgmr.msra.gmra.mxu0 %vm3863_vm4, %v16129_v61 }
 0x292   : > { %v4989_v0 = vpop.f32.mrf.mxu1  ;;  %5256 = vst.msk [vmem:[#allocation2 + $0x270] sm:$0xff] %vm5177_vm5, %v14330_v2  ;;  %14792 = vmatprep.mubr.msk.bf16.mxu0 %vm3863_vm4, %v16192_v8 }
 0x293   : > { %5387 = vst.msk [vmem:[#allocation2 + $0x688] sm:$0xff] %vm5177_vm5, %v4989_v0  ;;  %v4458_v56 = vpop.f32.mrf.mxu0 }
 0x294   : > { %14529 = vmatmul.mubr.msk.bf16.gmra.mxu1 %vm3863_vm4, %v16129_v61  ;;  %5254 = vst.msk [vmem:[#allocation2 + $0x260] sm:$0xff] %vm5177_vm5, %v4458_v56 }
 0x295   : > { %14532 = vmatprep.mubr.msk.bf16.mxu1 %vm3863_vm4, %v16192_v8  ;;  %v14331_v53 = vpop.f32.mrf.mxu0 }
 0x296   : > { %5257 = vst.msk [vmem:[#allocation2 + $0x278] sm:$0xff] %vm5177_vm5, %v14331_v53 }
 0x297   : > { %v4461_v27 = vpop.f32.mrf.mxu0 }
 0x298   : > { %5255 = vst.msk [vmem:[#allocation2 + $0x268] sm:$0xff] %vm5177_vm5, %v4461_v27 }
 0x299   : > { %14793 = vmatmul.mubr.msk.bf16.gmra.mxu0 %vm3863_vm4, %v16204_v14 }
 0x29a   : > { %14796 = vmatprep.mubr.msk.bf16.mxu0 %vm3863_vm4, %v16270_v32 }
 0x29c   : > { %v14466_v50 = vpop.f32.mrf.mxu1  ;;  %14533 = vmatmul.mubr.msk.bf16.gmra.mxu1 %vm3863_vm4, %v16204_v14 }
 0x29d   : > { %5392 = vst.msk [vmem:[#allocation2 + $0x6b0] sm:$0xff] %vm5177_vm5, %v14466_v50  ;;  %14536 = vmatprep.mubr.msk.bf16.mxu1 %vm3863_vm4, %v16270_v32 }
 0x29e   : > { %v5002_v61 = vpop.f32.mrf.mxu1 }
 0x29f   : > { %5390 = vst.msk [vmem:[#allocation2 + $0x6a0] sm:$0xff] %vm5177_vm5, %v5002_v61 }
 0x2a0   : > { %v14467_v8 = vpop.f32.mrf.mxu1 }
 0x2a1   : > { %5393 = vst.msk [vmem:[#allocation2 + $0x6b8] sm:$0xff] %vm5177_vm5, %v14467_v8  ;;  %v14334_v22 = vpop.f32.mrf.mxu0  ;;  %14797 = vmatmul.mubr.msk.bf16.gmra.mxu0 %vm3863_vm4, %v16284_v49 }
 0x2a2   : > { %v5005_v6 = vpop.f32.mrf.mxu1  ;;  %5260 = vst.msk [vmem:[#allocation2 + $0x290] sm:$0xff] %vm5177_vm5, %v14334_v22  ;;  %14800 = vmatprep.mubr.msk.bf16.mxu0 %vm3863_vm4, %v16350_v35 }
 0x2a3   : > { %5391 = vst.msk [vmem:[#allocation2 + $0x6a8] sm:$0xff] %vm5177_vm5, %v5005_v6  ;;  %v4474_v14 = vpop.f32.mrf.mxu0  ;;  %v21055_v6 = vld [vmem:[#allocation38_spill] sm:$0xff] }
 0x2a4   : > { %14537 = vmatmul.mubr.msk.bf16.gmra.mxu1 %vm3863_vm4, %v16284_v49  ;;  %5258 = vst.msk [vmem:[#allocation2 + $0x280] sm:$0xff] %vm5177_vm5, %v4474_v14  ;;  %v21056_v14 = vld [vmem:[#allocation41_spill] sm:$0xff] }
 0x2a5   : > { %14540 = vmatprep.mubr.msk.bf16.mxu1 %vm3863_vm4, %v16350_v35  ;;  %v14335_v32 = vpop.f32.mrf.mxu0 }
 0x2a6   : > { %5261 = vst.msk [vmem:[#allocation2 + $0x298] sm:$0xff] %vm5177_vm5, %v14335_v32 }
 0x2a7   : > { %v4477_v55 = vpop.f32.mrf.mxu0 }
 0x2a8   : > { %5259 = vst.msk [vmem:[#allocation2 + $0x288] sm:$0xff] %vm5177_vm5, %v4477_v55 }
 0x2a9   : > { %14801 = vmatmul.mubr.msk.bf16.gmra.mxu0 %vm3863_vm4, %v16362_v19 }
 0x2aa   : > { %14804 = vmatprep.mubr.msk.bf16.mxu0 %vm3863_vm4, %v16433_v12 }
 0x2ac   : > { %v14470_v59 = vpop.f32.mrf.mxu1  ;;  %14541 = vmatmul.mubr.msk.bf16.gmra.mxu1 %vm3863_vm4, %v16362_v19 }
 0x2ad   : > { %5396 = vst.msk [vmem:[#allocation2 + $0x6d0] sm:$0xff] %vm5177_vm5, %v14470_v59  ;;  %14544 = vmatprep.mubr.msk.bf16.mxu1 %vm3863_vm4, %v16433_v12  ;;  %v21057_v59 = vld [vmem:[#allocation42_spill] sm:$0xff] }
 0x2ae   : > { %v5018_v49 = vpop.f32.mrf.mxu1 }
 0x2af   : > { %5394 = vst.msk [vmem:[#allocation2 + $0x6c0] sm:$0xff] %vm5177_vm5, %v5018_v49 }
 0x2b0   : > { %v14471_v35 = vpop.f32.mrf.mxu1 }
 0x2b1   : > { %5397 = vst.msk [vmem:[#allocation2 + $0x6d8] sm:$0xff] %vm5177_vm5, %v14471_v35  ;;  %v14338_v13 = vpop.f32.mrf.mxu0  ;;  %14805 = vmatmul.mubr.msk.bf16.gmra.mxu0 %vm3863_vm4, %v16444_v21  ;;  %v21058_v35 = vld [vmem:[#allocation45_spill] sm:$0xff] }
 0x2b2   : > { %v5021_v38 = vpop.f32.mrf.mxu1  ;;  %5264 = vst.msk [vmem:[#allocation2 + $0x2b0] sm:$0xff] %vm5177_vm5, %v14338_v13  ;;  %14808 = vmatprep.mubr.msk.bf16.mxu0 %vm3863_vm4, %v16511_v43 }
 0x2b3   : > { %5395 = vst.msk [vmem:[#allocation2 + $0x6c8] sm:$0xff] %vm5177_vm5, %v5021_v38  ;;  %v4490_v19 = vpop.f32.mrf.mxu0 }
 0x2b4   : > { %14545 = vmatmul.mubr.msk.bf16.gmra.mxu1 %vm3863_vm4, %v16444_v21  ;;  %5262 = vst.msk [vmem:[#allocation2 + $0x2a0] sm:$0xff] %vm5177_vm5, %v4490_v19 }
 0x2b5   : > { %14548 = vmatprep.mubr.msk.bf16.mxu1 %vm3863_vm4, %v16511_v43  ;;  %v14339_v12 = vpop.f32.mrf.mxu0 }
 0x2b6   : > { %5265 = vst.msk [vmem:[#allocation2 + $0x2b8] sm:$0xff] %vm5177_vm5, %v14339_v12  ;;  %v21059_v12 = vld [vmem:[#allocation46_spill] sm:$0xff] }
 0x2b7   : > { %v4493_v47 = vpop.f32.mrf.mxu0 }
 0x2b8   : > { %5263 = vst.msk [vmem:[#allocation2 + $0x2a8] sm:$0xff] %vm5177_vm5, %v4493_v47  ;;  %v21060_v47 = vld [vmem:[#allocation49_spill] sm:$0xff] }
 0x2b9   : > { %14809 = vmatmul.mubr.msk.bf16.gmra.mxu0 %vm3863_vm4, %v16522_v25 }
 0x2ba   : > { %14812 = vmatprep.mubr.msk.bf16.mxu0 %vm3863_vm4, %v16597_v41 }
 0x2bc   : > { %v14474_v29 = vpop.f32.mrf.mxu1  ;;  %14549 = vmatmul.mubr.msk.bf16.gmra.mxu1 %vm3863_vm4, %v16522_v25 }
 0x2bd   : > { %5400 = vst.msk [vmem:[#allocation2 + $0x6f0] sm:$0xff] %vm5177_vm5, %v14474_v29  ;;  %14552 = vmatprep.mubr.msk.bf16.mxu1 %vm3863_vm4, %v16597_v41 }
 0x2be   : > { %v5034_v21 = vpop.f32.mrf.mxu1 }
 0x2bf   : > { %5398 = vst.msk [vmem:[#allocation2 + $0x6e0] sm:$0xff] %vm5177_vm5, %v5034_v21 }
 0x2c0   : > { %v14475_v43 = vpop.f32.mrf.mxu1 }
 0x2c1   : > { %5401 = vst.msk [vmem:[#allocation2 + $0x6f8] sm:$0xff] %vm5177_vm5, %v14475_v43  ;;  %v14342_v24 = vpop.f32.mrf.mxu0  ;;  %14813 = vmatmul.mubr.msk.bf16.gmra.mxu0 %vm3863_vm4, %v16608_v52 }
 0x2c2   : > { %v5037_v16 = vpop.f32.mrf.mxu1  ;;  %5268 = vst.msk [vmem:[#allocation2 + $0x2d0] sm:$0xff] %vm5177_vm5, %v14342_v24  ;;  %14816 = vmatprep.mubr.msk.bf16.mxu0 %vm3863_vm4, %v16675_v45 }
 0x2c3   : > { %5399 = vst.msk [vmem:[#allocation2 + $0x6e8] sm:$0xff] %vm5177_vm5, %v5037_v16  ;;  %v4506_v25 = vpop.f32.mrf.mxu0  ;;  %v21061_v16 = vld [vmem:[#allocation50_spill] sm:$0xff] }
 0x2c4   : > { %14553 = vmatmul.mubr.msk.bf16.gmra.mxu1 %vm3863_vm4, %v16608_v52  ;;  %5266 = vst.msk [vmem:[#allocation2 + $0x2c0] sm:$0xff] %vm5177_vm5, %v4506_v25 }
 0x2c5   : > { %14556 = vmatprep.mubr.msk.bf16.mxu1 %vm3863_vm4, %v16675_v45  ;;  %v14343_v41 = vpop.f32.mrf.mxu0 }
 0x2c6   : > { %5269 = vst.msk [vmem:[#allocation2 + $0x2d8] sm:$0xff] %vm5177_vm5, %v14343_v41  ;;  %v21062_v41 = vld [vmem:[#allocation53_spill] sm:$0xff] }
 0x2c7   : > { %v4509_v2 = vpop.f32.mrf.mxu0 }
 0x2c8   : > { %5267 = vst.msk [vmem:[#allocation2 + $0x2c8] sm:$0xff] %vm5177_vm5, %v4509_v2 }
 0x2c9   : > { %14817 = vmatmul.mubr.msk.bf16.gmra.mxu0 %vm3863_vm4, %v16686_v42 }
 0x2ca   : > { %14820 = vmatprep.mubr.msk.bf16.mxu0 %vm3863_vm4, %v16761_v63 }
 0x2cc   : > { %v14478_v0 = vpop.f32.mrf.mxu1  ;;  %14557 = vmatmul.mubr.msk.bf16.gmra.mxu1 %vm3863_vm4, %v16686_v42 }
 0x2cd   : > { %5404 = vst.msk [vmem:[#allocation2 + $0x710] sm:$0xff] %vm5177_vm5, %v14478_v0  ;;  %14560 = vmatprep.mubr.msk.bf16.mxu1 %vm3863_vm4, %v16761_v63 }
 0x2ce   : > { %v5050_v52 = vpop.f32.mrf.mxu1 }
 0x2cf   : > { %5402 = vst.msk [vmem:[#allocation2 + $0x700] sm:$0xff] %vm5177_vm5, %v5050_v52 }
 0x2d0   : > { %v14479_v45 = vpop.f32.mrf.mxu1 }
 0x2d1   : > { %5405 = vst.msk [vmem:[#allocation2 + $0x718] sm:$0xff] %vm5177_vm5, %v14479_v45  ;;  %v14346_v56 = vpop.f32.mrf.mxu0  ;;  %14821 = vmatmul.mubr.msk.bf16.gmra.mxu0 %vm3863_vm4, %v16773_v20  ;;  %v21063_v45 = vld [vmem:[#allocation54_spill] sm:$0xff] }
 0x2d2   : > { %v5053_v53 = vpop.f32.mrf.mxu1  ;;  %5272 = vst.msk [vmem:[#allocation2 + $0x2f0] sm:$0xff] %vm5177_vm5, %v14346_v56  ;;  %14824 = vmatprep.mubr.msk.bf16.mxu0 %vm3863_vm4, %v16856_v5  ;;  %v21064_v56 = vld [vmem:[#allocation57_spill] sm:$0xff] }
 0x2d3   : > { %5403 = vst.msk [vmem:[#allocation2 + $0x708] sm:$0xff] %vm5177_vm5, %v5053_v53  ;;  %v4522_v42 = vpop.f32.mrf.mxu0 }
 0x2d4   : > { %14561 = vmatmul.mubr.msk.bf16.gmra.mxu1 %vm3863_vm4, %v16773_v20  ;;  %5270 = vst.msk [vmem:[#allocation2 + $0x2e0] sm:$0xff] %vm5177_vm5, %v4522_v42 }
 0x2d5   : > { %14564 = vmatprep.mubr.msk.bf16.mxu1 %vm3863_vm4, %v16856_v5  ;;  %v14347_v63 = vpop.f32.mrf.mxu0 }
 0x2d6   : > { %5273 = vst.msk [vmem:[#allocation2 + $0x2f8] sm:$0xff] %vm5177_vm5, %v14347_v63 }
 0x2d7   : > { %v4525_v27 = vpop.f32.mrf.mxu0 }
 0x2d8   : > { %5271 = vst.msk [vmem:[#allocation2 + $0x2e8] sm:$0xff] %vm5177_vm5, %v4525_v27 }
 0x2d9   : > { %14825 = vmatmul.mubr.msk.bf16.gmra.mxu0 %vm3863_vm4, %v16868_v3 }
 0x2da   : > { %14828 = vmatprep.mubr.msk.bf16.mxu0 %vm3863_vm4, %v16944_v40 }
 0x2dc   : > { %v14482_v50 = vpop.f32.mrf.mxu1  ;;  %14565 = vmatmul.mubr.msk.bf16.gmra.mxu1 %vm3863_vm4, %v16868_v3 }
 0x2dd   : > { %5408 = vst.msk [vmem:[#allocation2 + $0x730] sm:$0xff] %vm5177_vm5, %v14482_v50  ;;  %14568 = vmatprep.mubr.msk.bf16.mxu1 %vm3863_vm4, %v16944_v40  ;;  %v21065_v50 = vld [vmem:[#allocation58_spill] sm:$0xff] }
 0x2de   : > { %v5066_v20 = vpop.f32.mrf.mxu1 }
 0x2df   : > { %5406 = vst.msk [vmem:[#allocation2 + $0x720] sm:$0xff] %vm5177_vm5, %v5066_v20 }
 0x2e0   : > { %v14483_v5 = vpop.f32.mrf.mxu1 }
 0x2e1   : > { %5409 = vst.msk [vmem:[#allocation2 + $0x738] sm:$0xff] %vm5177_vm5, %v14483_v5  ;;  %v14350_v61 = vpop.f32.mrf.mxu0  ;;  %14829 = vmatmul.mubr.msk.bf16.gmra.mxu0 %vm3863_vm4, %v16956_v15  ;;  %v21066_v5 = vld [vmem:[#allocation61_spill] sm:$0xff] }
 0x2e2   : > { %v5069_v8 = vpop.f32.mrf.mxu1  ;;  %5276 = vst.msk [vmem:[#allocation2 + $0x310] sm:$0xff] %vm5177_vm5, %v14350_v61  ;;  %14832 = vmatprep.mubr.msk.bf16.mxu0 %vm3863_vm4, %v17033_v51 }
 0x2e3   : > { %5407 = vst.msk [vmem:[#allocation2 + $0x728] sm:$0xff] %vm5177_vm5, %v5069_v8  ;;  %v4538_v3 = vpop.f32.mrf.mxu0 }
 0x2e4   : > { %14569 = vmatmul.mubr.msk.bf16.gmra.mxu1 %vm3863_vm4, %v16956_v15  ;;  %5274 = vst.msk [vmem:[#allocation2 + $0x300] sm:$0xff] %vm5177_vm5, %v4538_v3 }
 0x2e5   : > { %14572 = vmatprep.mubr.msk.bf16.mxu1 %vm3863_vm4, %v17033_v51  ;;  %v14351_v40 = vpop.f32.mrf.mxu0 }
 0x2e6   : > { %5277 = vst.msk [vmem:[#allocation2 + $0x318] sm:$0xff] %vm5177_vm5, %v14351_v40  ;;  %v21067_v40 = vld [vmem:[#allocation62_spill] sm:$0xff] }
 0x2e7   : > { %v4541_v22 = vpop.f32.mrf.mxu0 }
 0x2e8   : > { %5275 = vst.msk [vmem:[#allocation2 + $0x308] sm:$0xff] %vm5177_vm5, %v4541_v22  ;;  %v21068_v22 = vld [vmem:[#allocation65_spill] sm:$0xff] }
 0x2e9   : > { %14833 = vmatmul.mubr.msk.bf16.gmra.mxu0 %vm3863_vm4, %v21055_v6 }
 0x2ea   : > { %14836 = vmatprep.mubr.msk.bf16.mxu0 %vm3863_vm4, %v21056_v14 }
 0x2ec   : > { %v14486_v32 = vpop.f32.mrf.mxu1  ;;  %14573 = vmatmul.mubr.msk.bf16.gmra.mxu1 %vm3863_vm4, %v21055_v6 }
 0x2ed   : > { %5412 = vst.msk [vmem:[#allocation2 + $0x750] sm:$0xff] %vm5177_vm5, %v14486_v32  ;;  %14576 = vmatprep.mubr.msk.bf16.mxu1 %vm3863_vm4, %v21056_v14 }
 0x2ee   : > { %v5082_v15 = vpop.f32.mrf.mxu1 }
 0x2ef   : > { %5410 = vst.msk [vmem:[#allocation2 + $0x740] sm:$0xff] %vm5177_vm5, %v5082_v15 }
 0x2f0   : > { %v14487_v51 = vpop.f32.mrf.mxu1 }
 0x2f1   : > { %5413 = vst.msk [vmem:[#allocation2 + $0x758] sm:$0xff] %vm5177_vm5, %v14487_v51  ;;  %v14354_v55 = vpop.f32.mrf.mxu0  ;;  %14837 = vmatmul.mubr.msk.bf16.gmra.mxu0 %vm3863_vm4, %v21057_v59  ;;  %v21069_v51 = vld [vmem:[#allocation66_spill] sm:$0xff] }
 0x2f2   : > { %v5085_v49 = vpop.f32.mrf.mxu1  ;;  %5280 = vst.msk [vmem:[#allocation2 + $0x330] sm:$0xff] %vm5177_vm5, %v14354_v55  ;;  %14840 = vmatprep.mubr.msk.bf16.mxu0 %vm3863_vm4, %v21058_v35 }
 0x2f3   : > { %5411 = vst.msk [vmem:[#allocation2 + $0x748] sm:$0xff] %vm5177_vm5, %v5085_v49  ;;  %v4554_v13 = vpop.f32.mrf.mxu0 }
 0x2f4   : > { %14577 = vmatmul.mubr.msk.bf16.gmra.mxu1 %vm3863_vm4, %v21057_v59  ;;  %5278 = vst.msk [vmem:[#allocation2 + $0x320] sm:$0xff] %vm5177_vm5, %v4554_v13 }
 0x2f5   : > { %14580 = vmatprep.mubr.msk.bf16.mxu1 %vm3863_vm4, %v21058_v35  ;;  %v14355_v38 = vpop.f32.mrf.mxu0 }
 0x2f6   : > { %5281 = vst.msk [vmem:[#allocation2 + $0x338] sm:$0xff] %vm5177_vm5, %v14355_v38 }
 0x2f7   : > { %v4557_v19 = vpop.f32.mrf.mxu0 }
 0x2f8   : > { %5279 = vst.msk [vmem:[#allocation2 + $0x328] sm:$0xff] %vm5177_vm5, %v4557_v19 }
 0x2f9   : > { %14841 = vmatmul.mubr.msk.bf16.gmra.mxu0 %vm3863_vm4, %v21059_v12 }
 0x2fa   : > { %14844 = vmatprep.mubr.msk.bf16.mxu0 %vm3863_vm4, %v21060_v47 }
 0x2fc   : > { %v14490_v29 = vpop.f32.mrf.mxu1  ;;  %14581 = vmatmul.mubr.msk.bf16.gmra.mxu1 %vm3863_vm4, %v21059_v12 }
 0x2fd   : > { %5416 = vst.msk [vmem:[#allocation2 + $0x770] sm:$0xff] %vm5177_vm5, %v14490_v29  ;;  %14584 = vmatprep.mubr.msk.bf16.mxu1 %vm3863_vm4, %v21060_v47 }
 0x2fe   : > { %v5098_v21 = vpop.f32.mrf.mxu1 }
 0x2ff   : > { %5414 = vst.msk [vmem:[#allocation2 + $0x760] sm:$0xff] %vm5177_vm5, %v5098_v21 }
 0x300   : > { %v14491_v43 = vpop.f32.mrf.mxu1 }
 0x301   : > { %5417 = vst.msk [vmem:[#allocation2 + $0x778] sm:$0xff] %vm5177_vm5, %v14491_v43  ;;  %v14358_v24 = vpop.f32.mrf.mxu0  ;;  %14845 = vmatmul.mubr.msk.bf16.gmra.mxu0 %vm3863_vm4, %v21061_v16 }
 0x302   : > { %v5101_v25 = vpop.f32.mrf.mxu1  ;;  %5284 = vst.msk [vmem:[#allocation2 + $0x350] sm:$0xff] %vm5177_vm5, %v14358_v24  ;;  %14848 = vmatprep.mubr.msk.bf16.mxu0 %vm3863_vm4, %v21062_v41  ;;  %v6650_v24 = vld [vmem:[#allocation2 + $0x10] sm:$0xff] }
 0x303   : > { %5415 = vst.msk [vmem:[#allocation2 + $0x768] sm:$0xff] %vm5177_vm5, %v5101_v25  ;;  %v4570_v2 = vpop.f32.mrf.mxu0 }
 0x304   : > { %14585 = vmatmul.mubr.msk.bf16.gmra.mxu1 %vm3863_vm4, %v21061_v16  ;;  %5282 = vst.msk [vmem:[#allocation2 + $0x340] sm:$0xff] %vm5177_vm5, %v4570_v2  ;;  %v6648_v2 = vld [vmem:[#allocation2] sm:$0xff] }
 0x305   : > { %14588 = vmatprep.mubr.msk.bf16.mxu1 %vm3863_vm4, %v21062_v41  ;;  %v14359_v0 = vpop.f32.mrf.mxu0 }
 0x306   : > { %5285 = vst.msk [vmem:[#allocation2 + $0x358] sm:$0xff] %vm5177_vm5, %v14359_v0 }
 0x307   : > { %v4573_v52 = vpop.f32.mrf.mxu0 }
 0x308   : > { %5283 = vst.msk [vmem:[#allocation2 + $0x348] sm:$0xff] %vm5177_vm5, %v4573_v52 }
 0x309   : > { %14849 = vmatmul.mubr.msk.bf16.gmra.mxu0 %vm3863_vm4, %v21063_v45 }
 0x30a   : > { %14852 = vmatprep.mubr.msk.bf16.mxu0 %vm3863_vm4, %v21064_v56 }
 0x30c   : > { %v14494_v53 = vpop.f32.mrf.mxu1  ;;  %14589 = vmatmul.mubr.msk.bf16.gmra.mxu1 %vm3863_vm4, %v21063_v45 }
 0x30d   : > { %5420 = vst.msk [vmem:[#allocation2 + $0x790] sm:$0xff] %vm5177_vm5, %v14494_v53  ;;  %14592 = vmatprep.mubr.msk.bf16.mxu1 %vm3863_vm4, %v21064_v56  ;;  %v6651_v56 = vld [vmem:[#allocation2 + $0x18] sm:$0xff] }
 0x30e   : > { %v5114_v42 = vpop.f32.mrf.mxu1 }
 0x30f   : > { %5418 = vst.msk [vmem:[#allocation2 + $0x780] sm:$0xff] %vm5177_vm5, %v5114_v42  ;;  %v6649_v42 = vld [vmem:[#allocation2 + $0x8] sm:$0xff] }
 0x310   : > { %v14495_v63 = vpop.f32.mrf.mxu1 }
 0x311   : > { %5421 = vst.msk [vmem:[#allocation2 + $0x798] sm:$0xff] %vm5177_vm5, %v14495_v63  ;;  %v14362_v27 = vpop.f32.mrf.mxu0  ;;  %14853 = vmatmul.mubr.msk.bf16.gmra.mxu0 %vm3863_vm4, %v21065_v50 }
 0x312   : > { %v5117_v20 = vpop.f32.mrf.mxu1  ;;  %5288 = vst.msk [vmem:[#allocation2 + $0x370] sm:$0xff] %vm5177_vm5, %v14362_v27  ;;  %14856 = vmatprep.mubr.msk.bf16.mxu0 %vm3863_vm4, %v21066_v5 }
 0x313   : > { %5419 = vst.msk [vmem:[#allocation2 + $0x788] sm:$0xff] %vm5177_vm5, %v5117_v20  ;;  %v4586_v61 = vpop.f32.mrf.mxu0  ;;  %v6654_v20 = vld [vmem:[#allocation2 + $0x30] sm:$0xff] }
 0x314   : > { %14593 = vmatmul.mubr.msk.bf16.gmra.mxu1 %vm3863_vm4, %v21065_v50  ;;  %5286 = vst.msk [vmem:[#allocation2 + $0x360] sm:$0xff] %vm5177_vm5, %v4586_v61 }
 0x315   : > { %14596 = vmatprep.mubr.msk.bf16.mxu1 %vm3863_vm4, %v21066_v5  ;;  %v14363_v8 = vpop.f32.mrf.mxu0 }
 0x316   : > { %5289 = vst.msk [vmem:[#allocation2 + $0x378] sm:$0xff] %vm5177_vm5, %v14363_v8 }
 0x317   : > { %v4589_v3 = vpop.f32.mrf.mxu0 }
 0x318   : > { %5287 = vst.msk [vmem:[#allocation2 + $0x368] sm:$0xff] %vm5177_vm5, %v4589_v3  ;;  %v6652_v3 = vld [vmem:[#allocation2 + $0x20] sm:$0xff] }
 0x319   : > { %14857 = vmatmul.mubr.msk.bf16.gmra.mxu0 %vm3863_vm4, %v21067_v40 }
 0x31a   : > { %14860 = vmatprep.mubr.msk.bf16.mxu0 %vm3863_vm4, %v21068_v22 }
 0x31c   : > { %v14498_v6 = vpop.f32.mrf.mxu1  ;;  %14597 = vmatmul.mubr.msk.bf16.gmra.mxu1 %vm3863_vm4, %v21067_v40 }
 0x31d   : > { %5424 = vst.msk [vmem:[#allocation2 + $0x7b0] sm:$0xff] %vm5177_vm5, %v14498_v6  ;;  %14600 = vmatprep.mubr.msk.bf16.mxu1 %vm3863_vm4, %v21068_v22  ;;  %v6655_v6 = vld [vmem:[#allocation2 + $0x38] sm:$0xff] }
 0x31e   : > { %v5130_v14 = vpop.f32.mrf.mxu1 }
 0x31f   : > { %5422 = vst.msk [vmem:[#allocation2 + $0x7a0] sm:$0xff] %vm5177_vm5, %v5130_v14 }
 0x320   : > { %v14499_v32 = vpop.f32.mrf.mxu1 }
 0x321   : > { %5425 = vst.msk [vmem:[#allocation2 + $0x7b8] sm:$0xff] %vm5177_vm5, %v14499_v32  ;;  %v14366_v15 = vpop.f32.mrf.mxu0  ;;  %14861 = vmatmul.mubr.msk.bf16.gmra.mxu0 %vm3863_vm4, %v21069_v51 }
 0x322   : > { %v5133_v55 = vpop.f32.mrf.mxu1  ;;  %5292 = vst.msk [vmem:[#allocation2 + $0x390] sm:$0xff] %vm5177_vm5, %v14366_v15  ;;  %14864 = vmatprep.mubr.msk.bf16.mxu0 %vm3863_vm4, %v17722_v18 }
 0x323   : > { %5423 = vst.msk [vmem:[#allocation2 + $0x7a8] sm:$0xff] %vm5177_vm5, %v5133_v55  ;;  %v4602_v59 = vpop.f32.mrf.mxu0 }
 0x324   : > { %14601 = vmatmul.mubr.msk.bf16.gmra.mxu1 %vm3863_vm4, %v21069_v51  ;;  %5290 = vst.msk [vmem:[#allocation2 + $0x380] sm:$0xff] %vm5177_vm5, %v4602_v59  ;;  %v6653_v51 = vld [vmem:[#allocation2 + $0x28] sm:$0xff] }
 0x325   : > { %14604 = vmatprep.mubr.msk.bf16.mxu1 %vm3863_vm4, %v17722_v18  ;;  %v14367_v49 = vpop.f32.mrf.mxu0 }
 0x326   : > { %5293 = vst.msk [vmem:[#allocation2 + $0x398] sm:$0xff] %vm5177_vm5, %v14367_v49 }
 0x327   : > { %v4605_v35 = vpop.f32.mrf.mxu0 }
 0x328   : > { %5291 = vst.msk [vmem:[#allocation2 + $0x388] sm:$0xff] %vm5177_vm5, %v4605_v35 }
 0x329   : > { %14865 = vmatmul.mubr.msk.bf16.gmra.mxu0 %vm3863_vm4, %v17733_v58 }
 0x32a   : > { %14868 = vmatprep.mubr.msk.bf16.mxu0 %vm3863_vm4, %v17766_v54 }
 0x32c   : > { %v14502_v13 = vpop.f32.mrf.mxu1  ;;  %14605 = vmatmul.mubr.msk.bf16.gmra.mxu1 %vm3863_vm4, %v17733_v58 }
 0x32d   : > { %5428 = vst.msk [vmem:[#allocation2 + $0x7d0] sm:$0xff] %vm5177_vm5, %v14502_v13  ;;  %14608 = vmatprep.mubr.msk.bf16.mxu1 %vm3863_vm4, %v17766_v54 }
 0x32e   : > { %v5146_v18 = vpop.f32.mrf.mxu1 }
 0x32f   : > { %5426 = vst.msk [vmem:[#allocation2 + $0x7c0] sm:$0xff] %vm5177_vm5, %v5146_v18  ;;  %v6658_v18 = vld [vmem:[#allocation2 + $0x50] sm:$0xff] }
 0x330   : > { %v14503_v38 = vpop.f32.mrf.mxu1 }
 0x331   : > { %5429 = vst.msk [vmem:[#allocation2 + $0x7d8] sm:$0xff] %vm5177_vm5, %v14503_v38  ;;  %v14370_v19 = vpop.f32.mrf.mxu0  ;;  %14869 = vmatmul.mubr.msk.bf16.gmra.mxu0 %vm3863_vm4, %v17774_v44 }
 0x332   : > { %v5149_v12 = vpop.f32.mrf.mxu1  ;;  %5296 = vst.msk [vmem:[#allocation2 + $0x3b0] sm:$0xff] %vm5177_vm5, %v14370_v19  ;;  %14872 = vmatprep.mubr.msk.bf16.mxu0 %vm3863_vm4, %v17802_v10 }
 0x333   : > { %5427 = vst.msk [vmem:[#allocation2 + $0x7c8] sm:$0xff] %vm5177_vm5, %v5149_v12  ;;  %v4618_v58 = vpop.f32.mrf.mxu0 }
 0x334   : > { %14609 = vmatmul.mubr.msk.bf16.gmra.mxu1 %vm3863_vm4, %v17774_v44  ;;  %5294 = vst.msk [vmem:[#allocation2 + $0x3a0] sm:$0xff] %vm5177_vm5, %v4618_v58 }
 0x335   : > { %14612 = vmatprep.mubr.msk.bf16.mxu1 %vm3863_vm4, %v17802_v10  ;;  %v14371_v54 = vpop.f32.mrf.mxu0 }
 0x336   : > { %5297 = vst.msk [vmem:[#allocation2 + $0x3b8] sm:$0xff] %vm5177_vm5, %v14371_v54 }
 0x337   : > { %v4621_v47 = vpop.f32.mrf.mxu0 }
 0x338   : > { %5295 = vst.msk [vmem:[#allocation2 + $0x3a8] sm:$0xff] %vm5177_vm5, %v4621_v47 }
 0x339   : > { %14873 = vmatmul.mubr.msk.bf16.gmra.mxu0 %vm3863_vm4, %v17810_v57 }
 0x33a   : > { %14876 = vmatprep.mubr.msk.bf16.mxu0 %vm3863_vm4, %v17838_v31 }
 0x33c   : > { %v14506_v29 = vpop.f32.mrf.mxu1  ;;  %14613 = vmatmul.mubr.msk.bf16.gmra.mxu1 %vm3863_vm4, %v17810_v57 }
 0x33d   : > { %5432 = vst.msk [vmem:[#allocation2 + $0x7f0] sm:$0xff] %vm5177_vm5, %v14506_v29  ;;  %14616 = vmatprep.mubr.msk.bf16.mxu1 %vm3863_vm4, %v17838_v31 }
 0x33e   : > { %v5162_v44 = vpop.f32.mrf.mxu1 }
 0x33f   : > { %5430 = vst.msk [vmem:[#allocation2 + $0x7e0] sm:$0xff] %vm5177_vm5, %v5162_v44  ;;  %v18355_v44 = vld [vmem:[%s18346_s27 + $0x8] sm:$0xff]  }
 0x340   : > { %v14507_v10 = vpop.f32.mrf.mxu1 }
 0x341   : > { %5433 = vst.msk [vmem:[#allocation2 + $0x7f8] sm:$0xff] %vm5177_vm5, %v14507_v10  ;;  %v14374_v21 = vpop.f32.mrf.mxu0  ;;  %14877 = vmatmul.mubr.msk.bf16.gmra.mxu0 %vm3863_vm4, %v17846_v46 }
 0x342   : > { %v5165_v43 = vpop.f32.mrf.mxu1  ;;  %5300 = vst.msk [vmem:[#allocation2 + $0x3d0] sm:$0xff] %vm5177_vm5, %v14374_v21  ;;  %14880 = vmatprep.mubr.msk.bf16.mxu0 %vm3863_vm4, %v17874_v48 }
 0x343   : > { %5431 = vst.msk [vmem:[#allocation2 + $0x7e8] sm:$0xff] %vm5177_vm5, %v5165_v43  ;;  %v4634_v57 = vpop.f32.mrf.mxu0 }
 0x344   : > { %v14522_v31 = vpop.f32.mrf.mxu1  ;;  %14617 = vmatmul.mubr.msk.bf16.gmra.mxu1 %vm3863_vm4, %v17846_v46  ;;  %5298 = vst.msk [vmem:[#allocation2 + $0x3c0] sm:$0xff] %vm5177_vm5, %v4634_v57  ;;  %v6659_v57 = vld [vmem:[#allocation2 + $0x58] sm:$0xff] }
 0x345   : > { %v6906_v16 = vadd.f32 %v14522_v31, %v6650_v24  ;;  %14620 = vmatprep.mubr.msk.bf16.mxu1 %vm3863_vm4, %v17874_v48  ;;  %v14375_v25 = vpop.f32.mrf.mxu0  ;;  %v6657_v24 = vld [vmem:[#allocation2 + $0x48] sm:$0xff] }
 0x346   : > { %v5625_v41 = vpop.f32.mrf.mxu1  ;;  %5301 = vst.msk [vmem:[#allocation2 + $0x3d8] sm:$0xff] %vm5177_vm5, %v14375_v25  ;;  %v18365_v25 = vld [vmem:[%s18346_s27] sm:$0xff]  }
 0x347   : > { %7162 = vst.msk [vmem:[#allocation2 + $0x10] sm:$0xff] %vm5177_vm5, %v6906_v16  ;;  %v6904_v0 = vadd.f32 %v6648_v2, %v5625_v41  ;;  %v4637_v52 = vpop.f32.mrf.mxu0  ;;  %v18362_v16 = vld [vmem:[%s20810_s2] ss:$0 sm:$0xff] }
 0x348   : > { %v14523_v45 = vpop.f32.mrf.mxu1  ;;  %5299 = vst.msk [vmem:[#allocation2 + $0x3c8] sm:$0xff] %vm5177_vm5, %v4637_v52  ;;  %v13205_v52 = vunpack.c.l.bf16 %v18355_v44 }
 0x349   : > { %7160 = vst.msk [vmem:[#allocation2] sm:$0xff] %vm5177_vm5, %v6904_v0  ;;  %v6907_v46 = vadd.f32 %v14523_v45, %v6651_v56  ;;  %v14378_v53 = vpop.f32.mrf.mxu0  ;;  %14881 = vmatmul.mubr.msk.bf16.gmra.mxu0 %vm3863_vm4, %v17882_v34 }
 0x34a   : > { %v5628_v48 = vpop.f32.mrf.mxu1  ;;  %5304 = vst.msk [vmem:[#allocation2 + $0x3f0] sm:$0xff] %vm5177_vm5, %v14378_v53  ;;  %14884 = vmatprep.mubr.msk.bf16.mxu0 %vm3863_vm4, %v17910_v1 }
 0x34b   : > { %7163 = vst.msk [vmem:[#allocation2 + $0x18] sm:$0xff] %vm5177_vm5, %v6907_v46  ;;  %v6905_v63 = vadd.f32 %v6649_v42, %v5628_v48  ;;  %v4650_v27 = vpop.f32.mrf.mxu0 }
 0x34c   : > { %v14526_v50 = vpop.f32.mrf.mxu1  ;;  %14621 = vmatmul.mubr.msk.bf16.gmra.mxu1 %vm3863_vm4, %v17882_v34  ;;  %5302 = vst.msk [vmem:[#allocation2 + $0x3e0] sm:$0xff] %vm5177_vm5, %v4650_v27 }
 0x34d   : > { %7161 = vst.msk [vmem:[#allocation2 + $0x8] sm:$0xff] %vm5177_vm5, %v6905_v63  ;;  %v6910_v5 = vadd.f32 %v14526_v50, %v6654_v20  ;;  %14624 = vmatprep.mubr.msk.bf16.mxu1 %vm3863_vm4, %v17910_v1  ;;  %v14379_v61 = vpop.f32.mrf.mxu0  ;;  %v6662_v63 = vld [vmem:[#allocation2 + $0x70] sm:$0xff]  ;;  %v13201_v50 = vunpack.c.l.bf16 %v18365_v25 }
 0x34e   : > { %v5641_v8 = vpop.f32.mrf.mxu1  ;;  %5305 = vst.msk [vmem:[#allocation2 + $0x3f8] sm:$0xff] %vm5177_vm5, %v14379_v61  ;;  %v8632_v32 = vld [vmem:[#allocation2 + $0x10] sm:$0xff] }
 0x34f   : > { %7166 = vst.msk [vmem:[#allocation2 + $0x30] sm:$0xff] %vm5177_vm5, %v6910_v5  ;;  %v6908_v34 = vadd.f32 %v6652_v3, %v5641_v8  ;;  %v4653_v40 = vpop.f32.mrf.mxu0  ;;  %v13206_v8 = vunpack.c.h.bf16 %v18355_v44 }
 0x350   : > { %v14527_v22 = vpop.f32.mrf.mxu1  ;;  %5303 = vst.msk [vmem:[#allocation2 + $0x3e8] sm:$0xff] %vm5177_vm5, %v4653_v40  ;;  %v8630_v35 = vld [vmem:[#allocation2] sm:$0xff] }
 0x351   : > { %7164 = vst.msk [vmem:[#allocation2 + $0x20] sm:$0xff] %vm5177_vm5, %v6908_v34  ;;  %v6911_v1 = vadd.f32 %v14527_v22, %v6655_v6  ;;  %v14790_v14 = vpop.f32.mrf.mxu0  ;;  %14885 = vmatmul.mubr.msk.bf16.gmra.mxu0 %vm3863_vm4, %v17918_v17  ;;  %v6660_v40 = vld [vmem:[#allocation2 + $0x60] sm:$0xff] }
 0x352   : > { %v5644_v15 = vpop.f32.mrf.mxu1  ;;  %v8888_v55 = vadd.f32 %v14790_v14, %v8632_v32  ;;  %14888 = vmatprep.mubr.msk.bf16.mxu0 %vm3863_vm4, %v17946_v30  ;;  %v8633_v58 = vld [vmem:[#allocation2 + $0x18] sm:$0xff] }
 0x353   : > { %7167 = vst.msk [vmem:[#allocation2 + $0x38] sm:$0xff] %vm5177_vm5, %v6911_v1  ;;  %v6909_v59 = vadd.f32 %v6653_v51, %v5644_v15  ;;  %v7607_v49 = vpop.f32.mrf.mxu0  ;;  %v18385_v1 = vld [vmem:[%s18346_s27 + $0x18] sm:$0xff]   ;;  %v13202_v15 = vunpack.c.h.bf16 %v18365_v25 }
 0x354   : > { %v14530_v13 = vpop.f32.mrf.mxu1  ;;  %14625 = vmatmul.mubr.msk.bf16.gmra.mxu1 %vm3863_vm4, %v17918_v17  ;;  %9144 = vst.msk [vmem:[#allocation2 + $0x10] sm:$0xff] %vm5177_vm5, %v8888_v55  ;;  %v8886_v38 = vadd.f32 %v8630_v35, %v7607_v49  ;;  %v6656_v17 = vld [vmem:[#allocation2 + $0x40] sm:$0xff]  ;;  %v8631_v21 = vld [vmem:[#allocation2 + $0x8] sm:$0xff] }
 0x355   : > { %7165 = vst.msk [vmem:[#allocation2 + $0x28] sm:$0xff] %vm5177_vm5, %v6909_v59  ;;  %v6914_v19 = vadd.f32 %v14530_v13, %v6658_v18  ;;  %14628 = vmatprep.mubr.msk.bf16.mxu1 %vm3863_vm4, %v17946_v30  ;;  %v14791_v12 = vpop.f32.mrf.mxu0  ;;  %v18399_v18 = vld [vmem:[%s18346_s27 + $0x10] sm:$0xff]  }
 0x356   : > { %v5657_v54 = vpop.f32.mrf.mxu1  ;;  %9142 = vst.msk [vmem:[#allocation2] sm:$0xff] %vm5177_vm5, %v8886_v38  ;;  %v8889_v47 = vadd.f32 %v14791_v12, %v8633_v58  ;;  %v8636_v2 = vld [vmem:[#allocation2 + $0x30] sm:$0xff]  ;;  %v13213_v58 = vunpack.c.l.bf16 %v18385_v1 }
 0x357   : > { %7170 = vst.msk [vmem:[#allocation2 + $0x50] sm:$0xff] %vm5177_vm5, %v6914_v19  ;;  %v6912_v29 = vadd.f32 %v6656_v17, %v5657_v54  ;;  %v7610_v10 = vpop.f32.mrf.mxu0  ;;  %v6663_v19 = vld [vmem:[#allocation2 + $0x78] sm:$0xff] }
 0x358   : > { %v14531_v43 = vpop.f32.mrf.mxu1  ;;  %9145 = vst.msk [vmem:[#allocation2 + $0x18] sm:$0xff] %vm5177_vm5, %v8889_v47  ;;  %v8887_v30 = vadd.f32 %v8631_v21, %v7610_v10  ;;  %v8634_v48 = vld [vmem:[#allocation2 + $0x20] sm:$0xff] }
 0x359   : > { %7168 = vst.msk [vmem:[#allocation2 + $0x40] sm:$0xff] %vm5177_vm5, %v6912_v29  ;;  %v6915_v31 = vadd.f32 %v14531_v43, %v6659_v57  ;;  %v14794_v41 = vpop.f32.mrf.mxu0  ;;  %14889 = vmatmul.mubr.msk.bf16.gmra.mxu0 %vm3863_vm4, %v17954_v37  ;;  %v6661_v57 = vld [vmem:[#allocation2 + $0x68] sm:$0xff] }
 0x35a   : > { %v5660_v0 = vpop.f32.mrf.mxu1  ;;  %9143 = vst.msk [vmem:[#allocation2 + $0x8] sm:$0xff] %vm5177_vm5, %v8887_v30  ;;  %v8892_v45 = vadd.f32 %v14794_v41, %v8636_v2  ;;  %14892 = vmatprep.mubr.msk.bf16.mxu0 %vm3863_vm4, %v17984_v23 }
 0x35b   : > { %7171 = vst.msk [vmem:[#allocation2 + $0x58] sm:$0xff] %vm5177_vm5, %v6915_v31  ;;  %v6913_v56 = vadd.f32 %v6657_v24, %v5660_v0  ;;  %v9400_v46 = vld [vmem:[#allocation2 + $0x10] sm:$0xff]  ;;  %v7623_v53 = vpop.f32.mrf.mxu0  ;;  %v13209_v31 = vunpack.c.l.bf16 %v18399_v18 }
 0x35c   : > { %v14534_v42 = vpop.f32.mrf.mxu1  ;;  %14629 = vmatmul.mubr.msk.bf16.gmra.mxu1 %vm3863_vm4, %v17954_v37  ;;  %v9663_v27 = vadd.f32 %v18362_v16, %v9400_v46  ;;  %9148 = vst.msk [vmem:[#allocation2 + $0x30] sm:$0xff] %vm5177_vm5, %v8892_v45  ;;  %v8890_v20 = vadd.f32 %v8634_v48, %v7623_v53  ;;  %v8637_v37 = vld [vmem:[#allocation2 + $0x38] sm:$0xff]  ;;  %v8635_v55 = vld [vmem:[#allocation2 + $0x28] sm:$0xff]  ;;  %v6666_v46 = vld [vmem:[#allocation2 + $0x90] sm:$0xff]  ;;  %v13214_v48 = vunpack.c.h.bf16 %v18385_v1 }
 0x35d   : > { %7169 = vst.msk [vmem:[#allocation2 + $0x48] sm:$0xff] %vm5177_vm5, %v6913_v56  ;;  %v6918_v5 = vadd.f32 %v14534_v42, %v6662_v63  ;;  %14632 = vmatprep.mubr.msk.bf16.mxu1 %vm3863_vm4, %v17984_v23  ;;  %v9398_v61 = vld [vmem:[#allocation2] sm:$0xff]  ;;  %v14795_v3 = vpop.f32.mrf.mxu0 }
 0x35e   : > { %v5673_v34 = vpop.f32.mrf.mxu1  ;;  %v10431_v22 = vadd.f32 %v13205_v52, %v9663_v27  ;;  %v9661_v6 = vadd.f32 %v18362_v16, %v9398_v61  ;;  %9146 = vst.msk [vmem:[#allocation2 + $0x20] sm:$0xff] %vm5177_vm5, %v8890_v20  ;;  %v8893_v14 = vadd.f32 %v14795_v3, %v8637_v37  ;;  %v8640_v47 = vld [vmem:[#allocation2 + $0x50] sm:$0xff]  ;;  %v18428_v61 = vld [vmem:[%s18346_s27 + $0x28] sm:$0xff]   ;;  %v13210_v37 = vunpack.c.h.bf16 %v18399_v18 }
 0x35f   : > { %7174 = vst.msk [vmem:[#allocation2 + $0x70] sm:$0xff] %vm5177_vm5, %v6918_v5  ;;  %v6916_v32 = vadd.f32 %v6660_v40, %v5673_v34  ;;  %v9401_v23 = vld [vmem:[#allocation2 + $0x18] sm:$0xff]  ;;  %v7626_v51 = vpop.f32.mrf.mxu0 }
 0x360   : > { %v14535_v59 = vpop.f32.mrf.mxu1  ;;  %v12945_v49 = vpack.c.bf16 %v10431_v22, %v10431_v22  ;;  %v10429_v35 = vadd.f32 %v13201_v50, %v9661_v6  ;;  %v9664_v13 = vadd.f32 %v18362_v16, %v9401_v23  ;;  %9149 = vst.msk [vmem:[#allocation2 + $0x38] sm:$0xff] %vm5177_vm5, %v8893_v14  ;;  %v8891_v38 = vadd.f32 %v8635_v55, %v7626_v51  ;;  %v8638_v41 = vld [vmem:[#allocation2 + $0x40] sm:$0xff]  ;;  %v6667_v51 = vld [vmem:[#allocation2 + $0x98] sm:$0xff] }
 0x361   : > { %7172 = vst.msk [vmem:[#allocation2 + $0x60] sm:$0xff] %vm5177_vm5, %v6916_v32  ;;  %v9399_v12 = vld [vmem:[#allocation2 + $0x8] sm:$0xff]  ;;  %v6919_v54 = vadd.f32 %v14535_v59, %v6663_v19  ;;  %v14798_v17 = vpop.f32.mrf.mxu0  ;;  %14893 = vmatmul.mubr.msk.bf16.gmra.mxu0 %vm3863_vm4, %v17992_v33  ;;  %v18437_v23 = vld [vmem:[%s18346_s27 + $0x20] sm:$0xff]   ;;  %v13221_v59 = vunpack.c.l.bf16 %v18428_v61 }
 0x362   : > { %v5676_v29 = vpop.f32.mrf.mxu1  ;;  %11712 = vst.msk [vmem:[%s18394_s8 + $0x8] sm:$0xf] %vm11709_vm6, %v12945_v49  ;;  %v12943_v44 = vpack.c.bf16 %v10429_v35, %v10429_v35  ;;  %v10432_v10 = vadd.f32 %v13206_v8, %v9664_v13  ;;  %v9662_v21 = vadd.f32 %v18362_v16, %v9399_v12  ;;  %v8896_v43 = vadd.f32 %v14798_v17, %v8640_v47  ;;  %v8641_v63 = vld [vmem:[#allocation2 + $0x58] sm:$0xff]  ;;  %v6664_v8 = vld [vmem:[#allocation2 + $0x80] sm:$0xff]  ;;  %v6665_v17 = vld [vmem:[#allocation2 + $0x88] sm:$0xff] }
 0x363   : > { %9147 = vst.msk [vmem:[#allocation2 + $0x28] sm:$0xff] %vm5177_vm5, %v8891_v38  ;;  %14896 = vmatprep.mubr.msk.bf16.mxu0 %vm3863_vm4, %v18008_v60  ;;  %v9404_v30 = vld [vmem:[#allocation2 + $0x30] sm:$0xff]  ;;  %7175 = vst.msk [vmem:[#allocation2 + $0x78] sm:$0xff] %vm5177_vm5, %v6919_v54  ;;  %v6917_v24 = vadd.f32 %v6661_v57, %v5676_v29  ;;  %v7639_v25 = vpop.f32.mrf.mxu0  ;;  %v18449_v54 = vld [vmem:[%s18346_s27 + $0x38] sm:$0xff]  }
 0x364   : > { %v14538_v2 = vpop.f32.mrf.mxu1  ;;  %14633 = vmatmul.mubr.msk.bf16.gmra.mxu1 %vm3863_vm4, %v17992_v33  ;;  %11710 = vst.msk [vmem:[%s18394_s8] sm:$0xf] %vm11709_vm6, %v12943_v44  ;;  %v12946_v0 = vpack.c.bf16 %v10432_v10, %v10432_v10  ;;  %v10430_v52 = vadd.f32 %v13202_v15, %v9662_v21  ;;  %v9667_v45 = vadd.f32 %v18362_v16, %v9404_v30  ;;  %v8639_v22 = vld [vmem:[#allocation2 + $0x48] sm:$0xff]  ;;  %v21071_v47 = vld [vmem:[#allocation4_spill] sm:$0xff]  ;;  %v18454_v29 = vld [vmem:[%s18346_s27 + $0x30] sm:$0xff]   ;;  %v13217_v10 = vunpack.c.l.bf16 %v18437_v23 }
 0x365   : > { %9152 = vst.msk [vmem:[#allocation2 + $0x50] sm:$0xff] %vm5177_vm5, %v8896_v43  ;;  %v8894_v56 = vadd.f32 %v8638_v41, %v7639_v25  ;;  %14636 = vmatprep.mubr.msk.bf16.mxu1 %vm3863_vm4, %v18008_v60  ;;  %v9402_v53 = vld [vmem:[#allocation2 + $0x20] sm:$0xff]  ;;  %7173 = vst.msk [vmem:[#allocation2 + $0x68] sm:$0xff] %vm5177_vm5, %v6917_v24  ;;  %v6922_v33 = vadd.f32 %v14538_v2, %v6666_v46  ;;  %v14799_v42 = vpop.f32.mrf.mxu0  ;;  %v13222_v21 = vunpack.c.h.bf16 %v18428_v61 }
 0x366   : > { %v5689_v27 = vpop.f32.mrf.mxu1  ;;  %11713 = vst.msk [vmem:[%s18394_s8 + $0xc] sm:$0xf] %vm11709_vm6, %v12946_v0  ;;  %v12944_v50 = vpack.c.bf16 %v10430_v52, %v10430_v52  ;;  %v10435_v20 = vadd.f32 %v13213_v58, %v9667_v45  ;;  %v9665_v5 = vadd.f32 %v18362_v16, %v9402_v53  ;;  %v8897_v60 = vadd.f32 %v14799_v42, %v8641_v63  ;;  %v8644_v13 = vld [vmem:[#allocation2 + $0x70] sm:$0xff]  ;;  %v18472_v42 = vld [vmem:[%s15490_s6 + $0x480] sm:$0xff]  }
 0x367   : > { %9150 = vst.msk [vmem:[#allocation2 + $0x40] sm:$0xff] %vm5177_vm5, %v8894_v56  ;;  %v9405_v3 = vld [vmem:[#allocation2 + $0x38] sm:$0xff]  ;;  %7178 = vst.msk [vmem:[#allocation2 + $0x90] sm:$0xff] %vm5177_vm5, %v6922_v33  ;;  %v6920_v34 = vadd.f32 %v6664_v8, %v5689_v27  ;;  %v7642_v40 = vpop.f32.mrf.mxu0  ;;  %v6670_v0 = vld [vmem:[#allocation2 + $0xb0] sm:$0xff]  ;;  %v13218_v45 = vunpack.c.h.bf16 %v18437_v23  ;;  %v13225_v56 = vunpack.c.l.bf16 %v18454_v29 }
 0x368   : > { %v14539_v6 = vpop.f32.mrf.mxu1  ;;  %11711 = vst.msk [vmem:[%s18394_s8 + $0x4] sm:$0xf] %vm11709_vm6, %v12944_v50  ;;  %v12949_v1 = vpack.c.bf16 %v10435_v20, %v10435_v20  ;;  %v10433_v14 = vadd.f32 %v13209_v31, %v9665_v5  ;;  %v9668_v32 = vadd.f32 %v18362_v16, %v9405_v3  ;;  %v8895_v15 = vadd.f32 %v8639_v22, %v7642_v40  ;;  %v8642_v30 = vld [vmem:[#allocation2 + $0x60] sm:$0xff] }
 0x369   : > { %9153 = vst.msk [vmem:[#allocation2 + $0x58] sm:$0xff] %vm5177_vm5, %v8897_v60  ;;  %7176 = vst.msk [vmem:[#allocation2 + $0x80] sm:$0xff] %vm5177_vm5, %v6920_v34  ;;  %v6923_v49 = vadd.f32 %v14539_v6, %v6667_v51  ;;  %v14802_v35 = vpop.f32.mrf.mxu0  ;;  %14897 = vmatmul.mubr.msk.bf16.gmra.mxu0 %vm3863_vm4, %v18015_v36  ;;  %v6668_v5 = vld [vmem:[#allocation2 + $0xa0] sm:$0xff]  ;;  %v18479_v60 = vld [vmem:[%s18346_s27 + $0x48] sm:$0xff]   ;;  %v13230_v3 = vunpack.c.h.bf16 %v18449_v54  ;;  %v13226_v22 = vunpack.c.h.bf16 %v18454_v29 }
 0x36a   : > { %v9403_v55 = vld [vmem:[#allocation2 + $0x28] sm:$0xff]  ;;  %v5692_v18 = vpop.f32.mrf.mxu1  ;;  %11716 = vst.msk [vmem:[%s18394_s8 + $0x18] sm:$0xf] %vm11709_vm6, %v12949_v1  ;;  %v12947_v38 = vpack.c.bf16 %v10433_v14, %v10433_v14  ;;  %v10436_v19 = vadd.f32 %v13214_v48, %v9668_v32  ;;  %v8900_v58 = vadd.f32 %v14802_v35, %v8644_v13  ;;  %14900 = vmatprep.mubr.msk.bf16.mxu0 %vm3863_vm4, %v21071_v47  ;;  %v8645_v48 = vld [vmem:[#allocation2 + $0x78] sm:$0xff]  ;;  %v5460_v14 = vshll.u32 %v18472_v42, 16 }
 0x36b   : > { %v9666_v12 = vadd.f32 %v18362_v16, %v9403_v55  ;;  %9151 = vst.msk [vmem:[#allocation2 + $0x48] sm:$0xff] %vm5177_vm5, %v8895_v15  ;;  %7179 = vst.msk [vmem:[#allocation2 + $0x98] sm:$0xff] %vm5177_vm5, %v6923_v49  ;;  %v6921_v43 = vadd.f32 %v6665_v17, %v5692_v18  ;;  %v7655_v57 = vpop.f32.mrf.mxu0  ;;  %v18485_v1 = vld [vmem:[%s15490_s6 + $0x488] sm:$0xff]   ;;  %v18493_v49 = vld [vmem:[%s18346_s27 + $0x40] sm:$0xff]   ;;  %v5458_v17 = vshrl.u32 %v18472_v42, 16 }
 0x36c   : > { %v9408_v44 = vld [vmem:[#allocation2 + $0x50] sm:$0xff]  ;;  %v14542_v31 = vpop.f32.mrf.mxu1  ;;  %14637 = vmatmul.mubr.msk.bf16.gmra.mxu1 %vm3863_vm4, %v18015_v36  ;;  %11714 = vst.msk [vmem:[%s18394_s8 + $0x10] sm:$0xf] %vm11709_vm6, %v12947_v38  ;;  %v12950_v24 = vpack.c.bf16 %v10436_v19, %v10436_v19  ;;  %v8898_v2 = vadd.f32 %v8642_v30, %v7655_v57  ;;  %v13229_v36 = vunpack.c.l.bf16 %v18449_v54  ;;  %v8643_v40 = vld [vmem:[#allocation2 + $0x68] sm:$0xff]  ;;  %v13237_v19 = vunpack.c.l.bf16 %v18479_v60 }
 0x36d   : > { %v10434_v25 = vadd.f32 %v13210_v37, %v9666_v12  ;;  %v9671_v41 = vadd.f32 %v18362_v16, %v9408_v44  ;;  %9156 = vst.msk [vmem:[#allocation2 + $0x70] sm:$0xff] %vm5177_vm5, %v8900_v58  ;;  %14640 = vmatprep.mubr.msk.bf16.mxu1 %vm3863_vm4, %v21071_v47  ;;  %7177 = vst.msk [vmem:[#allocation2 + $0x88] sm:$0xff] %vm5177_vm5, %v6921_v43  ;;  %v6926_v46 = vadd.f32 %v14542_v31, %v6670_v0  ;;  %v14803_v53 = vpop.f32.mrf.mxu0  ;;  %v21072_v12 = vld [vmem:[#allocation5_spill] sm:$0xff]  ;;  %v21073_v31 = vld [vmem:[#allocation6_spill] sm:$0xff] }
 0x36e   : > { %v9406_v52 = vld [vmem:[#allocation2 + $0x40] sm:$0xff]  ;;  %v5705_v33 = vpop.f32.mrf.mxu1  ;;  %11717 = vst.msk [vmem:[%s18394_s8 + $0x1c] sm:$0xf] %vm11709_vm6, %v12950_v24  ;;  %v8901_v20 = vadd.f32 %v14803_v53, %v8645_v48  ;;  %v8648_v38 = vld [vmem:[#allocation2 + $0x90] sm:$0xff]  ;;  %v5462_v47 = vrot.slane %v5460_v14, 1  ;;  %v6669_v30 = vld [vmem:[#allocation2 + $0xa8] sm:$0xff]  ;;  %v13233_v61 = vunpack.c.l.bf16 %v18493_v49 }
 0x36f   : > { %v12948_v63 = vpack.c.bf16 %v10434_v25, %v10434_v25  ;;  %v10439_v27 = vadd.f32 %v13221_v59, %v9671_v41  ;;  %v9669_v50 = vadd.f32 %v18362_v16, %v9406_v52  ;;  %9154 = vst.msk [vmem:[#allocation2 + $0x60] sm:$0xff] %vm5177_vm5, %v8898_v2  ;;  %7182 = vst.msk [vmem:[#allocation2 + $0xb0] sm:$0xff] %vm5177_vm5, %v6926_v46  ;;  %v7658_v34 = vpop.f32.mrf.mxu0  ;;  %v6671_v59 = vld [vmem:[#allocation2 + $0xb8] sm:$0xff]  ;;  %v5465_v52 = vshll.u32 %v18485_v1, 16 }
 0x370   : > { %v9409_v8 = vld [vmem:[#allocation2 + $0x58] sm:$0xff]  ;;  %v6924_v37 = vadd.f32 %v6668_v5, %v5705_v33  ;;  %v14543_v6 = vpop.f32.mrf.mxu1  ;;  %9157 = vst.msk [vmem:[#allocation2 + $0x78] sm:$0xff] %vm5177_vm5, %v8901_v20  ;;  %v8899_v55 = vadd.f32 %v8643_v40, %v7658_v34  ;;  %v8646_v2 = vld [vmem:[#allocation2 + $0x80] sm:$0xff]  ;;  %v5463_v0 = vor.u32 %v5462_v47, %v5458_v17  ;;  %v18527_v34 = vld [vmem:[%s15490_s6 + $0x490] sm:$0xff]   ;;  %v5469_v40 = vshrl.u32 %v18485_v1, 16 }
 0x371   : > { %11715 = vst.msk [vmem:[%s18394_s8 + $0x14] sm:$0xf] %vm11709_vm6, %v12948_v63  ;;  %v12953_v32 = vpack.c.bf16 %v10439_v27, %v10439_v27  ;;  %v10437_v15 = vadd.f32 %v13217_v10, %v9669_v50  ;;  %v9672_v51 = vadd.f32 %v18362_v16, %v9409_v8  ;;  %v6927_v13 = vadd.f32 %v14543_v6, %v6671_v59  ;;  %v14806_v18 = vpop.f32.mrf.mxu0  ;;  %v6674_v63 = vld [vmem:[#allocation2 + $0xd0] sm:$0xff]  ;;  %v18522_v27 = vld [vmem:[%s18346_s27 + $0x58] sm:$0xff]  }
 0x372   : > { %v9407_v35 = vld [vmem:[#allocation2 + $0x48] sm:$0xff]  ;;  %7180 = vst.msk [vmem:[#allocation2 + $0xa0] sm:$0xff] %vm5177_vm5, %v6924_v37  ;;  %14901 = vmatmul.mubr.msk.bf16.gmra.mxu0 %vm3863_vm4, %v21072_v12  ;;  %v5708_v58 = vpop.f32.mrf.mxu1  ;;  %9155 = vst.msk [vmem:[#allocation2 + $0x68] sm:$0xff] %vm5177_vm5, %v8899_v55  ;;  %v8904_v57 = vadd.f32 %v14806_v18, %v8648_v38  ;;  %v8649_v23 = vld [vmem:[#allocation2 + $0x98] sm:$0xff]  ;;  %v5467_v37 = vrot.slane %v5465_v52, 1  ;;  %v13234_v18 = vunpack.c.h.bf16 %v18493_v49  ;;  %v13246_v29 = vunpack.c.h.bf16 %v18522_v27 }
 0x373   : > { %11720 = vst.msk [vmem:[%s18394_s8 + $0x28] sm:$0xf] %vm11709_vm6, %v12953_v32  ;;  %v12951_v44 = vpack.c.bf16 %v10437_v15, %v10437_v15  ;;  %v10440_v10 = vadd.f32 %v13222_v21, %v9672_v51  ;;  %v9670_v43 = vadd.f32 %v18362_v16, %v9407_v35  ;;  %14904 = vmatprep.mubr.msk.bf16.mxu0 %vm3863_vm4, %v21073_v31  ;;  %v7671_v41 = vpop.f32.mrf.mxu0  ;;  %v6672_v51 = vld [vmem:[#allocation2 + $0xc0] sm:$0xff] }
 0x374   : > { %v9412_v24 = vld [vmem:[#allocation2 + $0x70] sm:$0xff]  ;;  %7183 = vst.msk [vmem:[#allocation2 + $0xb8] sm:$0xff] %vm5177_vm5, %v6927_v13  ;;  %v6925_v25 = vadd.f32 %v6669_v30, %v5708_v58  ;;  %v14546_v21 = vpop.f32.mrf.mxu1  ;;  %14641 = vmatmul.mubr.msk.bf16.gmra.mxu1 %vm3863_vm4, %v21072_v12  ;;  %9160 = vst.msk [vmem:[#allocation2 + $0x90] sm:$0xff] %vm5177_vm5, %v8904_v57  ;;  %v8902_v33 = vadd.f32 %v8646_v2, %v7671_v41  ;;  %v8647_v13 = vld [vmem:[#allocation2 + $0x88] sm:$0xff]  ;;  %v13245_v12 = vunpack.c.l.bf16 %v18522_v27  ;;  %v5473_v2 = vshll.u32 %v18527_v34, 16 }
 0x375   : > { %11718 = vst.msk [vmem:[%s18394_s8 + $0x20] sm:$0xf] %vm11709_vm6, %v12951_v44  ;;  %v12954_v46 = vpack.c.bf16 %v10440_v10, %v10440_v10  ;;  %v10438_v53 = vadd.f32 %v13218_v45, %v9670_v43  ;;  %v9675_v48 = vadd.f32 %v18362_v16, %v9412_v24  ;;  %14644 = vmatprep.mubr.msk.bf16.mxu1 %vm3863_vm4, %v21073_v31  ;;  %v14807_v5 = vpop.f32.mrf.mxu0  ;;  %v13238_v45 = vunpack.c.h.bf16 %v18479_v60  ;;  %v6675_v10 = vld [vmem:[#allocation2 + $0xd8] sm:$0xff]  ;;  %v18547_v43 = vld [vmem:[%s18346_s27 + $0x50] sm:$0xff]  }
 0x376   : > { %v9410_v50 = vld [vmem:[#allocation2 + $0x60] sm:$0xff]  ;;  %7181 = vst.msk [vmem:[#allocation2 + $0xa8] sm:$0xff] %vm5177_vm5, %v6925_v25  ;;  %v6930_v20 = vadd.f32 %v14546_v21, %v6674_v63  ;;  %v5721_v8 = vpop.f32.mrf.mxu1  ;;  %9158 = vst.msk [vmem:[#allocation2 + $0x80] sm:$0xff] %vm5177_vm5, %v8902_v33  ;;  %v8905_v15 = vadd.f32 %v14807_v5, %v8649_v23  ;;  %v8652_v24 = vld [vmem:[#allocation2 + $0xb0] sm:$0xff]  ;;  %v5471_v41 = vor.u32 %v5469_v40, %v5467_v37  ;;  %v5501_v21 = vrot.slane %v18472_v42, 1 }
 0x377   : > { %11721 = vst.msk [vmem:[%s18394_s8 + $0x2c] sm:$0xf] %vm11709_vm6, %v12954_v46  ;;  %v12952_v6 = vpack.c.bf16 %v10438_v53, %v10438_v53  ;;  %v10443_v14 = vadd.f32 %v13229_v36, %v9675_v48  ;;  %v9673_v32 = vadd.f32 %v18362_v16, %v9410_v50  ;;  %v9413_v55 = vld [vmem:[#allocation2 + $0x78] sm:$0xff]  ;;  %v6928_v59 = vadd.f32 %v6672_v51, %v5721_v8  ;;  %v7674_v35 = vpop.f32.mrf.mxu0  ;;  %v6673_v48 = vld [vmem:[#allocation2 + $0xc8] sm:$0xff]  ;;  %v21075_v33 = vld [vmem:[#allocation8_spill] sm:$0xff] }
 0x378   : > { %7186 = vst.msk [vmem:[#allocation2 + $0xd0] sm:$0xff] %vm5177_vm5, %v6930_v20  ;;  %v14547_v38 = vpop.f32.mrf.mxu1  ;;  %v5468_v36 = vsel %vm1347_vm1, %v5463_v0, %v5467_v37  ;;  %v9676_v47 = vadd.f32 %v18362_v16, %v9413_v55  ;;  %9161 = vst.msk [vmem:[#allocation2 + $0x98] sm:$0xff] %vm5177_vm5, %v8905_v15  ;;  %v8903_v44 = vadd.f32 %v8647_v13, %v7674_v35  ;;  %v21074_v25 = vld [vmem:[#allocation7_spill] sm:$0xff]  ;;  %v13241_v5 = vunpack.c.l.bf16 %v18547_v43 }
 0x379   : > { %11719 = vst.msk [vmem:[%s18394_s8 + $0x24] sm:$0xf] %vm11709_vm6, %v12952_v6  ;;  %v12957_v58 = vpack.c.bf16 %v10443_v14, %v10443_v14  ;;  %v10441_v17 = vadd.f32 %v13225_v56, %v9673_v32  ;;  %5493 = vrot.lane.b32.xlu0 %v5468_v36, %s15425_s12  ;;  %v9411_v57 = vld [vmem:[#allocation2 + $0x68] sm:$0xff]  ;;  %v6931_v30 = vadd.f32 %v14547_v38, %v6675_v10  ;;  %v14810_v31 = vpop.f32.mrf.mxu0  ;;  %v8650_v20 = vld [vmem:[#allocation2 + $0xa0] sm:$0xff]  ;;  %v5502_v23 = vrot.slane %v18485_v1, 1  ;;  %v6678_v14 = vld [vmem:[#allocation2 + $0xf0] sm:$0xff] }
 0x37a   : > { %7184 = vst.msk [vmem:[#allocation2 + $0xc0] sm:$0xff] %vm5177_vm5, %v6928_v59  ;;  %14905 = vmatmul.mubr.msk.bf16.gmra.mxu0 %vm3863_vm4, %v21074_v25  ;;  %v5724_v56 = vpop.f32.mrf.mxu1  ;;  %v10444_v52 = vadd.f32 %v13230_v3, %v9676_v47  ;;  %v9674_v46 = vadd.f32 %v18362_v16, %v9411_v57  ;;  %9159 = vst.msk [vmem:[#allocation2 + $0x88] sm:$0xff] %vm5177_vm5, %v8903_v44  ;;  %v8908_v53 = vadd.f32 %v14810_v31, %v8652_v24  ;;  %v18593_v47 = vld [vmem:[%s18346_s27 + $0x60] sm:$0xff]  }
 0x37b   : > { %11724 = vst.msk [vmem:[%s18394_s8 + $0x38] sm:$0xf] %vm11709_vm6, %v12957_v58  ;;  %v12955_v0 = vpack.c.bf16 %v10441_v17, %v10441_v17  ;;  %14908 = vmatprep.mubr.msk.bf16.mxu0 %vm3863_vm4, %v21075_v33  ;;  %v9416_v63 = vld [vmem:[#allocation2 + $0x90] sm:$0xff]  ;;  %v6929_v42 = vadd.f32 %v6673_v48, %v5724_v56  ;;  %v7687_v50 = vpop.f32.mrf.mxu0  ;;  %v18567_v3 = vrot.slane %v5473_v2, 1  ;;  %v8653_v51 = vld [vmem:[#allocation2 + $0xb8] sm:$0xff]  ;;  %v5503_v59 = vsel %vm2756_vm0, %v5501_v21, %v5502_v23  ;;  %v6676_v58 = vld [vmem:[#allocation2 + $0xe0] sm:$0xff] }
 0x37c   : > { %7187 = vst.msk [vmem:[#allocation2 + $0xd8] sm:$0xff] %vm5177_vm5, %v6931_v30  ;;  %v14550_v54 = vpop.f32.mrf.mxu1  ;;  %14645 = vmatmul.mubr.msk.bf16.gmra.mxu1 %vm3863_vm4, %v21074_v25  ;;  %v12958_v8 = vpack.c.bf16 %v10444_v52, %v10444_v52  ;;  %v10442_v37 = vadd.f32 %v13226_v22, %v9674_v46  ;;  %v9679_v40 = vadd.f32 %v18362_v16, %v9416_v63  ;;  %9164 = vst.msk [vmem:[#allocation2 + $0xb0] sm:$0xff] %vm5177_vm5, %v8908_v53  ;;  %v18590_v17 = vld [vmem:[%s18346_s27 + $0x68] sm:$0xff]   ;;  %v18601_v25 = vld [vmem:[%s15490_s6 + $0x498] sm:$0xff]  }
 0x37d   : > { %11722 = vst.msk [vmem:[%s18394_s8 + $0x30] sm:$0xf] %vm11709_vm6, %v12955_v0  ;;  %v8906_v6 = vadd.f32 %v8650_v20, %v7687_v50  ;;  %14648 = vmatprep.mubr.msk.bf16.mxu1 %vm3863_vm4, %v21075_v33  ;;  %v9414_v32 = vld [vmem:[#allocation2 + $0x80] sm:$0xff]  ;;  %v6934_v1 = vadd.f32 %v14550_v54, %v6678_v14  ;;  %v14811_v15 = vpop.f32.mrf.mxu0  ;;  %v5476_v55 = vsel %vm1347_vm1, %v5471_v41, %v18567_v3  ;;  %v13242_v30 = vunpack.c.h.bf16 %v18547_v43  ;;  %v6679_v52 = vld [vmem:[#allocation2 + $0xf8] sm:$0xff]  ;;  %v6677_v14 = vld [vmem:[#allocation2 + $0xe8] sm:$0xff] }
 0x37e   : > { %7185 = vst.msk [vmem:[#allocation2 + $0xc8] sm:$0xff] %vm5177_vm5, %v6929_v42  ;;  %v5737_v22 = vpop.f32.mrf.mxu1  ;;  %v12956_v35 = vpack.c.bf16 %v10442_v37, %v10442_v37  ;;  %v10447_v13 = vadd.f32 %v13237_v19, %v9679_v40  ;;  %v9677_v38 = vadd.f32 %v18362_v16, %v9414_v32  ;;  %v8909_v36 = vadd.f32 %v14811_v15, %v8653_v51  ;;  %v8651_v19 = vld [vmem:[#allocation2 + $0xa8] sm:$0xff]  ;;  %v18619_v54 = vld [vmem:[%s15490_s6 + $0x4a0] ss:$0 sps:$4 sm:$0x11]   ;;  %v21077_v32 = vld [vmem:[#allocation10_spill] sm:$0xff] }
 0x37f   : > { %11725 = vst.msk [vmem:[%s18394_s8 + $0x3c] sm:$0xf] %vm11709_vm6, %v12958_v8  ;;  %5495 = vrot.lane.b32.xlu1 %v5476_v55, %s15425_s12  ;;  %v9417_v44 = vld [vmem:[#allocation2 + $0x98] sm:$0xff]  ;;  %v6932_v10 = vadd.f32 %v6676_v58, %v5737_v22  ;;  %v7690_v57 = vpop.f32.mrf.mxu0  ;;  %5510 = vrot.lane.b32.xlu0 %v5503_v59, %s15424_s11  ;;  %v5504_v24 = vrot.slane %v18527_v34, 1  ;;  %v5477_v56 = vshrl.u32 %v18527_v34, 16  ;;  %v8656_v33 = vld [vmem:[#allocation2 + $0xd0] sm:$0xff]  ;;  %v13253_v63 = vunpack.c.l.bf16 %v18590_v17 }
 0x380   : > { %9162 = vst.msk [vmem:[#allocation2 + $0xa0] sm:$0xff] %vm5177_vm5, %v8906_v6  ;;  %7190 = vst.msk [vmem:[#allocation2 + $0xf0] sm:$0xff] %vm5177_vm5, %v6934_v1  ;;  %v14551_v31 = vpop.f32.mrf.mxu1  ;;  %v12961_v41 = vpack.c.bf16 %v10447_v13, %v10447_v13  ;;  %v10445_v2 = vadd.f32 %v13233_v61, %v9677_v38  ;;  %v9680_v21 = vadd.f32 %v18362_v16, %v9417_v44  ;;  %v21076_v42 = vld [vmem:[#allocation9_spill] sm:$0xff]  ;;  %v13249_v61 = vunpack.c.l.bf16 %v18593_v47 }
 0x381   : > { %11723 = vst.msk [vmem:[%s18394_s8 + $0x34] sm:$0xf] %vm11709_vm6, %v12956_v35  ;;  %v8907_v0 = vadd.f32 %v8651_v19, %v7690_v57  ;;  %v9415_v46 = vld [vmem:[#allocation2 + $0x88] sm:$0xff]  ;;  %v6935_v53 = vadd.f32 %v14551_v31, %v6679_v52  ;;  %v14814_v48 = vpop.f32.mrf.mxu0  ;;  %v5505_v20 = vsel %vm2756_vm0, %v5502_v23, %v5504_v24  ;;  %v8654_v51 = vld [vmem:[#allocation2 + $0xc0] sm:$0xff]  ;;  %v5479_v60 = vor.u32 %v5477_v56, %v18567_v3 }
 0x382   : > { %9165 = vst.msk [vmem:[#allocation2 + $0xb8] sm:$0xff] %vm5177_vm5, %v8909_v36  ;;  %7188 = vst.msk [vmem:[#allocation2 + $0xe0] sm:$0xff] %vm5177_vm5, %v6932_v10  ;;  %14909 = vmatmul.mubr.msk.bf16.gmra.mxu0 %vm3863_vm4, %v21076_v42  ;;  %v5740_v50 = vpop.f32.mrf.mxu1  ;;  %v12959_v8 = vpack.c.bf16 %v10445_v2, %v10445_v2  ;;  %v10448_v37 = vadd.f32 %v13238_v45, %v9680_v21  ;;  %v9678_v40 = vadd.f32 %v18362_v16, %v9415_v46  ;;  %v6682_v36 = vld [vmem:[#allocation2 + $0x110] sm:$0xff]  ;;  %v6680_v21 = vld [vmem:[#allocation2 + $0x100] sm:$0xff] }
 0x383   : > { %11728 = vst.msk [vmem:[%s18394_s8 + $0x48] sm:$0xf] %vm11709_vm6, %v12961_v41  ;;  %v8912_v6 = vadd.f32 %v14814_v48, %v8656_v33  ;;  %14912 = vmatprep.mubr.msk.bf16.mxu0 %vm3863_vm4, %v21077_v32  ;;  %v9420_v1 = vld [vmem:[#allocation2 + $0xb0] sm:$0xff]  ;;  %v6933_v23 = vadd.f32 %v6677_v14, %v5740_v50  ;;  %v7703_v15 = vpop.f32.mrf.mxu0  ;;  %5512 = vrot.lane.b32.xlu1 %v5505_v20, %s15424_s11  ;;  %v5481_v45 = vshll.u32 %v18601_v25, 16  ;;  %v5485_v55 = vshrl.u32 %v18601_v25, 16  ;;  %v8657_v10 = vld [vmem:[#allocation2 + $0xd8] sm:$0xff] }
 0x384   : > { %9163 = vst.msk [vmem:[#allocation2 + $0xa8] sm:$0xff] %vm5177_vm5, %v8907_v0  ;;  %7191 = vst.msk [vmem:[#allocation2 + $0xf8] sm:$0xff] %vm5177_vm5, %v6935_v53  ;;  %v14554_v22 = vpop.f32.mrf.mxu1  ;;  %14649 = vmatmul.mubr.msk.bf16.gmra.mxu1 %vm3863_vm4, %v21076_v42  ;;  %v12962_v59 = vpack.c.bf16 %v10448_v37, %v10448_v37  ;;  %v10446_v35 = vadd.f32 %v13234_v18, %v9678_v40  ;;  %v9683_v13 = vadd.f32 %v18362_v16, %v9420_v1  ;;  %v18654_v0 = vld [vmem:[%s18346_s27 + $0x78] sm:$0xff]   ;;  %v18666_v14 = vld [vmem:[%s18346_s27 + $0x70] sm:$0xff]  }
 0x385   : > { %11726 = vst.msk [vmem:[%s18394_s8 + $0x40] sm:$0xf] %vm11709_vm6, %v12959_v8  ;;  %v8910_v38 = vadd.f32 %v8654_v51, %v7703_v15  ;;  %14652 = vmatprep.mubr.msk.bf16.mxu1 %vm3863_vm4, %v21077_v32  ;;  %v6938_v58 = vadd.f32 %v14554_v22, %v6682_v36  ;;  %v14815_v44 = vpop.f32.mrf.mxu0  ;;  %v13254_v49 = vunpack.c.h.bf16 %v18590_v17  ;;  %v5483_v18 = vrot.slane %v5481_v45, 1  ;;  %v8655_v48 = vld [vmem:[#allocation2 + $0xc8] sm:$0xff]  ;;  %v21079_v36 = vld [vmem:[#allocation12_spill] sm:$0xff] }
 0x386   : > { %9168 = vst.msk [vmem:[#allocation2 + $0xd0] sm:$0xff] %vm5177_vm5, %v8912_v6  ;;  %7189 = vst.msk [vmem:[#allocation2 + $0xe8] sm:$0xff] %vm5177_vm5, %v6933_v23  ;;  %v5753_v57 = vpop.f32.mrf.mxu1  ;;  %v5489_v19 = vshll.u32 %v18619_v54, 16  ;;  %v12960_v31 = vpack.c.bf16 %v10446_v35, %v10446_v35  ;;  %v10451_v56 = vadd.f32 %v13245_v12, %v9683_v13  ;;  %v8913_v2 = vadd.f32 %v14815_v44, %v8657_v10  ;;  %v6683_v6 = vld [vmem:[#allocation2 + $0x118] sm:$0xff] }
 0x387   : > { %v9418_v3 = vld [vmem:[#allocation2 + $0xa0] sm:$0xff]  ;;  %11729 = vst.msk [vmem:[%s18394_s8 + $0x4c] sm:$0xf] %vm11709_vm6, %v12962_v59  ;;  %v6936_v46 = vadd.f32 %v6680_v21, %v5753_v57  ;;  %v7706_v53 = vpop.f32.mrf.mxu0  ;;  %v13250_v33 = vunpack.c.h.bf16 %v18593_v47  ;;  %v5484_v12 = vsel %vm1347_vm1, %v5479_v60, %v5483_v18  ;;  %v5487_v50 = vor.u32 %v5485_v55, %v5483_v18  ;;  %v8660_v15 = vld [vmem:[#allocation2 + $0xf0] sm:$0xff] }
 0x388   : > { %v9681_v41 = vadd.f32 %v18362_v16, %v9418_v3  ;;  %9166 = vst.msk [vmem:[#allocation2 + $0xc0] sm:$0xff] %vm5177_vm5, %v8910_v38  ;;  %7194 = vst.msk [vmem:[#allocation2 + $0x110] sm:$0xff] %vm5177_vm5, %v6938_v58  ;;  %v14555_v42 = vpop.f32.mrf.mxu1  ;;  %v12965_v20 = vpack.c.bf16 %v10451_v56, %v10451_v56  ;;  %v8911_v40 = vadd.f32 %v8655_v48, %v7706_v53  ;;  %5497 = vrot.lane.b32.xlu0 %v5484_v12, %s15425_s12  ;;  %v6681_v38 = vld [vmem:[#allocation2 + $0x108] sm:$0xff] }
 0x389   : > { %v9421_v52 = vld [vmem:[#allocation2 + $0xb8] sm:$0xff]  ;;  %11727 = vst.msk [vmem:[%s18394_s8 + $0x44] sm:$0xf] %vm11709_vm6, %v12960_v31  ;;  %v6939_v1 = vadd.f32 %v14555_v42, %v6683_v6  ;;  %v14818_v23 = vpop.f32.mrf.mxu0  ;;  %v13261_v51 = vunpack.c.l.bf16 %v18654_v0  ;;  %v5491_v60 = vrot.slane %v5489_v19, 1  ;;  %v5506_v45 = vrot.slane %v18601_v25, 1  ;;  %v8658_v44 = vld [vmem:[#allocation2 + $0xe0] sm:$0xff] }
 0x38a   : > { %v10449_v8 = vadd.f32 %v13241_v5, %v9681_v41  ;;  %v9684_v37 = vadd.f32 %v18362_v16, %v9421_v52  ;;  %9169 = vst.msk [vmem:[#allocation2 + $0xd8] sm:$0xff] %vm5177_vm5, %v8913_v2  ;;  %7192 = vst.msk [vmem:[#allocation2 + $0x100] sm:$0xff] %vm5177_vm5, %v6936_v46  ;;  %v21078_v5 = vld [vmem:[#allocation11_spill] sm:$0xff]  ;;  %v5756_v22 = vpop.f32.mrf.mxu1  ;;  %v8916_v13 = vadd.f32 %v14818_v23, %v8660_v15  ;;  %v13257_v27 = vunpack.c.l.bf16 %v18666_v14  ;;  %v18691_v18 = vld [vmem:[%s15490_s6 + $0x4a4] sm:$0xff]  }
 0x38b   : > { %v9419_v32 = vld [vmem:[#allocation2 + $0xa8] sm:$0xff]  ;;  %14913 = vmatmul.mubr.msk.bf16.gmra.mxu0 %vm3863_vm4, %v21078_v5  ;;  %11732 = vst.msk [vmem:[%s18394_s8 + $0x58] sm:$0xf] %vm11709_vm6, %v12965_v20  ;;  %v6937_v25 = vadd.f32 %v6681_v38, %v5756_v22  ;;  %v7719_v58 = vpop.f32.mrf.mxu0  ;;  %v5492_v10 = vsel %vm1347_vm1, %v5487_v50, %v5491_v60  ;;  %v5507_v57 = vsel %vm2756_vm0, %v5504_v24, %v5506_v45  ;;  %v6686_v2 = vld [vmem:[#allocation2 + $0x130] sm:$0xff]  ;;  %v8661_v52 = vld [vmem:[#allocation2 + $0xf8] sm:$0xff]  ;;  %v13262_v43 = vunpack.c.h.bf16 %v18654_v0 }
 0x38c   : > { %v12963_v55 = vpack.c.bf16 %v10449_v8, %v10449_v8  ;;  %v10452_v59 = vadd.f32 %v13246_v29, %v9684_v37  ;;  %v9682_v35 = vadd.f32 %v18362_v16, %v9419_v32  ;;  %9167 = vst.msk [vmem:[#allocation2 + $0xc8] sm:$0xff] %vm5177_vm5, %v8911_v40  ;;  %14916 = vmatprep.mubr.msk.bf16.mxu0 %vm3863_vm4, %v21079_v36  ;;  %7195 = vst.msk [vmem:[#allocation2 + $0x118] sm:$0xff] %vm5177_vm5, %v6939_v1  ;;  %v14558_v29 = vpop.f32.mrf.mxu1  ;;  %v18708_v48 = vld [vmem:[%s15490_s6 + $0x4ac] sm:$0xff]   ;;  %v6684_v8 = vld [vmem:[#allocation2 + $0x120] sm:$0xff] }
 0x38d   : > { %v9424_v3 = vld [vmem:[#allocation2 + $0xd0] sm:$0xff]  ;;  %14653 = vmatmul.mubr.msk.bf16.gmra.mxu1 %vm3863_vm4, %v21078_v5  ;;  %9172 = vst.msk [vmem:[#allocation2 + $0xf0] sm:$0xff] %vm5177_vm5, %v8916_v13  ;;  %v8914_v41 = vadd.f32 %v8658_v44, %v7719_v58  ;;  %7193 = vst.msk [vmem:[#allocation2 + $0x108] sm:$0xff] %vm5177_vm5, %v6937_v25  ;;  %v6942_v24 = vadd.f32 %v14558_v29, %v6686_v2  ;;  %v14819_v21 = vpop.f32.mrf.mxu0  ;;  %v13258_v46 = vunpack.c.h.bf16 %v18666_v14  ;;  %5499 = vrot.lane.b32.xlu1 %v5492_v10, %s15425_s12  ;;  %v18717_v37 = vld [vmem:[%s18346_s27 + $0x88] sm:$0xff]  }
 0x38e   : > { %11730 = vst.msk [vmem:[%s18394_s8 + $0x50] sm:$0xf] %vm11709_vm6, %v12963_v55  ;;  %v12966_v19 = vpack.c.bf16 %v10452_v59, %v10452_v59  ;;  %v10450_v31 = vadd.f32 %v13242_v30, %v9682_v35  ;;  %v9687_v56 = vadd.f32 %v18362_v16, %v9424_v3  ;;  %14656 = vmatprep.mubr.msk.bf16.mxu1 %vm3863_vm4, %v21079_v36  ;;  %v5769_v30 = vpop.f32.mrf.mxu1  ;;  %v5508_v53 = vrot.slane %v18619_v54, 1  ;;  %v8659_v32 = vld [vmem:[#allocation2 + $0xe8] sm:$0xff]  ;;  %v6687_v59 = vld [vmem:[#allocation2 + $0x138] sm:$0xff] }
 0x38f   : > { %v9422_v34 = vld [vmem:[#allocation2 + $0xc0] sm:$0xff]  ;;  %5514 = vrot.lane.b32.xlu0 %v5507_v57, %s15424_s11  ;;  %9170 = vst.msk [vmem:[#allocation2 + $0xe0] sm:$0xff] %vm5177_vm5, %v8914_v41  ;;  %v8917_v20 = vadd.f32 %v14819_v21, %v8661_v52  ;;  %7198 = vst.msk [vmem:[#allocation2 + $0x130] sm:$0xff] %vm5177_vm5, %v6942_v24  ;;  %v6940_v54 = vadd.f32 %v6684_v8, %v5769_v30  ;;  %v7722_v6 = vpop.f32.mrf.mxu0  ;;  %v7440_v15 = vshrl.u32 %v18691_v18, 16  ;;  %v8664_v38 = vld [vmem:[#allocation2 + $0x110] sm:$0xff]  ;;  %v13269_v36 = vunpack.c.l.bf16 %v18717_v37 }
 0x390   : > { %11733 = vst.msk [vmem:[%s18394_s8 + $0x5c] sm:$0xf] %vm11709_vm6, %v12966_v19  ;;  %v12964_v42 = vpack.c.bf16 %v10450_v31, %v10450_v31  ;;  %v10455_v12 = vadd.f32 %v13253_v63, %v9687_v56  ;;  %v9685_v50 = vadd.f32 %v18362_v16, %v9422_v34  ;;  %v14559_v1 = vpop.f32.mrf.mxu1  ;;  %v5509_v23 = vsel %vm2756_vm0, %v5506_v45, %v5508_v53  ;;  %v21080_v3 = vld [vmem:[#allocation13_spill] sm:$0xff]  ;;  %v18736_v44 = vld [vmem:[%s15490_s6 + $0x4b4] sm:$0xff]  }
 0x391   : > { %v9425_v40 = vld [vmem:[#allocation2 + $0xd8] sm:$0xff]  ;;  %v7442_v63 = vshll.u32 %v18691_v18, 16  ;;  %9173 = vst.msk [vmem:[#allocation2 + $0xf8] sm:$0xff] %vm5177_vm5, %v8917_v20  ;;  %v8915_v55 = vadd.f32 %v8659_v32, %v7722_v6  ;;  %7196 = vst.msk [vmem:[#allocation2 + $0x120] sm:$0xff] %vm5177_vm5, %v6940_v54  ;;  %v6943_v45 = vadd.f32 %v14559_v1, %v6687_v59  ;;  %v14822_v13 = vpop.f32.mrf.mxu0  ;;  %5516 = vrot.lane.b32.xlu1 %v5509_v23, %s15424_s11  ;;  %v7447_v58 = vshll.u32 %v18708_v48, 16  ;;  %v6685_v31 = vld [vmem:[#allocation2 + $0x128] sm:$0xff] }
 0x392   : > { %11731 = vst.msk [vmem:[%s18394_s8 + $0x54] sm:$0xf] %vm11709_vm6, %v12964_v42  ;;  %v12969_v5 = vpack.c.bf16 %v10455_v12, %v10455_v12  ;;  %v10453_v22 = vadd.f32 %v13249_v61, %v9685_v50  ;;  %v9688_v60 = vadd.f32 %v18362_v16, %v9425_v40  ;;  %v5772_v61 = vpop.f32.mrf.mxu1  ;;  %v8920_v19 = vadd.f32 %v14822_v13, %v8664_v38  ;;  %v21081_v56 = vld [vmem:[#allocation14_spill] sm:$0xff]  ;;  %v8662_v24 = vld [vmem:[#allocation2 + $0x100] sm:$0xff] }
 0x393   : > { %v9423_v35 = vld [vmem:[#allocation2 + $0xc8] sm:$0xff]  ;;  %14917 = vmatmul.mubr.msk.bf16.gmra.mxu0 %vm3863_vm4, %v21080_v3  ;;  %v7444_v25 = vrot.slane %v7442_v63, 1  ;;  %9171 = vst.msk [vmem:[#allocation2 + $0xe8] sm:$0xff] %vm5177_vm5, %v8915_v55  ;;  %7199 = vst.msk [vmem:[#allocation2 + $0x138] sm:$0xff] %vm5177_vm5, %v6943_v45  ;;  %v6941_v2 = vadd.f32 %v6685_v31, %v5772_v61  ;;  %v7735_v34 = vpop.f32.mrf.mxu0  ;;  %v7451_v52 = vshrl.u32 %v18708_v48, 16  ;;  %v18757_v50 = vld [vmem:[%s18346_s27 + $0x80] sm:$0xff]  }
 0x394   : > { %11736 = vst.msk [vmem:[%s18394_s8 + $0x68] sm:$0xf] %vm11709_vm6, %v12969_v5  ;;  %v12967_v29 = vpack.c.bf16 %v10453_v22, %v10453_v22  ;;  %v10456_v10 = vadd.f32 %v13254_v49, %v9688_v60  ;;  %v9686_v57 = vadd.f32 %v18362_v16, %v9423_v35  ;;  %14920 = vmatprep.mubr.msk.bf16.mxu0 %vm3863_vm4, %v21081_v56  ;;  %v9428_v41 = vld [vmem:[#allocation2 + $0xf0] sm:$0xff]  ;;  %v14562_v21 = vpop.f32.mrf.mxu1  ;;  %v7449_v49 = vrot.slane %v7447_v58, 1  ;;  %v8665_v6 = vld [vmem:[#allocation2 + $0x118] sm:$0xff]  ;;  %v6688_v22 = vld [vmem:[#allocation2 + $0x140] sm:$0xff] }
 0x395   : > { %14657 = vmatmul.mubr.msk.bf16.gmra.mxu1 %vm3863_vm4, %v21080_v3  ;;  %v7445_v17 = vor.u32 %v7444_v25, %v7440_v15  ;;  %v9691_v42 = vadd.f32 %v18362_v16, %v9428_v41  ;;  %9176 = vst.msk [vmem:[#allocation2 + $0x110] sm:$0xff] %vm5177_vm5, %v8920_v19  ;;  %v8918_v12 = vadd.f32 %v8662_v24, %v7735_v34  ;;  %v6690_v20 = vld [vmem:[#allocation2 + $0x150] sm:$0xff]  ;;  %7197 = vst.msk [vmem:[#allocation2 + $0x128] sm:$0xff] %vm5177_vm5, %v6941_v2  ;;  %v14823_v54 = vpop.f32.mrf.mxu0  ;;  %v18771_v15 = vld [vmem:[%s20810_s2] ss:$0 sm:$0xff] }
 0x396   : > { %11734 = vst.msk [vmem:[%s18394_s8 + $0x60] sm:$0xf] %vm11709_vm6, %v12967_v29  ;;  %v12970_v30 = vpack.c.bf16 %v10456_v10, %v10456_v10  ;;  %v10454_v53 = vadd.f32 %v13250_v33, %v9686_v57  ;;  %14660 = vmatprep.mubr.msk.bf16.mxu1 %vm3863_vm4, %v21081_v56  ;;  %v9426_v8 = vld [vmem:[#allocation2 + $0xe0] sm:$0xff]  ;;  %v6946_v40 = vadd.f32 %v14562_v21, %v6690_v20  ;;  %v5785_v47 = vpop.f32.mrf.mxu1  ;;  %v7455_v16 = vshll.u32 %v18736_v44, 16  ;;  %v8663_v35 = vld [vmem:[#allocation2 + $0x108] sm:$0xff]  ;;  %v6691_v29 = vld [vmem:[#allocation2 + $0x158] sm:$0xff] }
 0x397   : > { %v7450_v33 = vsel %vm1347_vm1, %v7445_v17, %v7449_v49  ;;  %v7453_v32 = vor.u32 %v7451_v52, %v7449_v49  ;;  %v10459_v23 = vadd.f32 %v13261_v51, %v9691_v42  ;;  %v9689_v63 = vadd.f32 %v18771_v15, %v9426_v8  ;;  %9174 = vst.msk [vmem:[#allocation2 + $0x100] sm:$0xff] %vm5177_vm5, %v8918_v12  ;;  %v7738_v59 = vpop.f32.mrf.mxu0  ;;  %v8668_v31 = vld [vmem:[#allocation2 + $0x130] sm:$0xff]  ;;  %v21082_v56 = vld [vmem:[#allocation15_spill] sm:$0xff]  ;;  %v6689_v52 = vld [vmem:[#allocation2 + $0x148] sm:$0xff] }
 0x398   : > { %11737 = vst.msk [vmem:[%s18394_s8 + $0x6c] sm:$0xf] %vm11709_vm6, %v12970_v30  ;;  %v12968_v1 = vpack.c.bf16 %v10454_v53, %v10454_v53  ;;  %v8921_v5 = vadd.f32 %v14823_v54, %v8665_v6  ;;  %7475 = vrot.lane.b32.xlu0 %v7450_v33, %s15425_s12  ;;  %v9429_v60 = vld [vmem:[#allocation2 + $0xf8] sm:$0xff]  ;;  %v13265_v55 = vunpack.c.l.bf16 %v18757_v50  ;;  %v6944_v51 = vadd.f32 %v6688_v22, %v5785_v47  ;;  %v14563_v45 = vpop.f32.mrf.mxu1  ;;  %v21083_v30 = vld [vmem:[#allocation16_spill] sm:$0xff] }
 0x399   : > { %7202 = vst.msk [vmem:[#allocation2 + $0x150] sm:$0xff] %vm5177_vm5, %v6946_v40  ;;  %v18778_v13 = vrot.slane %v7455_v16, 1  ;;  %v7483_v38 = vrot.slane %v18691_v18, 1  ;;  %v12973_v3 = vpack.c.bf16 %v10459_v23, %v10459_v23  ;;  %v10457_v61 = vadd.f32 %v13257_v27, %v9689_v63  ;;  %v14826_v19 = vpop.f32.mrf.mxu0  ;;  %v18795_v34 = vld [vmem:[%s15490_s6 + $0x4bc] sm:$0xff]  }
 0x39a   : > { %11735 = vst.msk [vmem:[%s18394_s8 + $0x64] sm:$0xf] %vm11709_vm6, %v12968_v1  ;;  %v9692_v25 = vadd.f32 %v18771_v15, %v9429_v60  ;;  %v8919_v58 = vadd.f32 %v8663_v35, %v7738_v59  ;;  %v9427_v10 = vld [vmem:[#allocation2 + $0xe8] sm:$0xff]  ;;  %v13270_v57 = vunpack.c.h.bf16 %v18717_v37  ;;  %v6947_v18 = vadd.f32 %v14563_v45, %v6691_v29  ;;  %v5788_v41 = vpop.f32.mrf.mxu1  ;;  %v8666_v0 = vld [vmem:[#allocation2 + $0x120] sm:$0xff]  ;;  %v18819_v47 = vld [vmem:[%s18346_s27 + $0x98] sm:$0xff]  }
 0x39b   : > { %9177 = vst.msk [vmem:[#allocation2 + $0x118] sm:$0xff] %vm5177_vm5, %v8921_v5  ;;  %7200 = vst.msk [vmem:[#allocation2 + $0x140] sm:$0xff] %vm5177_vm5, %v6944_v51  ;;  %14921 = vmatmul.mubr.msk.bf16.gmra.mxu0 %vm3863_vm4, %v21082_v56  ;;  %v7458_v27 = vsel %vm1347_vm1, %v7453_v32, %v18778_v13  ;;  %v7484_v2 = vrot.slane %v18708_v48, 1  ;;  %v12971_v24 = vpack.c.bf16 %v10457_v61, %v10457_v61  ;;  %v13266_v48 = vunpack.c.h.bf16 %v18757_v50  ;;  %v7751_v12 = vpop.f32.mrf.mxu0  ;;  %v6694_v32 = vld [vmem:[#allocation2 + $0x170] sm:$0xff] }
 0x39c   : > { %11740 = vst.msk [vmem:[%s18394_s8 + $0x78] sm:$0xf] %vm11709_vm6, %v12973_v3  ;;  %v10460_v21 = vadd.f32 %v13262_v43, %v9692_v25  ;;  %v9690_v17 = vadd.f32 %v18771_v15, %v9427_v10  ;;  %v8924_v49 = vadd.f32 %v14826_v19, %v8668_v31  ;;  %14924 = vmatprep.mubr.msk.bf16.mxu0 %vm3863_vm4, %v21083_v30  ;;  %v9432_v53 = vld [vmem:[#allocation2 + $0x110] sm:$0xff]  ;;  %v14566_v43 = vpop.f32.mrf.mxu1  ;;  %v7486_v8 = vrot.slane %v18736_v44, 1  ;;  %v8667_v29 = vld [vmem:[#allocation2 + $0x128] sm:$0xff] }
 0x39d   : > { %9175 = vst.msk [vmem:[#allocation2 + $0x108] sm:$0xff] %vm5177_vm5, %v8919_v58  ;;  %7203 = vst.msk [vmem:[#allocation2 + $0x158] sm:$0xff] %vm5177_vm5, %v6947_v18  ;;  %v6945_v42 = vadd.f32 %v6689_v52, %v5788_v41  ;;  %14661 = vmatmul.mubr.msk.bf16.gmra.mxu1 %vm3863_vm4, %v21082_v56  ;;  %7477 = vrot.lane.b32.xlu1 %v7458_v27, %s15425_s12  ;;  %v7485_v20 = vsel %vm2756_vm0, %v7483_v38, %v7484_v2  ;;  %v18824_v16 = vld [vmem:[%s15490_s6 + $0x4c4] ss:$0 sps:$4 sm:$0x11]   ;;  %v14827_v14 = vpop.f32.mrf.mxu0  ;;  %v7459_v22 = vshrl.u32 %v18736_v44, 16 }
 0x39e   : > { %11738 = vst.msk [vmem:[%s18394_s8 + $0x70] sm:$0xf] %vm11709_vm6, %v12971_v24  ;;  %v12974_v40 = vpack.c.bf16 %v10460_v21, %v10460_v21  ;;  %v10458_v54 = vadd.f32 %v13258_v46, %v9690_v17  ;;  %v9695_v6 = vadd.f32 %v18771_v15, %v9432_v53  ;;  %v8922_v33 = vadd.f32 %v8666_v0, %v7751_v12  ;;  %v9430_v1 = vld [vmem:[#allocation2 + $0x100] sm:$0xff]  ;;  %v8669_v46 = vld [vmem:[#allocation2 + $0x138] sm:$0xff]  ;;  %v5801_v63 = vpop.f32.mrf.mxu1  ;;  %v18849_v41 = vld [vmem:[%s18346_s27 + $0x90] sm:$0xff]  }
 0x39f   : > { %9180 = vst.msk [vmem:[#allocation2 + $0x130] sm:$0xff] %vm5177_vm5, %v8924_v49  ;;  %14664 = vmatprep.mubr.msk.bf16.mxu1 %vm3863_vm4, %v21083_v30  ;;  %7201 = vst.msk [vmem:[#allocation2 + $0x148] sm:$0xff] %vm5177_vm5, %v6945_v42  ;;  %v6950_v23 = vadd.f32 %v14566_v43, %v6694_v32  ;;  %7492 = vrot.lane.b32.xlu0 %v7485_v20, %s15424_s11  ;;  %v7487_v5 = vsel %vm2756_vm0, %v7484_v2, %v7486_v8  ;;  %v7463_v60 = vshll.u32 %v18795_v34, 16  ;;  %v6692_v38 = vld [vmem:[#allocation2 + $0x160] sm:$0xff]  ;;  %v7754_v58 = vpop.f32.mrf.mxu0  ;;  %v6695_v2 = vld [vmem:[#allocation2 + $0x178] sm:$0xff] }
 0x3a0   : > { %11741 = vst.msk [vmem:[%s18394_s8 + $0x7c] sm:$0xf] %vm11709_vm6, %v12974_v40  ;;  %v12972_v51 = vpack.c.bf16 %v10458_v54, %v10458_v54  ;;  %v10463_v59 = vadd.f32 %v13269_v36, %v9695_v6  ;;  %v9693_v35 = vadd.f32 %v18771_v15, %v9430_v1  ;;  %v8925_v45 = vadd.f32 %v14827_v14, %v8669_v46  ;;  %v14567_v10 = vpop.f32.mrf.mxu1  ;;  %v8672_v17 = vld [vmem:[#allocation2 + $0x150] sm:$0xff]  ;;  %v21084_v49 = vld [vmem:[#allocation17_spill] sm:$0xff] }
 0x3a1   : > { %9178 = vst.msk [vmem:[#allocation2 + $0x120] sm:$0xff] %vm5177_vm5, %v8922_v33  ;;  %v13277_v61 = vunpack.c.l.bf16 %v18819_v47  ;;  %7206 = vst.msk [vmem:[#allocation2 + $0x170] sm:$0xff] %vm5177_vm5, %v6950_v23  ;;  %v6948_v25 = vadd.f32 %v6692_v38, %v5801_v63  ;;  %7494 = vrot.lane.b32.xlu1 %v7487_v5, %s15424_s11  ;;  %v7461_v36 = vor.u32 %v7459_v22, %v18778_v13  ;;  %v7465_v18 = vrot.slane %v7463_v60, 1  ;;  %v14830_v21 = vpop.f32.mrf.mxu0  ;;  %v6693_v20 = vld [vmem:[#allocation2 + $0x168] sm:$0xff]  ;;  %v21085_v40 = vld [vmem:[#allocation18_spill] sm:$0xff] }
 0x3a2   : > { %v9433_v3 = vld [vmem:[#allocation2 + $0x118] sm:$0xff]  ;;  %11739 = vst.msk [vmem:[%s18394_s8 + $0x74] sm:$0xf] %vm11709_vm6, %v12972_v51  ;;  %v12977_v19 = vpack.c.bf16 %v10463_v59, %v10463_v59  ;;  %v10461_v31 = vadd.f32 %v13265_v55, %v9693_v35  ;;  %v8923_v27 = vadd.f32 %v8667_v29, %v7754_v58  ;;  %v6951_v13 = vadd.f32 %v14567_v10, %v6695_v2  ;;  %v5804_v52 = vpop.f32.mrf.mxu1  ;;  %v8670_v1 = vld [vmem:[#allocation2 + $0x140] sm:$0xff]  ;;  %v6698_v22 = vld [vmem:[#allocation2 + $0x190] sm:$0xff] }
 0x3a3   : > { %v9696_v56 = vadd.f32 %v18771_v15, %v9433_v3  ;;  %9181 = vst.msk [vmem:[#allocation2 + $0x138] sm:$0xff] %vm5177_vm5, %v8925_v45  ;;  %7204 = vst.msk [vmem:[#allocation2 + $0x160] sm:$0xff] %vm5177_vm5, %v6948_v25  ;;  %14925 = vmatmul.mubr.msk.bf16.gmra.mxu0 %vm3863_vm4, %v21084_v49  ;;  %v7466_v55 = vsel %vm1347_vm1, %v7461_v36, %v7465_v18  ;;  %v7467_v30 = vshrl.u32 %v18795_v34, 16  ;;  %v7471_v53 = vshll.u32 %v18824_v16, 16  ;;  %v7767_v32 = vpop.f32.mrf.mxu0  ;;  %v18889_v29 = vld [vmem:[%s18346_s27 + $0xa8] sm:$0xff]   ;;  %v6696_v36 = vld [vmem:[#allocation2 + $0x180] sm:$0xff] }
 0x3a4   : > { %v9431_v24 = vld [vmem:[#allocation2 + $0x108] sm:$0xff]  ;;  %11744 = vst.msk [vmem:[%s18394_s8 + $0x88] sm:$0xf] %vm11709_vm6, %v12977_v19  ;;  %v12975_v42 = vpack.c.bf16 %v10461_v31, %v10461_v31  ;;  %v8928_v43 = vadd.f32 %v14830_v21, %v8672_v17  ;;  %14928 = vmatprep.mubr.msk.bf16.mxu0 %vm3863_vm4, %v21085_v40  ;;  %v13273_v6 = vunpack.c.l.bf16 %v18849_v41  ;;  %v6949_v33 = vadd.f32 %v6693_v20, %v5804_v52  ;;  %v14570_v37 = vpop.f32.mrf.mxu1  ;;  %v8673_v50 = vld [vmem:[#allocation2 + $0x158] sm:$0xff] }
 0x3a5   : > { %v10464_v12 = vadd.f32 %v13270_v57, %v9696_v56  ;;  %v9694_v0 = vadd.f32 %v18771_v15, %v9431_v24  ;;  %9179 = vst.msk [vmem:[#allocation2 + $0x128] sm:$0xff] %vm5177_vm5, %v8923_v27  ;;  %7207 = vst.msk [vmem:[#allocation2 + $0x178] sm:$0xff] %vm5177_vm5, %v6951_v13  ;;  %14665 = vmatmul.mubr.msk.bf16.gmra.mxu1 %vm3863_vm4, %v21084_v49  ;;  %7479 = vrot.lane.b32.xlu0 %v7466_v55, %s15425_s12  ;;  %v7473_v23 = vrot.slane %v7471_v53, 1  ;;  %v14831_v35 = vpop.f32.mrf.mxu0  ;;  %v6699_v17 = vld [vmem:[#allocation2 + $0x198] sm:$0xff]  ;;  %v6697_v20 = vld [vmem:[#allocation2 + $0x188] sm:$0xff] }
 0x3a6   : > { %v9436_v54 = vld [vmem:[#allocation2 + $0x130] sm:$0xff]  ;;  %v7469_v57 = vor.u32 %v7467_v30, %v7465_v18  ;;  %11742 = vst.msk [vmem:[%s18394_s8 + $0x80] sm:$0xf] %vm11709_vm6, %v12975_v42  ;;  %v8926_v5 = vadd.f32 %v8670_v1, %v7767_v32  ;;  %14668 = vmatprep.mubr.msk.bf16.mxu1 %vm3863_vm4, %v21085_v40  ;;  %v13278_v51 = vunpack.c.h.bf16 %v18819_v47  ;;  %v6954_v59 = vadd.f32 %v14570_v37, %v6698_v22  ;;  %v5817_v45 = vpop.f32.mrf.mxu1  ;;  %v21086_v55 = vld [vmem:[#allocation19_spill] sm:$0xff]  ;;  %v21087_v40 = vld [vmem:[#allocation20_spill] sm:$0xff] }
 0x3a7   : > { %v12978_v14 = vpack.c.bf16 %v10464_v12, %v10464_v12  ;;  %v10462_v46 = vadd.f32 %v13266_v48, %v9694_v0  ;;  %v9699_v63 = vadd.f32 %v18771_v15, %v9436_v54  ;;  %9184 = vst.msk [vmem:[#allocation2 + $0x150] sm:$0xff] %vm5177_vm5, %v8928_v43  ;;  %7205 = vst.msk [vmem:[#allocation2 + $0x168] sm:$0xff] %vm5177_vm5, %v6949_v33  ;;  %v7488_v38 = vrot.slane %v18795_v34, 1  ;;  %v7770_v47 = vpop.f32.mrf.mxu0 }
 0x3a8   : > { %v9434_v60 = vld [vmem:[#allocation2 + $0x120] sm:$0xff]  ;;  %v7474_v48 = vsel %vm1347_vm1, %v7469_v57, %v7473_v23  ;;  %9182 = vst.msk [vmem:[#allocation2 + $0x140] sm:$0xff] %vm5177_vm5, %v8926_v5  ;;  %v8929_v10 = vadd.f32 %v14831_v35, %v8673_v50  ;;  %v13274_v34 = vunpack.c.h.bf16 %v18849_v41  ;;  %7210 = vst.msk [vmem:[#allocation2 + $0x190] sm:$0xff] %vm5177_vm5, %v6954_v59  ;;  %v6952_v19 = vadd.f32 %v6696_v36, %v5817_v45  ;;  %v14571_v31 = vpop.f32.mrf.mxu1  ;;  %v8676_v52 = vld [vmem:[#allocation2 + $0x170] sm:$0xff] }
 0x3a9   : > { %11745 = vst.msk [vmem:[%s18394_s8 + $0x8c] sm:$0xf] %vm11709_vm6, %v12978_v14  ;;  %v12976_v3 = vpack.c.bf16 %v10462_v46, %v10462_v46  ;;  %v10467_v25 = vadd.f32 %v13277_v61, %v9699_v63  ;;  %v9697_v58 = vadd.f32 %v18771_v15, %v9434_v60  ;;  %7481 = vrot.lane.b32.xlu1 %v7474_v48, %s15425_s12  ;;  %v8671_v61 = vld [vmem:[#allocation2 + $0x148] sm:$0xff]  ;;  %v7490_v27 = vrot.slane %v18824_v16, 1  ;;  %v18903_v41 = vld [vmem:[%s18346_s27 + $0xa0] sm:$0xff]   ;;  %v14834_v49 = vpop.f32.mrf.mxu0  ;;  %v6702_v63 = vld [vmem:[#allocation2 + $0x1b0] sm:$0xff] }
 0x3aa   : > { %v9437_v18 = vld [vmem:[#allocation2 + $0x138] sm:$0xff]  ;;  %v7489_v56 = vsel %vm2756_vm0, %v7486_v8, %v7488_v38  ;;  %9185 = vst.msk [vmem:[#allocation2 + $0x158] sm:$0xff] %vm5177_vm5, %v8929_v10  ;;  %v8927_v21 = vadd.f32 %v8671_v61, %v7770_v47  ;;  %v13285_v8 = vunpack.c.l.bf16 %v18889_v29  ;;  %7208 = vst.msk [vmem:[#allocation2 + $0x180] sm:$0xff] %vm5177_vm5, %v6952_v19  ;;  %v6955_v16 = vadd.f32 %v14571_v31, %v6699_v17  ;;  %v5820_v30 = vpop.f32.mrf.mxu1  ;;  %v8674_v1 = vld [vmem:[#allocation2 + $0x160] sm:$0xff] }
 0x3ab   : > { %11743 = vst.msk [vmem:[%s18394_s8 + $0x84] sm:$0xf] %vm11709_vm6, %v12976_v3  ;;  %v12981_v2 = vpack.c.bf16 %v10467_v25, %v10467_v25  ;;  %v10465_v24 = vadd.f32 %v13273_v6, %v9697_v58  ;;  %v9700_v13 = vadd.f32 %v18771_v15, %v9437_v18  ;;  %7496 = vrot.lane.b32.xlu0 %v7489_v56, %s15424_s11  ;;  %v13281_v6 = vunpack.c.l.bf16 %v18903_v41  ;;  %v7783_v32 = vpop.f32.mrf.mxu0  ;;  %v6700_v25 = vld [vmem:[#allocation2 + $0x1a0] sm:$0xff]  ;;  %v18944_v31 = vld [vmem:[%s18346_s27 + $0xb0] sm:$0xff]   ;;  %v21088_v17 = vld [vmem:[#allocation21_spill] sm:$0xff] }
 0x3ac   : > { %v9435_v44 = vld [vmem:[#allocation2 + $0x128] sm:$0xff]  ;;  %14929 = vmatmul.mubr.msk.bf16.gmra.mxu0 %vm3863_vm4, %v21086_v55  ;;  %v7491_v53 = vsel %vm2756_vm0, %v7488_v38, %v7490_v27  ;;  %9183 = vst.msk [vmem:[#allocation2 + $0x148] sm:$0xff] %vm5177_vm5, %v8927_v21  ;;  %v8932_v43 = vadd.f32 %v14834_v49, %v8676_v52  ;;  %7211 = vst.msk [vmem:[#allocation2 + $0x198] sm:$0xff] %vm5177_vm5, %v6955_v16  ;;  %v6953_v33 = vadd.f32 %v6697_v20, %v5820_v30  ;;  %v14574_v37 = vpop.f32.mrf.mxu1  ;;  %v8677_v59 = vld [vmem:[#allocation2 + $0x178] sm:$0xff] }
 0x3ad   : > { %11748 = vst.msk [vmem:[%s18394_s8 + $0x98] sm:$0xf] %vm11709_vm6, %v12981_v2  ;;  %v12979_v42 = vpack.c.bf16 %v10465_v24, %v10465_v24  ;;  %v10468_v12 = vadd.f32 %v13278_v51, %v9700_v13  ;;  %v9698_v0 = vadd.f32 %v18771_v15, %v9435_v44  ;;  %14932 = vmatprep.mubr.msk.bf16.mxu0 %vm3863_vm4, %v21087_v40  ;;  %v13286_v22 = vunpack.c.h.bf16 %v18889_v29  ;;  %v14835_v51 = vpop.f32.mrf.mxu0  ;;  %v18935_v38 = vld [vmem:[%s18346_s27 + $0xb8] sm:$0xff]   ;;  %v21089_v30 = vld [vmem:[#allocation22_spill] sm:$0xff] }
 0x3ae   : > { %v9440_v54 = vld [vmem:[#allocation2 + $0x150] sm:$0xff]  ;;  %14669 = vmatmul.mubr.msk.bf16.gmra.mxu1 %vm3863_vm4, %v21086_v55  ;;  %7498 = vrot.lane.b32.xlu1 %v7491_v53, %s15424_s11  ;;  %9188 = vst.msk [vmem:[#allocation2 + $0x170] sm:$0xff] %vm5177_vm5, %v8932_v43  ;;  %v8930_v46 = vadd.f32 %v8674_v1, %v7783_v32  ;;  %7209 = vst.msk [vmem:[#allocation2 + $0x188] sm:$0xff] %vm5177_vm5, %v6953_v33  ;;  %v6958_v60 = vadd.f32 %v14574_v37, %v6702_v63  ;;  %v5833_v35 = vpop.f32.mrf.mxu1  ;;  %v13282_v29 = vunpack.c.h.bf16 %v18903_v41  ;;  %v8675_v18 = vld [vmem:[#allocation2 + $0x168] sm:$0xff] }
 0x3af   : > { %11746 = vst.msk [vmem:[%s18394_s8 + $0x90] sm:$0xf] %vm11709_vm6, %v12979_v42  ;;  %v12982_v57 = vpack.c.bf16 %v10468_v12, %v10468_v12  ;;  %v10466_v23 = vadd.f32 %v13274_v34, %v9698_v0  ;;  %v9703_v14 = vadd.f32 %v18771_v15, %v9440_v54  ;;  %14672 = vmatprep.mubr.msk.bf16.mxu1 %vm3863_vm4, %v21087_v40  ;;  %v9438_v5 = vld [vmem:[#allocation2 + $0x140] sm:$0xff]  ;;  %v7786_v36 = vpop.f32.mrf.mxu0  ;;  %v6703_v27 = vld [vmem:[#allocation2 + $0x1b8] sm:$0xff]  ;;  %v13293_v24 = vunpack.c.l.bf16 %v18935_v38  ;;  %v8680_v21 = vld [vmem:[#allocation2 + $0x190] sm:$0xff] }
 0x3b0   : > { %v9701_v48 = vadd.f32 %v18771_v15, %v9438_v5  ;;  %9186 = vst.msk [vmem:[#allocation2 + $0x160] sm:$0xff] %vm5177_vm5, %v8930_v46  ;;  %v8933_v3 = vadd.f32 %v14835_v51, %v8677_v59  ;;  %7214 = vst.msk [vmem:[#allocation2 + $0x1b0] sm:$0xff] %vm5177_vm5, %v6958_v60  ;;  %v6956_v10 = vadd.f32 %v6700_v25, %v5833_v35  ;;  %v14575_v34 = vpop.f32.mrf.mxu1  ;;  %v6701_v55 = vld [vmem:[#allocation2 + $0x1a8] sm:$0xff]  ;;  %v13289_v42 = vunpack.c.l.bf16 %v18944_v31  ;;  %v6706_v32 = vld [vmem:[#allocation2 + $0x1d0] sm:$0xff] }
 0x3b1   : > { %11749 = vst.msk [vmem:[%s18394_s8 + $0x9c] sm:$0xf] %vm11709_vm6, %v12982_v57  ;;  %v12980_v50 = vpack.c.bf16 %v10466_v23, %v10466_v23  ;;  %v10471_v45 = vadd.f32 %v13285_v8, %v9703_v14  ;;  %v9441_v58 = vld [vmem:[#allocation2 + $0x158] sm:$0xff]  ;;  %v8931_v56 = vadd.f32 %v8675_v18, %v7786_v36  ;;  %v6959_v13 = vadd.f32 %v14575_v34, %v6703_v27  ;;  %v14838_v41 = vpop.f32.mrf.mxu0  ;;  %v8678_v43 = vld [vmem:[#allocation2 + $0x180] sm:$0xff]  ;;  %v18973_v60 = vld [vmem:[%s18346_s27 + $0xc8] sm:$0xff]  }
 0x3b2   : > { %v10469_v47 = vadd.f32 %v13281_v6, %v9701_v48  ;;  %v9704_v61 = vadd.f32 %v18771_v15, %v9441_v58  ;;  %9189 = vst.msk [vmem:[#allocation2 + $0x178] sm:$0xff] %vm5177_vm5, %v8933_v3  ;;  %7212 = vst.msk [vmem:[#allocation2 + $0x1a0] sm:$0xff] %vm5177_vm5, %v6956_v10  ;;  %v5836_v44 = vpop.f32.mrf.mxu1  ;;  %v8936_v52 = vadd.f32 %v14838_v41, %v8680_v21  ;;  %v13294_v37 = vunpack.c.h.bf16 %v18935_v38  ;;  %v6704_v59 = vld [vmem:[#allocation2 + $0x1c0] sm:$0xff]  ;;  %v6707_v18 = vld [vmem:[#allocation2 + $0x1d8] sm:$0xff] }
 0x3b3   : > { %11747 = vst.msk [vmem:[%s18394_s8 + $0x94] sm:$0xf] %vm11709_vm6, %v12980_v50  ;;  %v12985_v19 = vpack.c.bf16 %v10471_v45, %v10471_v45  ;;  %v9439_v2 = vld [vmem:[#allocation2 + $0x148] sm:$0xff]  ;;  %v6957_v12 = vadd.f32 %v6701_v55, %v5836_v44  ;;  %v7799_v0 = vpop.f32.mrf.mxu0  ;;  %v8681_v14 = vld [vmem:[#allocation2 + $0x198] sm:$0xff]  ;;  %v13290_v50 = vunpack.c.h.bf16 %v18944_v31  ;;  %v18982_v10 = vld [vmem:[%s18346_s27 + $0xc0] sm:$0xff]  }
 0x3b4   : > { %14933 = vmatmul.mubr.msk.bf16.gmra.mxu0 %vm3863_vm4, %v21088_v17  ;;  %v12983_v8 = vpack.c.bf16 %v10469_v47, %v10469_v47  ;;  %v10472_v16 = vadd.f32 %v13286_v22, %v9704_v61  ;;  %v9702_v49 = vadd.f32 %v18771_v15, %v9439_v2  ;;  %9187 = vst.msk [vmem:[#allocation2 + $0x168] sm:$0xff] %vm5177_vm5, %v8931_v56  ;;  %7215 = vst.msk [vmem:[#allocation2 + $0x1b8] sm:$0xff] %vm5177_vm5, %v6959_v13  ;;  %v14578_v20 = vpop.f32.mrf.mxu1  ;;  %v21090_v56 = vld [vmem:[#allocation23_spill] sm:$0xff]  ;;  %v6705_v21 = vld [vmem:[#allocation2 + $0x1c8] sm:$0xff] }
 0x3b5   : > { %11752 = vst.msk [vmem:[%s18394_s8 + $0xa8] sm:$0xf] %vm11709_vm6, %v12985_v19  ;;  %14936 = vmatprep.mubr.msk.bf16.mxu0 %vm3863_vm4, %v21089_v30  ;;  %v9444_v53 = vld [vmem:[#allocation2 + $0x170] sm:$0xff]  ;;  %v8934_v33 = vadd.f32 %v8678_v43, %v7799_v0  ;;  %v6962_v57 = vadd.f32 %v14578_v20, %v6706_v32  ;;  %v14839_v23 = vpop.f32.mrf.mxu0  ;;  %v8679_v38 = vld [vmem:[#allocation2 + $0x188] sm:$0xff]  ;;  %v13301_v19 = vunpack.c.l.bf16 %v18973_v60  ;;  %v13302_v20 = vunpack.c.h.bf16 %v18973_v60 }
 0x3b6   : > { %14673 = vmatmul.mubr.msk.bf16.gmra.mxu1 %vm3863_vm4, %v21088_v17  ;;  %11750 = vst.msk [vmem:[%s18394_s8 + $0xa0] sm:$0xf] %vm11709_vm6, %v12983_v8  ;;  %v12986_v40 = vpack.c.bf16 %v10472_v16, %v10472_v16  ;;  %v10470_v54 = vadd.f32 %v13282_v29, %v9702_v49  ;;  %v9707_v6 = vadd.f32 %v18771_v15, %v9444_v53  ;;  %v5849_v46 = vpop.f32.mrf.mxu1  ;;  %v21091_v17 = vld [vmem:[#allocation24_spill] sm:$0xff]  ;;  %v13297_v8 = vunpack.c.l.bf16 %v18982_v10  ;;  %v6710_v0 = vld [vmem:[#allocation2 + $0x1f0] sm:$0xff] }
 0x3b7   : > { %9192 = vst.msk [vmem:[#allocation2 + $0x190] sm:$0xff] %vm5177_vm5, %v8936_v52  ;;  %14676 = vmatprep.mubr.msk.bf16.mxu1 %vm3863_vm4, %v21089_v30  ;;  %v9442_v1 = vld [vmem:[#allocation2 + $0x160] sm:$0xff]  ;;  %7213 = vst.msk [vmem:[#allocation2 + $0x1a8] sm:$0xff] %vm5177_vm5, %v6957_v12  ;;  %v8937_v51 = vadd.f32 %v14839_v23, %v8681_v14  ;;  %v6960_v45 = vadd.f32 %v6704_v59, %v5849_v46  ;;  %v7802_v48 = vpop.f32.mrf.mxu0  ;;  %v8684_v31 = vld [vmem:[#allocation2 + $0x1b0] sm:$0xff] }
 0x3b8   : > { %11753 = vst.msk [vmem:[%s18394_s8 + $0xac] sm:$0xf] %vm11709_vm6, %v12986_v40  ;;  %v12984_v63 = vpack.c.bf16 %v10470_v54, %v10470_v54  ;;  %v10475_v5 = vadd.f32 %v13293_v24, %v9707_v6  ;;  %v9705_v22 = vadd.f32 %v18771_v15, %v9442_v1  ;;  %v14579_v3 = vpop.f32.mrf.mxu1  ;;  %v8935_v36 = vadd.f32 %v8679_v38, %v7802_v48  ;;  %v6708_v14 = vld [vmem:[#allocation2 + $0x1e0] sm:$0xff]  ;;  %v6711_v38 = vld [vmem:[#allocation2 + $0x1f8] sm:$0xff] }
 0x3b9   : > { %9190 = vst.msk [vmem:[#allocation2 + $0x180] sm:$0xff] %vm5177_vm5, %v8934_v33  ;;  %v9445_v35 = vld [vmem:[#allocation2 + $0x178] sm:$0xff]  ;;  %7218 = vst.msk [vmem:[#allocation2 + $0x1d0] sm:$0xff] %vm5177_vm5, %v6962_v57  ;;  %v6963_v47 = vadd.f32 %v14579_v3, %v6707_v18  ;;  %v14842_v61 = vpop.f32.mrf.mxu0  ;;  %v8682_v52 = vld [vmem:[#allocation2 + $0x1a0] sm:$0xff] }
 0x3ba   : > { %11751 = vst.msk [vmem:[%s18394_s8 + $0xa4] sm:$0xf] %vm11709_vm6, %v12984_v63  ;;  %v12989_v25 = vpack.c.bf16 %v10475_v5, %v10475_v5  ;;  %v10473_v58 = vadd.f32 %v13289_v42, %v9705_v22  ;;  %v9708_v29 = vadd.f32 %v18771_v15, %v9445_v35  ;;  %v5852_v27 = vpop.f32.mrf.mxu1  ;;  %v8940_v41 = vadd.f32 %v14842_v61, %v8684_v31  ;;  %v19011_v57 = vld [vmem:[%s18346_s27 + $0xd8] sm:$0xff]   ;;  %v6709_v31 = vld [vmem:[#allocation2 + $0x1e8] sm:$0xff] }
 0x3bb   : > { %9193 = vst.msk [vmem:[#allocation2 + $0x198] sm:$0xff] %vm5177_vm5, %v8937_v51  ;;  %v9443_v34 = vld [vmem:[#allocation2 + $0x168] sm:$0xff]  ;;  %7216 = vst.msk [vmem:[#allocation2 + $0x1c0] sm:$0xff] %vm5177_vm5, %v6960_v45  ;;  %v6961_v16 = vadd.f32 %v6705_v21, %v5852_v27  ;;  %v7815_v49 = vpop.f32.mrf.mxu0  ;;  %v8685_v6 = vld [vmem:[#allocation2 + $0x1b8] sm:$0xff]  ;;  %v13298_v63 = vunpack.c.h.bf16 %v18982_v10 }
 0x3bc   : > { %14937 = vmatmul.mubr.msk.bf16.gmra.mxu0 %vm3863_vm4, %v21090_v56  ;;  %11756 = vst.msk [vmem:[%s18394_s8 + $0xb8] sm:$0xf] %vm11709_vm6, %v12989_v25  ;;  %v12987_v2 = vpack.c.bf16 %v10473_v58, %v10473_v58  ;;  %v10476_v24 = vadd.f32 %v13294_v37, %v9708_v29  ;;  %v9706_v13 = vadd.f32 %v18771_v15, %v9443_v34  ;;  %v14582_v55 = vpop.f32.mrf.mxu1  ;;  %v19020_v45 = vld [vmem:[%s18346_s27 + $0xd0] sm:$0xff]   ;;  %v13309_v25 = vunpack.c.l.bf16 %v19011_v57 }
 0x3bd   : > { %9191 = vst.msk [vmem:[#allocation2 + $0x188] sm:$0xff] %vm5177_vm5, %v8935_v36  ;;  %14940 = vmatprep.mubr.msk.bf16.mxu0 %vm3863_vm4, %v21091_v17  ;;  %7219 = vst.msk [vmem:[#allocation2 + $0x1d8] sm:$0xff] %vm5177_vm5, %v6963_v47  ;;  %v8938_v12 = vadd.f32 %v8682_v52, %v7815_v49  ;;  %v6966_v40 = vadd.f32 %v14582_v55, %v6710_v0  ;;  %v14843_v54 = vpop.f32.mrf.mxu0  ;;  %v21092_v36 = vld [vmem:[#allocation25_spill] sm:$0xff]  ;;  %v6714_v49 = vld [vmem:[#allocation2 + $0x210] sm:$0xff]  ;;  %v13310_v55 = vunpack.c.h.bf16 %v19011_v57 }
 0x3be   : > { %v9448_v44 = vld [vmem:[#allocation2 + $0x190] sm:$0xff]  ;;  %14677 = vmatmul.mubr.msk.bf16.gmra.mxu1 %vm3863_vm4, %v21090_v56  ;;  %11754 = vst.msk [vmem:[%s18394_s8 + $0xb0] sm:$0xf] %vm11709_vm6, %v12987_v2  ;;  %v12990_v30 = vpack.c.bf16 %v10476_v24, %v10476_v24  ;;  %v10474_v53 = vadd.f32 %v13290_v50, %v9706_v13  ;;  %v5865_v33 = vpop.f32.mrf.mxu1  ;;  %v8941_v23 = vadd.f32 %v14843_v54, %v8685_v6  ;;  %v8683_v60 = vld [vmem:[#allocation2 + $0x1a8] sm:$0xff]  ;;  %v13305_v2 = vunpack.c.l.bf16 %v19020_v45  ;;  %v6712_v6 = vld [vmem:[#allocation2 + $0x200] sm:$0xff] }
 0x3bf   : > { %v9711_v42 = vadd.f32 %v18771_v15, %v9448_v44  ;;  %9196 = vst.msk [vmem:[#allocation2 + $0x1b0] sm:$0xff] %vm5177_vm5, %v8940_v41  ;;  %14680 = vmatprep.mubr.msk.bf16.mxu1 %vm3863_vm4, %v21091_v17  ;;  %7217 = vst.msk [vmem:[#allocation2 + $0x1c8] sm:$0xff] %vm5177_vm5, %v6961_v16  ;;  %v6964_v5 = vadd.f32 %v6708_v14, %v5865_v33  ;;  %v7818_v22 = vpop.f32.mrf.mxu0  ;;  %v21093_v56 = vld [vmem:[#allocation26_spill] sm:$0xff] }
 0x3c0   : > { %v9446_v43 = vld [vmem:[#allocation2 + $0x180] sm:$0xff]  ;;  %11757 = vst.msk [vmem:[%s18394_s8 + $0xbc] sm:$0xf] %vm11709_vm6, %v12990_v30  ;;  %v12988_v32 = vpack.c.bf16 %v10474_v53, %v10474_v53  ;;  %v14583_v51 = vpop.f32.mrf.mxu1  ;;  %v8939_v48 = vadd.f32 %v8683_v60, %v7818_v22  ;;  %v8688_v10 = vld [vmem:[#allocation2 + $0x1d0] sm:$0xff]  ;;  %v6715_v60 = vld [vmem:[#allocation2 + $0x218] sm:$0xff] }
 0x3c1   : > { %v10479_v1 = vadd.f32 %v13301_v19, %v9711_v42  ;;  %v9709_v37 = vadd.f32 %v18771_v15, %v9446_v43  ;;  %9194 = vst.msk [vmem:[#allocation2 + $0x1a0] sm:$0xff] %vm5177_vm5, %v8938_v12  ;;  %7222 = vst.msk [vmem:[#allocation2 + $0x1f0] sm:$0xff] %vm5177_vm5, %v6966_v40  ;;  %v6967_v58 = vadd.f32 %v14583_v51, %v6711_v38  ;;  %v14846_v29 = vpop.f32.mrf.mxu0  ;;  %v19049_v40 = vld [vmem:[%s18346_s27 + $0xe8] sm:$0xff]  }
 0x3c2   : > { %v9449_v46 = vld [vmem:[#allocation2 + $0x198] sm:$0xff]  ;;  %11755 = vst.msk [vmem:[%s18394_s8 + $0xb4] sm:$0xf] %vm11709_vm6, %v12988_v32  ;;  %v5868_v18 = vpop.f32.mrf.mxu1  ;;  %v8944_v61 = vadd.f32 %v14846_v29, %v8688_v10  ;;  %v8686_v41 = vld [vmem:[#allocation2 + $0x1c0] sm:$0xff]  ;;  %v13306_v32 = vunpack.c.h.bf16 %v19020_v45  ;;  %v6713_v10 = vld [vmem:[#allocation2 + $0x208] sm:$0xff] }
 0x3c3   : > { %v12993_v59 = vpack.c.bf16 %v10479_v1, %v10479_v1  ;;  %v10477_v35 = vadd.f32 %v13297_v8, %v9709_v37  ;;  %v9712_v50 = vadd.f32 %v18771_v15, %v9449_v46  ;;  %9197 = vst.msk [vmem:[#allocation2 + $0x1b8] sm:$0xff] %vm5177_vm5, %v8941_v23  ;;  %7220 = vst.msk [vmem:[#allocation2 + $0x1e0] sm:$0xff] %vm5177_vm5, %v6964_v5  ;;  %v7831_v13 = vpop.f32.mrf.mxu0  ;;  %v19058_v5 = vld [vmem:[%s18346_s27 + $0xe0] sm:$0xff]  }
 0x3c4   : > { %v9447_v3 = vld [vmem:[#allocation2 + $0x188] sm:$0xff]  ;;  %14941 = vmatmul.mubr.msk.bf16.gmra.mxu0 %vm3863_vm4, %v21092_v36  ;;  %9195 = vst.msk [vmem:[#allocation2 + $0x1a8] sm:$0xff] %vm5177_vm5, %v8939_v48  ;;  %7223 = vst.msk [vmem:[#allocation2 + $0x1f8] sm:$0xff] %vm5177_vm5, %v6967_v58  ;;  %v6965_v24 = vadd.f32 %v6709_v31, %v5868_v18  ;;  %v14586_v21 = vpop.f32.mrf.mxu1  ;;  %v8942_v16 = vadd.f32 %v8686_v41, %v7831_v13  ;;  %v8689_v42 = vld [vmem:[#allocation2 + $0x1d8] sm:$0xff] }
 0x3c5   : > { %11760 = vst.msk [vmem:[%s18394_s8 + $0xc8] sm:$0xf] %vm11709_vm6, %v12993_v59  ;;  %v12991_v34 = vpack.c.bf16 %v10477_v35, %v10477_v35  ;;  %v10480_v19 = vadd.f32 %v13302_v20, %v9712_v50  ;;  %v9710_v47 = vadd.f32 %v18771_v15, %v9447_v3  ;;  %14944 = vmatprep.mubr.msk.bf16.mxu0 %vm3863_vm4, %v21093_v56  ;;  %v14847_v53 = vpop.f32.mrf.mxu0  ;;  %v13317_v59 = vunpack.c.l.bf16 %v19049_v40  ;;  %v21094_v48 = vld [vmem:[#allocation27_spill] sm:$0xff]  ;;  %v6718_v13 = vld [vmem:[#allocation2 + $0x230] sm:$0xff] }
 0x3c6   : > { %v9452_v27 = vld [vmem:[#allocation2 + $0x1b0] sm:$0xff]  ;;  %14681 = vmatmul.mubr.msk.bf16.gmra.mxu1 %vm3863_vm4, %v21092_v36  ;;  %9200 = vst.msk [vmem:[#allocation2 + $0x1d0] sm:$0xff] %vm5177_vm5, %v8944_v61  ;;  %7221 = vst.msk [vmem:[#allocation2 + $0x1e8] sm:$0xff] %vm5177_vm5, %v6965_v24  ;;  %v6970_v30 = vadd.f32 %v14586_v21, %v6714_v49  ;;  %v5881_v12 = vpop.f32.mrf.mxu1  ;;  %v8945_v54 = vadd.f32 %v14847_v53, %v8689_v42  ;;  %v8687_v57 = vld [vmem:[#allocation2 + $0x1c8] sm:$0xff]  ;;  %v13318_v21 = vunpack.c.h.bf16 %v19049_v40 }
 0x3c7   : > { %11758 = vst.msk [vmem:[%s18394_s8 + $0xc0] sm:$0xf] %vm11709_vm6, %v12991_v34  ;;  %v12994_v17 = vpack.c.bf16 %v10480_v19, %v10480_v19  ;;  %v10478_v44 = vadd.f32 %v13298_v63, %v9710_v47  ;;  %v9715_v8 = vadd.f32 %v18771_v15, %v9452_v27  ;;  %14684 = vmatprep.mubr.msk.bf16.mxu1 %vm3863_vm4, %v21093_v56  ;;  %v7834_v37 = vpop.f32.mrf.mxu0  ;;  %v21095_v36 = vld [vmem:[#allocation28_spill] sm:$0xff]  ;;  %v13313_v34 = vunpack.c.l.bf16 %v19058_v5 }
 0x3c8   : > { %v9450_v52 = vld [vmem:[#allocation2 + $0x1a0] sm:$0xff]  ;;  %9198 = vst.msk [vmem:[#allocation2 + $0x1c0] sm:$0xff] %vm5177_vm5, %v8942_v16  ;;  %7226 = vst.msk [vmem:[#allocation2 + $0x210] sm:$0xff] %vm5177_vm5, %v6970_v30  ;;  %v6968_v1 = vadd.f32 %v6712_v6, %v5881_v12  ;;  %v14587_v23 = vpop.f32.mrf.mxu1  ;;  %v8943_v22 = vadd.f32 %v8687_v57, %v7834_v37  ;;  %v8692_v45 = vld [vmem:[#allocation2 + $0x1f0] sm:$0xff] }
 0x3c9   : > { %11761 = vst.msk [vmem:[%s18394_s8 + $0xcc] sm:$0xf] %vm11709_vm6, %v12994_v17  ;;  %v12992_v0 = vpack.c.bf16 %v10478_v44, %v10478_v44  ;;  %v10483_v43 = vadd.f32 %v13309_v25, %v9715_v8  ;;  %v9713_v20 = vadd.f32 %v18771_v15, %v9450_v52  ;;  %v6971_v35 = vadd.f32 %v14587_v23, %v6715_v60  ;;  %v14850_v50 = vpop.f32.mrf.mxu0  ;;  %v19087_v30 = vld [vmem:[%s18346_s27 + $0xf8] sm:$0xff]   ;;  %v6716_v42 = vld [vmem:[#allocation2 + $0x220] sm:$0xff] }
 0x3ca   : > { %v9453_v33 = vld [vmem:[#allocation2 + $0x1b8] sm:$0xff]  ;;  %9201 = vst.msk [vmem:[#allocation2 + $0x1d8] sm:$0xff] %vm5177_vm5, %v8945_v54  ;;  %7224 = vst.msk [vmem:[#allocation2 + $0x200] sm:$0xff] %vm5177_vm5, %v6968_v1  ;;  %v5884_v38 = vpop.f32.mrf.mxu1  ;;  %v8948_v29 = vadd.f32 %v14850_v50, %v8692_v45  ;;  %v8690_v61 = vld [vmem:[#allocation2 + $0x1e0] sm:$0xff] }
 0x3cb   : > { %11759 = vst.msk [vmem:[%s18394_s8 + $0xc4] sm:$0xf] %vm11709_vm6, %v12992_v0  ;;  %v12997_v14 = vpack.c.bf16 %v10483_v43, %v10483_v43  ;;  %v10481_v46 = vadd.f32 %v13305_v2, %v9713_v20  ;;  %v9716_v63 = vadd.f32 %v18771_v15, %v9453_v33  ;;  %v9451_v51 = vld [vmem:[#allocation2 + $0x1a8] sm:$0xff]  ;;  %v6969_v19 = vadd.f32 %v6713_v10, %v5884_v38  ;;  %v7847_v47 = vpop.f32.mrf.mxu0  ;;  %v8693_v8 = vld [vmem:[#allocation2 + $0x1f8] sm:$0xff]  ;;  %v19096_v1 = vld [vmem:[%s18346_s27 + $0xf0] sm:$0xff]  }
 0x3cc   : > { %14945 = vmatmul.mubr.msk.bf16.gmra.mxu0 %vm3863_vm4, %v21094_v48  ;;  %v9714_v58 = vadd.f32 %v18771_v15, %v9451_v51  ;;  %9199 = vst.msk [vmem:[#allocation2 + $0x1c8] sm:$0xff] %vm5177_vm5, %v8943_v22  ;;  %7227 = vst.msk [vmem:[#allocation2 + $0x218] sm:$0xff] %vm5177_vm5, %v6971_v35  ;;  %v14590_v31 = vpop.f32.mrf.mxu1  ;;  %v8946_v24 = vadd.f32 %v8690_v61, %v7847_v47  ;;  %v13314_v0 = vunpack.c.h.bf16 %v19058_v5  ;;  %v6719_v57 = vld [vmem:[#allocation2 + $0x238] sm:$0xff]  ;;  %v21096_v22 = vld [vmem:[#allocation29_spill] sm:$0xff] }
 0x3cd   : > { %11764 = vst.msk [vmem:[%s18394_s8 + $0xd8] sm:$0xf] %vm11709_vm6, %v12997_v14  ;;  %v12995_v3 = vpack.c.bf16 %v10481_v46, %v10481_v46  ;;  %v10484_v25 = vadd.f32 %v13310_v55, %v9716_v63  ;;  %14948 = vmatprep.mubr.msk.bf16.mxu0 %vm3863_vm4, %v21095_v36  ;;  %v9456_v18 = vld [vmem:[#allocation2 + $0x1d0] sm:$0xff]  ;;  %v6974_v17 = vadd.f32 %v14590_v31, %v6718_v13  ;;  %v14851_v44 = vpop.f32.mrf.mxu0  ;;  %v8691_v40 = vld [vmem:[#allocation2 + $0x1e8] sm:$0xff]  ;;  %v13325_v14 = vunpack.c.l.bf16 %v19087_v30 }
 0x3ce   : > { %14685 = vmatmul.mubr.msk.bf16.gmra.mxu1 %vm3863_vm4, %v21094_v48  ;;  %v10482_v27 = vadd.f32 %v13306_v32, %v9714_v58  ;;  %v9719_v2 = vadd.f32 %v18771_v15, %v9456_v18  ;;  %9204 = vst.msk [vmem:[#allocation2 + $0x1f0] sm:$0xff] %vm5177_vm5, %v8948_v29  ;;  %7225 = vst.msk [vmem:[#allocation2 + $0x208] sm:$0xff] %vm5177_vm5, %v6969_v19  ;;  %v5897_v16 = vpop.f32.mrf.mxu1  ;;  %v8949_v53 = vadd.f32 %v14851_v44, %v8693_v8  ;;  %v6717_v45 = vld [vmem:[#allocation2 + $0x228] sm:$0xff]  ;;  %v21097_v48 = vld [vmem:[#allocation30_spill] sm:$0xff] }
 0x3cf   : > { %11762 = vst.msk [vmem:[%s18394_s8 + $0xd0] sm:$0xf] %vm11709_vm6, %v12995_v3  ;;  %v12998_v56 = vpack.c.bf16 %v10484_v25, %v10484_v25  ;;  %14688 = vmatprep.mubr.msk.bf16.mxu1 %vm3863_vm4, %v21095_v36  ;;  %v9454_v41 = vld [vmem:[#allocation2 + $0x1c0] sm:$0xff]  ;;  %v6972_v43 = vadd.f32 %v6716_v42, %v5897_v16  ;;  %v7850_v20 = vpop.f32.mrf.mxu0  ;;  %v8696_v5 = vld [vmem:[#allocation2 + $0x210] sm:$0xff]  ;;  %v13321_v3 = vunpack.c.l.bf16 %v19096_v1  ;;  %v13326_v31 = vunpack.c.h.bf16 %v19087_v30 }
 0x3d0   : > { %v12996_v49 = vpack.c.bf16 %v10482_v27, %v10482_v27  ;;  %v10487_v52 = vadd.f32 %v13317_v59, %v9719_v2  ;;  %v9717_v55 = vadd.f32 %v18771_v15, %v9454_v41  ;;  %9202 = vst.msk [vmem:[#allocation2 + $0x1e0] sm:$0xff] %vm5177_vm5, %v8946_v24  ;;  %7230 = vst.msk [vmem:[#allocation2 + $0x230] sm:$0xff] %vm5177_vm5, %v6974_v17  ;;  %v14591_v54 = vpop.f32.mrf.mxu1  ;;  %v6722_v47 = vld [vmem:[#allocation2 + $0x250] sm:$0xff]  ;;  %v19126_v41 = vld [vmem:[%s20810_s2] ss:$0 sm:$0xff] }
 0x3d1   : > { %11765 = vst.msk [vmem:[%s18394_s8 + $0xdc] sm:$0xf] %vm11709_vm6, %v12998_v56  ;;  %v9457_v12 = vld [vmem:[#allocation2 + $0x1d8] sm:$0xff]  ;;  %v8947_v37 = vadd.f32 %v8691_v40, %v7850_v20  ;;  %v6975_v46 = vadd.f32 %v14591_v54, %v6719_v57  ;;  %v14854_v63 = vpop.f32.mrf.mxu0  ;;  %v8694_v29 = vld [vmem:[#allocation2 + $0x200] sm:$0xff]  ;;  %v19130_v17 = vld [vmem:[%s18346_s27 + $0x108] sm:$0xff]  }
 0x3d2   : > { %11763 = vst.msk [vmem:[%s18394_s8 + $0xd4] sm:$0xf] %vm11709_vm6, %v12996_v49  ;;  %v13001_v6 = vpack.c.bf16 %v10487_v52, %v10487_v52  ;;  %v10485_v33 = vadd.f32 %v13313_v34, %v9717_v55  ;;  %v9720_v32 = vadd.f32 %v18771_v15, %v9457_v12  ;;  %v5900_v60 = vpop.f32.mrf.mxu1  ;;  %v8952_v50 = vadd.f32 %v14854_v63, %v8696_v5  ;;  %v6720_v8 = vld [vmem:[#allocation2 + $0x240] sm:$0xff]  ;;  %v6723_v40 = vld [vmem:[#allocation2 + $0x258] sm:$0xff]  ;;  %v6721_v5 = vld [vmem:[#allocation2 + $0x248] sm:$0xff] }
 0x3d3   : > { %9205 = vst.msk [vmem:[#allocation2 + $0x1f8] sm:$0xff] %vm5177_vm5, %v8949_v53  ;;  %v9455_v23 = vld [vmem:[#allocation2 + $0x1c8] sm:$0xff]  ;;  %7228 = vst.msk [vmem:[#allocation2 + $0x220] sm:$0xff] %vm5177_vm5, %v6972_v43  ;;  %v6973_v25 = vadd.f32 %v6717_v45, %v5900_v60  ;;  %v7863_v58 = vpop.f32.mrf.mxu0  ;;  %v8697_v2 = vld [vmem:[#allocation2 + $0x218] sm:$0xff]  ;;  %v13322_v49 = vunpack.c.h.bf16 %v19096_v1 }
 0x3d4   : > { %14949 = vmatmul.mubr.msk.bf16.gmra.mxu0 %vm3863_vm4, %v21096_v22  ;;  %11768 = vst.msk [vmem:[%s18394_s8 + $0xe8] sm:$0xf] %vm11709_vm6, %v13001_v6  ;;  %v12999_v51 = vpack.c.bf16 %v10485_v33, %v10485_v33  ;;  %v10488_v59 = vadd.f32 %v13318_v21, %v9720_v32  ;;  %v9718_v35 = vadd.f32 %v18771_v15, %v9455_v23  ;;  %v14594_v10 = vpop.f32.mrf.mxu1  ;;  %v19139_v43 = vld [vmem:[%s18346_s27 + $0x100] sm:$0xff]   ;;  %v13333_v6 = vunpack.c.l.bf16 %v19130_v17 }
 0x3d5   : > { %9203 = vst.msk [vmem:[#allocation2 + $0x1e8] sm:$0xff] %vm5177_vm5, %v8947_v37  ;;  %14952 = vmatprep.mubr.msk.bf16.mxu0 %vm3863_vm4, %v21097_v48  ;;  %v9460_v38 = vld [vmem:[#allocation2 + $0x1f0] sm:$0xff]  ;;  %7231 = vst.msk [vmem:[#allocation2 + $0x238] sm:$0xff] %vm5177_vm5, %v6975_v46  ;;  %v8950_v19 = vadd.f32 %v8694_v29, %v7863_v58  ;;  %v6978_v56 = vadd.f32 %v14594_v10, %v6722_v47  ;;  %v14855_v27 = vpop.f32.mrf.mxu0  ;;  %v8695_v30 = vld [vmem:[#allocation2 + $0x208] sm:$0xff]  ;;  %v13334_v10 = vunpack.c.h.bf16 %v19130_v17 }
 0x3d6   : > { %14689 = vmatmul.mubr.msk.bf16.gmra.mxu1 %vm3863_vm4, %v21096_v22  ;;  %11766 = vst.msk [vmem:[%s18394_s8 + $0xe0] sm:$0xf] %vm11709_vm6, %v12999_v51  ;;  %v13002_v36 = vpack.c.bf16 %v10488_v59, %v10488_v59  ;;  %v10486_v18 = vadd.f32 %v13314_v0, %v9718_v35  ;;  %v9723_v34 = vadd.f32 %v18771_v15, %v9460_v38  ;;  %v5913_v24 = vpop.f32.mrf.mxu1  ;;  %v21098_v37 = vld [vmem:[#allocation31_spill] sm:$0xff]  ;;  %v21099_v22 = vld [vmem:[#allocation32_spill] sm:$0xff]  ;;  %v13329_v51 = vunpack.c.l.bf16 %v19139_v43  ;;  %v6726_v58 = vld [vmem:[#allocation2 + $0x270] sm:$0xff] }
 0x3d7   : > { %9208 = vst.msk [vmem:[#allocation2 + $0x210] sm:$0xff] %vm5177_vm5, %v8952_v50  ;;  %14692 = vmatprep.mubr.msk.bf16.mxu1 %vm3863_vm4, %v21097_v48  ;;  %v9458_v61 = vld [vmem:[#allocation2 + $0x1e0] sm:$0xff]  ;;  %7229 = vst.msk [vmem:[#allocation2 + $0x228] sm:$0xff] %vm5177_vm5, %v6973_v25  ;;  %v8953_v44 = vadd.f32 %v14855_v27, %v8697_v2  ;;  %v6976_v52 = vadd.f32 %v6720_v8, %v5913_v24  ;;  %v7866_v55 = vpop.f32.mrf.mxu0  ;;  %v8700_v1 = vld [vmem:[#allocation2 + $0x230] sm:$0xff] }
 0x3d8   : > { %11769 = vst.msk [vmem:[%s18394_s8 + $0xec] sm:$0xf] %vm11709_vm6, %v13002_v36  ;;  %v13000_v15 = vpack.c.bf16 %v10486_v18, %v10486_v18  ;;  %v10491_v13 = vadd.f32 %v13325_v14, %v9723_v34  ;;  %v9721_v21 = vadd.f32 %v19126_v41, %v9458_v61  ;;  %v14595_v53 = vpop.f32.mrf.mxu1  ;;  %v8951_v20 = vadd.f32 %v8695_v30, %v7866_v55  ;;  %v6724_v2 = vld [vmem:[#allocation2 + $0x260] sm:$0xff]  ;;  %v6727_v30 = vld [vmem:[#allocation2 + $0x278] sm:$0xff] }
 0x3d9   : > { %9206 = vst.msk [vmem:[#allocation2 + $0x200] sm:$0xff] %vm5177_vm5, %v8950_v19  ;;  %7234 = vst.msk [vmem:[#allocation2 + $0x250] sm:$0xff] %vm5177_vm5, %v6978_v56  ;;  %v6979_v33 = vadd.f32 %v14595_v53, %v6723_v40  ;;  %v14858_v32 = vpop.f32.mrf.mxu0  ;;  %v19168_v56 = vld [vmem:[%s18346_s27 + $0x118] sm:$0xff]  }
 0x3da   : > { %v9461_v16 = vld [vmem:[#allocation2 + $0x1f8] sm:$0xff]  ;;  %11767 = vst.msk [vmem:[%s18394_s8 + $0xe4] sm:$0xf] %vm11709_vm6, %v13000_v15  ;;  %v13005_v42 = vpack.c.bf16 %v10491_v13, %v10491_v13  ;;  %v10489_v12 = vadd.f32 %v13321_v3, %v9721_v21  ;;  %v5916_v57 = vpop.f32.mrf.mxu1  ;;  %v8956_v63 = vadd.f32 %v14858_v32, %v8700_v1  ;;  %v8698_v50 = vld [vmem:[#allocation2 + $0x220] sm:$0xff]  ;;  %v13330_v15 = vunpack.c.h.bf16 %v19139_v43  ;;  %v6725_v1 = vld [vmem:[#allocation2 + $0x268] sm:$0xff] }
 0x3db   : > { %v9724_v0 = vadd.f32 %v19126_v41, %v9461_v16  ;;  %9209 = vst.msk [vmem:[#allocation2 + $0x218] sm:$0xff] %vm5177_vm5, %v8953_v44  ;;  %7232 = vst.msk [vmem:[#allocation2 + $0x240] sm:$0xff] %vm5177_vm5, %v6976_v52  ;;  %v6977_v59 = vadd.f32 %v6721_v5, %v5916_v57  ;;  %v7879_v35 = vpop.f32.mrf.mxu0  ;;  %v19177_v52 = vld [vmem:[%s18346_s27 + $0x110] sm:$0xff]  }
 0x3dc   : > { %v9459_v54 = vld [vmem:[#allocation2 + $0x1e8] sm:$0xff]  ;;  %14953 = vmatmul.mubr.msk.bf16.gmra.mxu0 %vm3863_vm4, %v21098_v37  ;;  %11772 = vst.msk [vmem:[%s18394_s8 + $0xf8] sm:$0xf] %vm11709_vm6, %v13005_v42  ;;  %v13003_v23 = vpack.c.bf16 %v10489_v12, %v10489_v12  ;;  %v14598_v45 = vpop.f32.mrf.mxu1  ;;  %v8954_v25 = vadd.f32 %v8698_v50, %v7879_v35  ;;  %v8701_v34 = vld [vmem:[#allocation2 + $0x238] sm:$0xff]  ;;  %v13341_v42 = vunpack.c.l.bf16 %v19168_v56  ;;  %v6730_v35 = vld [vmem:[#allocation2 + $0x290] sm:$0xff] }
 0x3dd   : > { %v10492_v14 = vadd.f32 %v13326_v31, %v9724_v0  ;;  %v9722_v46 = vadd.f32 %v19126_v41, %v9459_v54  ;;  %9207 = vst.msk [vmem:[#allocation2 + $0x208] sm:$0xff] %vm5177_vm5, %v8951_v20  ;;  %14956 = vmatprep.mubr.msk.bf16.mxu0 %vm3863_vm4, %v21099_v22  ;;  %7235 = vst.msk [vmem:[#allocation2 + $0x258] sm:$0xff] %vm5177_vm5, %v6979_v33  ;;  %v6982_v36 = vadd.f32 %v14598_v45, %v6726_v58  ;;  %v14859_v18 = vpop.f32.mrf.mxu0  ;;  %v21100_v20 = vld [vmem:[#allocation33_spill] sm:$0xff] }
 0x3de   : > { %v9464_v60 = vld [vmem:[#allocation2 + $0x210] sm:$0xff]  ;;  %14693 = vmatmul.mubr.msk.bf16.gmra.mxu1 %vm3863_vm4, %v21098_v37  ;;  %11770 = vst.msk [vmem:[%s18394_s8 + $0xf0] sm:$0xf] %vm11709_vm6, %v13003_v23  ;;  %v5929_v19 = vpop.f32.mrf.mxu1  ;;  %v8957_v27 = vadd.f32 %v14859_v18, %v8701_v34  ;;  %v8699_v17 = vld [vmem:[#allocation2 + $0x228] sm:$0xff]  ;;  %v13337_v23 = vunpack.c.l.bf16 %v19177_v52  ;;  %v13342_v45 = vunpack.c.h.bf16 %v19168_v56  ;;  %v6728_v34 = vld [vmem:[#allocation2 + $0x280] sm:$0xff] }
 0x3df   : > { %v13006_v48 = vpack.c.bf16 %v10492_v14, %v10492_v14  ;;  %v10490_v38 = vadd.f32 %v13322_v49, %v9722_v46  ;;  %v9727_v3 = vadd.f32 %v19126_v41, %v9464_v60  ;;  %9212 = vst.msk [vmem:[#allocation2 + $0x230] sm:$0xff] %vm5177_vm5, %v8956_v63  ;;  %14696 = vmatprep.mubr.msk.bf16.mxu1 %vm3863_vm4, %v21099_v22  ;;  %7233 = vst.msk [vmem:[#allocation2 + $0x248] sm:$0xff] %vm5177_vm5, %v6977_v59  ;;  %v7882_v21 = vpop.f32.mrf.mxu0  ;;  %v21101_v37 = vld [vmem:[#allocation34_spill] sm:$0xff] }
 0x3e0   : > { %v9462_v29 = vld [vmem:[#allocation2 + $0x200] sm:$0xff]  ;;  %9210 = vst.msk [vmem:[#allocation2 + $0x220] sm:$0xff] %vm5177_vm5, %v8954_v25  ;;  %7238 = vst.msk [vmem:[#allocation2 + $0x270] sm:$0xff] %vm5177_vm5, %v6982_v36  ;;  %v6980_v13 = vadd.f32 %v6724_v2, %v5929_v19  ;;  %v14599_v44 = vpop.f32.mrf.mxu1  ;;  %v8955_v55 = vadd.f32 %v8699_v17, %v7882_v21  ;;  %v8704_v43 = vld [vmem:[#allocation2 + $0x250] sm:$0xff] }
 0x3e1   : > { %11773 = vst.msk [vmem:[%s18394_s8 + $0xfc] sm:$0xf] %vm11709_vm6, %v13006_v48  ;;  %v13004_v47 = vpack.c.bf16 %v10490_v38, %v10490_v38  ;;  %v10495_v61 = vadd.f32 %v13333_v6, %v9727_v3  ;;  %v9725_v31 = vadd.f32 %v19126_v41, %v9462_v29  ;;  %v6983_v12 = vadd.f32 %v14599_v44, %v6727_v30  ;;  %v14862_v0 = vpop.f32.mrf.mxu0  ;;  %v19206_v36 = vld [vmem:[%s18346_s27 + $0x128] sm:$0xff]   ;;  %v6731_v17 = vld [vmem:[#allocation2 + $0x298] sm:$0xff] }
 0x3e2   : > { %v9465_v24 = vld [vmem:[#allocation2 + $0x218] sm:$0xff]  ;;  %9213 = vst.msk [vmem:[#allocation2 + $0x238] sm:$0xff] %vm5177_vm5, %v8957_v27  ;;  %7236 = vst.msk [vmem:[#allocation2 + $0x260] sm:$0xff] %vm5177_vm5, %v6980_v13  ;;  %v5932_v40 = vpop.f32.mrf.mxu1  ;;  %v8960_v32 = vadd.f32 %v14862_v0, %v8704_v43  ;;  %v8702_v63 = vld [vmem:[#allocation2 + $0x240] sm:$0xff] }
 0x3e3   : > { %11771 = vst.msk [vmem:[%s18394_s8 + $0xf4] sm:$0xf] %vm11709_vm6, %v13004_v47  ;;  %v13009_v8 = vpack.c.bf16 %v10495_v61, %v10495_v61  ;;  %v10493_v16 = vadd.f32 %v13329_v51, %v9725_v31  ;;  %v9728_v49 = vadd.f32 %v19126_v41, %v9465_v24  ;;  %v6981_v14 = vadd.f32 %v6725_v1, %v5932_v40  ;;  %v7895_v46 = vpop.f32.mrf.mxu0  ;;  %v19215_v13 = vld [vmem:[%s18346_s27 + $0x120] sm:$0xff]   ;;  %v6729_v43 = vld [vmem:[#allocation2 + $0x288] sm:$0xff] }
 0x3e4   : > { %v9463_v53 = vld [vmem:[#allocation2 + $0x208] sm:$0xff]  ;;  %14957 = vmatmul.mubr.msk.bf16.gmra.mxu0 %vm3863_vm4, %v21100_v20  ;;  %9211 = vst.msk [vmem:[#allocation2 + $0x228] sm:$0xff] %vm5177_vm5, %v8955_v55  ;;  %7239 = vst.msk [vmem:[#allocation2 + $0x278] sm:$0xff] %vm5177_vm5, %v6983_v12  ;;  %v14602_v5 = vpop.f32.mrf.mxu1  ;;  %v8958_v59 = vadd.f32 %v8702_v63, %v7895_v46  ;;  %v8705_v3 = vld [vmem:[#allocation2 + $0x258] sm:$0xff]  ;;  %v13338_v47 = vunpack.c.h.bf16 %v19177_v52 }
 0x3e5   : > { %11776 = vst.msk [vmem:[%s18394_s8 + $0x108] sm:$0xf] %vm11709_vm6, %v13009_v8  ;;  %v13007_v54 = vpack.c.bf16 %v10493_v16, %v10493_v16  ;;  %v10496_v6 = vadd.f32 %v13334_v10, %v9728_v49  ;;  %v9726_v33 = vadd.f32 %v19126_v41, %v9463_v53  ;;  %14960 = vmatprep.mubr.msk.bf16.mxu0 %vm3863_vm4, %v21101_v37  ;;  %v14863_v38 = vpop.f32.mrf.mxu0  ;;  %v13349_v8 = vunpack.c.l.bf16 %v19206_v36  ;;  %v21102_v55 = vld [vmem:[#allocation35_spill] sm:$0xff]  ;;  %v6734_v46 = vld [vmem:[#allocation2 + $0x2b0] sm:$0xff] }
 0x3e6   : > { %v9468_v57 = vld [vmem:[#allocation2 + $0x230] sm:$0xff]  ;;  %14697 = vmatmul.mubr.msk.bf16.gmra.mxu1 %vm3863_vm4, %v21100_v20  ;;  %9216 = vst.msk [vmem:[#allocation2 + $0x250] sm:$0xff] %vm5177_vm5, %v8960_v32  ;;  %7237 = vst.msk [vmem:[#allocation2 + $0x268] sm:$0xff] %vm5177_vm5, %v6981_v14  ;;  %v6986_v48 = vadd.f32 %v14602_v5, %v6730_v35  ;;  %v5945_v25 = vpop.f32.mrf.mxu1  ;;  %v8961_v18 = vadd.f32 %v14863_v38, %v8705_v3  ;;  %v8703_v56 = vld [vmem:[#allocation2 + $0x248] sm:$0xff]  ;;  %v13350_v5 = vunpack.c.h.bf16 %v19206_v36 }
 0x3e7   : > { %11774 = vst.msk [vmem:[%s18394_s8 + $0x100] sm:$0xf] %vm11709_vm6, %v13007_v54  ;;  %v13010_v22 = vpack.c.bf16 %v10496_v6, %v10496_v6  ;;  %v10494_v60 = vadd.f32 %v13330_v15, %v9726_v33  ;;  %v9731_v51 = vadd.f32 %v19126_v41, %v9468_v57  ;;  %14700 = vmatprep.mubr.msk.bf16.mxu1 %vm3863_vm4, %v21101_v37  ;;  %v9466_v50 = vld [vmem:[#allocation2 + $0x220] sm:$0xff]  ;;  %v7898_v31 = vpop.f32.mrf.mxu0  ;;  %v8708_v52 = vld [vmem:[#allocation2 + $0x270] sm:$0xff]  ;;  %v13345_v54 = vunpack.c.l.bf16 %v19215_v13 }
 0x3e8   : > { %v9729_v10 = vadd.f32 %v19126_v41, %v9466_v50  ;;  %9214 = vst.msk [vmem:[#allocation2 + $0x240] sm:$0xff] %vm5177_vm5, %v8958_v59  ;;  %7242 = vst.msk [vmem:[#allocation2 + $0x290] sm:$0xff] %vm5177_vm5, %v6986_v48  ;;  %v6984_v61 = vadd.f32 %v6728_v34, %v5945_v25  ;;  %v14603_v27 = vpop.f32.mrf.mxu1  ;;  %v8959_v21 = vadd.f32 %v8703_v56, %v7898_v31  ;;  %v21103_v20 = vld [vmem:[#allocation36_spill] sm:$0xff]  ;;  %v19244_v48 = vld [vmem:[%s18346_s27 + $0x138] sm:$0xff]  }
 0x3e9   : > { %11777 = vst.msk [vmem:[%s18394_s8 + $0x10c] sm:$0xf] %vm11709_vm6, %v13010_v22  ;;  %v13008_v58 = vpack.c.bf16 %v10494_v60, %v10494_v60  ;;  %v10499_v29 = vadd.f32 %v13341_v42, %v9731_v51  ;;  %v9469_v19 = vld [vmem:[#allocation2 + $0x238] sm:$0xff]  ;;  %v6987_v16 = vadd.f32 %v14603_v27, %v6731_v17  ;;  %v14866_v49 = vpop.f32.mrf.mxu0  ;;  %v8706_v32 = vld [vmem:[#allocation2 + $0x260] sm:$0xff] }
 0x3ea   : > { %v10497_v24 = vadd.f32 %v13337_v23, %v9729_v10  ;;  %v9732_v15 = vadd.f32 %v19126_v41, %v9469_v19  ;;  %9217 = vst.msk [vmem:[#allocation2 + $0x258] sm:$0xff] %vm5177_vm5, %v8961_v18  ;;  %7240 = vst.msk [vmem:[#allocation2 + $0x280] sm:$0xff] %vm5177_vm5, %v6984_v61  ;;  %v5948_v30 = vpop.f32.mrf.mxu1  ;;  %v8964_v0 = vadd.f32 %v14866_v49, %v8708_v52  ;;  %v6732_v3 = vld [vmem:[#allocation2 + $0x2a0] sm:$0xff]  ;;  %v19253_v61 = vld [vmem:[%s18346_s27 + $0x130] sm:$0xff]  }
 0x3eb   : > { %11775 = vst.msk [vmem:[%s18394_s8 + $0x104] sm:$0xf] %vm11709_vm6, %v13008_v58  ;;  %v13013_v2 = vpack.c.bf16 %v10499_v29, %v10499_v29  ;;  %v9467_v44 = vld [vmem:[#allocation2 + $0x228] sm:$0xff]  ;;  %v6985_v6 = vadd.f32 %v6729_v43, %v5948_v30  ;;  %v7911_v33 = vpop.f32.mrf.mxu0  ;;  %v8709_v51 = vld [vmem:[#allocation2 + $0x278] sm:$0xff]  ;;  %v13346_v58 = vunpack.c.h.bf16 %v19215_v13 }
 0x3ec   : > { %14961 = vmatmul.mubr.msk.bf16.gmra.mxu0 %vm3863_vm4, %v21102_v55  ;;  %v13011_v53 = vpack.c.bf16 %v10497_v24, %v10497_v24  ;;  %v10500_v42 = vadd.f32 %v13342_v45, %v9732_v15  ;;  %v9730_v12 = vadd.f32 %v19126_v41, %v9467_v44  ;;  %9215 = vst.msk [vmem:[#allocation2 + $0x248] sm:$0xff] %vm5177_vm5, %v8959_v21  ;;  %7243 = vst.msk [vmem:[#allocation2 + $0x298] sm:$0xff] %vm5177_vm5, %v6987_v16  ;;  %v14606_v1 = vpop.f32.mrf.mxu1  ;;  %v6735_v56 = vld [vmem:[#allocation2 + $0x2b8] sm:$0xff]  ;;  %v21104_v21 = vld [vmem:[#allocation37_spill] sm:$0xff] }
 0x3ed   : > { %11780 = vst.msk [vmem:[%s18394_s8 + $0x118] sm:$0xf] %vm11709_vm6, %v13013_v2  ;;  %14964 = vmatprep.mubr.msk.bf16.mxu0 %vm3863_vm4, %v21103_v20  ;;  %v9472_v40 = vld [vmem:[#allocation2 + $0x250] sm:$0xff]  ;;  %v8962_v14 = vadd.f32 %v8706_v32, %v7911_v33  ;;  %v6990_v22 = vadd.f32 %v14606_v1, %v6734_v46  ;;  %v14867_v60 = vpop.f32.mrf.mxu0  ;;  %v8707_v36 = vld [vmem:[#allocation2 + $0x268] sm:$0xff]  ;;  %v13357_v2 = vunpack.c.l.bf16 %v19244_v48  ;;  %v13358_v1 = vunpack.c.h.bf16 %v19244_v48 }
 0x3ee   : > { %14701 = vmatmul.mubr.msk.bf16.gmra.mxu1 %vm3863_vm4, %v21102_v55  ;;  %11778 = vst.msk [vmem:[%s18394_s8 + $0x110] sm:$0xf] %vm11709_vm6, %v13011_v53  ;;  %v13014_v37 = vpack.c.bf16 %v10500_v42, %v10500_v42  ;;  %v10498_v57 = vadd.f32 %v13338_v47, %v9730_v12  ;;  %v9735_v23 = vadd.f32 %v19126_v41, %v9472_v40  ;;  %v5961_v59 = vpop.f32.mrf.mxu1  ;;  %v6733_v52 = vld [vmem:[#allocation2 + $0x2a8] sm:$0xff]  ;;  %v21105_v55 = vld [vmem:[#allocation39_spill] sm:$0xff]  ;;  %v13353_v53 = vunpack.c.l.bf16 %v19253_v61  ;;  %v6738_v33 = vld [vmem:[#allocation2 + $0x2d0] sm:$0xff] }
 0x3ef   : > { %9220 = vst.msk [vmem:[#allocation2 + $0x270] sm:$0xff] %vm5177_vm5, %v8964_v0  ;;  %14704 = vmatprep.mubr.msk.bf16.mxu1 %vm3863_vm4, %v21103_v20  ;;  %v9470_v63 = vld [vmem:[#allocation2 + $0x240] sm:$0xff]  ;;  %7241 = vst.msk [vmem:[#allocation2 + $0x288] sm:$0xff] %vm5177_vm5, %v6985_v6  ;;  %v8965_v38 = vadd.f32 %v14867_v60, %v8709_v51  ;;  %v6988_v29 = vadd.f32 %v6732_v3, %v5961_v59  ;;  %v7914_v10 = vpop.f32.mrf.mxu0  ;;  %v8712_v13 = vld [vmem:[#allocation2 + $0x290] sm:$0xff] }
 0x3f0   : > { %11781 = vst.msk [vmem:[%s18394_s8 + $0x11c] sm:$0xf] %vm11709_vm6, %v13014_v37  ;;  %v13012_v35 = vpack.c.bf16 %v10498_v57, %v10498_v57  ;;  %v10503_v50 = vadd.f32 %v13349_v8, %v9735_v23  ;;  %v9733_v45 = vadd.f32 %v19126_v41, %v9470_v63  ;;  %v14607_v18 = vpop.f32.mrf.mxu1  ;;  %v8963_v31 = vadd.f32 %v8707_v36, %v7914_v10  ;;  %v6736_v51 = vld [vmem:[#allocation2 + $0x2c0] sm:$0xff]  ;;  %v6739_v36 = vld [vmem:[#allocation2 + $0x2d8] sm:$0xff] }
 0x3f1   : > { %9218 = vst.msk [vmem:[#allocation2 + $0x260] sm:$0xff] %vm5177_vm5, %v8962_v14  ;;  %v9473_v25 = vld [vmem:[#allocation2 + $0x258] sm:$0xff]  ;;  %7246 = vst.msk [vmem:[#allocation2 + $0x2b0] sm:$0xff] %vm5177_vm5, %v6990_v22  ;;  %v6991_v24 = vadd.f32 %v14607_v18, %v6735_v56  ;;  %v14870_v15 = vpop.f32.mrf.mxu0  ;;  %v8710_v0 = vld [vmem:[#allocation2 + $0x280] sm:$0xff] }
 0x3f2   : > { %11779 = vst.msk [vmem:[%s18394_s8 + $0x114] sm:$0xf] %vm11709_vm6, %v13012_v35  ;;  %v13017_v34 = vpack.c.bf16 %v10503_v50, %v10503_v50  ;;  %v10501_v19 = vadd.f32 %v13345_v54, %v9733_v45  ;;  %v9736_v47 = vadd.f32 %v19126_v41, %v9473_v25  ;;  %v5964_v17 = vpop.f32.mrf.mxu1  ;;  %v8968_v49 = vadd.f32 %v14870_v15, %v8712_v13  ;;  %v19282_v22 = vld [vmem:[%s18346_s27 + $0x148] sm:$0xff]  }
 0x3f3   : > { %9221 = vst.msk [vmem:[#allocation2 + $0x278] sm:$0xff] %vm5177_vm5, %v8965_v38  ;;  %v9471_v27 = vld [vmem:[#allocation2 + $0x248] sm:$0xff]  ;;  %7244 = vst.msk [vmem:[#allocation2 + $0x2a0] sm:$0xff] %vm5177_vm5, %v6988_v29  ;;  %v6989_v42 = vadd.f32 %v6733_v52, %v5964_v17  ;;  %v7927_v12 = vpop.f32.mrf.mxu0  ;;  %v8713_v23 = vld [vmem:[#allocation2 + $0x298] sm:$0xff]  ;;  %v13354_v35 = vunpack.c.h.bf16 %v19253_v61 }
 0x3f4   : > { %14965 = vmatmul.mubr.msk.bf16.gmra.mxu0 %vm3863_vm4, %v21104_v21  ;;  %11784 = vst.msk [vmem:[%s18394_s8 + $0x128] sm:$0xf] %vm11709_vm6, %v13017_v34  ;;  %v13015_v44 = vpack.c.bf16 %v10501_v19, %v10501_v19  ;;  %v10504_v8 = vadd.f32 %v13350_v5, %v9736_v47  ;;  %v9734_v16 = vadd.f32 %v19126_v41, %v9471_v27  ;;  %v14610_v43 = vpop.f32.mrf.mxu1  ;;  %v19291_v29 = vld [vmem:[%s18346_s27 + $0x140] sm:$0xff]   ;;  %v13365_v34 = vunpack.c.l.bf16 %v19282_v22  ;;  %v6737_v13 = vld [vmem:[#allocation2 + $0x2c8] sm:$0xff] }
 0x3f5   : > { %9219 = vst.msk [vmem:[#allocation2 + $0x268] sm:$0xff] %vm5177_vm5, %v8963_v31  ;;  %14968 = vmatprep.mubr.msk.bf16.mxu0 %vm3863_vm4, %v21105_v55  ;;  %7247 = vst.msk [vmem:[#allocation2 + $0x2b8] sm:$0xff] %vm5177_vm5, %v6991_v24  ;;  %v8966_v6 = vadd.f32 %v8710_v0, %v7927_v12  ;;  %v6994_v37 = vadd.f32 %v14610_v43, %v6738_v33  ;;  %v14871_v57 = vpop.f32.mrf.mxu0  ;;  %v21106_v31 = vld [vmem:[#allocation40_spill] sm:$0xff]  ;;  %v6742_v12 = vld [vmem:[#allocation2 + $0x2f0] sm:$0xff]  ;;  %v13366_v43 = vunpack.c.h.bf16 %v19282_v22 }
 0x3f6   : > { %v9476_v30 = vld [vmem:[#allocation2 + $0x270] sm:$0xff]  ;;  %14705 = vmatmul.mubr.msk.bf16.gmra.mxu1 %vm3863_vm4, %v21104_v21  ;;  %11782 = vst.msk [vmem:[%s18394_s8 + $0x120] sm:$0xf] %vm11709_vm6, %v13015_v44  ;;  %v13018_v20 = vpack.c.bf16 %v10504_v8, %v10504_v8  ;;  %v10502_v40 = vadd.f32 %v13346_v58, %v9734_v16  ;;  %v5977_v14 = vpop.f32.mrf.mxu1  ;;  %v8969_v60 = vadd.f32 %v14871_v57, %v8713_v23  ;;  %v8711_v48 = vld [vmem:[#allocation2 + $0x288] sm:$0xff]  ;;  %v21107_v21 = vld [vmem:[#allocation43_spill] sm:$0xff]  ;;  %v13361_v44 = vunpack.c.l.bf16 %v19291_v29 }
 0x3f7   : > { %v9739_v54 = vadd.f32 %v19126_v41, %v9476_v30  ;;  %9224 = vst.msk [vmem:[#allocation2 + $0x290] sm:$0xff] %vm5177_vm5, %v8968_v49  ;;  %14708 = vmatprep.mubr.msk.bf16.mxu1 %vm3863_vm4, %v21105_v55  ;;  %7245 = vst.msk [vmem:[#allocation2 + $0x2a8] sm:$0xff] %vm5177_vm5, %v6989_v42  ;;  %v6992_v50 = vadd.f32 %v6736_v51, %v5977_v14  ;;  %v7930_v45 = vpop.f32.mrf.mxu0  ;;  %v6740_v23 = vld [vmem:[#allocation2 + $0x2e0] sm:$0xff] }
 0x3f8   : > { %v9474_v32 = vld [vmem:[#allocation2 + $0x260] sm:$0xff]  ;;  %11785 = vst.msk [vmem:[%s18394_s8 + $0x12c] sm:$0xf] %vm11709_vm6, %v13018_v20  ;;  %v13016_v46 = vpack.c.bf16 %v10502_v40, %v10502_v40  ;;  %v14611_v38 = vpop.f32.mrf.mxu1  ;;  %v8967_v10 = vadd.f32 %v8711_v48, %v7930_v45  ;;  %v8716_v61 = vld [vmem:[#allocation2 + $0x2b0] sm:$0xff]  ;;  %v6743_v48 = vld [vmem:[#allocation2 + $0x2f8] sm:$0xff] }
 0x3f9   : > { %v10507_v63 = vadd.f32 %v13357_v2, %v9739_v54  ;;  %v9737_v5 = vadd.f32 %v19126_v41, %v9474_v32  ;;  %9222 = vst.msk [vmem:[#allocation2 + $0x280] sm:$0xff] %vm5177_vm5, %v8966_v6  ;;  %7250 = vst.msk [vmem:[#allocation2 + $0x2d0] sm:$0xff] %vm5177_vm5, %v6994_v37  ;;  %v6995_v19 = vadd.f32 %v14611_v38, %v6739_v36  ;;  %v14874_v47 = vpop.f32.mrf.mxu0  ;;  %v19320_v37 = vld [vmem:[%s18346_s27 + $0x158] sm:$0xff]  }
 0x3fa   : > { %v9477_v59 = vld [vmem:[#allocation2 + $0x278] sm:$0xff]  ;;  %11783 = vst.msk [vmem:[%s18394_s8 + $0x124] sm:$0xf] %vm11709_vm6, %v13016_v46  ;;  %v5980_v56 = vpop.f32.mrf.mxu1  ;;  %v8972_v15 = vadd.f32 %v14874_v47, %v8716_v61  ;;  %v8714_v49 = vld [vmem:[#allocation2 + $0x2a0] sm:$0xff]  ;;  %v13362_v46 = vunpack.c.h.bf16 %v19291_v29  ;;  %v6741_v61 = vld [vmem:[#allocation2 + $0x2e8] sm:$0xff] }
 0x3fb   : > { %v13021_v3 = vpack.c.bf16 %v10507_v63, %v10507_v63  ;;  %v10505_v25 = vadd.f32 %v13353_v53, %v9737_v5  ;;  %v9740_v58 = vadd.f32 %v19126_v41, %v9477_v59  ;;  %9225 = vst.msk [vmem:[#allocation2 + $0x298] sm:$0xff] %vm5177_vm5, %v8969_v60  ;;  %7248 = vst.msk [vmem:[#allocation2 + $0x2c0] sm:$0xff] %vm5177_vm5, %v6992_v50  ;;  %v7943_v16 = vpop.f32.mrf.mxu0  ;;  %v19329_v50 = vld [vmem:[%s18346_s27 + $0x150] sm:$0xff]  }
 0x3fc   : > { %v9475_v18 = vld [vmem:[#allocation2 + $0x268] sm:$0xff]  ;;  %14969 = vmatmul.mubr.msk.bf16.gmra.mxu0 %vm3863_vm4, %v21106_v31  ;;  %9223 = vst.msk [vmem:[#allocation2 + $0x288] sm:$0xff] %vm5177_vm5, %v8967_v10  ;;  %7251 = vst.msk [vmem:[#allocation2 + $0x2d8] sm:$0xff] %vm5177_vm5, %v6995_v19  ;;  %v6993_v8 = vadd.f32 %v6737_v13, %v5980_v56  ;;  %v14614_v52 = vpop.f32.mrf.mxu1  ;;  %v8970_v42 = vadd.f32 %v8714_v49, %v7943_v16  ;;  %v8717_v54 = vld [vmem:[#allocation2 + $0x2b8] sm:$0xff] }
 0x3fd   : > { %11788 = vst.msk [vmem:[%s18394_s8 + $0x138] sm:$0xf] %vm11709_vm6, %v13021_v3  ;;  %v13019_v27 = vpack.c.bf16 %v10505_v25, %v10505_v25  ;;  %v10508_v2 = vadd.f32 %v13358_v1, %v9740_v58  ;;  %v9738_v24 = vadd.f32 %v19126_v41, %v9475_v18  ;;  %14972 = vmatprep.mubr.msk.bf16.mxu0 %vm3863_vm4, %v21107_v21  ;;  %v14875_v40 = vpop.f32.mrf.mxu0  ;;  %v13373_v3 = vunpack.c.l.bf16 %v19320_v37  ;;  %v21108_v10 = vld [vmem:[#allocation44_spill] sm:$0xff]  ;;  %v6746_v16 = vld [vmem:[#allocation2 + $0x310] sm:$0xff] }
 0x3fe   : > { %v9480_v17 = vld [vmem:[#allocation2 + $0x290] sm:$0xff]  ;;  %14709 = vmatmul.mubr.msk.bf16.gmra.mxu1 %vm3863_vm4, %v21106_v31  ;;  %9228 = vst.msk [vmem:[#allocation2 + $0x2b0] sm:$0xff] %vm5177_vm5, %v8972_v15  ;;  %7249 = vst.msk [vmem:[#allocation2 + $0x2c8] sm:$0xff] %vm5177_vm5, %v6993_v8  ;;  %v6998_v20 = vadd.f32 %v14614_v52, %v6742_v12  ;;  %v5993_v6 = vpop.f32.mrf.mxu1  ;;  %v8973_v57 = vadd.f32 %v14875_v40, %v8717_v54  ;;  %v8715_v22 = vld [vmem:[#allocation2 + $0x2a8] sm:$0xff]  ;;  %v13374_v52 = vunpack.c.h.bf16 %v19320_v37 }
 0x3ff   : > { %11786 = vst.msk [vmem:[%s18394_s8 + $0x130] sm:$0xf] %vm11709_vm6, %v13019_v27  ;;  %v13022_v55 = vpack.c.bf16 %v10508_v2, %v10508_v2  ;;  %v10506_v30 = vadd.f32 %v13354_v35, %v9738_v24  ;;  %v9743_v53 = vadd.f32 %v19126_v41, %v9480_v17  ;;  %14712 = vmatprep.mubr.msk.bf16.mxu1 %vm3863_vm4, %v21107_v21  ;;  %v7946_v5 = vpop.f32.mrf.mxu0  ;;  %v21109_v31 = vld [vmem:[#allocation47_spill] sm:$0xff]  ;;  %v13369_v27 = vunpack.c.l.bf16 %v19329_v50  ;;  %v6744_v54 = vld [vmem:[#allocation2 + $0x300] sm:$0xff] }
 0x400   : > { %v9478_v0 = vld [vmem:[#allocation2 + $0x280] sm:$0xff]  ;;  %9226 = vst.msk [vmem:[#allocation2 + $0x2a0] sm:$0xff] %vm5177_vm5, %v8970_v42  ;;  %7254 = vst.msk [vmem:[#allocation2 + $0x2f0] sm:$0xff] %vm5177_vm5, %v6998_v20  ;;  %v6996_v63 = vadd.f32 %v6740_v23, %v5993_v6  ;;  %v14615_v60 = vpop.f32.mrf.mxu1  ;;  %v8971_v45 = vadd.f32 %v8715_v22, %v7946_v5  ;;  %v8720_v29 = vld [vmem:[#allocation2 + $0x2d0] sm:$0xff] }
 0x401   : > { %11789 = vst.msk [vmem:[%s18394_s8 + $0x13c] sm:$0xf] %vm11709_vm6, %v13022_v55  ;;  %v13020_v33 = vpack.c.bf16 %v10506_v30, %v10506_v30  ;;  %v10511_v32 = vadd.f32 %v13365_v34, %v9743_v53  ;;  %v9741_v1 = vadd.f32 %v19126_v41, %v9478_v0  ;;  %v6999_v25 = vadd.f32 %v14615_v60, %v6743_v48  ;;  %v14878_v58 = vpop.f32.mrf.mxu0  ;;  %v19358_v20 = vld [vmem:[%s18346_s27 + $0x168] sm:$0xff]   ;;  %v6747_v22 = vld [vmem:[#allocation2 + $0x318] sm:$0xff] }
 0x402   : > { %v9481_v14 = vld [vmem:[#allocation2 + $0x298] sm:$0xff]  ;;  %9229 = vst.msk [vmem:[#allocation2 + $0x2b8] sm:$0xff] %vm5177_vm5, %v8973_v57  ;;  %7252 = vst.msk [vmem:[#allocation2 + $0x2e0] sm:$0xff] %vm5177_vm5, %v6996_v63  ;;  %v5996_v36 = vpop.f32.mrf.mxu1  ;;  %v8976_v47 = vadd.f32 %v14878_v58, %v8720_v29  ;;  %v8718_v15 = vld [vmem:[#allocation2 + $0x2c0] sm:$0xff] }
 0x403   : > { %11787 = vst.msk [vmem:[%s18394_s8 + $0x134] sm:$0xf] %vm11709_vm6, %v13020_v33  ;;  %v13025_v51 = vpack.c.bf16 %v10511_v32, %v10511_v32  ;;  %v10509_v59 = vadd.f32 %v13361_v44, %v9741_v1  ;;  %v9744_v35 = vadd.f32 %v19126_v41, %v9481_v14  ;;  %v9479_v38 = vld [vmem:[#allocation2 + $0x288] sm:$0xff]  ;;  %v6997_v2 = vadd.f32 %v6741_v61, %v5996_v36  ;;  %v7959_v24 = vpop.f32.mrf.mxu0  ;;  %v8721_v53 = vld [vmem:[#allocation2 + $0x2d8] sm:$0xff]  ;;  %v19367_v63 = vld [vmem:[%s18346_s27 + $0x160] sm:$0xff]  }
 0x404   : > { %14973 = vmatmul.mubr.msk.bf16.gmra.mxu0 %vm3863_vm4, %v21108_v10  ;;  %v9742_v19 = vadd.f32 %v19126_v41, %v9479_v38  ;;  %9227 = vst.msk [vmem:[#allocation2 + $0x2a8] sm:$0xff] %vm5177_vm5, %v8971_v45  ;;  %7255 = vst.msk [vmem:[#allocation2 + $0x2f8] sm:$0xff] %vm5177_vm5, %v6999_v25  ;;  %v14618_v13 = vpop.f32.mrf.mxu1  ;;  %v8974_v8 = vadd.f32 %v8718_v15, %v7959_v24  ;;  %v13370_v33 = vunpack.c.h.bf16 %v19329_v50  ;;  %v21110_v45 = vld [vmem:[#allocation48_spill] sm:$0xff]  ;;  %v6745_v29 = vld [vmem:[#allocation2 + $0x308] sm:$0xff] }
 0x405   : > { %11792 = vst.msk [vmem:[%s18394_s8 + $0x148] sm:$0xf] %vm11709_vm6, %v13025_v51  ;;  %v13023_v18 = vpack.c.bf16 %v10509_v59, %v10509_v59  ;;  %v10512_v34 = vadd.f32 %v13366_v43, %v9744_v35  ;;  %14976 = vmatprep.mubr.msk.bf16.mxu0 %vm3863_vm4, %v21109_v31  ;;  %v9484_v56 = vld [vmem:[#allocation2 + $0x2b0] sm:$0xff]  ;;  %v7002_v55 = vadd.f32 %v14618_v13, %v6746_v16  ;;  %v14879_v30 = vpop.f32.mrf.mxu0  ;;  %v8719_v37 = vld [vmem:[#allocation2 + $0x2c8] sm:$0xff]  ;;  %v13381_v51 = vunpack.c.l.bf16 %v19358_v20 }
 0x406   : > { %14713 = vmatmul.mubr.msk.bf16.gmra.mxu1 %vm3863_vm4, %v21108_v10  ;;  %v10510_v17 = vadd.f32 %v13362_v46, %v9742_v19  ;;  %v9747_v44 = vadd.f32 %v19126_v41, %v9484_v56  ;;  %9232 = vst.msk [vmem:[#allocation2 + $0x2d0] sm:$0xff] %vm5177_vm5, %v8976_v47  ;;  %7253 = vst.msk [vmem:[#allocation2 + $0x2e8] sm:$0xff] %vm5177_vm5, %v6997_v2  ;;  %v6009_v42 = vpop.f32.mrf.mxu1  ;;  %v8977_v40 = vadd.f32 %v14879_v30, %v8721_v53  ;;  %v21111_v10 = vld [vmem:[#allocation51_spill] sm:$0xff]  ;;  %v6750_v24 = vld [vmem:[#allocation2 + $0x330] sm:$0xff] }
 0x407   : > { %11790 = vst.msk [vmem:[%s18394_s8 + $0x140] sm:$0xf] %vm11709_vm6, %v13023_v18  ;;  %v13026_v21 = vpack.c.bf16 %v10512_v34, %v10512_v34  ;;  %14716 = vmatprep.mubr.msk.bf16.mxu1 %vm3863_vm4, %v21109_v31  ;;  %v9482_v49 = vld [vmem:[#allocation2 + $0x2a0] sm:$0xff]  ;;  %v7000_v32 = vadd.f32 %v6744_v54, %v6009_v42  ;;  %v7962_v1 = vpop.f32.mrf.mxu0  ;;  %v8724_v50 = vld [vmem:[#allocation2 + $0x2f0] sm:$0xff]  ;;  %v13377_v18 = vunpack.c.l.bf16 %v19367_v63  ;;  %v13382_v13 = vunpack.c.h.bf16 %v19358_v20 }
 0x408   : > { %v13024_v12 = vpack.c.bf16 %v10510_v17, %v10510_v17  ;;  %v10515_v0 = vadd.f32 %v13373_v3, %v9747_v44  ;;  %v9745_v43 = vadd.f32 %v19126_v41, %v9482_v49  ;;  %9230 = vst.msk [vmem:[#allocation2 + $0x2c0] sm:$0xff] %vm5177_vm5, %v8974_v8  ;;  %7258 = vst.msk [vmem:[#allocation2 + $0x310] sm:$0xff] %vm5177_vm5, %v7002_v55  ;;  %v14619_v57 = vpop.f32.mrf.mxu1  ;;  %v19396_v55 = vld [vmem:[%s18346_s27 + $0x178] sm:$0xff]   ;;  %v6748_v53 = vld [vmem:[#allocation2 + $0x320] sm:$0xff] }
 0x409   : > { %11793 = vst.msk [vmem:[%s18394_s8 + $0x14c] sm:$0xf] %vm11709_vm6, %v13026_v21  ;;  %v9485_v6 = vld [vmem:[#allocation2 + $0x2b8] sm:$0xff]  ;;  %v8975_v5 = vadd.f32 %v8719_v37, %v7962_v1  ;;  %v7003_v59 = vadd.f32 %v14619_v57, %v6747_v22  ;;  %v14882_v35 = vpop.f32.mrf.mxu0  ;;  %v8722_v47 = vld [vmem:[#allocation2 + $0x2e0] sm:$0xff] }
 0x40a   : > { %11791 = vst.msk [vmem:[%s18394_s8 + $0x144] sm:$0xf] %vm11709_vm6, %v13024_v12  ;;  %v13029_v23 = vpack.c.bf16 %v10515_v0, %v10515_v0  ;;  %v10513_v14 = vadd.f32 %v13369_v27, %v9745_v43  ;;  %v9748_v46 = vadd.f32 %v19126_v41, %v9485_v6  ;;  %v6012_v48 = vpop.f32.mrf.mxu1  ;;  %v8980_v58 = vadd.f32 %v14882_v35, %v8724_v50  ;;  %v6751_v37 = vld [vmem:[#allocation2 + $0x338] sm:$0xff]  ;;  %v6749_v50 = vld [vmem:[#allocation2 + $0x328] sm:$0xff] }
 0x40b   : > { %9233 = vst.msk [vmem:[#allocation2 + $0x2d8] sm:$0xff] %vm5177_vm5, %v8977_v40  ;;  %v9483_v60 = vld [vmem:[#allocation2 + $0x2a8] sm:$0xff]  ;;  %7256 = vst.msk [vmem:[#allocation2 + $0x300] sm:$0xff] %vm5177_vm5, %v7000_v32  ;;  %v7001_v34 = vadd.f32 %v6745_v29, %v6012_v48  ;;  %v7975_v19 = vpop.f32.mrf.mxu0  ;;  %v8725_v44 = vld [vmem:[#allocation2 + $0x2f8] sm:$0xff]  ;;  %v13378_v12 = vunpack.c.h.bf16 %v19367_v63 }
 0x40c   : > { %14977 = vmatmul.mubr.msk.bf16.gmra.mxu0 %vm3863_vm4, %v21110_v45  ;;  %11796 = vst.msk [vmem:[%s18394_s8 + $0x158] sm:$0xf] %vm11709_vm6, %v13029_v23  ;;  %v13027_v38 = vpack.c.bf16 %v10513_v14, %v10513_v14  ;;  %v10516_v3 = vadd.f32 %v13374_v52, %v9748_v46  ;;  %v9746_v25 = vadd.f32 %v19126_v41, %v9483_v60  ;;  %v14622_v61 = vpop.f32.mrf.mxu1  ;;  %v19405_v32 = vld [vmem:[%s18346_s27 + $0x170] sm:$0xff]   ;;  %v13389_v23 = vunpack.c.l.bf16 %v19396_v55 }
 0x40d   : > { %9231 = vst.msk [vmem:[#allocation2 + $0x2c8] sm:$0xff] %vm5177_vm5, %v8975_v5  ;;  %14980 = vmatprep.mubr.msk.bf16.mxu0 %vm3863_vm4, %v21111_v10  ;;  %v9488_v36 = vld [vmem:[#allocation2 + $0x2d0] sm:$0xff]  ;;  %7259 = vst.msk [vmem:[#allocation2 + $0x318] sm:$0xff] %vm5177_vm5, %v7003_v59  ;;  %v8978_v2 = vadd.f32 %v8722_v47, %v7975_v19  ;;  %v7006_v21 = vadd.f32 %v14622_v61, %v6750_v24  ;;  %v14883_v17 = vpop.f32.mrf.mxu0  ;;  %v8723_v20 = vld [vmem:[#allocation2 + $0x2e8] sm:$0xff]  ;;  %v13390_v61 = vunpack.c.h.bf16 %v19396_v55 }
 0x40e   : > { %14717 = vmatmul.mubr.msk.bf16.gmra.mxu1 %vm3863_vm4, %v21110_v45  ;;  %11794 = vst.msk [vmem:[%s18394_s8 + $0x150] sm:$0xf] %vm11709_vm6, %v13027_v38  ;;  %v13030_v31 = vpack.c.bf16 %v10516_v3, %v10516_v3  ;;  %v10514_v56 = vadd.f32 %v13370_v33, %v9746_v25  ;;  %v9751_v27 = vadd.f32 %v19126_v41, %v9488_v36  ;;  %v6025_v8 = vpop.f32.mrf.mxu1  ;;  %v21112_v5 = vld [vmem:[#allocation52_spill] sm:$0xff]  ;;  %v21113_v45 = vld [vmem:[#allocation55_spill] sm:$0xff]  ;;  %v13385_v38 = vunpack.c.l.bf16 %v19405_v32  ;;  %v6754_v19 = vld [vmem:[#allocation2 + $0x350] sm:$0xff] }
 0x40f   : > { %9236 = vst.msk [vmem:[#allocation2 + $0x2f0] sm:$0xff] %vm5177_vm5, %v8980_v58  ;;  %14720 = vmatprep.mubr.msk.bf16.mxu1 %vm3863_vm4, %v21111_v10  ;;  %v9486_v15 = vld [vmem:[#allocation2 + $0x2c0] sm:$0xff]  ;;  %7257 = vst.msk [vmem:[#allocation2 + $0x308] sm:$0xff] %vm5177_vm5, %v7001_v34  ;;  %v8981_v30 = vadd.f32 %v14883_v17, %v8725_v44  ;;  %v7004_v0 = vadd.f32 %v6748_v53, %v6025_v8  ;;  %v7978_v43 = vpop.f32.mrf.mxu0  ;;  %v8728_v63 = vld [vmem:[#allocation2 + $0x310] sm:$0xff] }
 0x410   : > { %11797 = vst.msk [vmem:[%s18394_s8 + $0x15c] sm:$0xf] %vm11709_vm6, %v13030_v31  ;;  %v13028_v16 = vpack.c.bf16 %v10514_v56, %v10514_v56  ;;  %v10519_v49 = vadd.f32 %v13381_v51, %v9751_v27  ;;  %v9749_v52 = vadd.f32 %v19126_v41, %v9486_v15  ;;  %v14623_v40 = vpop.f32.mrf.mxu1  ;;  %v8979_v1 = vadd.f32 %v8723_v20, %v7978_v43  ;;  %v6752_v44 = vld [vmem:[#allocation2 + $0x340] sm:$0xff]  ;;  %v6755_v20 = vld [vmem:[#allocation2 + $0x358] sm:$0xff] }
 0x411   : > { %9234 = vst.msk [vmem:[#allocation2 + $0x2e0] sm:$0xff] %vm5177_vm5, %v8978_v2  ;;  %7262 = vst.msk [vmem:[#allocation2 + $0x330] sm:$0xff] %vm5177_vm5, %v7006_v21  ;;  %v7007_v14 = vadd.f32 %v14623_v40, %v6751_v37  ;;  %v14886_v46 = vpop.f32.mrf.mxu0  ;;  %v19434_v21 = vld [vmem:[%s18346_s27 + $0x188] sm:$0xff]  }
 0x412   : > { %v9489_v42 = vld [vmem:[#allocation2 + $0x2d8] sm:$0xff]  ;;  %11795 = vst.msk [vmem:[%s18394_s8 + $0x154] sm:$0xf] %vm11709_vm6, %v13028_v16  ;;  %v13033_v54 = vpack.c.bf16 %v10519_v49, %v10519_v49  ;;  %v10517_v6 = vadd.f32 %v13377_v18, %v9749_v52  ;;  %v6028_v22 = vpop.f32.mrf.mxu1  ;;  %v8984_v35 = vadd.f32 %v14886_v46, %v8728_v63  ;;  %v8726_v58 = vld [vmem:[#allocation2 + $0x300] sm:$0xff]  ;;  %v13386_v16 = vunpack.c.h.bf16 %v19405_v32  ;;  %v6753_v63 = vld [vmem:[#allocation2 + $0x348] sm:$0xff] }
 0x413   : > { %v9752_v33 = vadd.f32 %v19126_v41, %v9489_v42  ;;  %9237 = vst.msk [vmem:[#allocation2 + $0x2f8] sm:$0xff] %vm5177_vm5, %v8981_v30  ;;  %7260 = vst.msk [vmem:[#allocation2 + $0x320] sm:$0xff] %vm5177_vm5, %v7004_v0  ;;  %v7005_v3 = vadd.f32 %v6749_v50, %v6028_v22  ;;  %v7991_v25 = vpop.f32.mrf.mxu0  ;;  %v19443_v0 = vld [vmem:[%s18346_s27 + $0x180] sm:$0xff]  }
 0x414   : > { %v9487_v57 = vld [vmem:[#allocation2 + $0x2c8] sm:$0xff]  ;;  %14981 = vmatmul.mubr.msk.bf16.gmra.mxu0 %vm3863_vm4, %v21112_v5  ;;  %11800 = vst.msk [vmem:[%s18394_s8 + $0x168] sm:$0xf] %vm11709_vm6, %v13033_v54  ;;  %v13031_v60 = vpack.c.bf16 %v10517_v6, %v10517_v6  ;;  %v14626_v29 = vpop.f32.mrf.mxu1  ;;  %v8982_v34 = vadd.f32 %v8726_v58, %v7991_v25  ;;  %v8729_v27 = vld [vmem:[#allocation2 + $0x318] sm:$0xff]  ;;  %v13397_v54 = vunpack.c.l.bf16 %v19434_v21  ;;  %v6758_v25 = vld [vmem:[#allocation2 + $0x370] sm:$0xff] }
 0x415   : > { %v10520_v51 = vadd.f32 %v13382_v13, %v9752_v33  ;;  %v9750_v59 = vadd.f32 %v19126_v41, %v9487_v57  ;;  %9235 = vst.msk [vmem:[#allocation2 + $0x2e8] sm:$0xff] %vm5177_vm5, %v8979_v1  ;;  %14984 = vmatprep.mubr.msk.bf16.mxu0 %vm3863_vm4, %v21113_v45  ;;  %7263 = vst.msk [vmem:[#allocation2 + $0x338] sm:$0xff] %vm5177_vm5, %v7007_v14  ;;  %v7010_v31 = vadd.f32 %v14626_v29, %v6754_v19  ;;  %v14887_v56 = vpop.f32.mrf.mxu0  ;;  %v21114_v1 = vld [vmem:[#allocation56_spill] sm:$0xff] }
 0x416   : > { %v9492_v48 = vld [vmem:[#allocation2 + $0x2f0] sm:$0xff]  ;;  %14721 = vmatmul.mubr.msk.bf16.gmra.mxu1 %vm3863_vm4, %v21112_v5  ;;  %11798 = vst.msk [vmem:[%s18394_s8 + $0x160] sm:$0xf] %vm11709_vm6, %v13031_v60  ;;  %v6041_v2 = vpop.f32.mrf.mxu1  ;;  %v8985_v17 = vadd.f32 %v14887_v56, %v8729_v27  ;;  %v8727_v55 = vld [vmem:[#allocation2 + $0x308] sm:$0xff]  ;;  %v21115_v5 = vld [vmem:[#allocation59_spill] sm:$0xff]  ;;  %v13393_v60 = vunpack.c.l.bf16 %v19443_v0  ;;  %v13398_v29 = vunpack.c.h.bf16 %v19434_v21 }
 0x417   : > { %v13034_v10 = vpack.c.bf16 %v10520_v51, %v10520_v51  ;;  %v10518_v36 = vadd.f32 %v13378_v12, %v9750_v59  ;;  %v9755_v18 = vadd.f32 %v19126_v41, %v9492_v48  ;;  %9240 = vst.msk [vmem:[#allocation2 + $0x310] sm:$0xff] %vm5177_vm5, %v8984_v35  ;;  %14724 = vmatprep.mubr.msk.bf16.mxu1 %vm3863_vm4, %v21113_v45  ;;  %7261 = vst.msk [vmem:[#allocation2 + $0x328] sm:$0xff] %vm5177_vm5, %v7005_v3  ;;  %v7994_v52 = vpop.f32.mrf.mxu0  ;;  %v6756_v27 = vld [vmem:[#allocation2 + $0x360] sm:$0xff] }
 0x418   : > { %v9490_v47 = vld [vmem:[#allocation2 + $0x2e0] sm:$0xff]  ;;  %9238 = vst.msk [vmem:[#allocation2 + $0x300] sm:$0xff] %vm5177_vm5, %v8982_v34  ;;  %7266 = vst.msk [vmem:[#allocation2 + $0x350] sm:$0xff] %vm5177_vm5, %v7010_v31  ;;  %v7008_v49 = vadd.f32 %v6752_v44, %v6041_v2  ;;  %v14627_v30 = vpop.f32.mrf.mxu1  ;;  %v8983_v43 = vadd.f32 %v8727_v55, %v7994_v52  ;;  %v8732_v32 = vld [vmem:[#allocation2 + $0x330] sm:$0xff] }
 0x419   : > { %11801 = vst.msk [vmem:[%s18394_s8 + $0x16c] sm:$0xf] %vm11709_vm6, %v13034_v10  ;;  %v13032_v24 = vpack.c.bf16 %v10518_v36, %v10518_v36  ;;  %v10523_v15 = vadd.f32 %v13389_v23, %v9755_v18  ;;  %v9753_v13 = vadd.f32 %v19126_v41, %v9490_v47  ;;  %v7011_v6 = vadd.f32 %v14627_v30, %v6755_v20  ;;  %v14890_v33 = vpop.f32.mrf.mxu0  ;;  %v19455_v23 = vld [vmem:[%s20810_s2] ss:$0 sm:$0xff]  ;;  %v19477_v31 = vld [vmem:[%s18346_s27 + $0x198] sm:$0xff]  }
 0x41a   : > { %v9493_v8 = vld [vmem:[#allocation2 + $0x2f8] sm:$0xff]  ;;  %9241 = vst.msk [vmem:[#allocation2 + $0x318] sm:$0xff] %vm5177_vm5, %v8985_v17  ;;  %7264 = vst.msk [vmem:[#allocation2 + $0x340] sm:$0xff] %vm5177_vm5, %v7008_v49  ;;  %v6044_v37 = vpop.f32.mrf.mxu1  ;;  %v8988_v46 = vadd.f32 %v14890_v33, %v8732_v32  ;;  %v8730_v35 = vld [vmem:[#allocation2 + $0x320] sm:$0xff] }
 0x41b   : > { %11799 = vst.msk [vmem:[%s18394_s8 + $0x164] sm:$0xf] %vm11709_vm6, %v13032_v24  ;;  %v13037_v53 = vpack.c.bf16 %v10523_v15, %v10523_v15  ;;  %v10521_v42 = vadd.f32 %v13385_v38, %v9753_v13  ;;  %v9756_v12 = vadd.f32 %v19126_v41, %v9493_v8  ;;  %v7009_v51 = vadd.f32 %v6753_v63, %v6044_v37  ;;  %v8007_v59 = vpop.f32.mrf.mxu0  ;;  %v19486_v49 = vld [vmem:[%s18346_s27 + $0x190] sm:$0xff]   ;;  %v6759_v55 = vld [vmem:[#allocation2 + $0x378] sm:$0xff]  ;;  %v6757_v32 = vld [vmem:[#allocation2 + $0x368] sm:$0xff] }
 0x41c   : > { %v9491_v40 = vld [vmem:[#allocation2 + $0x2e8] sm:$0xff]  ;;  %14985 = vmatmul.mubr.msk.bf16.gmra.mxu0 %vm3863_vm4, %v21114_v1  ;;  %9239 = vst.msk [vmem:[#allocation2 + $0x308] sm:$0xff] %vm5177_vm5, %v8983_v43  ;;  %7267 = vst.msk [vmem:[#allocation2 + $0x358] sm:$0xff] %vm5177_vm5, %v7011_v6  ;;  %v14630_v50 = vpop.f32.mrf.mxu1  ;;  %v8986_v3 = vadd.f32 %v8730_v35, %v8007_v59  ;;  %v8733_v18 = vld [vmem:[#allocation2 + $0x338] sm:$0xff]  ;;  %v13394_v24 = vunpack.c.h.bf16 %v19443_v0 }
 0x41d   : > { %11804 = vst.msk [vmem:[%s18394_s8 + $0x178] sm:$0xf] %vm11709_vm6, %v13037_v53  ;;  %v13035_v41 = vpack.c.bf16 %v10521_v42, %v10521_v42  ;;  %v10524_v57 = vadd.f32 %v13390_v61, %v9756_v12  ;;  %v9754_v14 = vadd.f32 %v19455_v23, %v9491_v40  ;;  %14988 = vmatprep.mubr.msk.bf16.mxu0 %vm3863_vm4, %v21115_v5  ;;  %v14891_v36 = vpop.f32.mrf.mxu0  ;;  %v13405_v53 = vunpack.c.l.bf16 %v19477_v31  ;;  %v21116_v43 = vld [vmem:[#allocation60_spill] sm:$0xff]  ;;  %v6762_v59 = vld [vmem:[#allocation2 + $0x390] sm:$0xff] }
 0x41e   : > { %v9496_v22 = vld [vmem:[#allocation2 + $0x310] sm:$0xff]  ;;  %14725 = vmatmul.mubr.msk.bf16.gmra.mxu1 %vm3863_vm4, %v21114_v1  ;;  %9244 = vst.msk [vmem:[#allocation2 + $0x330] sm:$0xff] %vm5177_vm5, %v8988_v46  ;;  %7265 = vst.msk [vmem:[#allocation2 + $0x348] sm:$0xff] %vm5177_vm5, %v7009_v51  ;;  %v7014_v10 = vadd.f32 %v14630_v50, %v6758_v25  ;;  %v6057_v34 = vpop.f32.mrf.mxu1  ;;  %v8989_v56 = vadd.f32 %v14891_v36, %v8733_v18  ;;  %v8731_v21 = vld [vmem:[#allocation2 + $0x328] sm:$0xff]  ;;  %v13406_v50 = vunpack.c.h.bf16 %v19477_v31 }
 0x41f   : > { %11802 = vst.msk [vmem:[%s18394_s8 + $0x170] sm:$0xf] %vm11709_vm6, %v13035_v41  ;;  %v13038_v45 = vpack.c.bf16 %v10524_v57, %v10524_v57  ;;  %v10522_v48 = vadd.f32 %v13386_v16, %v9754_v14  ;;  %v9759_v38 = vadd.f32 %v19455_v23, %v9496_v22  ;;  %14728 = vmatprep.mubr.msk.bf16.mxu1 %vm3863_vm4, %v21115_v5  ;;  %v9494_v58 = vld [vmem:[#allocation2 + $0x300] sm:$0xff]  ;;  %v8010_v13 = vpop.f32.mrf.mxu0  ;;  %v8736_v0 = vld [vmem:[#allocation2 + $0x350] sm:$0xff]  ;;  %v21117_v1 = vld [vmem:[#allocation63_spill] sm:$0xff]  ;;  %v13401_v41 = vunpack.c.l.bf16 %v19486_v49 }
 0x420   : > { %v9757_v61 = vadd.f32 %v19455_v23, %v9494_v58  ;;  %9242 = vst.msk [vmem:[#allocation2 + $0x320] sm:$0xff] %vm5177_vm5, %v8986_v3  ;;  %7270 = vst.msk [vmem:[#allocation2 + $0x370] sm:$0xff] %vm5177_vm5, %v7014_v10  ;;  %v7012_v15 = vadd.f32 %v6756_v27, %v6057_v34  ;;  %v14631_v17 = vpop.f32.mrf.mxu1  ;;  %v8987_v52 = vadd.f32 %v8731_v21, %v8010_v13  ;;  %v19515_v10 = vld [vmem:[%s18346_s27 + $0x1a8] sm:$0xff]   ;;  %v6760_v18 = vld [vmem:[#allocation2 + $0x380] sm:$0xff] }
 0x421   : > { %11805 = vst.msk [vmem:[%s18394_s8 + $0x17c] sm:$0xf] %vm11709_vm6, %v13038_v45  ;;  %v13036_v19 = vpack.c.bf16 %v10522_v48, %v10522_v48  ;;  %v10527_v47 = vadd.f32 %v13397_v54, %v9759_v38  ;;  %v9497_v2 = vld [vmem:[#allocation2 + $0x318] sm:$0xff]  ;;  %v7015_v42 = vadd.f32 %v14631_v17, %v6759_v55  ;;  %v14894_v12 = vpop.f32.mrf.mxu0  ;;  %v8734_v46 = vld [vmem:[#allocation2 + $0x340] sm:$0xff] }
 0x422   : > { %v10525_v8 = vadd.f32 %v13393_v60, %v9757_v61  ;;  %v9760_v16 = vadd.f32 %v19455_v23, %v9497_v2  ;;  %9245 = vst.msk [vmem:[#allocation2 + $0x338] sm:$0xff] %vm5177_vm5, %v8989_v56  ;;  %7268 = vst.msk [vmem:[#allocation2 + $0x360] sm:$0xff] %vm5177_vm5, %v7012_v15  ;;  %v6060_v20 = vpop.f32.mrf.mxu1  ;;  %v8992_v33 = vadd.f32 %v14894_v12, %v8736_v0  ;;  %v19524_v15 = vld [vmem:[%s18346_s27 + $0x1a0] sm:$0xff]   ;;  %v6763_v21 = vld [vmem:[#allocation2 + $0x398] sm:$0xff] }
 0x423   : > { %11803 = vst.msk [vmem:[%s18394_s8 + $0x174] sm:$0xf] %vm11709_vm6, %v13036_v19  ;;  %v13041_v44 = vpack.c.bf16 %v10527_v47, %v10527_v47  ;;  %v9495_v30 = vld [vmem:[#allocation2 + $0x308] sm:$0xff]  ;;  %v7013_v57 = vadd.f32 %v6757_v32, %v6060_v20  ;;  %v8023_v14 = vpop.f32.mrf.mxu0  ;;  %v8737_v38 = vld [vmem:[#allocation2 + $0x358] sm:$0xff]  ;;  %v13402_v19 = vunpack.c.h.bf16 %v19486_v49 }
 0x424   : > { %14989 = vmatmul.mubr.msk.bf16.gmra.mxu0 %vm3863_vm4, %v21116_v43  ;;  %v13039_v40 = vpack.c.bf16 %v10525_v8, %v10525_v8  ;;  %v10528_v54 = vadd.f32 %v13398_v29, %v9760_v16  ;;  %v9758_v6 = vadd.f32 %v19455_v23, %v9495_v30  ;;  %9243 = vst.msk [vmem:[#allocation2 + $0x328] sm:$0xff] %vm5177_vm5, %v8987_v52  ;;  %7271 = vst.msk [vmem:[#allocation2 + $0x378] sm:$0xff] %vm5177_vm5, %v7015_v42  ;;  %v14634_v63 = vpop.f32.mrf.mxu1  ;;  %v21118_v52 = vld [vmem:[#allocation64_spill] sm:$0xff]  ;;  %v6761_v0 = vld [vmem:[#allocation2 + $0x388] sm:$0xff] }
 0x425   : > { %11808 = vst.msk [vmem:[%s18394_s8 + $0x188] sm:$0xf] %vm11709_vm6, %v13041_v44  ;;  %14992 = vmatprep.mubr.msk.bf16.mxu0 %vm3863_vm4, %v21117_v1  ;;  %v9500_v37 = vld [vmem:[#allocation2 + $0x330] sm:$0xff]  ;;  %v8990_v51 = vadd.f32 %v8734_v46, %v8023_v14  ;;  %v7018_v45 = vadd.f32 %v14634_v63, %v6762_v59  ;;  %v14895_v48 = vpop.f32.mrf.mxu0  ;;  %v8735_v31 = vld [vmem:[#allocation2 + $0x348] sm:$0xff]  ;;  %v13413_v44 = vunpack.c.l.bf16 %v19515_v10  ;;  %v13414_v63 = vunpack.c.h.bf16 %v19515_v10 }
 0x426   : > { %14729 = vmatmul.mubr.msk.bf16.gmra.mxu1 %vm3863_vm4, %v21116_v43  ;;  %11806 = vst.msk [vmem:[%s18394_s8 + $0x180] sm:$0xf] %vm11709_vm6, %v13039_v40  ;;  %v13042_v5 = vpack.c.bf16 %v10528_v54, %v10528_v54  ;;  %v10526_v22 = vadd.f32 %v13394_v24, %v9758_v6  ;;  %v9763_v60 = vadd.f32 %v19455_v23, %v9500_v37  ;;  %v6073_v3 = vpop.f32.mrf.mxu1  ;;  %v21119_v43 = vld [vmem:[#allocation67_spill] sm:$0xff]  ;;  %v13409_v40 = vunpack.c.l.bf16 %v19524_v15  ;;  %v6766_v14 = vld [vmem:[#allocation2 + $0x3b0] sm:$0xff] }
 0x427   : > { %9248 = vst.msk [vmem:[#allocation2 + $0x350] sm:$0xff] %vm5177_vm5, %v8992_v33  ;;  %14732 = vmatprep.mubr.msk.bf16.mxu1 %vm3863_vm4, %v21117_v1  ;;  %v9498_v35 = vld [vmem:[#allocation2 + $0x320] sm:$0xff]  ;;  %7269 = vst.msk [vmem:[#allocation2 + $0x368] sm:$0xff] %vm5177_vm5, %v7013_v57  ;;  %v8993_v36 = vadd.f32 %v14895_v48, %v8737_v38  ;;  %v7016_v47 = vadd.f32 %v6760_v18, %v6073_v3  ;;  %v8026_v61 = vpop.f32.mrf.mxu0  ;;  %v8740_v49 = vld [vmem:[#allocation2 + $0x370] sm:$0xff] }
 0x428   : > { %11809 = vst.msk [vmem:[%s18394_s8 + $0x18c] sm:$0xf] %vm11709_vm6, %v13042_v5  ;;  %v13040_v25 = vpack.c.bf16 %v10526_v22, %v10526_v22  ;;  %v10531_v58 = vadd.f32 %v13405_v53, %v9763_v60  ;;  %v9761_v29 = vadd.f32 %v19455_v23, %v9498_v35  ;;  %v14635_v56 = vpop.f32.mrf.mxu1  ;;  %v8991_v13 = vadd.f32 %v8735_v31, %v8026_v61  ;;  %v6764_v38 = vld [vmem:[#allocation2 + $0x3a0] sm:$0xff]  ;;  %v6767_v31 = vld [vmem:[#allocation2 + $0x3b8] sm:$0xff] }
 0x429   : > { %9246 = vst.msk [vmem:[#allocation2 + $0x340] sm:$0xff] %vm5177_vm5, %v8990_v51  ;;  %v9501_v34 = vld [vmem:[#allocation2 + $0x338] sm:$0xff]  ;;  %7274 = vst.msk [vmem:[#allocation2 + $0x390] sm:$0xff] %vm5177_vm5, %v7018_v45  ;;  %v7019_v8 = vadd.f32 %v14635_v56, %v6763_v21  ;;  %v14898_v16 = vpop.f32.mrf.mxu0  ;;  %v8738_v33 = vld [vmem:[#allocation2 + $0x360] sm:$0xff] }
 0x42a   : > { %11807 = vst.msk [vmem:[%s18394_s8 + $0x184] sm:$0xf] %vm11709_vm6, %v13040_v25  ;;  %v13045_v27 = vpack.c.bf16 %v10531_v58, %v10531_v58  ;;  %v10529_v2 = vadd.f32 %v13401_v41, %v9761_v29  ;;  %v9764_v24 = vadd.f32 %v19455_v23, %v9501_v34  ;;  %v6076_v55 = vpop.f32.mrf.mxu1  ;;  %v8996_v12 = vadd.f32 %v14898_v16, %v8740_v49  ;;  %v19553_v45 = vld [vmem:[%s18346_s27 + $0x1b8] sm:$0xff]   ;;  %v6765_v16 = vld [vmem:[#allocation2 + $0x3a8] sm:$0xff] }
 0x42b   : > { %9249 = vst.msk [vmem:[#allocation2 + $0x358] sm:$0xff] %vm5177_vm5, %v8993_v36  ;;  %v9499_v17 = vld [vmem:[#allocation2 + $0x328] sm:$0xff]  ;;  %7272 = vst.msk [vmem:[#allocation2 + $0x380] sm:$0xff] %vm5177_vm5, %v7016_v47  ;;  %v7017_v54 = vadd.f32 %v6761_v0, %v6076_v55  ;;  %v8039_v6 = vpop.f32.mrf.mxu0  ;;  %v8741_v60 = vld [vmem:[#allocation2 + $0x378] sm:$0xff]  ;;  %v13410_v25 = vunpack.c.h.bf16 %v19524_v15 }
 0x42c   : > { %14993 = vmatmul.mubr.msk.bf16.gmra.mxu0 %vm3863_vm4, %v21118_v52  ;;  %11812 = vst.msk [vmem:[%s18394_s8 + $0x198] sm:$0xf] %vm11709_vm6, %v13045_v27  ;;  %v13043_v30 = vpack.c.bf16 %v10529_v2, %v10529_v2  ;;  %v10532_v53 = vadd.f32 %v13406_v50, %v9764_v24  ;;  %v9762_v42 = vadd.f32 %v19455_v23, %v9499_v17  ;;  %v14638_v32 = vpop.f32.mrf.mxu1  ;;  %v19562_v47 = vld [vmem:[%s18346_s27 + $0x1b0] sm:$0xff]   ;;  %v13421_v27 = vunpack.c.l.bf16 %v19553_v45 }
 0x42d   : > { %9247 = vst.msk [vmem:[#allocation2 + $0x348] sm:$0xff] %vm5177_vm5, %v8991_v13  ;;  %14996 = vmatprep.mubr.msk.bf16.mxu0 %vm3863_vm4, %v21119_v43  ;;  %7275 = vst.msk [vmem:[#allocation2 + $0x398] sm:$0xff] %vm5177_vm5, %v7019_v8  ;;  %v8994_v57 = vadd.f32 %v8738_v33, %v8039_v6  ;;  %v7022_v5 = vadd.f32 %v14638_v32, %v6766_v14  ;;  %v14899_v22 = vpop.f32.mrf.mxu0  ;;  %v13422_v6 = vunpack.c.h.bf16 %v19553_v45  ;;  %v19591_v14 = vld [vmem:[%s18346_s27 + $0x1c8] sm:$0xff]  }
 0x42e   : > { %v9504_v20 = vld [vmem:[#allocation2 + $0x350] sm:$0xff]  ;;  %14733 = vmatmul.mubr.msk.bf16.gmra.mxu1 %vm3863_vm4, %v21118_v52  ;;  %11810 = vst.msk [vmem:[%s18394_s8 + $0x190] sm:$0xf] %vm11709_vm6, %v13043_v30  ;;  %v13046_v1 = vpack.c.bf16 %v10532_v53, %v10532_v53  ;;  %v10530_v37 = vadd.f32 %v13402_v19, %v9762_v42  ;;  %v6089_v51 = vpop.f32.mrf.mxu1  ;;  %v8997_v48 = vadd.f32 %v14899_v22, %v8741_v60  ;;  %v8739_v10 = vld [vmem:[#allocation2 + $0x368] sm:$0xff]  ;;  %v13417_v52 = vunpack.c.l.bf16 %v19562_v47 }
 0x42f   : > { %v9767_v41 = vadd.f32 %v19455_v23, %v9504_v20  ;;  %9252 = vst.msk [vmem:[#allocation2 + $0x370] sm:$0xff] %vm5177_vm5, %v8996_v12  ;;  %14736 = vmatprep.mubr.msk.bf16.mxu1 %vm3863_vm4, %v21119_v43  ;;  %7273 = vst.msk [vmem:[#allocation2 + $0x388] sm:$0xff] %vm5177_vm5, %v7017_v54  ;;  %v7020_v58 = vadd.f32 %v6764_v38, %v6089_v51  ;;  %v8042_v29 = vpop.f32.mrf.mxu0 }
 0x430   : > { %v9502_v46 = vld [vmem:[#allocation2 + $0x340] sm:$0xff]  ;;  %11813 = vst.msk [vmem:[%s18394_s8 + $0x19c] sm:$0xf] %vm11709_vm6, %v13046_v1  ;;  %v13044_v59 = vpack.c.bf16 %v10530_v37, %v10530_v37  ;;  %v14639_v36 = vpop.f32.mrf.mxu1  ;;  %v8995_v61 = vadd.f32 %v8739_v10, %v8042_v29  ;;  %v8744_v15 = vld [vmem:[#allocation2 + $0x390] sm:$0xff] }
 0x431   : > { %v10535_v35 = vadd.f32 %v13413_v44, %v9767_v41  ;;  %v9765_v50 = vadd.f32 %v19455_v23, %v9502_v46  ;;  %9250 = vst.msk [vmem:[#allocation2 + $0x360] sm:$0xff] %vm5177_vm5, %v8994_v57  ;;  %7278 = vst.msk [vmem:[#allocation2 + $0x3b0] sm:$0xff] %vm5177_vm5, %v7022_v5  ;;  %v7023_v2 = vadd.f32 %v14639_v36, %v6767_v31  ;;  %v6768_v46 = vld [vmem:[#allocation2 + $0x3c0] sm:$0xff]  ;;  %v13418_v5 = vunpack.c.h.bf16 %v19562_v47 }
 0x432   : > { %v9505_v3 = vld [vmem:[#allocation2 + $0x358] sm:$0xff]  ;;  %11811 = vst.msk [vmem:[%s18394_s8 + $0x194] sm:$0xf] %vm11709_vm6, %v13044_v59  ;;  %v14902_v24 = vpop.f32.mrf.mxu0  ;;  %v6092_v13 = vpop.f32.mrf.mxu1  ;;  %v8742_v53 = vld [vmem:[#allocation2 + $0x380] sm:$0xff] }
 0x433   : > { %v13049_v18 = vpack.c.bf16 %v10535_v35, %v10535_v35  ;;  %v10533_v34 = vadd.f32 %v13409_v40, %v9765_v50  ;;  %v9768_v19 = vadd.f32 %v19455_v23, %v9505_v3  ;;  %9253 = vst.msk [vmem:[#allocation2 + $0x378] sm:$0xff] %vm5177_vm5, %v8997_v48  ;;  %7276 = vst.msk [vmem:[#allocation2 + $0x3a0] sm:$0xff] %vm5177_vm5, %v7020_v58  ;;  %v6770_v40 = vld [vmem:[#allocation2 + $0x3d0] sm:$0xff]  ;;  %v19600_v48 = vld [vmem:[%s18346_s27 + $0x1c0] sm:$0xff]   ;;  %v13429_v58 = vunpack.c.l.bf16 %v19591_v14 }
 0x434   : > { %v9503_v56 = vld [vmem:[#allocation2 + $0x348] sm:$0xff]  ;;  %14997 = vmatmul.mubr.msk.bf16.gmra.mxu0 %vm3863_vm4, %v17709_v9  ;;  %9251 = vst.msk [vmem:[#allocation2 + $0x368] sm:$0xff] %vm5177_vm5, %v8995_v61  ;;  %v9000_v8 = vadd.f32 %v14902_v24, %v8744_v15  ;;  %7279 = vst.msk [vmem:[#allocation2 + $0x3b8] sm:$0xff] %vm5177_vm5, %v7023_v2  ;;  %v7021_v55 = vadd.f32 %v6765_v16, %v6092_v13  ;;  %v8055_v30 = vpop.f32.mrf.mxu0  ;;  %v14642_v42 = vpop.f32.mrf.mxu1  ;;  %v8745_v32 = vld [vmem:[#allocation2 + $0x398] sm:$0xff]  ;;  %v13425_v24 = vunpack.c.l.bf16 %v19600_v48 }
 0x435   : > { %11816 = vst.msk [vmem:[%s18394_s8 + $0x1a8] sm:$0xf] %vm11709_vm6, %v13049_v18  ;;  %v13047_v21 = vpack.c.bf16 %v10533_v34, %v10533_v34  ;;  %v10536_v17 = vadd.f32 %v13414_v63, %v9768_v19  ;;  %v9766_v44 = vadd.f32 %v19455_v23, %v9503_v56  ;;  %15000 = vmatprep.mubr.msk.bf16.mxu0 %vm3863_vm4, %v17750_v4  ;;  %v6771_v3 = vld [vmem:[#allocation2 + $0x3d8] sm:$0xff]  ;;  %v21120_v18 = vld [vmem:[#allocation68_spill] sm:$0xff]  ;;  %v6769_v56 = vld [vmem:[#allocation2 + $0x3c8] sm:$0xff] }
 0x436   : > { %v9508_v49 = vld [vmem:[#allocation2 + $0x370] sm:$0xff]  ;;  %14737 = vmatmul.mubr.msk.bf16.gmra.mxu1 %vm3863_vm4, %v17709_v9  ;;  %9256 = vst.msk [vmem:[#allocation2 + $0x390] sm:$0xff] %vm5177_vm5, %v9000_v8  ;;  %v8998_v20 = vadd.f32 %v8742_v53, %v8055_v30  ;;  %7277 = vst.msk [vmem:[#allocation2 + $0x3a8] sm:$0xff] %vm5177_vm5, %v7021_v55  ;;  %v7026_v9 = vadd.f32 %v14642_v42, %v6770_v40  ;;  %v14903_v33 = vpop.f32.mrf.mxu0  ;;  %v6105_v1 = vpop.f32.mrf.mxu1  ;;  %v8743_v51 = vld [vmem:[#allocation2 + $0x388] sm:$0xff]  ;;  %v13430_v30 = vunpack.c.h.bf16 %v19591_v14 }
 0x437   : > { %11814 = vst.msk [vmem:[%s18394_s8 + $0x1a0] sm:$0xf] %vm11709_vm6, %v13047_v21  ;;  %v13050_v12 = vpack.c.bf16 %v10536_v17, %v10536_v17  ;;  %v10534_v0 = vadd.f32 %v13410_v25, %v9766_v44  ;;  %v9771_v43 = vadd.f32 %v19455_v23, %v9508_v49  ;;  %14740 = vmatprep.mubr.msk.bf16.mxu1 %vm3863_vm4, %v17750_v4 }
 0x438   : > { %v9506_v54 = vld [vmem:[#allocation2 + $0x360] sm:$0xff]  ;;  %9254 = vst.msk [vmem:[#allocation2 + $0x380] sm:$0xff] %vm5177_vm5, %v8998_v20  ;;  %v9001_v4 = vadd.f32 %v14903_v33, %v8745_v32  ;;  %7282 = vst.msk [vmem:[#allocation2 + $0x3d0] sm:$0xff] %vm5177_vm5, %v7026_v9  ;;  %v7024_v22 = vadd.f32 %v6768_v46, %v6105_v1  ;;  %v8058_v60 = vpop.f32.mrf.mxu0  ;;  %v14643_v59 = vpop.f32.mrf.mxu1  ;;  %v8748_v36 = vld [vmem:[#allocation2 + $0x3b0] sm:$0xff]  ;;  %v13426_v32 = vunpack.c.h.bf16 %v19600_v48 }
 0x439   : > { %11817 = vst.msk [vmem:[%s18394_s8 + $0x1ac] sm:$0xf] %vm11709_vm6, %v13050_v12  ;;  %v13048_v37 = vpack.c.bf16 %v10534_v0, %v10534_v0  ;;  %v10539_v41 = vadd.f32 %v13421_v27, %v9771_v43  ;;  %v9769_v57 = vadd.f32 %v19455_v23, %v9506_v54  ;;  %v8999_v38 = vadd.f32 %v8743_v51, %v8058_v60  ;;  %v21121_v27 = vld [vmem:[#allocation69_spill] sm:$0xff]  ;;  %v19629_v54 = vld [vmem:[%s18346_s27 + $0x1d8] sm:$0xff]   ;;  %v6772_v9 = vld [vmem:[#allocation2 + $0x3e0] sm:$0xff] }
 0x43a   : > { %v9509_v63 = vld [vmem:[#allocation2 + $0x378] sm:$0xff]  ;;  %9257 = vst.msk [vmem:[#allocation2 + $0x398] sm:$0xff] %vm5177_vm5, %v9001_v4  ;;  %7280 = vst.msk [vmem:[#allocation2 + $0x3c0] sm:$0xff] %vm5177_vm5, %v7024_v22  ;;  %v7027_v29 = vadd.f32 %v14643_v59, %v6771_v3  ;;  %v14906_v10 = vpop.f32.mrf.mxu0  ;;  %v6108_v34 = vpop.f32.mrf.mxu1  ;;  %v8746_v21 = vld [vmem:[#allocation2 + $0x3a0] sm:$0xff]  ;;  %v13437_v51 = vunpack.c.l.bf16 %v19629_v54 }
 0x43b   : > { %11815 = vst.msk [vmem:[%s18394_s8 + $0x1a4] sm:$0xf] %vm11709_vm6, %v13048_v37  ;;  %v13053_v35 = vpack.c.bf16 %v10539_v41, %v10539_v41  ;;  %v10537_v50 = vadd.f32 %v13417_v52, %v9769_v57  ;;  %v9772_v45 = vadd.f32 %v19455_v23, %v9509_v63  ;;  %v9507_v25 = vld [vmem:[#allocation2 + $0x368] sm:$0xff]  ;;  %v9004_v31 = vadd.f32 %v14906_v10, %v8748_v36  ;;  %v6774_v52 = vld [vmem:[#allocation2 + $0x3f0] sm:$0xff]  ;;  %v8749_v12 = vld [vmem:[#allocation2 + $0x3b8] sm:$0xff] }
 0x43c   : > { %15001 = vmatmul.mubr.msk.bf16.gmra.mxu0 %vm3863_vm4, %v21120_v18  ;;  %v9770_v61 = vadd.f32 %v19455_v23, %v9507_v25  ;;  %9255 = vst.msk [vmem:[#allocation2 + $0x388] sm:$0xff] %vm5177_vm5, %v8999_v38  ;;  %7283 = vst.msk [vmem:[#allocation2 + $0x3d8] sm:$0xff] %vm5177_vm5, %v7027_v29  ;;  %v7025_v15 = vadd.f32 %v6769_v56, %v6108_v34  ;;  %v8071_v13 = vpop.f32.mrf.mxu0  ;;  %v14646_v17 = vpop.f32.mrf.mxu1  ;;  %v19638_v63 = vld [vmem:[%s18346_s27 + $0x1d0] sm:$0xff]   ;;  %v6775_v22 = vld [vmem:[#allocation2 + $0x3f8] sm:$0xff] }
 0x43d   : > { %11820 = vst.msk [vmem:[%s18394_s8 + $0x1b8] sm:$0xf] %vm11709_vm6, %v13053_v35  ;;  %v13051_v19 = vpack.c.bf16 %v10537_v50, %v10537_v50  ;;  %v10540_v47 = vadd.f32 %v13422_v6, %v9772_v45  ;;  %15004 = vmatprep.mubr.msk.bf16.mxu0 %vm3863_vm4, %v21121_v27  ;;  %v9512_v2 = vld [vmem:[#allocation2 + $0x390] sm:$0xff]  ;;  %v9002_v49 = vadd.f32 %v8746_v21, %v8071_v13  ;;  %v8747_v41 = vld [vmem:[#allocation2 + $0x3a8] sm:$0xff]  ;;  %v21123_v10 = vld [vmem:[#allocation71_spill] sm:$0xff]  ;;  %v13438_v13 = vunpack.c.h.bf16 %v19629_v54 }
 0x43e   : > { %14741 = vmatmul.mubr.msk.bf16.gmra.mxu1 %vm3863_vm4, %v21120_v18  ;;  %v10538_v8 = vadd.f32 %v13418_v5, %v9770_v61  ;;  %v9775_v16 = vadd.f32 %v19455_v23, %v9512_v2  ;;  %9260 = vst.msk [vmem:[#allocation2 + $0x3b0] sm:$0xff] %vm5177_vm5, %v9004_v31  ;;  %7281 = vst.msk [vmem:[#allocation2 + $0x3c8] sm:$0xff] %vm5177_vm5, %v7025_v15  ;;  %v7030_v53 = vadd.f32 %v14646_v17, %v6774_v52  ;;  %v14907_v42 = vpop.f32.mrf.mxu0  ;;  %v6121_v0 = vpop.f32.mrf.mxu1  ;;  %v21122_v45 = vld [vmem:[#allocation70_spill] sm:$0xff]  ;;  %v6773_v29 = vld [vmem:[#allocation2 + $0x3e8] sm:$0xff] }
 0x43f   : > { %11818 = vst.msk [vmem:[%s18394_s8 + $0x1b0] sm:$0xf] %vm11709_vm6, %v13051_v19  ;;  %v13054_v44 = vpack.c.bf16 %v10540_v47, %v10540_v47  ;;  %14744 = vmatprep.mubr.msk.bf16.mxu1 %vm3863_vm4, %v21121_v27  ;;  %v9510_v55 = vld [vmem:[#allocation2 + $0x380] sm:$0xff]  ;;  %v9005_v6 = vadd.f32 %v14907_v42, %v8749_v12  ;;  %v7028_v1 = vadd.f32 %v6772_v9, %v6121_v0  ;;  %v8752_v50 = vld [vmem:[#allocation2 + $0x3d0] sm:$0xff]  ;;  %v13433_v18 = vunpack.c.l.bf16 %v19638_v63 }
 0x440   : > { %v13052_v43 = vpack.c.bf16 %v10538_v8, %v10538_v8  ;;  %v10543_v20 = vadd.f32 %v13429_v58, %v9775_v16  ;;  %v9773_v40 = vadd.f32 %v19455_v23, %v9510_v55  ;;  %9258 = vst.msk [vmem:[#allocation2 + $0x3a0] sm:$0xff] %vm5177_vm5, %v9002_v49  ;;  %7286 = vst.msk [vmem:[#allocation2 + $0x3f0] sm:$0xff] %vm5177_vm5, %v7030_v53  ;;  %v8074_v37 = vpop.f32.mrf.mxu0  ;;  %v14647_v57 = vpop.f32.mrf.mxu1  ;;  %v19667_v55 = vld [vmem:[%s18346_s27 + $0x1e8] sm:$0xff]   ;;  %v6776_v53 = vld [vmem:[#allocation2 + $0x400] sm:$0xff]  ;;  %v13434_v12 = vunpack.c.h.bf16 %v19638_v63 }
 0x441   : > { %11821 = vst.msk [vmem:[%s18394_s8 + $0x1bc] sm:$0xf] %vm11709_vm6, %v13054_v44  ;;  %v9513_v33 = vld [vmem:[#allocation2 + $0x398] sm:$0xff]  ;;  %v9003_v5 = vadd.f32 %v8747_v41, %v8074_v37  ;;  %v7031_v59 = vadd.f32 %v14647_v57, %v6775_v22  ;;  %v8750_v47 = vld [vmem:[#allocation2 + $0x3c0] sm:$0xff]  ;;  %v13445_v41 = vunpack.c.l.bf16 %v19667_v55 }
 0x442   : > { %11819 = vst.msk [vmem:[%s18394_s8 + $0x1b4] sm:$0xf] %vm11709_vm6, %v13052_v43  ;;  %v13057_v14 = vpack.c.bf16 %v10543_v20, %v10543_v20  ;;  %v10541_v4 = vadd.f32 %v13425_v24, %v9773_v40  ;;  %v9776_v46 = vadd.f32 %v19455_v23, %v9513_v33  ;;  %v14910_v35 = vpop.f32.mrf.mxu0  ;;  %v6124_v48 = vpop.f32.mrf.mxu1  ;;  %v6778_v24 = vld [vmem:[#allocation2 + $0x410] sm:$0xff]  ;;  %v19676_v33 = vld [vmem:[%s18346_s27 + $0x1e0] sm:$0xff]  }
 0x443   : > { %9261 = vst.msk [vmem:[#allocation2 + $0x3b8] sm:$0xff] %vm5177_vm5, %v9005_v6  ;;  %v9511_v60 = vld [vmem:[#allocation2 + $0x388] sm:$0xff]  ;;  %7284 = vst.msk [vmem:[#allocation2 + $0x3e0] sm:$0xff] %vm5177_vm5, %v7028_v1  ;;  %v9008_v58 = vadd.f32 %v14910_v35, %v8752_v50  ;;  %v7029_v34 = vadd.f32 %v6773_v29, %v6124_v48  ;;  %v8753_v44 = vld [vmem:[#allocation2 + $0x3d8] sm:$0xff] }
 0x444   : > { %15005 = vmatmul.mubr.msk.bf16.gmra.mxu0 %vm3863_vm4, %v21122_v45  ;;  %11824 = vst.msk [vmem:[%s18394_s8 + $0x1c8] sm:$0xf] %vm11709_vm6, %v13057_v14  ;;  %v13055_v38 = vpack.c.bf16 %v10541_v4, %v10541_v4  ;;  %v10544_v3 = vadd.f32 %v13430_v30, %v9776_v46  ;;  %v9774_v25 = vadd.f32 %v19455_v23, %v9511_v60  ;;  %v8087_v19 = vpop.f32.mrf.mxu0  ;;  %v14650_v61 = vpop.f32.mrf.mxu1  ;;  %v6779_v1 = vld [vmem:[#allocation2 + $0x418] sm:$0xff]  ;;  %v21124_v46 = vld [vmem:[#allocation72_spill] sm:$0xff]  ;;  %v21125_v35 = vld [vmem:[#allocation73_spill] sm:$0xff] }
 0x445   : > { %9259 = vst.msk [vmem:[#allocation2 + $0x3a8] sm:$0xff] %vm5177_vm5, %v9003_v5  ;;  %15008 = vmatprep.mubr.msk.bf16.mxu0 %vm3863_vm4, %v21123_v10  ;;  %v9516_v36 = vld [vmem:[#allocation2 + $0x3b0] sm:$0xff]  ;;  %7287 = vst.msk [vmem:[#allocation2 + $0x3f8] sm:$0xff] %vm5177_vm5, %v7031_v59  ;;  %v9006_v2 = vadd.f32 %v8750_v47, %v8087_v19  ;;  %v7034_v21 = vadd.f32 %v14650_v61, %v6778_v24  ;;  %v8751_v20 = vld [vmem:[#allocation2 + $0x3c8] sm:$0xff]  ;;  %v13446_v19 = vunpack.c.h.bf16 %v19667_v55 }
 0x446   : > { %14745 = vmatmul.mubr.msk.bf16.gmra.mxu1 %vm3863_vm4, %v21122_v45  ;;  %11822 = vst.msk [vmem:[%s18394_s8 + $0x1c0] sm:$0xf] %vm11709_vm6, %v13055_v38  ;;  %v13058_v31 = vpack.c.bf16 %v10544_v3, %v10544_v3  ;;  %v10542_v56 = vadd.f32 %v13426_v32, %v9774_v25  ;;  %v9779_v27 = vadd.f32 %v19455_v23, %v9516_v36  ;;  %v14911_v17 = vpop.f32.mrf.mxu0  ;;  %v6137_v8 = vpop.f32.mrf.mxu1  ;;  %v6777_v59 = vld [vmem:[#allocation2 + $0x408] sm:$0xff]  ;;  %v13441_v45 = vunpack.c.l.bf16 %v19676_v33 }
 0x447   : > { %9264 = vst.msk [vmem:[#allocation2 + $0x3d0] sm:$0xff] %vm5177_vm5, %v9008_v58  ;;  %14748 = vmatprep.mubr.msk.bf16.mxu1 %vm3863_vm4, %v21123_v10  ;;  %v9514_v15 = vld [vmem:[#allocation2 + $0x3a0] sm:$0xff]  ;;  %7285 = vst.msk [vmem:[#allocation2 + $0x3e8] sm:$0xff] %vm5177_vm5, %v7029_v34  ;;  %v9009_v30 = vadd.f32 %v14911_v17, %v8753_v44  ;;  %v7032_v0 = vadd.f32 %v6776_v53, %v6137_v8  ;;  %v8756_v4 = vld [vmem:[#allocation2 + $0x3f0] sm:$0xff]  ;;  %v13442_v44 = vunpack.c.h.bf16 %v19676_v33 }
 0x448   : > { %11825 = vst.msk [vmem:[%s18394_s8 + $0x1cc] sm:$0xf] %vm11709_vm6, %v13058_v31  ;;  %v13056_v16 = vpack.c.bf16 %v10542_v56, %v10542_v56  ;;  %v10547_v49 = vadd.f32 %v13437_v51, %v9779_v27  ;;  %v9777_v52 = vadd.f32 %v19455_v23, %v9514_v15  ;;  %v8090_v43 = vpop.f32.mrf.mxu0  ;;  %v14651_v40 = vpop.f32.mrf.mxu1  ;;  %v19705_v15 = vld [vmem:[%s18346_s27 + $0x1f8] sm:$0xff]  }
 0x449   : > { %9262 = vst.msk [vmem:[#allocation2 + $0x3c0] sm:$0xff] %vm5177_vm5, %v9006_v2  ;;  %7290 = vst.msk [vmem:[#allocation2 + $0x410] sm:$0xff] %vm5177_vm5, %v7034_v21  ;;  %v9007_v32 = vadd.f32 %v8751_v20, %v8090_v43  ;;  %v7035_v57 = vadd.f32 %v14651_v40, %v6779_v1  ;;  %v6780_v21 = vld [vmem:[#allocation2 + $0x420] sm:$0xff]  ;;  %v13453_v20 = vunpack.c.l.bf16 %v19705_v15 }
 0x44a   : > { %v9517_v42 = vld [vmem:[#allocation2 + $0x3b8] sm:$0xff]  ;;  %11823 = vst.msk [vmem:[%s18394_s8 + $0x1c4] sm:$0xf] %vm11709_vm6, %v13056_v16  ;;  %v13061_v54 = vpack.c.bf16 %v10547_v49, %v10547_v49  ;;  %v10545_v6 = vadd.f32 %v13433_v18, %v9777_v52  ;;  %v6140_v63 = vpop.f32.mrf.mxu1  ;;  %v8754_v3 = vld [vmem:[#allocation2 + $0x3e0] sm:$0xff]  ;;  %v6782_v18 = vld [vmem:[#allocation2 + $0x430] sm:$0xff] }
 0x44b   : > { %v9780_v9 = vadd.f32 %v19455_v23, %v9517_v42  ;;  %9265 = vst.msk [vmem:[#allocation2 + $0x3d8] sm:$0xff] %vm5177_vm5, %v9009_v30  ;;  %7288 = vst.msk [vmem:[#allocation2 + $0x400] sm:$0xff] %vm5177_vm5, %v7032_v0  ;;  %v14914_v14 = vpop.f32.mrf.mxu0  ;;  %v7033_v48 = vadd.f32 %v6777_v59, %v6140_v63  ;;  %v19714_v42 = vld [vmem:[%s18346_s27 + $0x1f0] sm:$0xff]   ;;  %v6783_v0 = vld [vmem:[#allocation2 + $0x438] sm:$0xff] }
 0x44c   : > { %v9515_v37 = vld [vmem:[#allocation2 + $0x3a8] sm:$0xff]  ;;  %15009 = vmatmul.mubr.msk.bf16.gmra.mxu0 %vm3863_vm4, %v21124_v46  ;;  %11828 = vst.msk [vmem:[%s18394_s8 + $0x1d8] sm:$0xf] %vm11709_vm6, %v13061_v54  ;;  %v13059_v5 = vpack.c.bf16 %v10545_v6, %v10545_v6  ;;  %v9012_v51 = vadd.f32 %v14914_v14, %v8756_v4  ;;  %v8757_v31 = vld [vmem:[#allocation2 + $0x3f8] sm:$0xff]  ;;  %v19727_v14 = vpop.permute.xlu0 %5493 }
 0x44d   : > { %v10548_v22 = vadd.f32 %v13438_v13, %v9780_v9  ;;  %v9778_v60 = vadd.f32 %v19455_v23, %v9515_v37  ;;  %9263 = vst.msk [vmem:[#allocation2 + $0x3c8] sm:$0xff] %vm5177_vm5, %v9007_v32  ;;  %15012 = vmatprep.mubr.msk.bf16.mxu0 %vm3863_vm4, %v21125_v35  ;;  %7291 = vst.msk [vmem:[#allocation2 + $0x418] sm:$0xff] %vm5177_vm5, %v7035_v57  ;;  %v8103_v38 = vpop.f32.mrf.mxu0  ;;  %v14654_v25 = vpop.f32.mrf.mxu1  ;;  %v21126_v9 = vld [vmem:[#allocation74_spill] sm:$0xff]  ;;  %v6781_v57 = vld [vmem:[#allocation2 + $0x428] sm:$0xff] }
 0x44e   : > { %v9520_v50 = vld [vmem:[#allocation2 + $0x3d0] sm:$0xff]  ;;  %14749 = vmatmul.mubr.msk.bf16.gmra.mxu1 %vm3863_vm4, %v21124_v46  ;;  %11826 = vst.msk [vmem:[%s18394_s8 + $0x1d0] sm:$0xf] %vm11709_vm6, %v13059_v5  ;;  %v9010_v36 = vadd.f32 %v8754_v3, %v8103_v38  ;;  %v7038_v47 = vadd.f32 %v14654_v25, %v6782_v18  ;;  %v8755_v49 = vld [vmem:[#allocation2 + $0x3e8] sm:$0xff]  ;;  %v13449_v46 = vunpack.c.l.bf16 %v19714_v42  ;;  %v13454_v38 = vunpack.c.h.bf16 %v19705_v15 }
 0x44f   : > { %v13062_v58 = vpack.c.bf16 %v10548_v22, %v10548_v22  ;;  %v10546_v29 = vadd.f32 %v13434_v12, %v9778_v60  ;;  %v9783_v10 = vadd.f32 %v19455_v23, %v9520_v50  ;;  %9268 = vst.msk [vmem:[#allocation2 + $0x3f0] sm:$0xff] %vm5177_vm5, %v9012_v51  ;;  %14752 = vmatprep.mubr.msk.bf16.mxu1 %vm3863_vm4, %v21125_v35  ;;  %7289 = vst.msk [vmem:[#allocation2 + $0x408] sm:$0xff] %vm5177_vm5, %v7033_v48  ;;  %v14915_v61 = vpop.f32.mrf.mxu0  ;;  %v6153_v56 = vpop.f32.mrf.mxu1 }
 0x450   : > { %v9518_v34 = vld [vmem:[#allocation2 + $0x3c0] sm:$0xff]  ;;  %9266 = vst.msk [vmem:[#allocation2 + $0x3e0] sm:$0xff] %vm5177_vm5, %v9010_v36  ;;  %v9013_v13 = vadd.f32 %v14915_v61, %v8757_v31  ;;  %7294 = vst.msk [vmem:[#allocation2 + $0x430] sm:$0xff] %vm5177_vm5, %v7038_v47  ;;  %v7036_v8 = vadd.f32 %v6780_v21, %v6153_v56  ;;  %v8760_v6 = vld [vmem:[#allocation2 + $0x410] sm:$0xff]  ;;  %v13450_v61 = vunpack.c.h.bf16 %v19714_v42 }
 0x451   : > { %11829 = vst.msk [vmem:[%s18394_s8 + $0x1dc] sm:$0xf] %vm11709_vm6, %v13062_v58  ;;  %v13060_v27 = vpack.c.bf16 %v10546_v29, %v10546_v29  ;;  %v10551_v2 = vadd.f32 %v13445_v41, %v9783_v10  ;;  %v9781_v24 = vadd.f32 %v19455_v23, %v9518_v34  ;;  %v8106_v16 = vpop.f32.mrf.mxu0  ;;  %v14655_v52 = vpop.f32.mrf.mxu1  ;;  %v19745_v34 = vld [vmem:[%s18346_s27 + $0x208] sm:$0xff]   ;;  %v19754_v21 = vld [vmem:[%s18346_s27 + $0x200] sm:$0xff]  }
 0x452   : > { %v9521_v17 = vld [vmem:[#allocation2 + $0x3d8] sm:$0xff]  ;;  %9269 = vst.msk [vmem:[#allocation2 + $0x3f8] sm:$0xff] %vm5177_vm5, %v9013_v13  ;;  %v9011_v12 = vadd.f32 %v8755_v49, %v8106_v16  ;;  %7292 = vst.msk [vmem:[#allocation2 + $0x420] sm:$0xff] %vm5177_vm5, %v7036_v8  ;;  %v7039_v40 = vadd.f32 %v14655_v52, %v6783_v0  ;;  %v8758_v22 = vld [vmem:[#allocation2 + $0x400] sm:$0xff]  ;;  %v19757_v8 = vpop.permute.xlu0 %5510  ;;  %v13461_v49 = vunpack.c.l.bf16 %v19745_v34 }
 0x453   : > { %11827 = vst.msk [vmem:[%s18394_s8 + $0x1d4] sm:$0xf] %vm11709_vm6, %v13060_v27  ;;  %v13065_v55 = vpack.c.bf16 %v10551_v2, %v10551_v2  ;;  %v10549_v30 = vadd.f32 %v13441_v45, %v9781_v24  ;;  %v9784_v53 = vadd.f32 %v19455_v23, %v9521_v17  ;;  %v14918_v54 = vpop.f32.mrf.mxu0  ;;  %v6156_v33 = vpop.f32.mrf.mxu1  ;;  %v6786_v45 = vld [vmem:[#allocation2 + $0x450] sm:$0xff] }
 0x454   : > { %v9519_v43 = vld [vmem:[#allocation2 + $0x3c8] sm:$0xff]  ;;  %15013 = vmatmul.mubr.msk.bf16.gmra.mxu0 %vm3863_vm4, %v21126_v9  ;;  %9267 = vst.msk [vmem:[#allocation2 + $0x3e8] sm:$0xff] %vm5177_vm5, %v9011_v12  ;;  %v9016_v41 = vadd.f32 %v14918_v54, %v8760_v6  ;;  %7295 = vst.msk [vmem:[#allocation2 + $0x438] sm:$0xff] %vm5177_vm5, %v7039_v40  ;;  %v7037_v63 = vadd.f32 %v6781_v57, %v6156_v33  ;;  %v8761_v58 = vld [vmem:[#allocation2 + $0x418] sm:$0xff]  ;;  %v19769_v40 = vpop.permute.xlu1 %5495  ;;  %v13457_v6 = vunpack.c.l.bf16 %v19754_v21 }
 0x455   : > { %11832 = vst.msk [vmem:[%s18394_s8 + $0x1e8] sm:$0xf] %vm11709_vm6, %v13065_v55  ;;  %v13063_v32 = vpack.c.bf16 %v10549_v30, %v10549_v30  ;;  %v10552_v1 = vadd.f32 %v13446_v19, %v9784_v53  ;;  %v9782_v37 = vadd.f32 %v19455_v23, %v9519_v43  ;;  %15016 = vmatprep.mubr.msk.bf16.mxu0 %vm3863_vm4, %v17894_v39  ;;  %v8119_v5 = vpop.f32.mrf.mxu0  ;;  %v14658_v60 = vpop.f32.mrf.mxu1  ;;  %v6784_v19 = vld [vmem:[#allocation2 + $0x440] sm:$0xff] }
 0x456   : > { %v9524_v4 = vld [vmem:[#allocation2 + $0x3f0] sm:$0xff]  ;;  %14753 = vmatmul.mubr.msk.bf16.gmra.mxu1 %vm3863_vm4, %v21126_v9  ;;  %9272 = vst.msk [vmem:[#allocation2 + $0x410] sm:$0xff] %vm5177_vm5, %v9016_v41  ;;  %v9014_v50 = vadd.f32 %v8758_v22, %v8119_v5  ;;  %7293 = vst.msk [vmem:[#allocation2 + $0x428] sm:$0xff] %vm5177_vm5, %v7037_v63  ;;  %v7042_v3 = vadd.f32 %v14658_v60, %v6786_v45  ;;  %v8759_v27 = vld [vmem:[#allocation2 + $0x408] sm:$0xff]  ;;  %v13462_v63 = vunpack.c.h.bf16 %v19745_v34 }
 0x457   : > { %11830 = vst.msk [vmem:[%s18394_s8 + $0x1e0] sm:$0xf] %vm11709_vm6, %v13063_v32  ;;  %v13066_v51 = vpack.c.bf16 %v10552_v1, %v10552_v1  ;;  %v10550_v59 = vadd.f32 %v13442_v44, %v9782_v37  ;;  %v9787_v35 = vadd.f32 %v19455_v23, %v9524_v4  ;;  %14756 = vmatprep.mubr.msk.bf16.mxu1 %vm3863_vm4, %v17894_v39  ;;  %v9522_v48 = vld [vmem:[#allocation2 + $0x3e0] sm:$0xff]  ;;  %v14919_v25 = vpop.f32.mrf.mxu0  ;;  %v6169_v29 = vpop.f32.mrf.mxu1  ;;  %v6787_v44 = vld [vmem:[#allocation2 + $0x458] sm:$0xff]  ;;  %v8764_v30 = vld [vmem:[#allocation2 + $0x430] sm:$0xff] }
 0x458   : > { %v9785_v18 = vadd.f32 %v19455_v23, %v9522_v48  ;;  %9270 = vst.msk [vmem:[#allocation2 + $0x400] sm:$0xff] %vm5177_vm5, %v9014_v50  ;;  %v9017_v39 = vadd.f32 %v14919_v25, %v8761_v58  ;;  %7298 = vst.msk [vmem:[#allocation2 + $0x450] sm:$0xff] %vm5177_vm5, %v7042_v3  ;;  %v7040_v31 = vadd.f32 %v6784_v19, %v6169_v29  ;;  %v19780_v41 = vld [vmem:[%s20810_s2] ss:$0 sm:$0xff]  ;;  %v19792_v45 = vld [vmem:[%s18346_s27 + $0x218] sm:$0xff]   ;;  %v13458_v25 = vunpack.c.h.bf16 %v19754_v21 }
 0x459   : > { %11833 = vst.msk [vmem:[%s18394_s8 + $0x1ec] sm:$0xf] %vm11709_vm6, %v13066_v51  ;;  %v13064_v10 = vpack.c.bf16 %v10550_v59, %v10550_v59  ;;  %v10555_v36 = vadd.f32 %v13453_v20, %v9787_v35  ;;  %v9525_v47 = vld [vmem:[#allocation2 + $0x3f8] sm:$0xff]  ;;  %v8122_v56 = vpop.f32.mrf.mxu0  ;;  %v14659_v2 = vpop.f32.mrf.mxu1  ;;  %v6785_v20 = vld [vmem:[#allocation2 + $0x448] sm:$0xff]  ;;  %v8762_v32 = vld [vmem:[#allocation2 + $0x420] sm:$0xff] }
 0x45a   : > { %v10553_v15 = vadd.f32 %v13449_v46, %v9785_v18  ;;  %v9788_v13 = vadd.f32 %v19455_v23, %v9525_v47  ;;  %9273 = vst.msk [vmem:[#allocation2 + $0x418] sm:$0xff] %vm5177_vm5, %v9017_v39  ;;  %v9015_v17 = vadd.f32 %v8759_v27, %v8122_v56  ;;  %7296 = vst.msk [vmem:[#allocation2 + $0x440] sm:$0xff] %vm5177_vm5, %v7040_v31  ;;  %v6790_v46 = vld [vmem:[#allocation2 + $0x470] sm:$0xff]  ;;  %v6788_v48 = vld [vmem:[#allocation2 + $0x460] sm:$0xff]  ;;  %v19806_v31 = vpop.permute.xlu1 %5512  ;;  %v13469_v27 = vunpack.c.l.bf16 %v19792_v45 }
 0x45b   : > { %11831 = vst.msk [vmem:[%s18394_s8 + $0x1e4] sm:$0xf] %vm11709_vm6, %v13064_v10  ;;  %v13069_v24 = vpack.c.bf16 %v10555_v36, %v10555_v36  ;;  %v9523_v16 = vld [vmem:[#allocation2 + $0x3e8] sm:$0xff]  ;;  %v7043_v52 = vadd.f32 %v14659_v2, %v6787_v44  ;;  %v14922_v55 = vpop.f32.mrf.mxu0  ;;  %v6172_v53 = vpop.f32.mrf.mxu1  ;;  %v8765_v60 = vld [vmem:[#allocation2 + $0x438] sm:$0xff]  ;;  %v19803_v19 = vld [vmem:[%s18346_s27 + $0x210] sm:$0xff]  }
 0x45c   : > { %15017 = vmatmul.mubr.msk.bf16.gmra.mxu0 %vm3863_vm4, %v17902_v11  ;;  %v13067_v42 = vpack.c.bf16 %v10553_v15, %v10553_v15  ;;  %v10556_v12 = vadd.f32 %v13454_v38, %v9788_v13  ;;  %v9786_v0 = vadd.f32 %v19455_v23, %v9523_v16  ;;  %9271 = vst.msk [vmem:[#allocation2 + $0x408] sm:$0xff] %vm5177_vm5, %v9015_v17  ;;  %v19795_v38 = vpop.permute.xlu0 %5497 }
 0x45d   : > { %11836 = vst.msk [vmem:[%s18394_s8 + $0x1f8] sm:$0xf] %vm11709_vm6, %v13069_v24  ;;  %v9020_v43 = vadd.f32 %v14922_v55, %v8764_v30  ;;  %15020 = vmatprep.mubr.msk.bf16.mxu0 %vm3863_vm4, %v17930_v62  ;;  %v9528_v54 = vld [vmem:[#allocation2 + $0x410] sm:$0xff]  ;;  %v7041_v9 = vadd.f32 %v6785_v20, %v6172_v53  ;;  %v8135_v33 = vpop.f32.mrf.mxu0  ;;  %v14662_v1 = vpop.f32.mrf.mxu1  ;;  %v8763_v10 = vld [vmem:[#allocation2 + $0x428] sm:$0xff]  ;;  %v13465_v55 = vunpack.c.l.bf16 %v19803_v19 }
 0x45e   : > { %7299 = vst.msk [vmem:[#allocation2 + $0x458] sm:$0xff] %vm5177_vm5, %v7043_v52  ;;  %14757 = vmatmul.mubr.msk.bf16.gmra.mxu1 %vm3863_vm4, %v17902_v11  ;;  %v13070_v23 = vpack.c.bf16 %v10556_v12, %v10556_v12  ;;  %v10554_v37 = vadd.f32 %v13450_v61, %v9786_v0  ;;  %v9791_v57 = vadd.f32 %v19780_v41, %v9528_v54  ;;  %v6791_v61 = vld [vmem:[#allocation2 + $0x478] sm:$0xff]  ;;  %v15389_v0 = vld [vmem:[%s15490_s6 + $0x480] sm:$0xff]  }
 0x45f   : > { %11834 = vst.msk [vmem:[%s18394_s8 + $0x1f0] sm:$0xf] %vm11709_vm6, %v13067_v42  ;;  %v9018_v4 = vadd.f32 %v8762_v32, %v8135_v33  ;;  %14760 = vmatprep.mubr.msk.bf16.mxu1 %vm3863_vm4, %v17930_v62  ;;  %v9526_v11 = vld [vmem:[#allocation2 + $0x400] sm:$0xff]  ;;  %v7046_v5 = vadd.f32 %v14662_v1, %v6790_v46  ;;  %v14923_v22 = vpop.f32.mrf.mxu0  ;;  %v6185_v51 = vpop.f32.mrf.mxu1  ;;  %v8768_v15 = vld [vmem:[#allocation2 + $0x450] sm:$0xff] }
 0x460   : > { %9276 = vst.msk [vmem:[#allocation2 + $0x430] sm:$0xff] %vm5177_vm5, %v9020_v43  ;;  %7297 = vst.msk [vmem:[#allocation2 + $0x448] sm:$0xff] %vm5177_vm5, %v7041_v9  ;;  %v13068_v59 = vpack.c.bf16 %v10554_v37, %v10554_v37  ;;  %v10559_v35 = vadd.f32 %v13461_v49, %v9791_v57  ;;  %v9789_v50 = vadd.f32 %v19780_v41, %v9526_v11  ;;  %v6789_v49 = vld [vmem:[#allocation2 + $0x468] sm:$0xff]  ;;  %v6794_v33 = vld [vmem:[#allocation2 + $0x490] sm:$0xff] }
 0x461   : > { %11837 = vst.msk [vmem:[%s18394_s8 + $0x1fc] sm:$0xf] %vm11709_vm6, %v13070_v23  ;;  %v9021_v62 = vadd.f32 %v14923_v22, %v8765_v60  ;;  %v9529_v3 = vld [vmem:[#allocation2 + $0x418] sm:$0xff]  ;;  %v7044_v58 = vadd.f32 %v6788_v48, %v6185_v51  ;;  %v8138_v29 = vpop.f32.mrf.mxu0  ;;  %v14663_v36 = vpop.f32.mrf.mxu1  ;;  %v8766_v42 = vld [vmem:[#allocation2 + $0x440] sm:$0xff]  ;;  %v5519_v43 = vsel %vm3301_vm2, %v15389_v0, %v19727_v14  ;;  %v13470_v14 = vunpack.c.h.bf16 %v19792_v45  ;;  %v6798_v0 = vld [vmem:[#allocation2 + $0x4b0] sm:$0xff] }
 0x462   : > { %9274 = vst.msk [vmem:[#allocation2 + $0x420] sm:$0xff] %vm5177_vm5, %v9018_v4  ;;  %7302 = vst.msk [vmem:[#allocation2 + $0x470] sm:$0xff] %vm5177_vm5, %v7046_v5  ;;  %v13073_v18 = vpack.c.bf16 %v10559_v35, %v10559_v35  ;;  %v10557_v34 = vadd.f32 %v13457_v6, %v9789_v50  ;;  %v9792_v39 = vadd.f32 %v19780_v41, %v9529_v3  ;;  %v6792_v5 = vld [vmem:[#allocation2 + $0x480] sm:$0xff]  ;;  %v19842_v22 = vpop.permute.xlu1 %5499  ;;  %v13466_v51 = vunpack.c.h.bf16 %v19803_v19 }
 0x463   : > { %11835 = vst.msk [vmem:[%s18394_s8 + $0x1f4] sm:$0xf] %vm11709_vm6, %v13068_v59  ;;  %v9019_v47 = vadd.f32 %v8763_v10, %v8138_v29  ;;  %v9527_v56 = vld [vmem:[#allocation2 + $0x408] sm:$0xff]  ;;  %v7047_v2 = vadd.f32 %v14663_v36, %v6791_v61  ;;  %v14926_v24 = vpop.f32.mrf.mxu0  ;;  %v6188_v13 = vpop.f32.mrf.mxu1  ;;  %v6795_v10 = vld [vmem:[#allocation2 + $0x498] sm:$0xff] }
 0x464   : > { %9277 = vst.msk [vmem:[#allocation2 + $0x438] sm:$0xff] %vm5177_vm5, %v9021_v62  ;;  %7300 = vst.msk [vmem:[#allocation2 + $0x460] sm:$0xff] %vm5177_vm5, %v7044_v58  ;;  %15021 = vmatmul.mubr.msk.bf16.gmra.mxu0 %vm3863_vm4, %v17938_v26  ;;  %v13071_v21 = vpack.c.bf16 %v10557_v34, %v10557_v34  ;;  %v10560_v17 = vadd.f32 %v13462_v63, %v9792_v39  ;;  %v9790_v44 = vadd.f32 %v19780_v41, %v9527_v56  ;;  %v19839_v63 = vld [vmem:[%s18346_s27 + $0x228] sm:$0xff]   ;;  %v19852_v58 = vld [vmem:[%s18346_s27 + $0x220] sm:$0xff]  }
 0x465   : > { %11840 = vst.msk [vmem:[%s18394_s8 + $0x208] sm:$0xf] %vm11709_vm6, %v13073_v18  ;;  %v9024_v16 = vadd.f32 %v14926_v24, %v8768_v15  ;;  %15024 = vmatprep.mubr.msk.bf16.mxu0 %vm3863_vm4, %v17966_v28  ;;  %v7045_v30 = vadd.f32 %v6789_v49, %v6188_v13  ;;  %v8151_v53 = vpop.f32.mrf.mxu0  ;;  %v14666_v12 = vpop.f32.mrf.mxu1  ;;  %v8769_v37 = vld [vmem:[#allocation2 + $0x458] sm:$0xff]  ;;  %v5527_v62 = vsel %vm3558_vm3, %v5519_v43, %v19757_v8  ;;  %v13477_v18 = vunpack.c.l.bf16 %v19839_v63 }
 0x466   : > { %9275 = vst.msk [vmem:[#allocation2 + $0x428] sm:$0xff] %vm5177_vm5, %v9019_v47  ;;  %7303 = vst.msk [vmem:[#allocation2 + $0x478] sm:$0xff] %vm5177_vm5, %v7047_v2  ;;  %14761 = vmatmul.mubr.msk.bf16.gmra.mxu1 %vm3863_vm4, %v17938_v26  ;;  %v13074_v20 = vpack.c.bf16 %v10560_v17, %v10560_v17  ;;  %v10558_v54 = vadd.f32 %v13458_v25, %v9790_v44  ;;  %v9022_v9 = vadd.f32 %v8766_v42, %v8151_v53  ;;  %v19831_v26 = vpop.permute.xlu0 %5514  ;;  %v6793_v2 = vld [vmem:[#allocation2 + $0x488] sm:$0xff]  ;;  %v19881_v43 = vpop.permute.xlu1 %5516 }
 0x467   : > { %v9532_v52 = vld [vmem:[#allocation2 + $0x430] sm:$0xff]  ;;  %11838 = vst.msk [vmem:[%s18394_s8 + $0x200] sm:$0xf] %vm11709_vm6, %v13071_v21  ;;  %14764 = vmatprep.mubr.msk.bf16.mxu1 %vm3863_vm4, %v17966_v28  ;;  %v7050_v1 = vadd.f32 %v14666_v12, %v6794_v33  ;;  %v14927_v23 = vpop.f32.mrf.mxu0  ;;  %v6201_v57 = vpop.f32.mrf.mxu1  ;;  %v8767_v50 = vld [vmem:[#allocation2 + $0x448] sm:$0xff]  ;;  %v13473_v13 = vunpack.c.l.bf16 %v19852_v58 }
 0x468   : > { %v9795_v6 = vadd.f32 %v19780_v41, %v9532_v52  ;;  %9280 = vst.msk [vmem:[#allocation2 + $0x450] sm:$0xff] %vm5177_vm5, %v9024_v16  ;;  %7301 = vst.msk [vmem:[#allocation2 + $0x468] sm:$0xff] %vm5177_vm5, %v7045_v30  ;;  %v13072_v4 = vpack.c.bf16 %v10558_v54, %v10558_v54  ;;  %v9025_v28 = vadd.f32 %v14927_v23, %v8769_v37  ;;  %v15390_v21 = vld [vmem:[%s15490_s6 + $0x488] sm:$0xff]   ;;  %v6796_v37 = vld [vmem:[#allocation2 + $0x4a0] sm:$0xff] }
 0x469   : > { %v9530_v32 = vld [vmem:[#allocation2 + $0x420] sm:$0xff]  ;;  %11841 = vst.msk [vmem:[%s18394_s8 + $0x20c] sm:$0xf] %vm11709_vm6, %v13074_v20  ;;  %v7048_v59 = vadd.f32 %v6792_v5, %v6201_v57  ;;  %v8154_v35 = vpop.f32.mrf.mxu0  ;;  %v14667_v45 = vpop.f32.mrf.mxu1  ;;  %v8772_v39 = vld [vmem:[#allocation2 + $0x470] sm:$0xff]  ;;  %v5521_v17 = vsel %vm3301_vm2, %v15390_v21, %v19769_v40  ;;  %v13478_v20 = vunpack.c.h.bf16 %v19839_v63 }
 0x46a   : > { %v10563_v46 = vadd.f32 %v13469_v27, %v9795_v6  ;;  %v9793_v11 = vadd.f32 %v19780_v41, %v9530_v32  ;;  %9278 = vst.msk [vmem:[#allocation2 + $0x440] sm:$0xff] %vm5177_vm5, %v9022_v9  ;;  %7306 = vst.msk [vmem:[#allocation2 + $0x490] sm:$0xff] %vm5177_vm5, %v7050_v1  ;;  %v9023_v29 = vadd.f32 %v8767_v50, %v8154_v35  ;;  %v19864_v24 = vpop.permute.xlu0 %7475  ;;  %v19889_v1 = vld [vmem:[%s18346_s27 + $0x238] sm:$0xff]   ;;  %v19902_v50 = vld [vmem:[%s18346_s27 + $0x230] sm:$0xff]  }
 0x46b   : > { %v9533_v60 = vld [vmem:[#allocation2 + $0x438] sm:$0xff]  ;;  %11839 = vst.msk [vmem:[%s18394_s8 + $0x204] sm:$0xf] %vm11709_vm6, %v13072_v4  ;;  %v7051_v34 = vadd.f32 %v14667_v45, %v6795_v10  ;;  %v6204_v19 = vpop.f32.mrf.mxu1  ;;  %v8770_v49 = vld [vmem:[#allocation2 + $0x460] sm:$0xff]  ;;  %v13474_v4 = vunpack.c.h.bf16 %v19852_v58 }
 0x46c   : > { %v13077_v48 = vpack.c.bf16 %v10563_v46, %v10563_v46  ;;  %v10561_v3 = vadd.f32 %v13465_v55, %v9793_v11  ;;  %v9796_v25 = vadd.f32 %v19780_v41, %v9533_v60  ;;  %9281 = vst.msk [vmem:[#allocation2 + $0x458] sm:$0xff] %vm5177_vm5, %v9025_v28  ;;  %7304 = vst.msk [vmem:[#allocation2 + $0x480] sm:$0xff] %vm5177_vm5, %v7048_v59  ;;  %v14930_v8 = vpop.f32.mrf.mxu0  ;;  %15025 = vmatmul.mubr.msk.bf16.gmra.mxu0 %vm3863_vm4, %v17974_v7  ;;  %v15391_v55 = vld [vmem:[%s15490_s6 + $0x490] sm:$0xff]   ;;  %v15393_v21 = vld [vmem:[%s15490_s6 + $0x4a4] sm:$0xff]  }
 0x46d   : > { %v9531_v36 = vld [vmem:[#allocation2 + $0x428] sm:$0xff]  ;;  %9279 = vst.msk [vmem:[#allocation2 + $0x448] sm:$0xff] %vm5177_vm5, %v9023_v29  ;;  %v9028_v27 = vadd.f32 %v14930_v8, %v8772_v39  ;;  %15028 = vmatprep.mubr.msk.bf16.mxu0 %vm3863_vm4, %v5527_v62  ;;  %7307 = vst.msk [vmem:[#allocation2 + $0x498] sm:$0xff] %vm5177_vm5, %v7051_v34  ;;  %v7049_v44 = vadd.f32 %v6793_v2, %v6204_v19  ;;  %v5523_v30 = vsel %vm3301_vm2, %v15391_v55, %v19795_v38  ;;  %v8773_v6 = vld [vmem:[#allocation2 + $0x478] sm:$0xff]  ;;  %v19915_v39 = vpop.permute.xlu1 %7477 }
 0x46e   : > { %11844 = vst.msk [vmem:[%s18394_s8 + $0x218] sm:$0xf] %vm11709_vm6, %v13077_v48  ;;  %v13075_v47 = vpack.c.bf16 %v10561_v3, %v10561_v3  ;;  %v10564_v61 = vadd.f32 %v13470_v14, %v9796_v25  ;;  %v9794_v56 = vadd.f32 %v19780_v41, %v9531_v36  ;;  %v8167_v16 = vpop.f32.mrf.mxu0  ;;  %v14670_v52 = vpop.f32.mrf.mxu1  ;;  %14765 = vmatmul.mubr.msk.bf16.gmra.mxu1 %vm3863_vm4, %v17974_v7  ;;  %v13485_v3 = vunpack.c.l.bf16 %v19889_v1  ;;  %v6797_v8 = vld [vmem:[#allocation2 + $0x4a8] sm:$0xff] }
 0x46f   : > { %v9536_v15 = vld [vmem:[#allocation2 + $0x450] sm:$0xff]  ;;  %9284 = vst.msk [vmem:[#allocation2 + $0x470] sm:$0xff] %vm5177_vm5, %v9028_v27  ;;  %v9026_v40 = vadd.f32 %v8770_v49, %v8167_v16  ;;  %14768 = vmatprep.mubr.msk.bf16.mxu1 %vm3863_vm4, %v5527_v62  ;;  %7305 = vst.msk [vmem:[#allocation2 + $0x488] sm:$0xff] %vm5177_vm5, %v7049_v44  ;;  %v7054_v38 = vadd.f32 %v14670_v52, %v6798_v0  ;;  %v5529_v46 = vsel %vm3558_vm3, %v5521_v17, %v19806_v31  ;;  %v8771_v28 = vld [vmem:[#allocation2 + $0x468] sm:$0xff]  ;;  %v19905_v62 = vpop.permute.xlu0 %7492 }
 0x470   : > { %11842 = vst.msk [vmem:[%s18394_s8 + $0x210] sm:$0xf] %vm11709_vm6, %v13075_v47  ;;  %v13078_v53 = vpack.c.bf16 %v10564_v61, %v10564_v61  ;;  %v10562_v42 = vadd.f32 %v13466_v51, %v9794_v56  ;;  %v9799_v12 = vadd.f32 %v19780_v41, %v9536_v15  ;;  %v14931_v54 = vpop.f32.mrf.mxu0  ;;  %v6217_v9 = vpop.f32.mrf.mxu1  ;;  %v5531_v60 = vsel %vm3558_vm3, %v5523_v30, %v19831_v26  ;;  %v6799_v31 = vld [vmem:[#allocation2 + $0x4b8] sm:$0xff]  ;;  %v6802_v52 = vld [vmem:[#allocation2 + $0x4d0] sm:$0xff] }
 0x471   : > { %v9534_v7 = vld [vmem:[#allocation2 + $0x440] sm:$0xff]  ;;  %9282 = vst.msk [vmem:[#allocation2 + $0x460] sm:$0xff] %vm5177_vm5, %v9026_v40  ;;  %v9029_v23 = vadd.f32 %v14931_v54, %v8773_v6  ;;  %7310 = vst.msk [vmem:[#allocation2 + $0x4b0] sm:$0xff] %vm5177_vm5, %v7054_v38  ;;  %v7052_v11 = vadd.f32 %v6796_v37, %v6217_v9  ;;  %v8776_v58 = vld [vmem:[#allocation2 + $0x490] sm:$0xff]  ;;  %v13481_v47 = vunpack.c.l.bf16 %v19902_v50  ;;  %v7501_v17 = vsel %vm3301_vm2, %v15393_v21, %v19864_v24 }
 0x472   : > { %11845 = vst.msk [vmem:[%s18394_s8 + $0x21c] sm:$0xf] %vm11709_vm6, %v13078_v53  ;;  %v13076_v33 = vpack.c.bf16 %v10562_v42, %v10562_v42  ;;  %v10567_v32 = vadd.f32 %v13477_v18, %v9799_v12  ;;  %v9797_v14 = vadd.f32 %v19780_v41, %v9534_v7  ;;  %v8170_v63 = vpop.f32.mrf.mxu0  ;;  %v14671_v5 = vpop.f32.mrf.mxu1  ;;  %v15392_v61 = vld [vmem:[%s15490_s6 + $0x498] sm:$0xff]   ;;  %v13486_v30 = vunpack.c.h.bf16 %v19889_v1  ;;  %v6800_v54 = vld [vmem:[#allocation2 + $0x4c0] sm:$0xff] }
 0x473   : > { %v9537_v57 = vld [vmem:[#allocation2 + $0x458] sm:$0xff]  ;;  %9285 = vst.msk [vmem:[#allocation2 + $0x478] sm:$0xff] %vm5177_vm5, %v9029_v23  ;;  %v9027_v45 = vadd.f32 %v8771_v28, %v8170_v63  ;;  %7308 = vst.msk [vmem:[#allocation2 + $0x4a0] sm:$0xff] %vm5177_vm5, %v7052_v11  ;;  %v7055_v26 = vadd.f32 %v14671_v5, %v6799_v31  ;;  %v5525_v56 = vsel %vm3301_vm2, %v15392_v61, %v19842_v22  ;;  %v8774_v15 = vld [vmem:[#allocation2 + $0x480] sm:$0xff]  ;;  %v7480_v6 = vpop.permute.xlu0 %7479  ;;  %v7495_v5 = vpop.permute.xlu1 %7494 }
 0x474   : > { %11843 = vst.msk [vmem:[%s18394_s8 + $0x214] sm:$0xf] %vm11709_vm6, %v13076_v33  ;;  %v13081_v51 = vpack.c.bf16 %v10567_v32, %v10567_v32  ;;  %v10565_v59 = vadd.f32 %v13473_v13, %v9797_v14  ;;  %v9800_v35 = vadd.f32 %v19780_v41, %v9537_v57  ;;  %v9535_v48 = vld [vmem:[#allocation2 + $0x448] sm:$0xff]  ;;  %v14934_v25 = vpop.f32.mrf.mxu0  ;;  %15029 = vmatmul.mubr.msk.bf16.gmra.mxu0 %vm3863_vm4, %v5529_v46  ;;  %v6220_v29 = vpop.f32.mrf.mxu1  ;;  %v8777_v42 = vld [vmem:[#allocation2 + $0x498] sm:$0xff]  ;;  %v13482_v33 = vunpack.c.h.bf16 %v19902_v50  ;;  %v19950_v63 = vld [vmem:[%s18346_s27 + $0x240] sm:$0xff]  }
 0x475   : > { %v9798_v18 = vadd.f32 %v19780_v41, %v9535_v48  ;;  %9283 = vst.msk [vmem:[#allocation2 + $0x468] sm:$0xff] %vm5177_vm5, %v9027_v45  ;;  %v9032_v34 = vadd.f32 %v14934_v25, %v8776_v58  ;;  %15032 = vmatprep.mubr.msk.bf16.mxu0 %vm3863_vm4, %v5531_v60  ;;  %7311 = vst.msk [vmem:[#allocation2 + $0x4b8] sm:$0xff] %vm5177_vm5, %v7055_v26  ;;  %v7053_v27 = vadd.f32 %v6797_v8, %v6220_v29  ;;  %v6801_v26 = vld [vmem:[#allocation2 + $0x4c8] sm:$0xff] }
 0x476   : > { %11848 = vst.msk [vmem:[%s18394_s8 + $0x228] sm:$0xf] %vm11709_vm6, %v13081_v51  ;;  %v13079_v10 = vpack.c.bf16 %v10565_v59, %v10565_v59  ;;  %v10568_v36 = vadd.f32 %v13478_v20, %v9800_v35  ;;  %v9540_v19 = vld [vmem:[#allocation2 + $0x470] sm:$0xff]  ;;  %v8183_v2 = vpop.f32.mrf.mxu0  ;;  %v14674_v13 = vpop.f32.mrf.mxu1  ;;  %14769 = vmatmul.mubr.msk.bf16.gmra.mxu1 %vm3863_vm4, %v5529_v46  ;;  %v19937_v20 = vld [vmem:[%s18346_s27 + $0x248] sm:$0xff]   ;;  %v5533_v32 = vsel %vm3558_vm3, %v5525_v56, %v19881_v43  ;;  %v6803_v43 = vld [vmem:[#allocation2 + $0x4d8] sm:$0xff]  ;;  %v13489_v58 = vunpack.c.l.bf16 %v19950_v63 }
 0x477   : > { %v10566_v16 = vadd.f32 %v13474_v4, %v9798_v18  ;;  %v9803_v49 = vadd.f32 %v19780_v41, %v9540_v19  ;;  %9288 = vst.msk [vmem:[#allocation2 + $0x490] sm:$0xff] %vm5177_vm5, %v9032_v34  ;;  %v9030_v22 = vadd.f32 %v8774_v15, %v8183_v2  ;;  %14772 = vmatprep.mubr.msk.bf16.mxu1 %vm3863_vm4, %v5531_v60  ;;  %7309 = vst.msk [vmem:[#allocation2 + $0x4a8] sm:$0xff] %vm5177_vm5, %v7053_v27  ;;  %v8775_v23 = vld [vmem:[#allocation2 + $0x488] sm:$0xff]  ;;  %v15395_v19 = vld [vmem:[%s15490_s6 + $0x4b4] sm:$0xff]   ;;  %v7497_v15 = vpop.permute.xlu0 %7496 }
 0x478   : > { %11846 = vst.msk [vmem:[%s18394_s8 + $0x220] sm:$0xf] %vm11709_vm6, %v13079_v10  ;;  %v13082_v44 = vpack.c.bf16 %v10568_v36, %v10568_v36  ;;  %v9538_v55 = vld [vmem:[#allocation2 + $0x460] sm:$0xff]  ;;  %v7058_v24 = vadd.f32 %v14674_v13, %v6802_v52  ;;  %v14935_v53 = vpop.f32.mrf.mxu0  ;;  %v6233_v12 = vpop.f32.mrf.mxu1  ;;  %v7509_v57 = vsel %vm3558_vm3, %v7501_v17, %v19905_v62  ;;  %v13493_v51 = vunpack.c.l.bf16 %v19937_v20  ;;  %v8780_v50 = vld [vmem:[#allocation2 + $0x4b0] sm:$0xff] }
 0x479   : > { %v13080_v40 = vpack.c.bf16 %v10566_v16, %v10566_v16  ;;  %v10571_v0 = vadd.f32 %v13485_v3, %v9803_v49  ;;  %v9801_v7 = vadd.f32 %v19780_v41, %v9538_v55  ;;  %9286 = vst.msk [vmem:[#allocation2 + $0x480] sm:$0xff] %vm5177_vm5, %v9030_v22  ;;  %v9033_v38 = vadd.f32 %v14935_v53, %v8777_v42  ;;  %v15394_v29 = vld [vmem:[%s15490_s6 + $0x4ac] sm:$0xff]   ;;  %v6804_v53 = vld [vmem:[#allocation2 + $0x4e0] sm:$0xff]  ;;  %v7482_v42 = vpop.permute.xlu1 %7481 }
 0x47a   : > { %11849 = vst.msk [vmem:[%s18394_s8 + $0x22c] sm:$0xf] %vm11709_vm6, %v13082_v44  ;;  %v9541_v9 = vld [vmem:[#allocation2 + $0x478] sm:$0xff]  ;;  %v7056_v14 = vadd.f32 %v6800_v54, %v6233_v12  ;;  %v8186_v1 = vpop.f32.mrf.mxu0  ;;  %v14675_v37 = vpop.f32.mrf.mxu1  ;;  %v7503_v10 = vsel %vm3301_vm2, %v15394_v29, %v19915_v39  ;;  %v8778_v34 = vld [vmem:[#allocation2 + $0x4a0] sm:$0xff]  ;;  %v6806_v2 = vld [vmem:[#allocation2 + $0x4f0] sm:$0xff]  ;;  %v13494_v21 = vunpack.c.h.bf16 %v19937_v20 }
 0x47b   : > { %7314 = vst.msk [vmem:[#allocation2 + $0x4d0] sm:$0xff] %vm5177_vm5, %v7058_v24  ;;  %v13085_v4 = vpack.c.bf16 %v10571_v0, %v10571_v0  ;;  %v10569_v46 = vadd.f32 %v13481_v47, %v9801_v7  ;;  %v9804_v11 = vadd.f32 %v19780_v41, %v9541_v9  ;;  %9289 = vst.msk [vmem:[#allocation2 + $0x498] sm:$0xff] %vm5177_vm5, %v9033_v38 }
 0x47c   : > { %11847 = vst.msk [vmem:[%s18394_s8 + $0x224] sm:$0xf] %vm11709_vm6, %v13080_v40  ;;  %v9031_v28 = vadd.f32 %v8775_v23, %v8186_v1  ;;  %v9539_v60 = vld [vmem:[#allocation2 + $0x468] sm:$0xff]  ;;  %v7059_v59 = vadd.f32 %v14675_v37, %v6803_v43  ;;  %v14938_v35 = vpop.f32.mrf.mxu0  ;;  %15033 = vmatmul.mubr.msk.bf16.gmra.mxu0 %vm3863_vm4, %v5533_v32  ;;  %v6236_v45 = vpop.f32.mrf.mxu1  ;;  %v7505_v47 = vsel %vm3301_vm2, %v15395_v19, %v7480_v6  ;;  %v8781_v16 = vld [vmem:[#allocation2 + $0x4b8] sm:$0xff]  ;;  %v13490_v40 = vunpack.c.h.bf16 %v19950_v63 }
 0x47d   : > { %7312 = vst.msk [vmem:[#allocation2 + $0x4c0] sm:$0xff] %vm5177_vm5, %v7056_v14  ;;  %v13083_v31 = vpack.c.bf16 %v10569_v46, %v10569_v46  ;;  %v10572_v62 = vadd.f32 %v13486_v30, %v9804_v11  ;;  %v9802_v48 = vadd.f32 %v19780_v41, %v9539_v60  ;;  %v9036_v3 = vadd.f32 %v14938_v35, %v8780_v50  ;;  %v19979_v30 = vld [vmem:[%s18346_s27 + $0x258] sm:$0xff]   ;;  %v19990_v14 = vld [vmem:[%s18346_s27 + $0x250] sm:$0xff]  }
 0x47e   : > { %11852 = vst.msk [vmem:[%s18394_s8 + $0x238] sm:$0xf] %vm11709_vm6, %v13085_v4  ;;  %15036 = vmatprep.mubr.msk.bf16.mxu0 %vm3863_vm4, %v7509_v57  ;;  %v9544_v25 = vld [vmem:[#allocation2 + $0x490] sm:$0xff]  ;;  %v7057_v36 = vadd.f32 %v6801_v26, %v6236_v45  ;;  %v8199_v18 = vpop.f32.mrf.mxu0  ;;  %v14678_v8 = vpop.f32.mrf.mxu1  ;;  %14773 = vmatmul.mubr.msk.bf16.gmra.mxu1 %vm3863_vm4, %v5533_v32  ;;  %v7511_v0 = vsel %vm3558_vm3, %v7503_v10, %v7495_v5  ;;  %v8779_v38 = vld [vmem:[#allocation2 + $0x4a8] sm:$0xff]  ;;  %v6807_v23 = vld [vmem:[#allocation2 + $0x4f8] sm:$0xff]  ;;  %v13501_v57 = vunpack.c.l.bf16 %v19979_v30  ;;  %v13497_v35 = vunpack.c.l.bf16 %v19990_v14 }
 0x47f   : > { %9287 = vst.msk [vmem:[#allocation2 + $0x488] sm:$0xff] %vm5177_vm5, %v9031_v28  ;;  %7315 = vst.msk [vmem:[#allocation2 + $0x4d8] sm:$0xff] %vm5177_vm5, %v7059_v59  ;;  %v13086_v61 = vpack.c.bf16 %v10572_v62, %v10572_v62  ;;  %v10570_v56 = vadd.f32 %v13482_v33, %v9802_v48  ;;  %v9807_v27 = vadd.f32 %v19780_v41, %v9544_v25  ;;  %v15396_v50 = vld [vmem:[%s15490_s6 + $0x4bc] sm:$0xff]   ;;  %v6810_v10 = vld [vmem:[#allocation2 + $0x510] sm:$0xff] }
 0x480   : > { %11850 = vst.msk [vmem:[%s18394_s8 + $0x230] sm:$0xf] %vm11709_vm6, %v13083_v31  ;;  %v9034_v39 = vadd.f32 %v8778_v34, %v8199_v18  ;;  %v9542_v13 = vld [vmem:[#allocation2 + $0x480] sm:$0xff]  ;;  %v7062_v17 = vadd.f32 %v14678_v8, %v6806_v2  ;;  %v14939_v44 = vpop.f32.mrf.mxu0  ;;  %v6249_v49 = vpop.f32.mrf.mxu1  ;;  %v7513_v6 = vsel %vm3558_vm3, %v7505_v47, %v7497_v15  ;;  %v7507_v45 = vsel %vm3301_vm2, %v15396_v50, %v7482_v42  ;;  %v20015_v2 = vld [vmem:[%s18346_s27 + $0x268] sm:$0xff]  }
 0x481   : > { %9292 = vst.msk [vmem:[#allocation2 + $0x4b0] sm:$0xff] %vm5177_vm5, %v9036_v3  ;;  %7313 = vst.msk [vmem:[#allocation2 + $0x4c8] sm:$0xff] %vm5177_vm5, %v7057_v36  ;;  %v13084_v22 = vpack.c.bf16 %v10570_v56, %v10570_v56  ;;  %v10575_v52 = vadd.f32 %v13493_v51, %v9807_v27  ;;  %v9805_v55 = vadd.f32 %v19780_v41, %v9542_v13  ;;  %v6805_v51 = vld [vmem:[#allocation2 + $0x4e8] sm:$0xff]  ;;  %v7499_v36 = vpop.permute.xlu1 %7498  ;;  %v13502_v34 = vunpack.c.h.bf16 %v19979_v30  ;;  %v6808_v13 = vld [vmem:[#allocation2 + $0x500] sm:$0xff] }
 0x482   : > { %11853 = vst.msk [vmem:[%s18394_s8 + $0x23c] sm:$0xf] %vm11709_vm6, %v13086_v61  ;;  %v9037_v24 = vadd.f32 %v14939_v44, %v8781_v16  ;;  %v9545_v12 = vld [vmem:[#allocation2 + $0x498] sm:$0xff]  ;;  %v7060_v7 = vadd.f32 %v6804_v53, %v6249_v49  ;;  %v8202_v20 = vpop.f32.mrf.mxu0  ;;  %v14679_v54 = vpop.f32.mrf.mxu1  ;;  %v8784_v11 = vld [vmem:[#allocation2 + $0x4d0] sm:$0xff]  ;;  %v7515_v44 = vsel %vm3558_vm3, %v7507_v45, %v7499_v36  ;;  %v20025_v53 = vld [vmem:[%s18346_s27 + $0x260] sm:$0xff]  }
 0x483   : > { %9290 = vst.msk [vmem:[#allocation2 + $0x4a0] sm:$0xff] %vm5177_vm5, %v9034_v39  ;;  %7318 = vst.msk [vmem:[#allocation2 + $0x4f0] sm:$0xff] %vm5177_vm5, %v7062_v17  ;;  %v13089_v9 = vpack.c.bf16 %v10575_v52, %v10575_v52  ;;  %v10573_v33 = vadd.f32 %v13489_v58, %v9805_v55  ;;  %v9808_v32 = vadd.f32 %v19780_v41, %v9545_v12  ;;  %v13498_v17 = vunpack.c.h.bf16 %v19990_v14  ;;  %v6811_v12 = vld [vmem:[#allocation2 + $0x518] sm:$0xff]  ;;  %v6809_v14 = vld [vmem:[#allocation2 + $0x508] sm:$0xff] }
 0x484   : > { %11851 = vst.msk [vmem:[%s18394_s8 + $0x234] sm:$0xf] %vm11709_vm6, %v13084_v22  ;;  %v9035_v1 = vadd.f32 %v8779_v38, %v8202_v20  ;;  %v7063_v4 = vadd.f32 %v14679_v54, %v6807_v23  ;;  %v14942_v46 = vpop.f32.mrf.mxu0  ;;  %15037 = vmatmul.mubr.msk.bf16.gmra.mxu0 %vm3863_vm4, %v7511_v0  ;;  %v6252_v63 = vpop.f32.mrf.mxu1  ;;  %v8782_v48 = vld [vmem:[#allocation2 + $0x4c0] sm:$0xff]  ;;  %v13509_v0 = vunpack.c.l.bf16 %v20015_v2  ;;  %v13505_v23 = vunpack.c.l.bf16 %v20025_v53 }
 0x485   : > { %9293 = vst.msk [vmem:[#allocation2 + $0x4b8] sm:$0xff] %vm5177_vm5, %v9037_v24  ;;  %7316 = vst.msk [vmem:[#allocation2 + $0x4e0] sm:$0xff] %vm5177_vm5, %v7060_v7  ;;  %v13087_v28 = vpack.c.bf16 %v10573_v33, %v10573_v33  ;;  %v10576_v43 = vadd.f32 %v13494_v21, %v9808_v32  ;;  %v9040_v60 = vadd.f32 %v14942_v46, %v8784_v11  ;;  %15040 = vmatprep.mubr.msk.bf16.mxu0 %vm3863_vm4, %v7513_v6 }
 0x486   : > { %v9543_v37 = vld [vmem:[#allocation2 + $0x488] sm:$0xff]  ;;  %11856 = vst.msk [vmem:[%s18394_s8 + $0x248] sm:$0xf] %vm11709_vm6, %v13089_v9  ;;  %v7061_v31 = vadd.f32 %v6805_v51, %v6252_v63  ;;  %v8215_v62 = vpop.f32.mrf.mxu0  ;;  %v14682_v3 = vpop.f32.mrf.mxu1  ;;  %v8785_v47 = vld [vmem:[#allocation2 + $0x4d8] sm:$0xff]  ;;  %v13510_v51 = vunpack.c.h.bf16 %v20015_v2 }
 0x487   : > { %v9806_v5 = vadd.f32 %v19780_v41, %v9543_v37  ;;  %9291 = vst.msk [vmem:[#allocation2 + $0x4a8] sm:$0xff] %vm5177_vm5, %v9035_v1  ;;  %7319 = vst.msk [vmem:[#allocation2 + $0x4f8] sm:$0xff] %vm5177_vm5, %v7063_v4  ;;  %v13090_v26 = vpack.c.bf16 %v10576_v43, %v10576_v43  ;;  %v9038_v29 = vadd.f32 %v8782_v48, %v8215_v62 }
 0x488   : > { %v9548_v59 = vld [vmem:[#allocation2 + $0x4b0] sm:$0xff]  ;;  %11854 = vst.msk [vmem:[%s18394_s8 + $0x240] sm:$0xf] %vm11709_vm6, %v13087_v28  ;;  %v7066_v8 = vadd.f32 %v14682_v3, %v6810_v10  ;;  %v14943_v19 = vpop.f32.mrf.mxu0  ;;  %v6265_v61 = vpop.f32.mrf.mxu1  ;;  %v8783_v22 = vld [vmem:[#allocation2 + $0x4c8] sm:$0xff]  ;;  %v20047_v3 = vld [vmem:[%s18346_s27 + $0x278] sm:$0xff]  }
 0x489   : > { %v10574_v25 = vadd.f32 %v13490_v40, %v9806_v5  ;;  %v9811_v58 = vadd.f32 %v19780_v41, %v9548_v59  ;;  %9296 = vst.msk [vmem:[#allocation2 + $0x4d0] sm:$0xff] %vm5177_vm5, %v9040_v60  ;;  %7317 = vst.msk [vmem:[#allocation2 + $0x4e8] sm:$0xff] %vm5177_vm5, %v7061_v31  ;;  %v9041_v15 = vadd.f32 %v14943_v19, %v8785_v47  ;;  %v6814_v5 = vld [vmem:[#allocation2 + $0x530] sm:$0xff]  ;;  %v13517_v2 = vunpack.c.l.bf16 %v20047_v3 }
 0x48a   : > { %v9546_v18 = vld [vmem:[#allocation2 + $0x4a0] sm:$0xff]  ;;  %11857 = vst.msk [vmem:[%s18394_s8 + $0x24c] sm:$0xf] %vm11709_vm6, %v13090_v26  ;;  %v7064_v16 = vadd.f32 %v6808_v13, %v6265_v61  ;;  %v8218_v49 = vpop.f32.mrf.mxu0  ;;  %v14683_v52 = vpop.f32.mrf.mxu1  ;;  %v8788_v38 = vld [vmem:[#allocation2 + $0x4f0] sm:$0xff] }
 0x48b   : > { %v13088_v56 = vpack.c.bf16 %v10574_v25, %v10574_v25  ;;  %v10579_v27 = vadd.f32 %v13501_v57, %v9811_v58  ;;  %v9809_v39 = vadd.f32 %v19780_v41, %v9546_v18  ;;  %9294 = vst.msk [vmem:[#allocation2 + $0x4c0] sm:$0xff] %vm5177_vm5, %v9038_v29  ;;  %7322 = vst.msk [vmem:[#allocation2 + $0x510] sm:$0xff] %vm5177_vm5, %v7066_v8  ;;  %v6812_v25 = vld [vmem:[#allocation2 + $0x520] sm:$0xff]  ;;  %v13506_v29 = vunpack.c.h.bf16 %v20025_v53  ;;  %v20056_v61 = vld [vmem:[%s18346_s27 + $0x270] sm:$0xff]  }
 0x48c   : > { %v9549_v21 = vld [vmem:[#allocation2 + $0x4b8] sm:$0xff]  ;;  %9297 = vst.msk [vmem:[#allocation2 + $0x4d8] sm:$0xff] %vm5177_vm5, %v9041_v15  ;;  %v9039_v42 = vadd.f32 %v8783_v22, %v8218_v49  ;;  %7320 = vst.msk [vmem:[#allocation2 + $0x500] sm:$0xff] %vm5177_vm5, %v7064_v16  ;;  %v7067_v7 = vadd.f32 %v14683_v52, %v6811_v12  ;;  %v14946_v20 = vpop.f32.mrf.mxu0  ;;  %15041 = vmatmul.mubr.msk.bf16.gmra.mxu0 %vm3863_vm4, %v7515_v44  ;;  %v6268_v54 = vpop.f32.mrf.mxu1  ;;  %v8786_v4 = vld [vmem:[#allocation2 + $0x4e0] sm:$0xff] }
 0x48d   : > { %11855 = vst.msk [vmem:[%s18394_s8 + $0x244] sm:$0xf] %vm11709_vm6, %v13088_v56  ;;  %v13093_v55 = vpack.c.bf16 %v10579_v27, %v10579_v27  ;;  %v10577_v30 = vadd.f32 %v13497_v35, %v9809_v39  ;;  %v9812_v24 = vadd.f32 %v19780_v41, %v9549_v21  ;;  %v9044_v32 = vadd.f32 %v14946_v20, %v8788_v38  ;;  %v6815_v27 = vld [vmem:[#allocation2 + $0x538] sm:$0xff]  ;;  %v6813_v52 = vld [vmem:[#allocation2 + $0x528] sm:$0xff]  ;;  %v6818_v38 = vld [vmem:[#allocation2 + $0x550] sm:$0xff] }
 0x48e   : > { %v9547_v40 = vld [vmem:[#allocation2 + $0x4a8] sm:$0xff]  ;;  %9295 = vst.msk [vmem:[#allocation2 + $0x4c8] sm:$0xff] %vm5177_vm5, %v9039_v42  ;;  %7323 = vst.msk [vmem:[#allocation2 + $0x518] sm:$0xff] %vm5177_vm5, %v7067_v7  ;;  %v7065_v37 = vadd.f32 %v6809_v14, %v6268_v54  ;;  %v8231_v57 = vpop.f32.mrf.mxu0  ;;  %v14686_v46 = vpop.f32.mrf.mxu1  ;;  %v8789_v50 = vld [vmem:[#allocation2 + $0x4f8] sm:$0xff] }
 0x48f   : > { %11860 = vst.msk [vmem:[%s18394_s8 + $0x258] sm:$0xf] %vm11709_vm6, %v13093_v55  ;;  %v13091_v6 = vpack.c.bf16 %v10577_v30, %v10577_v30  ;;  %v10580_v9 = vadd.f32 %v13502_v34, %v9812_v24  ;;  %v9810_v33 = vadd.f32 %v19780_v41, %v9547_v40  ;;  %v9042_v43 = vadd.f32 %v8786_v4, %v8231_v57  ;;  %v20077_v57 = vld [vmem:[%s18346_s27 + $0x288] sm:$0xff]  }
 0x490   : > { %v9552_v1 = vld [vmem:[#allocation2 + $0x4d0] sm:$0xff]  ;;  %9300 = vst.msk [vmem:[#allocation2 + $0x4f0] sm:$0xff] %vm5177_vm5, %v9044_v32  ;;  %7321 = vst.msk [vmem:[#allocation2 + $0x508] sm:$0xff] %vm5177_vm5, %v7065_v37  ;;  %v7070_v59 = vadd.f32 %v14686_v46, %v6814_v5  ;;  %v14947_v35 = vpop.f32.mrf.mxu0  ;;  %v6281_v45 = vpop.f32.mrf.mxu1  ;;  %v8787_v18 = vld [vmem:[#allocation2 + $0x4e8] sm:$0xff]  ;;  %v13513_v30 = vunpack.c.l.bf16 %v20056_v61 }
 0x491   : > { %11858 = vst.msk [vmem:[%s18394_s8 + $0x250] sm:$0xf] %vm11709_vm6, %v13091_v6  ;;  %v13094_v11 = vpack.c.bf16 %v10580_v9, %v10580_v9  ;;  %v10578_v63 = vadd.f32 %v13498_v17, %v9810_v33  ;;  %v9815_v28 = vadd.f32 %v19780_v41, %v9552_v1  ;;  %v9045_v26 = vadd.f32 %v14947_v35, %v8789_v50  ;;  %v6816_v46 = vld [vmem:[#allocation2 + $0x540] sm:$0xff] }
 0x492   : > { %v9550_v60 = vld [vmem:[#allocation2 + $0x4c0] sm:$0xff]  ;;  %9298 = vst.msk [vmem:[#allocation2 + $0x4e0] sm:$0xff] %vm5177_vm5, %v9042_v43  ;;  %7326 = vst.msk [vmem:[#allocation2 + $0x530] sm:$0xff] %vm5177_vm5, %v7070_v59  ;;  %v7068_v10 = vadd.f32 %v6812_v25, %v6281_v45  ;;  %v8234_v36 = vpop.f32.mrf.mxu0  ;;  %v14687_v34 = vpop.f32.mrf.mxu1  ;;  %v8792_v21 = vld [vmem:[#allocation2 + $0x510] sm:$0xff]  ;;  %v13518_v6 = vunpack.c.h.bf16 %v20047_v3 }
 0x493   : > { %11861 = vst.msk [vmem:[%s18394_s8 + $0x25c] sm:$0xf] %vm11709_vm6, %v13094_v11  ;;  %v13092_v31 = vpack.c.bf16 %v10578_v63, %v10578_v63  ;;  %v10583_v62 = vadd.f32 %v13509_v0, %v9815_v28  ;;  %v9813_v48 = vadd.f32 %v19780_v41, %v9550_v60  ;;  %v9553_v58 = vld [vmem:[#allocation2 + $0x4d8] sm:$0xff]  ;;  %v9043_v56 = vadd.f32 %v8787_v18, %v8234_v36  ;;  %v8790_v42 = vld [vmem:[#allocation2 + $0x500] sm:$0xff] }
 0x494   : > { %v9816_v47 = vadd.f32 %v19780_v41, %v9553_v58  ;;  %9301 = vst.msk [vmem:[#allocation2 + $0x4f8] sm:$0xff] %vm5177_vm5, %v9045_v26  ;;  %7324 = vst.msk [vmem:[#allocation2 + $0x520] sm:$0xff] %vm5177_vm5, %v7068_v10  ;;  %v7071_v15 = vadd.f32 %v14687_v34, %v6815_v27  ;;  %v14950_v13 = vpop.f32.mrf.mxu0  ;;  %v6284_v17 = vpop.f32.mrf.mxu1  ;;  %v13514_v63 = vunpack.c.h.bf16 %v20056_v61  ;;  %v20086_v50 = vld [vmem:[%s18346_s27 + $0x280] sm:$0xff]   ;;  %v6817_v34 = vld [vmem:[#allocation2 + $0x548] sm:$0xff] }
 0x495   : > { %11859 = vst.msk [vmem:[%s18394_s8 + $0x254] sm:$0xf] %vm11709_vm6, %v13092_v31  ;;  %v13097_v8 = vpack.c.bf16 %v10583_v62, %v10583_v62  ;;  %v10581_v19 = vadd.f32 %v13505_v23, %v9813_v48  ;;  %v9551_v39 = vld [vmem:[#allocation2 + $0x4c8] sm:$0xff]  ;;  %v9048_v22 = vadd.f32 %v14950_v13, %v8792_v21  ;;  %v7069_v24 = vadd.f32 %v6813_v52, %v6284_v17  ;;  %v8793_v32 = vld [vmem:[#allocation2 + $0x518] sm:$0xff]  ;;  %v6822_v21 = vld [vmem:[#allocation2 + $0x570] sm:$0xff] }
 0x496   : > { %v10584_v16 = vadd.f32 %v13510_v51, %v9816_v47  ;;  %v9814_v49 = vadd.f32 %v19780_v41, %v9551_v39  ;;  %9299 = vst.msk [vmem:[#allocation2 + $0x4e8] sm:$0xff] %vm5177_vm5, %v9043_v56  ;;  %7327 = vst.msk [vmem:[#allocation2 + $0x538] sm:$0xff] %vm5177_vm5, %v7071_v15  ;;  %v8247_v53 = vpop.f32.mrf.mxu0  ;;  %v14690_v12 = vpop.f32.mrf.mxu1  ;;  %v6819_v31 = vld [vmem:[#allocation2 + $0x558] sm:$0xff]  ;;  %v13525_v48 = vunpack.c.l.bf16 %v20077_v57 }
 0x497   : > { %11864 = vst.msk [vmem:[%s18394_s8 + $0x268] sm:$0xf] %vm11709_vm6, %v13097_v8  ;;  %v13095_v44 = vpack.c.bf16 %v10581_v19, %v10581_v19  ;;  %v9556_v55 = vld [vmem:[#allocation2 + $0x4f0] sm:$0xff]  ;;  %v9046_v20 = vadd.f32 %v8790_v42, %v8247_v53  ;;  %v7074_v9 = vadd.f32 %v14690_v12, %v6818_v38  ;;  %v8791_v5 = vld [vmem:[#allocation2 + $0x508] sm:$0xff]  ;;  %v13521_v19 = vunpack.c.l.bf16 %v20086_v50  ;;  %v20112_v53 = vld [vmem:[%s18346_s27 + $0x298] sm:$0xff]  }
 0x498   : > { %v13098_v40 = vpack.c.bf16 %v10584_v16, %v10584_v16  ;;  %v10582_v0 = vadd.f32 %v13506_v29, %v9814_v49  ;;  %v9819_v7 = vadd.f32 %v19780_v41, %v9556_v55  ;;  %9304 = vst.msk [vmem:[#allocation2 + $0x510] sm:$0xff] %vm5177_vm5, %v9048_v22  ;;  %7325 = vst.msk [vmem:[#allocation2 + $0x528] sm:$0xff] %vm5177_vm5, %v7069_v24  ;;  %v14951_v33 = vpop.f32.mrf.mxu0  ;;  %v6297_v14 = vpop.f32.mrf.mxu1  ;;  %v6820_v12 = vld [vmem:[#allocation2 + $0x560] sm:$0xff] }
 0x499   : > { %11862 = vst.msk [vmem:[%s18394_s8 + $0x260] sm:$0xf] %vm11709_vm6, %v13095_v44  ;;  %v9554_v54 = vld [vmem:[#allocation2 + $0x4e0] sm:$0xff]  ;;  %v9049_v4 = vadd.f32 %v14951_v33, %v8793_v32  ;;  %v7072_v28 = vadd.f32 %v6816_v46, %v6297_v14  ;;  %v8796_v25 = vld [vmem:[#allocation2 + $0x530] sm:$0xff]  ;;  %v13526_v44 = vunpack.c.h.bf16 %v20077_v57 }
 0x49a   : > { %11865 = vst.msk [vmem:[%s18394_s8 + $0x26c] sm:$0xf] %vm11709_vm6, %v13098_v40  ;;  %v13096_v1 = vpack.c.bf16 %v10582_v0, %v10582_v0  ;;  %v10587_v23 = vadd.f32 %v13517_v2, %v9819_v7  ;;  %v9817_v37 = vadd.f32 %v19780_v41, %v9554_v54  ;;  %v8250_v43 = vpop.f32.mrf.mxu0  ;;  %v14691_v60 = vpop.f32.mrf.mxu1  ;;  %v13522_v0 = vunpack.c.h.bf16 %v20086_v50  ;;  %v20121_v32 = vld [vmem:[%s18346_s27 + $0x290] sm:$0xff]  }
 0x49b   : > { %9302 = vst.msk [vmem:[#allocation2 + $0x500] sm:$0xff] %vm5177_vm5, %v9046_v20  ;;  %v9557_v11 = vld [vmem:[#allocation2 + $0x4f8] sm:$0xff]  ;;  %7330 = vst.msk [vmem:[#allocation2 + $0x550] sm:$0xff] %vm5177_vm5, %v7074_v9  ;;  %v9047_v45 = vadd.f32 %v8791_v5, %v8250_v43  ;;  %v7075_v3 = vadd.f32 %v14691_v60, %v6819_v31  ;;  %v8794_v56 = vld [vmem:[#allocation2 + $0x520] sm:$0xff] }
 0x49c   : > { %11863 = vst.msk [vmem:[%s18394_s8 + $0x264] sm:$0xf] %vm11709_vm6, %v13096_v1  ;;  %v13101_v51 = vpack.c.bf16 %v10587_v23, %v10587_v23  ;;  %v10585_v59 = vadd.f32 %v13513_v30, %v9817_v37  ;;  %v9820_v35 = vadd.f32 %v19780_v41, %v9557_v11  ;;  %v14954_v26 = vpop.f32.mrf.mxu0  ;;  %v6300_v58 = vpop.f32.mrf.mxu1  ;;  %v6823_v1 = vld [vmem:[#allocation2 + $0x578] sm:$0xff]  ;;  %v13533_v37 = vunpack.c.l.bf16 %v20112_v53  ;;  %v6821_v60 = vld [vmem:[#allocation2 + $0x568] sm:$0xff] }
 0x49d   : > { %9305 = vst.msk [vmem:[#allocation2 + $0x518] sm:$0xff] %vm5177_vm5, %v9049_v4  ;;  %v9555_v62 = vld [vmem:[#allocation2 + $0x4e8] sm:$0xff]  ;;  %7328 = vst.msk [vmem:[#allocation2 + $0x540] sm:$0xff] %vm5177_vm5, %v7072_v28  ;;  %v9052_v18 = vadd.f32 %v14954_v26, %v8796_v25  ;;  %v7073_v47 = vadd.f32 %v6817_v34, %v6300_v58  ;;  %v8797_v22 = vld [vmem:[#allocation2 + $0x538] sm:$0xff] }
 0x49e   : > { %11868 = vst.msk [vmem:[%s18394_s8 + $0x278] sm:$0xf] %vm11709_vm6, %v13101_v51  ;;  %v13099_v29 = vpack.c.bf16 %v10585_v59, %v10585_v59  ;;  %v10588_v10 = vadd.f32 %v13518_v6, %v9820_v35  ;;  %v9818_v36 = vadd.f32 %v19780_v41, %v9555_v62  ;;  %v8263_v61 = vpop.f32.mrf.mxu0  ;;  %v14694_v27 = vpop.f32.mrf.mxu1  ;;  %v20102_v41 = vld [vmem:[%s20810_s2] ss:$0 sm:$0xff]  ;;  %v13529_v59 = vunpack.c.l.bf16 %v20121_v32  ;;  %v6826_v25 = vld [vmem:[#allocation2 + $0x590] sm:$0xff] }
 0x49f   : > { %9303 = vst.msk [vmem:[#allocation2 + $0x508] sm:$0xff] %vm5177_vm5, %v9047_v45  ;;  %v9560_v8 = vld [vmem:[#allocation2 + $0x510] sm:$0xff]  ;;  %7331 = vst.msk [vmem:[#allocation2 + $0x558] sm:$0xff] %vm5177_vm5, %v7075_v3  ;;  %v9050_v13 = vadd.f32 %v8794_v56, %v8263_v61  ;;  %v7078_v16 = vadd.f32 %v14694_v27, %v6822_v21  ;;  %v8795_v38 = vld [vmem:[#allocation2 + $0x528] sm:$0xff] }
 0x4a0   : > { %11866 = vst.msk [vmem:[%s18394_s8 + $0x270] sm:$0xf] %vm11709_vm6, %v13099_v29  ;;  %v13102_v39 = vpack.c.bf16 %v10588_v10, %v10588_v10  ;;  %v10586_v2 = vadd.f32 %v13514_v63, %v9818_v36  ;;  %v9823_v15 = vadd.f32 %v20102_v41, %v9560_v8  ;;  %v14955_v49 = vpop.f32.mrf.mxu0  ;;  %v6313_v52 = vpop.f32.mrf.mxu1  ;;  %v13534_v29 = vunpack.c.h.bf16 %v20112_v53  ;;  %v20142_v61 = vld [vmem:[%s18346_s27 + $0x2a8] sm:$0xff]   ;;  %v6824_v27 = vld [vmem:[#allocation2 + $0x580] sm:$0xff] }
 0x4a1   : > { %9308 = vst.msk [vmem:[#allocation2 + $0x530] sm:$0xff] %vm5177_vm5, %v9052_v18  ;;  %7329 = vst.msk [vmem:[#allocation2 + $0x548] sm:$0xff] %vm5177_vm5, %v7073_v47  ;;  %v9053_v42 = vadd.f32 %v14955_v49, %v8797_v22  ;;  %v7076_v7 = vadd.f32 %v6820_v12, %v6313_v52  ;;  %v20151_v22 = vld [vmem:[%s18346_s27 + $0x2a0] sm:$0xff]  }
 0x4a2   : > { %v9558_v17 = vld [vmem:[#allocation2 + $0x500] sm:$0xff]  ;;  %11869 = vst.msk [vmem:[%s18394_s8 + $0x27c] sm:$0xf] %vm11709_vm6, %v13102_v39  ;;  %v13100_v55 = vpack.c.bf16 %v10586_v2, %v10586_v2  ;;  %v10591_v30 = vadd.f32 %v13525_v48, %v9823_v15  ;;  %v8266_v20 = vpop.f32.mrf.mxu0  ;;  %v14695_v54 = vpop.f32.mrf.mxu1  ;;  %v8800_v46 = vld [vmem:[#allocation2 + $0x550] sm:$0xff]  ;;  %v13530_v2 = vunpack.c.h.bf16 %v20121_v32 }
 0x4a3   : > { %v9821_v24 = vadd.f32 %v20102_v41, %v9558_v17  ;;  %9306 = vst.msk [vmem:[#allocation2 + $0x520] sm:$0xff] %vm5177_vm5, %v9050_v13  ;;  %7334 = vst.msk [vmem:[#allocation2 + $0x570] sm:$0xff] %vm5177_vm5, %v7078_v16  ;;  %v9051_v14 = vadd.f32 %v8795_v38, %v8266_v20  ;;  %v7079_v57 = vadd.f32 %v14695_v54, %v6823_v1  ;;  %v6825_v54 = vld [vmem:[#allocation2 + $0x588] sm:$0xff] }
 0x4a4   : > { %v9561_v40 = vld [vmem:[#allocation2 + $0x518] sm:$0xff]  ;;  %11867 = vst.msk [vmem:[%s18394_s8 + $0x274] sm:$0xf] %vm11709_vm6, %v13100_v55  ;;  %v13105_v6 = vpack.c.bf16 %v10591_v30, %v10591_v30  ;;  %v14958_v4 = vpop.f32.mrf.mxu0  ;;  %v6316_v11 = vpop.f32.mrf.mxu1  ;;  %v8798_v45 = vld [vmem:[#allocation2 + $0x540] sm:$0xff] }
 0x4a5   : > { %v10589_v9 = vadd.f32 %v13521_v19, %v9821_v24  ;;  %v9824_v33 = vadd.f32 %v20102_v41, %v9561_v40  ;;  %9309 = vst.msk [vmem:[#allocation2 + $0x538] sm:$0xff] %vm5177_vm5, %v9053_v42  ;;  %7332 = vst.msk [vmem:[#allocation2 + $0x560] sm:$0xff] %vm5177_vm5, %v7076_v7  ;;  %v9056_v5 = vadd.f32 %v14958_v4, %v8800_v46  ;;  %v6827_v55 = vld [vmem:[#allocation2 + $0x598] sm:$0xff]  ;;  %v13541_v24 = vunpack.c.l.bf16 %v20142_v61  ;;  %v6830_v46 = vld [vmem:[#allocation2 + $0x5b0] sm:$0xff] }
 0x4a6   : > { %v9559_v23 = vld [vmem:[#allocation2 + $0x508] sm:$0xff]  ;;  %11872 = vst.msk [vmem:[%s18394_s8 + $0x288] sm:$0xf] %vm11709_vm6, %v13105_v6  ;;  %v7077_v35 = vadd.f32 %v6821_v60, %v6316_v11  ;;  %v8279_v50 = vpop.f32.mrf.mxu0  ;;  %v14698_v31 = vpop.f32.mrf.mxu1  ;;  %v8801_v18 = vld [vmem:[#allocation2 + $0x558] sm:$0xff] }
 0x4a7   : > { %v13103_v63 = vpack.c.bf16 %v10589_v9, %v10589_v9  ;;  %v10592_v28 = vadd.f32 %v13526_v44, %v9824_v33  ;;  %v9822_v43 = vadd.f32 %v20102_v41, %v9559_v23  ;;  %9307 = vst.msk [vmem:[#allocation2 + $0x528] sm:$0xff] %vm5177_vm5, %v9051_v14  ;;  %7335 = vst.msk [vmem:[#allocation2 + $0x578] sm:$0xff] %vm5177_vm5, %v7079_v57  ;;  %v13537_v9 = vunpack.c.l.bf16 %v20151_v22 }
 0x4a8   : > { %v9564_v51 = vld [vmem:[#allocation2 + $0x530] sm:$0xff]  ;;  %9312 = vst.msk [vmem:[#allocation2 + $0x550] sm:$0xff] %vm5177_vm5, %v9056_v5  ;;  %v9054_v26 = vadd.f32 %v8798_v45, %v8279_v50  ;;  %7333 = vst.msk [vmem:[#allocation2 + $0x568] sm:$0xff] %vm5177_vm5, %v7077_v35  ;;  %v7082_v10 = vadd.f32 %v14698_v31, %v6826_v25  ;;  %v14959_v36 = vpop.f32.mrf.mxu0  ;;  %v6329_v34 = vpop.f32.mrf.mxu1  ;;  %v8799_v21 = vld [vmem:[#allocation2 + $0x548] sm:$0xff] }
 0x4a9   : > { %11870 = vst.msk [vmem:[%s18394_s8 + $0x280] sm:$0xf] %vm11709_vm6, %v13103_v63  ;;  %v13106_v62 = vpack.c.bf16 %v10592_v28, %v10592_v28  ;;  %v10590_v48 = vadd.f32 %v13522_v0, %v9822_v43  ;;  %v9827_v3 = vadd.f32 %v20102_v41, %v9564_v51  ;;  %v9057_v56 = vadd.f32 %v14959_v36, %v8801_v18  ;;  %v20172_v50 = vld [vmem:[%s18346_s27 + $0x2b8] sm:$0xff]   ;;  %v6828_v31 = vld [vmem:[#allocation2 + $0x5a0] sm:$0xff]  ;;  %v20181_v18 = vld [vmem:[%s18346_s27 + $0x2b0] sm:$0xff]  }
 0x4aa   : > { %v9562_v58 = vld [vmem:[#allocation2 + $0x520] sm:$0xff]  ;;  %9310 = vst.msk [vmem:[#allocation2 + $0x540] sm:$0xff] %vm5177_vm5, %v9054_v26  ;;  %7338 = vst.msk [vmem:[#allocation2 + $0x590] sm:$0xff] %vm5177_vm5, %v7082_v10  ;;  %v7080_v15 = vadd.f32 %v6824_v27, %v6329_v34  ;;  %v8282_v13 = vpop.f32.mrf.mxu0  ;;  %v14699_v17 = vpop.f32.mrf.mxu1  ;;  %v8804_v12 = vld [vmem:[#allocation2 + $0x570] sm:$0xff]  ;;  %v13542_v63 = vunpack.c.h.bf16 %v20142_v61 }
 0x4ab   : > { %11873 = vst.msk [vmem:[%s18394_s8 + $0x28c] sm:$0xf] %vm11709_vm6, %v13106_v62  ;;  %v13104_v8 = vpack.c.bf16 %v10590_v48, %v10590_v48  ;;  %v10595_v19 = vadd.f32 %v13533_v37, %v9827_v3  ;;  %v9825_v47 = vadd.f32 %v20102_v41, %v9562_v58  ;;  %v9055_v52 = vadd.f32 %v8799_v21, %v8282_v13 }
 0x4ac   : > { %v9565_v39 = vld [vmem:[#allocation2 + $0x538] sm:$0xff]  ;;  %9313 = vst.msk [vmem:[#allocation2 + $0x558] sm:$0xff] %vm5177_vm5, %v9057_v56  ;;  %7336 = vst.msk [vmem:[#allocation2 + $0x580] sm:$0xff] %vm5177_vm5, %v7080_v15  ;;  %v7083_v53 = vadd.f32 %v14699_v17, %v6827_v55  ;;  %v14962_v42 = vpop.f32.mrf.mxu0  ;;  %v6332_v40 = vpop.f32.mrf.mxu1  ;;  %v8802_v14 = vld [vmem:[#allocation2 + $0x560] sm:$0xff]  ;;  %v13538_v48 = vunpack.c.h.bf16 %v20151_v22 }
 0x4ad   : > { %11871 = vst.msk [vmem:[%s18394_s8 + $0x284] sm:$0xf] %vm11709_vm6, %v13104_v8  ;;  %v13109_v44 = vpack.c.bf16 %v10595_v19, %v10595_v19  ;;  %v10593_v16 = vadd.f32 %v13529_v59, %v9825_v47  ;;  %v9828_v49 = vadd.f32 %v20102_v41, %v9565_v39  ;;  %v9060_v38 = vadd.f32 %v14962_v42, %v8804_v12  ;;  %v6831_v8 = vld [vmem:[#allocation2 + $0x5b8] sm:$0xff]  ;;  %v6829_v17 = vld [vmem:[#allocation2 + $0x5a8] sm:$0xff]  ;;  %v6834_v12 = vld [vmem:[#allocation2 + $0x5d0] sm:$0xff] }
 0x4ae   : > { %v9563_v30 = vld [vmem:[#allocation2 + $0x528] sm:$0xff]  ;;  %9311 = vst.msk [vmem:[#allocation2 + $0x548] sm:$0xff] %vm5177_vm5, %v9055_v52  ;;  %7339 = vst.msk [vmem:[#allocation2 + $0x598] sm:$0xff] %vm5177_vm5, %v7083_v53  ;;  %v7081_v33 = vadd.f32 %v6825_v54, %v6332_v40  ;;  %v8295_v32 = vpop.f32.mrf.mxu0  ;;  %v14702_v1 = vpop.f32.mrf.mxu1  ;;  %v8805_v5 = vld [vmem:[#allocation2 + $0x578] sm:$0xff]  ;;  %v13549_v47 = vunpack.c.l.bf16 %v20172_v50 }
 0x4af   : > { %11876 = vst.msk [vmem:[%s18394_s8 + $0x298] sm:$0xf] %vm11709_vm6, %v13109_v44  ;;  %v13107_v0 = vpack.c.bf16 %v10593_v16, %v10593_v16  ;;  %v10596_v7 = vadd.f32 %v13534_v29, %v9828_v49  ;;  %v9826_v20 = vadd.f32 %v20102_v41, %v9563_v30  ;;  %v9568_v6 = vld [vmem:[#allocation2 + $0x550] sm:$0xff]  ;;  %v9058_v4 = vadd.f32 %v8802_v14, %v8295_v32  ;;  %v8803_v25 = vld [vmem:[#allocation2 + $0x568] sm:$0xff] }
 0x4b0   : > { %v9831_v57 = vadd.f32 %v20102_v41, %v9568_v6  ;;  %9316 = vst.msk [vmem:[#allocation2 + $0x570] sm:$0xff] %vm5177_vm5, %v9060_v38  ;;  %7337 = vst.msk [vmem:[#allocation2 + $0x588] sm:$0xff] %vm5177_vm5, %v7081_v33  ;;  %v7086_v28 = vadd.f32 %v14702_v1, %v6830_v46  ;;  %v14963_v43 = vpop.f32.mrf.mxu0  ;;  %v6345_v60 = vpop.f32.mrf.mxu1  ;;  %v13545_v16 = vunpack.c.l.bf16 %v20181_v18  ;;  %v20202_v32 = vld [vmem:[%s18346_s27 + $0x2c8] sm:$0xff]   ;;  %v6832_v1 = vld [vmem:[#allocation2 + $0x5c0] sm:$0xff] }
 0x4b1   : > { %11874 = vst.msk [vmem:[%s18394_s8 + $0x290] sm:$0xf] %vm11709_vm6, %v13107_v0  ;;  %v13110_v23 = vpack.c.bf16 %v10596_v7, %v10596_v7  ;;  %v10594_v37 = vadd.f32 %v13530_v2, %v9826_v20  ;;  %v9566_v11 = vld [vmem:[#allocation2 + $0x540] sm:$0xff]  ;;  %v9061_v45 = vadd.f32 %v14963_v43, %v8805_v5  ;;  %v7084_v3 = vadd.f32 %v6828_v31, %v6345_v60  ;;  %v8808_v27 = vld [vmem:[#allocation2 + $0x590] sm:$0xff] }
 0x4b2   : > { %v10599_v59 = vadd.f32 %v13541_v24, %v9831_v57  ;;  %v9829_v35 = vadd.f32 %v20102_v41, %v9566_v11  ;;  %9314 = vst.msk [vmem:[#allocation2 + $0x560] sm:$0xff] %vm5177_vm5, %v9058_v4  ;;  %7342 = vst.msk [vmem:[#allocation2 + $0x5b0] sm:$0xff] %vm5177_vm5, %v7086_v28  ;;  %v8298_v26 = vpop.f32.mrf.mxu0  ;;  %v14703_v58 = vpop.f32.mrf.mxu1  ;;  %v13550_v0 = vunpack.c.h.bf16 %v20172_v50  ;;  %v20211_v5 = vld [vmem:[%s18346_s27 + $0x2c0] sm:$0xff]  }
 0x4b3   : > { %11877 = vst.msk [vmem:[%s18394_s8 + $0x29c] sm:$0xf] %vm11709_vm6, %v13110_v23  ;;  %v13108_v51 = vpack.c.bf16 %v10594_v37, %v10594_v37  ;;  %v9569_v62 = vld [vmem:[#allocation2 + $0x558] sm:$0xff]  ;;  %v9059_v34 = vadd.f32 %v8803_v25, %v8298_v26  ;;  %v7087_v61 = vadd.f32 %v14703_v58, %v6831_v8  ;;  %v8806_v52 = vld [vmem:[#allocation2 + $0x580] sm:$0xff]  ;;  %v13546_v37 = vunpack.c.h.bf16 %v20181_v18  ;;  %v6833_v58 = vld [vmem:[#allocation2 + $0x5c8] sm:$0xff] }
 0x4b4   : > { %v13113_v29 = vpack.c.bf16 %v10599_v59, %v10599_v59  ;;  %v10597_v10 = vadd.f32 %v13537_v9, %v9829_v35  ;;  %v9832_v36 = vadd.f32 %v20102_v41, %v9569_v62  ;;  %9317 = vst.msk [vmem:[#allocation2 + $0x578] sm:$0xff] %vm5177_vm5, %v9061_v45  ;;  %7340 = vst.msk [vmem:[#allocation2 + $0x5a0] sm:$0xff] %vm5177_vm5, %v7084_v3  ;;  %v14966_v56 = vpop.f32.mrf.mxu0  ;;  %v6348_v39 = vpop.f32.mrf.mxu1  ;;  %v13557_v35 = vunpack.c.l.bf16 %v20202_v32 }
 0x4b5   : > { %11875 = vst.msk [vmem:[%s18394_s8 + $0x294] sm:$0xf] %vm11709_vm6, %v13108_v51  ;;  %v9567_v19 = vld [vmem:[#allocation2 + $0x548] sm:$0xff]  ;;  %v9064_v21 = vadd.f32 %v14966_v56, %v8808_v27  ;;  %v7085_v49 = vadd.f32 %v6829_v17, %v6348_v39  ;;  %v8809_v38 = vld [vmem:[#allocation2 + $0x598] sm:$0xff]  ;;  %v6838_v27 = vld [vmem:[#allocation2 + $0x5f0] sm:$0xff] }
 0x4b6   : > { %11880 = vst.msk [vmem:[%s18394_s8 + $0x2a8] sm:$0xf] %vm11709_vm6, %v13113_v29  ;;  %v13111_v2 = vpack.c.bf16 %v10597_v10, %v10597_v10  ;;  %v10600_v15 = vadd.f32 %v13542_v63, %v9832_v36  ;;  %v9830_v13 = vadd.f32 %v20102_v41, %v9567_v19  ;;  %v8311_v22 = vpop.f32.mrf.mxu0  ;;  %v14706_v55 = vpop.f32.mrf.mxu1  ;;  %v6835_v51 = vld [vmem:[#allocation2 + $0x5d8] sm:$0xff]  ;;  %v13553_v10 = vunpack.c.l.bf16 %v20211_v5 }
 0x4b7   : > { %9315 = vst.msk [vmem:[#allocation2 + $0x568] sm:$0xff] %vm5177_vm5, %v9059_v34  ;;  %v9572_v44 = vld [vmem:[#allocation2 + $0x570] sm:$0xff]  ;;  %7343 = vst.msk [vmem:[#allocation2 + $0x5b8] sm:$0xff] %vm5177_vm5, %v7087_v61  ;;  %v9062_v42 = vadd.f32 %v8806_v52, %v8311_v22  ;;  %v7090_v7 = vadd.f32 %v14706_v55, %v6834_v12  ;;  %v8807_v46 = vld [vmem:[#allocation2 + $0x588] sm:$0xff] }
 0x4b8   : > { %11878 = vst.msk [vmem:[%s18394_s8 + $0x2a0] sm:$0xf] %vm11709_vm6, %v13111_v2  ;;  %v13114_v30 = vpack.c.bf16 %v10600_v15, %v10600_v15  ;;  %v10598_v24 = vadd.f32 %v13538_v48, %v9830_v13  ;;  %v9835_v53 = vadd.f32 %v20102_v41, %v9572_v44  ;;  %v14967_v20 = vpop.f32.mrf.mxu0  ;;  %v6361_v54 = vpop.f32.mrf.mxu1  ;;  %v13558_v2 = vunpack.c.h.bf16 %v20202_v32  ;;  %v20232_v22 = vld [vmem:[%s18346_s27 + $0x2d8] sm:$0xff]   ;;  %v6836_v55 = vld [vmem:[#allocation2 + $0x5e0] sm:$0xff] }
 0x4b9   : > { %9320 = vst.msk [vmem:[#allocation2 + $0x590] sm:$0xff] %vm5177_vm5, %v9064_v21  ;;  %v9570_v40 = vld [vmem:[#allocation2 + $0x560] sm:$0xff]  ;;  %7341 = vst.msk [vmem:[#allocation2 + $0x5a8] sm:$0xff] %vm5177_vm5, %v7085_v49  ;;  %v9065_v14 = vadd.f32 %v14967_v20, %v8809_v38  ;;  %v7088_v57 = vadd.f32 %v6832_v1, %v6361_v54  ;;  %v8812_v31 = vld [vmem:[#allocation2 + $0x5b0] sm:$0xff] }
 0x4ba   : > { %11881 = vst.msk [vmem:[%s18394_s8 + $0x2ac] sm:$0xf] %vm11709_vm6, %v13114_v30  ;;  %v13112_v6 = vpack.c.bf16 %v10598_v24, %v10598_v24  ;;  %v10603_v9 = vadd.f32 %v13549_v47, %v9835_v53  ;;  %v9833_v33 = vadd.f32 %v20102_v41, %v9570_v40  ;;  %v8314_v4 = vpop.f32.mrf.mxu0  ;;  %v14707_v11 = vpop.f32.mrf.mxu1  ;;  %v13554_v24 = vunpack.c.h.bf16 %v20211_v5  ;;  %v20241_v38 = vld [vmem:[%s18346_s27 + $0x2d0] sm:$0xff]  }
 0x4bb   : > { %9318 = vst.msk [vmem:[#allocation2 + $0x580] sm:$0xff] %vm5177_vm5, %v9062_v42  ;;  %v9573_v23 = vld [vmem:[#allocation2 + $0x578] sm:$0xff]  ;;  %7346 = vst.msk [vmem:[#allocation2 + $0x5d0] sm:$0xff] %vm5177_vm5, %v7090_v7  ;;  %v9063_v60 = vadd.f32 %v8807_v46, %v8314_v4  ;;  %v7091_v50 = vadd.f32 %v14707_v11, %v6835_v51  ;;  %v8810_v34 = vld [vmem:[#allocation2 + $0x5a0] sm:$0xff] }
 0x4bc   : > { %11879 = vst.msk [vmem:[%s18394_s8 + $0x2a4] sm:$0xf] %vm11709_vm6, %v13112_v6  ;;  %v13117_v63 = vpack.c.bf16 %v10603_v9, %v10603_v9  ;;  %v10601_v28 = vadd.f32 %v13545_v16, %v9833_v33  ;;  %v9836_v43 = vadd.f32 %v20102_v41, %v9573_v23  ;;  %v14970_v45 = vpop.f32.mrf.mxu0  ;;  %v6364_v62 = vpop.f32.mrf.mxu1  ;;  %v6839_v6 = vld [vmem:[#allocation2 + $0x5f8] sm:$0xff]  ;;  %v13565_v33 = vunpack.c.l.bf16 %v20232_v22  ;;  %v6837_v11 = vld [vmem:[#allocation2 + $0x5e8] sm:$0xff] }
 0x4bd   : > { %9321 = vst.msk [vmem:[#allocation2 + $0x598] sm:$0xff] %vm5177_vm5, %v9065_v14  ;;  %7344 = vst.msk [vmem:[#allocation2 + $0x5c0] sm:$0xff] %vm5177_vm5, %v7088_v57  ;;  %v9068_v25 = vadd.f32 %v14970_v45, %v8812_v31  ;;  %v7089_v36 = vadd.f32 %v6833_v58, %v6364_v62  ;;  %v6842_v31 = vld [vmem:[#allocation2 + $0x610] sm:$0xff] }
 0x4be   : > { %v9571_v59 = vld [vmem:[#allocation2 + $0x568] sm:$0xff]  ;;  %11884 = vst.msk [vmem:[%s18394_s8 + $0x2b8] sm:$0xf] %vm11709_vm6, %v13117_v63  ;;  %v13115_v48 = vpack.c.bf16 %v10601_v28, %v10601_v28  ;;  %v10604_v3 = vadd.f32 %v13550_v0, %v9836_v43  ;;  %v8327_v18 = vpop.f32.mrf.mxu0  ;;  %v14710_v8 = vpop.f32.mrf.mxu1  ;;  %v8813_v21 = vld [vmem:[#allocation2 + $0x5b8] sm:$0xff]  ;;  %v13561_v28 = vunpack.c.l.bf16 %v20241_v38 }
 0x4bf   : > { %v9834_v26 = vadd.f32 %v20102_v41, %v9571_v59  ;;  %9319 = vst.msk [vmem:[#allocation2 + $0x588] sm:$0xff] %vm5177_vm5, %v9063_v60  ;;  %7347 = vst.msk [vmem:[#allocation2 + $0x5d8] sm:$0xff] %vm5177_vm5, %v7091_v50  ;;  %v9066_v56 = vadd.f32 %v8810_v34, %v8327_v18  ;;  %v7094_v15 = vadd.f32 %v14710_v8, %v6838_v27  ;;  %v20262_v18 = vld [vmem:[%s18346_s27 + $0x2e8] sm:$0xff]   ;;  %v6840_v8 = vld [vmem:[#allocation2 + $0x600] sm:$0xff] }
 0x4c0   : > { %v9576_v29 = vld [vmem:[#allocation2 + $0x590] sm:$0xff]  ;;  %11882 = vst.msk [vmem:[%s18394_s8 + $0x2b0] sm:$0xf] %vm11709_vm6, %v13115_v48  ;;  %v13118_v19 = vpack.c.bf16 %v10604_v3, %v10604_v3  ;;  %v14971_v13 = vpop.f32.mrf.mxu0  ;;  %v6377_v17 = vpop.f32.mrf.mxu1  ;;  %v8811_v12 = vld [vmem:[#allocation2 + $0x5a8] sm:$0xff]  ;;  %v13566_v48 = vunpack.c.h.bf16 %v20232_v22 }
 0x4c1   : > { %v10602_v47 = vadd.f32 %v13546_v37, %v9834_v26  ;;  %v9839_v61 = vadd.f32 %v20102_v41, %v9576_v29  ;;  %9324 = vst.msk [vmem:[#allocation2 + $0x5b0] sm:$0xff] %vm5177_vm5, %v9068_v25  ;;  %7345 = vst.msk [vmem:[#allocation2 + $0x5c8] sm:$0xff] %vm5177_vm5, %v7089_v36  ;;  %v9069_v52 = vadd.f32 %v14971_v13, %v8813_v21  ;;  %v20271_v21 = vld [vmem:[%s18346_s27 + $0x2e0] sm:$0xff]  }
 0x4c2   : > { %v9574_v39 = vld [vmem:[#allocation2 + $0x580] sm:$0xff]  ;;  %11885 = vst.msk [vmem:[%s18394_s8 + $0x2bc] sm:$0xf] %vm11709_vm6, %v13118_v19  ;;  %v7092_v53 = vadd.f32 %v6836_v55, %v6377_v17  ;;  %v8330_v42 = vpop.f32.mrf.mxu0  ;;  %v14711_v40 = vpop.f32.mrf.mxu1  ;;  %v8816_v1 = vld [vmem:[#allocation2 + $0x5d0] sm:$0xff] }
 0x4c3   : > { %v13116_v44 = vpack.c.bf16 %v10602_v47, %v10602_v47  ;;  %v10607_v16 = vadd.f32 %v13557_v35, %v9839_v61  ;;  %v9837_v49 = vadd.f32 %v20102_v41, %v9574_v39  ;;  %9322 = vst.msk [vmem:[#allocation2 + $0x5a0] sm:$0xff] %vm5177_vm5, %v9066_v56  ;;  %7350 = vst.msk [vmem:[#allocation2 + $0x5f0] sm:$0xff] %vm5177_vm5, %v7094_v15  ;;  %v13562_v47 = vunpack.c.h.bf16 %v20241_v38 }
 0x4c4   : > { %v9577_v30 = vld [vmem:[#allocation2 + $0x598] sm:$0xff]  ;;  %9325 = vst.msk [vmem:[#allocation2 + $0x5b8] sm:$0xff] %vm5177_vm5, %v9069_v52  ;;  %v9067_v54 = vadd.f32 %v8811_v12, %v8330_v42  ;;  %7348 = vst.msk [vmem:[#allocation2 + $0x5e0] sm:$0xff] %vm5177_vm5, %v7092_v53  ;;  %v7095_v32 = vadd.f32 %v14711_v40, %v6839_v6  ;;  %v14974_v14 = vpop.f32.mrf.mxu0  ;;  %v6380_v23 = vpop.f32.mrf.mxu1  ;;  %v8814_v60 = vld [vmem:[#allocation2 + $0x5c0] sm:$0xff] }
 0x4c5   : > { %11883 = vst.msk [vmem:[%s18394_s8 + $0x2b4] sm:$0xf] %vm11709_vm6, %v13116_v44  ;;  %v13121_v0 = vpack.c.bf16 %v10607_v16, %v10607_v16  ;;  %v10605_v7 = vadd.f32 %v13553_v10, %v9837_v49  ;;  %v9840_v20 = vadd.f32 %v20102_v41, %v9577_v30  ;;  %v9072_v46 = vadd.f32 %v14974_v14, %v8816_v1  ;;  %v6843_v44 = vld [vmem:[#allocation2 + $0x618] sm:$0xff]  ;;  %v6841_v40 = vld [vmem:[#allocation2 + $0x608] sm:$0xff]  ;;  %v6846_v1 = vld [vmem:[#allocation2 + $0x630] sm:$0xff] }
 0x4c6   : > { %v9575_v9 = vld [vmem:[#allocation2 + $0x588] sm:$0xff]  ;;  %9323 = vst.msk [vmem:[#allocation2 + $0x5a8] sm:$0xff] %vm5177_vm5, %v9067_v54  ;;  %7351 = vst.msk [vmem:[#allocation2 + $0x5f8] sm:$0xff] %vm5177_vm5, %v7095_v32  ;;  %v7093_v43 = vadd.f32 %v6837_v11, %v6380_v23  ;;  %v8343_v5 = vpop.f32.mrf.mxu0  ;;  %v14714_v51 = vpop.f32.mrf.mxu1  ;;  %v8817_v25 = vld [vmem:[#allocation2 + $0x5d8] sm:$0xff]  ;;  %v13573_v49 = vunpack.c.l.bf16 %v20262_v18 }
 0x4c7   : > { %11888 = vst.msk [vmem:[%s18394_s8 + $0x2c8] sm:$0xf] %vm11709_vm6, %v13121_v0  ;;  %v13119_v37 = vpack.c.bf16 %v10605_v7, %v10605_v7  ;;  %v10608_v57 = vadd.f32 %v13558_v2, %v9840_v20  ;;  %v9838_v4 = vadd.f32 %v20102_v41, %v9575_v9  ;;  %v9070_v45 = vadd.f32 %v8814_v60, %v8343_v5  ;;  %v20292_v5 = vld [vmem:[%s18346_s27 + $0x2f8] sm:$0xff]  }
 0x4c8   : > { %v9580_v63 = vld [vmem:[#allocation2 + $0x5b0] sm:$0xff]  ;;  %9328 = vst.msk [vmem:[#allocation2 + $0x5d0] sm:$0xff] %vm5177_vm5, %v9072_v46  ;;  %7349 = vst.msk [vmem:[#allocation2 + $0x5e8] sm:$0xff] %vm5177_vm5, %v7093_v43  ;;  %v7098_v3 = vadd.f32 %v14714_v51, %v6842_v31  ;;  %v14975_v26 = vpop.f32.mrf.mxu0  ;;  %v6393_v58 = vpop.f32.mrf.mxu1  ;;  %v8815_v27 = vld [vmem:[#allocation2 + $0x5c8] sm:$0xff]  ;;  %v13569_v7 = vunpack.c.l.bf16 %v20271_v21 }
 0x4c9   : > { %11886 = vst.msk [vmem:[%s18394_s8 + $0x2c0] sm:$0xf] %vm11709_vm6, %v13119_v37  ;;  %v13122_v59 = vpack.c.bf16 %v10608_v57, %v10608_v57  ;;  %v10606_v35 = vadd.f32 %v13554_v24, %v9838_v4  ;;  %v9843_v50 = vadd.f32 %v20102_v41, %v9580_v63  ;;  %v9073_v34 = vadd.f32 %v14975_v26, %v8817_v25  ;;  %v6844_v51 = vld [vmem:[#allocation2 + $0x620] sm:$0xff]  ;;  %v20301_v25 = vld [vmem:[%s18346_s27 + $0x2f0] sm:$0xff]  }
 0x4ca   : > { %v9578_v62 = vld [vmem:[#allocation2 + $0x5a0] sm:$0xff]  ;;  %9326 = vst.msk [vmem:[#allocation2 + $0x5c0] sm:$0xff] %vm5177_vm5, %v9070_v45  ;;  %7354 = vst.msk [vmem:[#allocation2 + $0x610] sm:$0xff] %vm5177_vm5, %v7098_v3  ;;  %v7096_v61 = vadd.f32 %v6840_v8, %v6393_v58  ;;  %v8346_v56 = vpop.f32.mrf.mxu0  ;;  %v14715_v39 = vpop.f32.mrf.mxu1  ;;  %v8820_v55 = vld [vmem:[#allocation2 + $0x5f0] sm:$0xff]  ;;  %v13574_v37 = vunpack.c.h.bf16 %v20262_v18 }
 0x4cb   : > { %11889 = vst.msk [vmem:[%s18394_s8 + $0x2cc] sm:$0xf] %vm11709_vm6, %v13122_v59  ;;  %v13120_v29 = vpack.c.bf16 %v10606_v35, %v10606_v35  ;;  %v10611_v10 = vadd.f32 %v13565_v33, %v9843_v50  ;;  %v9841_v36 = vadd.f32 %v20102_v41, %v9578_v62  ;;  %v9581_v19 = vld [vmem:[#allocation2 + $0x5b8] sm:$0xff]  ;;  %v9071_v17 = vadd.f32 %v8815_v27, %v8346_v56  ;;  %v8818_v54 = vld [vmem:[#allocation2 + $0x5e0] sm:$0xff] }
 0x4cc   : > { %v9844_v13 = vadd.f32 %v20102_v41, %v9581_v19  ;;  %9329 = vst.msk [vmem:[#allocation2 + $0x5d8] sm:$0xff] %vm5177_vm5, %v9073_v34  ;;  %7352 = vst.msk [vmem:[#allocation2 + $0x600] sm:$0xff] %vm5177_vm5, %v7096_v61  ;;  %v7099_v22 = vadd.f32 %v14715_v39, %v6843_v44  ;;  %v14978_v52 = vpop.f32.mrf.mxu0  ;;  %v6396_v30 = vpop.f32.mrf.mxu1  ;;  %v13570_v35 = vunpack.c.h.bf16 %v20271_v21  ;;  %v6845_v39 = vld [vmem:[#allocation2 + $0x628] sm:$0xff] }
 0x4cd   : > { %11887 = vst.msk [vmem:[%s18394_s8 + $0x2c4] sm:$0xf] %vm11709_vm6, %v13120_v29  ;;  %v13125_v2 = vpack.c.bf16 %v10611_v10, %v10611_v10  ;;  %v10609_v15 = vadd.f32 %v13561_v28, %v9841_v36  ;;  %v9579_v16 = vld [vmem:[#allocation2 + $0x5a8] sm:$0xff]  ;;  %v9076_v12 = vadd.f32 %v14978_v52, %v8820_v55  ;;  %v7097_v20 = vadd.f32 %v6841_v40, %v6396_v30  ;;  %v8821_v46 = vld [vmem:[#allocation2 + $0x5f8] sm:$0xff]  ;;  %v6850_v55 = vld [vmem:[#allocation2 + $0x650] sm:$0xff] }
 0x4ce   : > { %v10612_v53 = vadd.f32 %v13566_v48, %v9844_v13  ;;  %v9842_v42 = vadd.f32 %v20102_v41, %v9579_v16  ;;  %9327 = vst.msk [vmem:[#allocation2 + $0x5c8] sm:$0xff] %vm5177_vm5, %v9071_v17  ;;  %7355 = vst.msk [vmem:[#allocation2 + $0x618] sm:$0xff] %vm5177_vm5, %v7099_v22  ;;  %v8359_v38 = vpop.f32.mrf.mxu0  ;;  %v14718_v6 = vpop.f32.mrf.mxu1  ;;  %v6847_v29 = vld [vmem:[#allocation2 + $0x638] sm:$0xff]  ;;  %v13581_v36 = vunpack.c.l.bf16 %v20292_v5 }
 0x4cf   : > { %11892 = vst.msk [vmem:[%s18394_s8 + $0x2d8] sm:$0xf] %vm11709_vm6, %v13125_v2  ;;  %v13123_v24 = vpack.c.bf16 %v10609_v15, %v10609_v15  ;;  %v9584_v0 = vld [vmem:[#allocation2 + $0x5d0] sm:$0xff]  ;;  %v9074_v14 = vadd.f32 %v8818_v54, %v8359_v38  ;;  %v7102_v57 = vadd.f32 %v14718_v6, %v6846_v1  ;;  %v8819_v31 = vld [vmem:[#allocation2 + $0x5e8] sm:$0xff]  ;;  %v13577_v15 = vunpack.c.l.bf16 %v20301_v25  ;;  %v6848_v6 = vld [vmem:[#allocation2 + $0x640] sm:$0xff] }
 0x4d0   : > { %v13126_v9 = vpack.c.bf16 %v10612_v53, %v10612_v53  ;;  %v10610_v33 = vadd.f32 %v13562_v47, %v9842_v42  ;;  %v9847_v32 = vadd.f32 %v20102_v41, %v9584_v0  ;;  %9332 = vst.msk [vmem:[#allocation2 + $0x5f0] sm:$0xff] %vm5177_vm5, %v9076_v12  ;;  %7353 = vst.msk [vmem:[#allocation2 + $0x608] sm:$0xff] %vm5177_vm5, %v7097_v20  ;;  %v14979_v4 = vpop.f32.mrf.mxu0  ;;  %v6409_v11 = vpop.f32.mrf.mxu1  ;;  %v20322_v38 = vld [vmem:[%s18346_s27 + $0x308] sm:$0xff]  }
 0x4d1   : > { %11890 = vst.msk [vmem:[%s18394_s8 + $0x2d0] sm:$0xf] %vm11709_vm6, %v13123_v24  ;;  %v9582_v23 = vld [vmem:[#allocation2 + $0x5c0] sm:$0xff]  ;;  %v9077_v60 = vadd.f32 %v14979_v4, %v8821_v46  ;;  %v7100_v50 = vadd.f32 %v6844_v51, %v6409_v11  ;;  %v8824_v8 = vld [vmem:[#allocation2 + $0x610] sm:$0xff]  ;;  %v13582_v24 = vunpack.c.h.bf16 %v20292_v5 }
 0x4d2   : > { %11893 = vst.msk [vmem:[%s18394_s8 + $0x2dc] sm:$0xf] %vm11709_vm6, %v13126_v9  ;;  %v13124_v63 = vpack.c.bf16 %v10610_v33, %v10610_v33  ;;  %v10615_v28 = vadd.f32 %v13573_v49, %v9847_v32  ;;  %v9845_v43 = vadd.f32 %v20102_v41, %v9582_v23  ;;  %v8362_v45 = vpop.f32.mrf.mxu0  ;;  %v14719_v62 = vpop.f32.mrf.mxu1  ;;  %v13578_v33 = vunpack.c.h.bf16 %v20301_v25  ;;  %v20331_v46 = vld [vmem:[%s18346_s27 + $0x300] sm:$0xff]  }
 0x4d3   : > { %9330 = vst.msk [vmem:[#allocation2 + $0x5e0] sm:$0xff] %vm5177_vm5, %v9074_v14  ;;  %v9585_v59 = vld [vmem:[#allocation2 + $0x5d8] sm:$0xff]  ;;  %7358 = vst.msk [vmem:[#allocation2 + $0x630] sm:$0xff] %vm5177_vm5, %v7102_v57  ;;  %v9075_v58 = vadd.f32 %v8819_v31, %v8362_v45  ;;  %v7103_v18 = vadd.f32 %v14719_v62, %v6847_v29  ;;  %v8822_v17 = vld [vmem:[#allocation2 + $0x600] sm:$0xff] }
 0x4d4   : > { %11891 = vst.msk [vmem:[%s18394_s8 + $0x2d4] sm:$0xf] %vm11709_vm6, %v13124_v63  ;;  %v13129_v48 = vpack.c.bf16 %v10615_v28, %v10615_v28  ;;  %v10613_v3 = vadd.f32 %v13569_v7, %v9845_v43  ;;  %v9848_v26 = vadd.f32 %v20102_v41, %v9585_v59  ;;  %v14982_v34 = vpop.f32.mrf.mxu0  ;;  %v6412_v19 = vpop.f32.mrf.mxu1  ;;  %v6851_v63 = vld [vmem:[#allocation2 + $0x658] sm:$0xff]  ;;  %v13589_v43 = vunpack.c.l.bf16 %v20322_v38  ;;  %v6849_v62 = vld [vmem:[#allocation2 + $0x648] sm:$0xff] }
 0x4d5   : > { %9333 = vst.msk [vmem:[#allocation2 + $0x5f8] sm:$0xff] %vm5177_vm5, %v9077_v60  ;;  %v9583_v10 = vld [vmem:[#allocation2 + $0x5c8] sm:$0xff]  ;;  %7356 = vst.msk [vmem:[#allocation2 + $0x620] sm:$0xff] %vm5177_vm5, %v7100_v50  ;;  %v9080_v27 = vadd.f32 %v14982_v34, %v8824_v8  ;;  %v7101_v13 = vadd.f32 %v6845_v39, %v6412_v19  ;;  %v8825_v12 = vld [vmem:[#allocation2 + $0x618] sm:$0xff] }
 0x4d6   : > { %11896 = vst.msk [vmem:[%s18394_s8 + $0x2e8] sm:$0xf] %vm11709_vm6, %v13129_v48  ;;  %v13127_v47 = vpack.c.bf16 %v10613_v3, %v10613_v3  ;;  %v10616_v61 = vadd.f32 %v13574_v37, %v9848_v26  ;;  %v9846_v56 = vadd.f32 %v20102_v41, %v9583_v10  ;;  %v8375_v21 = vpop.f32.mrf.mxu0  ;;  %v14722_v44 = vpop.f32.mrf.mxu1  ;;  %v13585_v3 = vunpack.c.l.bf16 %v20331_v46  ;;  %v6854_v8 = vld [vmem:[#allocation2 + $0x670] sm:$0xff] }
 0x4d7   : > { %9331 = vst.msk [vmem:[#allocation2 + $0x5e8] sm:$0xff] %vm5177_vm5, %v9075_v58  ;;  %v9588_v2 = vld [vmem:[#allocation2 + $0x5f0] sm:$0xff]  ;;  %7359 = vst.msk [vmem:[#allocation2 + $0x638] sm:$0xff] %vm5177_vm5, %v7103_v18  ;;  %v9078_v52 = vadd.f32 %v8822_v17, %v8375_v21  ;;  %v7106_v53 = vadd.f32 %v14722_v44, %v6850_v55  ;;  %v8823_v1 = vld [vmem:[#allocation2 + $0x608] sm:$0xff] }
 0x4d8   : > { %11894 = vst.msk [vmem:[%s18394_s8 + $0x2e0] sm:$0xf] %vm11709_vm6, %v13127_v47  ;;  %v13130_v16 = vpack.c.bf16 %v10616_v61, %v10616_v61  ;;  %v10614_v49 = vadd.f32 %v13570_v35, %v9846_v56  ;;  %v9851_v22 = vadd.f32 %v20102_v41, %v9588_v2  ;;  %v14983_v42 = vpop.f32.mrf.mxu0  ;;  %v6425_v40 = vpop.f32.mrf.mxu1  ;;  %v13590_v47 = vunpack.c.h.bf16 %v20322_v38  ;;  %v20352_v21 = vld [vmem:[%s18346_s27 + $0x318] sm:$0xff]   ;;  %v6852_v44 = vld [vmem:[#allocation2 + $0x660] sm:$0xff] }
 0x4d9   : > { %9336 = vst.msk [vmem:[#allocation2 + $0x610] sm:$0xff] %vm5177_vm5, %v9080_v27  ;;  %7357 = vst.msk [vmem:[#allocation2 + $0x628] sm:$0xff] %vm5177_vm5, %v7101_v13  ;;  %v9081_v54 = vadd.f32 %v14983_v42, %v8825_v12  ;;  %v7104_v32 = vadd.f32 %v6848_v6, %v6425_v40  ;;  %v20361_v12 = vld [vmem:[%s18346_s27 + $0x310] sm:$0xff]  }
 0x4da   : > { %v9586_v30 = vld [vmem:[#allocation2 + $0x5e0] sm:$0xff]  ;;  %11897 = vst.msk [vmem:[%s18394_s8 + $0x2ec] sm:$0xf] %vm11709_vm6, %v13130_v16  ;;  %v13128_v0 = vpack.c.bf16 %v10614_v49, %v10614_v49  ;;  %v10619_v7 = vadd.f32 %v13581_v36, %v9851_v22  ;;  %v8378_v14 = vpop.f32.mrf.mxu0  ;;  %v14723_v23 = vpop.f32.mrf.mxu1  ;;  %v8828_v51 = vld [vmem:[#allocation2 + $0x630] sm:$0xff]  ;;  %v13586_v49 = vunpack.c.h.bf16 %v20331_v46 }
 0x4db   : > { %v9849_v20 = vadd.f32 %v20102_v41, %v9586_v30  ;;  %9334 = vst.msk [vmem:[#allocation2 + $0x600] sm:$0xff] %vm5177_vm5, %v9078_v52  ;;  %7362 = vst.msk [vmem:[#allocation2 + $0x650] sm:$0xff] %vm5177_vm5, %v7106_v53  ;;  %v9079_v11 = vadd.f32 %v8823_v1, %v8378_v14  ;;  %v7107_v5 = vadd.f32 %v14723_v23, %v6851_v63  ;;  %v6853_v23 = vld [vmem:[#allocation2 + $0x668] sm:$0xff] }
 0x4dc   : > { %v9589_v9 = vld [vmem:[#allocation2 + $0x5f8] sm:$0xff]  ;;  %11895 = vst.msk [vmem:[%s18394_s8 + $0x2e4] sm:$0xf] %vm11709_vm6, %v13128_v0  ;;  %v13133_v37 = vpack.c.bf16 %v10619_v7, %v10619_v7  ;;  %v14986_v60 = vpop.f32.mrf.mxu0  ;;  %v6428_v59 = vpop.f32.mrf.mxu1  ;;  %v8826_v58 = vld [vmem:[#allocation2 + $0x620] sm:$0xff] }
 0x4dd   : > { %v10617_v57 = vadd.f32 %v13577_v15, %v9849_v20  ;;  %v9852_v4 = vadd.f32 %v20102_v41, %v9589_v9  ;;  %9337 = vst.msk [vmem:[#allocation2 + $0x618] sm:$0xff] %vm5177_vm5, %v9081_v54  ;;  %7360 = vst.msk [vmem:[#allocation2 + $0x640] sm:$0xff] %vm5177_vm5, %v7104_v32  ;;  %v9084_v31 = vadd.f32 %v14986_v60, %v8828_v51  ;;  %v6855_v0 = vld [vmem:[#allocation2 + $0x678] sm:$0xff]  ;;  %v13597_v20 = vunpack.c.l.bf16 %v20352_v21  ;;  %v6858_v51 = vld [vmem:[#allocation2 + $0x690] sm:$0xff] }
 0x4de   : > { %v9587_v28 = vld [vmem:[#allocation2 + $0x5e8] sm:$0xff]  ;;  %11900 = vst.msk [vmem:[%s18394_s8 + $0x2f8] sm:$0xf] %vm11709_vm6, %v13133_v37  ;;  %v7105_v26 = vadd.f32 %v6849_v62, %v6428_v59  ;;  %v8391_v25 = vpop.f32.mrf.mxu0  ;;  %v14726_v29 = vpop.f32.mrf.mxu1  ;;  %v8829_v27 = vld [vmem:[#allocation2 + $0x638] sm:$0xff] }
 0x4df   : > { %v13131_v35 = vpack.c.bf16 %v10617_v57, %v10617_v57  ;;  %v10620_v50 = vadd.f32 %v13582_v24, %v9852_v4  ;;  %v9850_v45 = vadd.f32 %v20102_v41, %v9587_v28  ;;  %9335 = vst.msk [vmem:[#allocation2 + $0x608] sm:$0xff] %vm5177_vm5, %v9079_v11  ;;  %7363 = vst.msk [vmem:[#allocation2 + $0x658] sm:$0xff] %vm5177_vm5, %v7107_v5  ;;  %v13593_v57 = vunpack.c.l.bf16 %v20361_v12 }
 0x4e0   : > { %v9592_v48 = vld [vmem:[#allocation2 + $0x610] sm:$0xff]  ;;  %9340 = vst.msk [vmem:[#allocation2 + $0x630] sm:$0xff] %vm5177_vm5, %v9084_v31  ;;  %v9082_v34 = vadd.f32 %v8826_v58, %v8391_v25  ;;  %7361 = vst.msk [vmem:[#allocation2 + $0x648] sm:$0xff] %vm5177_vm5, %v7105_v26  ;;  %v7110_v61 = vadd.f32 %v14726_v29, %v6854_v8  ;;  %v14987_v56 = vpop.f32.mrf.mxu0  ;;  %v6441_v39 = vpop.f32.mrf.mxu1  ;;  %v8827_v55 = vld [vmem:[#allocation2 + $0x628] sm:$0xff] }
 0x4e1   : > { %11898 = vst.msk [vmem:[%s18394_s8 + $0x2f0] sm:$0xf] %vm11709_vm6, %v13131_v35  ;;  %v13134_v10 = vpack.c.bf16 %v10620_v50, %v10620_v50  ;;  %v10618_v36 = vadd.f32 %v13578_v33, %v9850_v45  ;;  %v9855_v18 = vadd.f32 %v20102_v41, %v9592_v48  ;;  %v9085_v17 = vadd.f32 %v14987_v56, %v8829_v27  ;;  %v20387_v25 = vld [vmem:[%s18346_s27 + $0x328] sm:$0xff]   ;;  %v6856_v29 = vld [vmem:[#allocation2 + $0x680] sm:$0xff] }
 0x4e2   : > { %v9590_v19 = vld [vmem:[#allocation2 + $0x600] sm:$0xff]  ;;  %9338 = vst.msk [vmem:[#allocation2 + $0x620] sm:$0xff] %vm5177_vm5, %v9082_v34  ;;  %7366 = vst.msk [vmem:[#allocation2 + $0x670] sm:$0xff] %vm5177_vm5, %v7110_v61  ;;  %v7108_v22 = vadd.f32 %v6852_v44, %v6441_v39  ;;  %v8394_v52 = vpop.f32.mrf.mxu0  ;;  %v14727_v30 = vpop.f32.mrf.mxu1  ;;  %v8832_v6 = vld [vmem:[#allocation2 + $0x650] sm:$0xff]  ;;  %v13598_v35 = vunpack.c.h.bf16 %v20352_v21 }
 0x4e3   : > { %11901 = vst.msk [vmem:[%s18394_s8 + $0x2fc] sm:$0xf] %vm11709_vm6, %v13134_v10  ;;  %v13132_v2 = vpack.c.bf16 %v10618_v36, %v10618_v36  ;;  %v10623_v15 = vadd.f32 %v13589_v43, %v9855_v18  ;;  %v9853_v13 = vadd.f32 %v20102_v41, %v9590_v19  ;;  %v9083_v40 = vadd.f32 %v8827_v55, %v8394_v52  ;;  %v20396_v27 = vld [vmem:[%s18346_s27 + $0x320] sm:$0xff]  }
 0x4e4   : > { %v9593_v16 = vld [vmem:[#allocation2 + $0x618] sm:$0xff]  ;;  %9341 = vst.msk [vmem:[#allocation2 + $0x638] sm:$0xff] %vm5177_vm5, %v9085_v17  ;;  %7364 = vst.msk [vmem:[#allocation2 + $0x660] sm:$0xff] %vm5177_vm5, %v7108_v22  ;;  %v7111_v38 = vadd.f32 %v14727_v30, %v6855_v0  ;;  %v14990_v54 = vpop.f32.mrf.mxu0  ;;  %v6444_v9 = vpop.f32.mrf.mxu1  ;;  %v8830_v11 = vld [vmem:[#allocation2 + $0x640] sm:$0xff]  ;;  %v13594_v36 = vunpack.c.h.bf16 %v20361_v12 }
 0x4e5   : > { %11899 = vst.msk [vmem:[%s18394_s8 + $0x2f4] sm:$0xf] %vm11709_vm6, %v13132_v2  ;;  %v13137_v24 = vpack.c.bf16 %v10623_v15, %v10623_v15  ;;  %v10621_v53 = vadd.f32 %v13585_v3, %v9853_v13  ;;  %v9856_v42 = vadd.f32 %v20102_v41, %v9593_v16  ;;  %v9088_v1 = vadd.f32 %v14990_v54, %v8832_v6  ;;  %v6859_v2 = vld [vmem:[#allocation2 + $0x698] sm:$0xff]  ;;  %v6857_v30 = vld [vmem:[#allocation2 + $0x688] sm:$0xff]  ;;  %v6862_v6 = vld [vmem:[#allocation2 + $0x6b0] sm:$0xff] }
 0x4e6   : > { %v9591_v7 = vld [vmem:[#allocation2 + $0x608] sm:$0xff]  ;;  %9339 = vst.msk [vmem:[#allocation2 + $0x628] sm:$0xff] %vm5177_vm5, %v9083_v40  ;;  %7367 = vst.msk [vmem:[#allocation2 + $0x678] sm:$0xff] %vm5177_vm5, %v7111_v38  ;;  %v7109_v4 = vadd.f32 %v6853_v23, %v6444_v9  ;;  %v8407_v46 = vpop.f32.mrf.mxu0  ;;  %v14730_v63 = vpop.f32.mrf.mxu1  ;;  %v8833_v31 = vld [vmem:[#allocation2 + $0x658] sm:$0xff]  ;;  %v13605_v13 = vunpack.c.l.bf16 %v20387_v25 }
 0x4e7   : > { %11904 = vst.msk [vmem:[%s18394_s8 + $0x308] sm:$0xf] %vm11709_vm6, %v13137_v24  ;;  %v13135_v33 = vpack.c.bf16 %v10621_v53, %v10621_v53  ;;  %v10624_v32 = vadd.f32 %v13590_v47, %v9856_v42  ;;  %v9854_v14 = vadd.f32 %v20102_v41, %v9591_v7  ;;  %v9596_v37 = vld [vmem:[#allocation2 + $0x630] sm:$0xff]  ;;  %v20377_v41 = vld [vmem:[%s20810_s2] ss:$0 sm:$0xff]  ;;  %v9086_v60 = vadd.f32 %v8830_v11, %v8407_v46  ;;  %v8831_v8 = vld [vmem:[#allocation2 + $0x648] sm:$0xff] }
 0x4e8   : > { %v9859_v5 = vadd.f32 %v20377_v41, %v9596_v37  ;;  %9344 = vst.msk [vmem:[#allocation2 + $0x650] sm:$0xff] %vm5177_vm5, %v9088_v1  ;;  %7365 = vst.msk [vmem:[#allocation2 + $0x668] sm:$0xff] %vm5177_vm5, %v7109_v4  ;;  %v7114_v50 = vadd.f32 %v14730_v63, %v6858_v51  ;;  %v14991_v45 = vpop.f32.mrf.mxu0  ;;  %v6457_v62 = vpop.f32.mrf.mxu1  ;;  %v13601_v53 = vunpack.c.l.bf16 %v20396_v27  ;;  %v20417_v46 = vld [vmem:[%s18346_s27 + $0x338] sm:$0xff]   ;;  %v6860_v63 = vld [vmem:[#allocation2 + $0x6a0] sm:$0xff] }
 0x4e9   : > { %11902 = vst.msk [vmem:[%s18394_s8 + $0x300] sm:$0xf] %vm11709_vm6, %v13135_v33  ;;  %v13138_v28 = vpack.c.bf16 %v10624_v32, %v10624_v32  ;;  %v10622_v43 = vadd.f32 %v13586_v49, %v9854_v14  ;;  %v9594_v59 = vld [vmem:[#allocation2 + $0x620] sm:$0xff]  ;;  %v9089_v58 = vadd.f32 %v14991_v45, %v8833_v31  ;;  %v7112_v18 = vadd.f32 %v6856_v29, %v6457_v62  ;;  %v8836_v44 = vld [vmem:[#allocation2 + $0x670] sm:$0xff] }
 0x4ea   : > { %v10627_v3 = vadd.f32 %v13597_v20, %v9859_v5  ;;  %v9857_v26 = vadd.f32 %v20377_v41, %v9594_v59  ;;  %9342 = vst.msk [vmem:[#allocation2 + $0x640] sm:$0xff] %vm5177_vm5, %v9086_v60  ;;  %7370 = vst.msk [vmem:[#allocation2 + $0x690] sm:$0xff] %vm5177_vm5, %v7114_v50  ;;  %v8410_v34 = vpop.f32.mrf.mxu0  ;;  %v14731_v19 = vpop.f32.mrf.mxu1  ;;  %v13606_v33 = vunpack.c.h.bf16 %v20387_v25  ;;  %v20426_v31 = vld [vmem:[%s18346_s27 + $0x330] sm:$0xff]  }
 0x4eb   : > { %11905 = vst.msk [vmem:[%s18394_s8 + $0x30c] sm:$0xf] %vm11709_vm6, %v13138_v28  ;;  %v13136_v48 = vpack.c.bf16 %v10622_v43, %v10622_v43  ;;  %v9597_v10 = vld [vmem:[#allocation2 + $0x638] sm:$0xff]  ;;  %v9087_v39 = vadd.f32 %v8831_v8, %v8410_v34  ;;  %v7115_v21 = vadd.f32 %v14731_v19, %v6859_v2  ;;  %v8834_v40 = vld [vmem:[#allocation2 + $0x660] sm:$0xff]  ;;  %v13602_v43 = vunpack.c.h.bf16 %v20396_v27  ;;  %v6861_v19 = vld [vmem:[#allocation2 + $0x6a8] sm:$0xff] }
 0x4ec   : > { %v13141_v47 = vpack.c.bf16 %v10627_v3, %v10627_v3  ;;  %v10625_v61 = vadd.f32 %v13593_v57, %v9857_v26  ;;  %v9860_v56 = vadd.f32 %v20377_v41, %v9597_v10  ;;  %9345 = vst.msk [vmem:[#allocation2 + $0x658] sm:$0xff] %vm5177_vm5, %v9089_v58  ;;  %7368 = vst.msk [vmem:[#allocation2 + $0x680] sm:$0xff] %vm5177_vm5, %v7112_v18  ;;  %v14994_v17 = vpop.f32.mrf.mxu0  ;;  %v6460_v16 = vpop.f32.mrf.mxu1  ;;  %v13613_v26 = vunpack.c.l.bf16 %v20417_v46 }
 0x4ed   : > { %11903 = vst.msk [vmem:[%s18394_s8 + $0x304] sm:$0xf] %vm11709_vm6, %v13136_v48  ;;  %v9595_v15 = vld [vmem:[#allocation2 + $0x628] sm:$0xff]  ;;  %v9092_v55 = vadd.f32 %v14994_v17, %v8836_v44  ;;  %v7113_v42 = vadd.f32 %v6857_v30, %v6460_v16  ;;  %v8837_v1 = vld [vmem:[#allocation2 + $0x678] sm:$0xff]  ;;  %v6866_v44 = vld [vmem:[#allocation2 + $0x6d0] sm:$0xff] }
 0x4ee   : > { %11908 = vst.msk [vmem:[%s18394_s8 + $0x318] sm:$0xf] %vm11709_vm6, %v13141_v47  ;;  %v13139_v49 = vpack.c.bf16 %v10625_v61, %v10625_v61  ;;  %v10628_v22 = vadd.f32 %v13598_v35, %v9860_v56  ;;  %v9858_v52 = vadd.f32 %v20377_v41, %v9595_v15  ;;  %v8423_v12 = vpop.f32.mrf.mxu0  ;;  %v14734_v0 = vpop.f32.mrf.mxu1  ;;  %v6863_v48 = vld [vmem:[#allocation2 + $0x6b8] sm:$0xff]  ;;  %v13609_v61 = vunpack.c.l.bf16 %v20426_v31 }
 0x4ef   : > { %9343 = vst.msk [vmem:[#allocation2 + $0x648] sm:$0xff] %vm5177_vm5, %v9087_v39  ;;  %v9600_v24 = vld [vmem:[#allocation2 + $0x650] sm:$0xff]  ;;  %7371 = vst.msk [vmem:[#allocation2 + $0x698] sm:$0xff] %vm5177_vm5, %v7115_v21  ;;  %v9090_v54 = vadd.f32 %v8834_v40, %v8423_v12  ;;  %v7118_v32 = vadd.f32 %v14734_v0, %v6862_v6  ;;  %v8835_v51 = vld [vmem:[#allocation2 + $0x668] sm:$0xff] }
 0x4f0   : > { %11906 = vst.msk [vmem:[%s18394_s8 + $0x310] sm:$0xf] %vm11709_vm6, %v13139_v49  ;;  %v13142_v7 = vpack.c.bf16 %v10628_v22, %v10628_v22  ;;  %v10626_v20 = vadd.f32 %v13594_v36, %v9858_v52  ;;  %v9863_v38 = vadd.f32 %v20377_v41, %v9600_v24  ;;  %v14995_v14 = vpop.f32.mrf.mxu0  ;;  %v6473_v23 = vpop.f32.mrf.mxu1  ;;  %v13614_v49 = vunpack.c.h.bf16 %v20417_v46  ;;  %v20447_v12 = vld [vmem:[%s18346_s27 + $0x348] sm:$0xff]   ;;  %v6864_v0 = vld [vmem:[#allocation2 + $0x6c0] sm:$0xff] }
 0x4f1   : > { %9348 = vst.msk [vmem:[#allocation2 + $0x670] sm:$0xff] %vm5177_vm5, %v9092_v55  ;;  %v9598_v9 = vld [vmem:[#allocation2 + $0x640] sm:$0xff]  ;;  %7369 = vst.msk [vmem:[#allocation2 + $0x688] sm:$0xff] %vm5177_vm5, %v7113_v42  ;;  %v9093_v11 = vadd.f32 %v14995_v14, %v8837_v1  ;;  %v7116_v5 = vadd.f32 %v6860_v63, %v6473_v23  ;;  %v8840_v29 = vld [vmem:[#allocation2 + $0x690] sm:$0xff] }
 0x4f2   : > { %11909 = vst.msk [vmem:[%s18394_s8 + $0x31c] sm:$0xf] %vm11709_vm6, %v13142_v7  ;;  %v13140_v37 = vpack.c.bf16 %v10626_v20, %v10626_v20  ;;  %v10631_v57 = vadd.f32 %v13605_v13, %v9863_v38  ;;  %v9861_v4 = vadd.f32 %v20377_v41, %v9598_v9  ;;  %v8426_v60 = vpop.f32.mrf.mxu0  ;;  %v14735_v59 = vpop.f32.mrf.mxu1  ;;  %v13610_v20 = vunpack.c.h.bf16 %v20426_v31  ;;  %v20456_v1 = vld [vmem:[%s18346_s27 + $0x340] sm:$0xff]  }
 0x4f3   : > { %9346 = vst.msk [vmem:[#allocation2 + $0x660] sm:$0xff] %vm5177_vm5, %v9090_v54  ;;  %v9601_v28 = vld [vmem:[#allocation2 + $0x658] sm:$0xff]  ;;  %7374 = vst.msk [vmem:[#allocation2 + $0x6b0] sm:$0xff] %vm5177_vm5, %v7118_v32  ;;  %v9091_v62 = vadd.f32 %v8835_v51, %v8426_v60  ;;  %v7119_v25 = vadd.f32 %v14735_v59, %v6863_v48  ;;  %v8838_v39 = vld [vmem:[#allocation2 + $0x680] sm:$0xff] }
 0x4f4   : > { %11907 = vst.msk [vmem:[%s18394_s8 + $0x314] sm:$0xf] %vm11709_vm6, %v13140_v37  ;;  %v13145_v35 = vpack.c.bf16 %v10631_v57, %v10631_v57  ;;  %v10629_v50 = vadd.f32 %v13601_v53, %v9861_v4  ;;  %v9864_v45 = vadd.f32 %v20377_v41, %v9601_v28  ;;  %v14998_v58 = vpop.f32.mrf.mxu0  ;;  %v6476_v10 = vpop.f32.mrf.mxu1  ;;  %v6867_v37 = vld [vmem:[#allocation2 + $0x6d8] sm:$0xff]  ;;  %v13621_v4 = vunpack.c.l.bf16 %v20447_v12  ;;  %v6865_v59 = vld [vmem:[#allocation2 + $0x6c8] sm:$0xff] }
 0x4f5   : > { %9349 = vst.msk [vmem:[#allocation2 + $0x678] sm:$0xff] %vm5177_vm5, %v9093_v11  ;;  %7372 = vst.msk [vmem:[#allocation2 + $0x6a0] sm:$0xff] %vm5177_vm5, %v7116_v5  ;;  %v9096_v8 = vadd.f32 %v14998_v58, %v8840_v29  ;;  %v7117_v56 = vadd.f32 %v6861_v19, %v6476_v10  ;;  %v6870_v29 = vld [vmem:[#allocation2 + $0x6f0] sm:$0xff] }
 0x4f6   : > { %v9599_v3 = vld [vmem:[#allocation2 + $0x648] sm:$0xff]  ;;  %11912 = vst.msk [vmem:[%s18394_s8 + $0x328] sm:$0xf] %vm11709_vm6, %v13145_v35  ;;  %v13143_v36 = vpack.c.bf16 %v10629_v50, %v10629_v50  ;;  %v10632_v18 = vadd.f32 %v13606_v33, %v9864_v45  ;;  %v8439_v27 = vpop.f32.mrf.mxu0  ;;  %v14738_v2 = vpop.f32.mrf.mxu1  ;;  %v8841_v55 = vld [vmem:[#allocation2 + $0x698] sm:$0xff]  ;;  %v13617_v50 = vunpack.c.l.bf16 %v20456_v1 }
 0x4f7   : > { %v9862_v34 = vadd.f32 %v20377_v41, %v9599_v3  ;;  %9347 = vst.msk [vmem:[#allocation2 + $0x668] sm:$0xff] %vm5177_vm5, %v9091_v62  ;;  %7375 = vst.msk [vmem:[#allocation2 + $0x6b8] sm:$0xff] %vm5177_vm5, %v7119_v25  ;;  %v9094_v17 = vadd.f32 %v8838_v39, %v8439_v27  ;;  %v7122_v22 = vadd.f32 %v14738_v2, %v6866_v44  ;;  %v20477_v27 = vld [vmem:[%s18346_s27 + $0x358] sm:$0xff]   ;;  %v6868_v2 = vld [vmem:[#allocation2 + $0x6e0] sm:$0xff] }
 0x4f8   : > { %v9604_v47 = vld [vmem:[#allocation2 + $0x670] sm:$0xff]  ;;  %11910 = vst.msk [vmem:[%s18394_s8 + $0x320] sm:$0xf] %vm11709_vm6, %v13143_v36  ;;  %v13146_v15 = vpack.c.bf16 %v10632_v18, %v10632_v18  ;;  %v14999_v52 = vpop.f32.mrf.mxu0  ;;  %v6489_v30 = vpop.f32.mrf.mxu1  ;;  %v8839_v6 = vld [vmem:[#allocation2 + $0x688] sm:$0xff]  ;;  %v13622_v36 = vunpack.c.h.bf16 %v20447_v12 }
 0x4f9   : > { %v10630_v13 = vadd.f32 %v13602_v43, %v9862_v34  ;;  %v9867_v21 = vadd.f32 %v20377_v41, %v9604_v47  ;;  %9352 = vst.msk [vmem:[#allocation2 + $0x690] sm:$0xff] %vm5177_vm5, %v9096_v8  ;;  %7373 = vst.msk [vmem:[#allocation2 + $0x6a8] sm:$0xff] %vm5177_vm5, %v7117_v56  ;;  %v9097_v40 = vadd.f32 %v14999_v52, %v8841_v55  ;;  %v20486_v55 = vld [vmem:[%s18346_s27 + $0x350] sm:$0xff]  }
 0x4fa   : > { %v9602_v16 = vld [vmem:[#allocation2 + $0x660] sm:$0xff]  ;;  %11913 = vst.msk [vmem:[%s18394_s8 + $0x32c] sm:$0xf] %vm11709_vm6, %v13146_v15  ;;  %v7120_v38 = vadd.f32 %v6864_v0, %v6489_v30  ;;  %v8442_v54 = vpop.f32.mrf.mxu0  ;;  %v14739_v9 = vpop.f32.mrf.mxu1  ;;  %v8844_v63 = vld [vmem:[#allocation2 + $0x6b0] sm:$0xff] }
 0x4fb   : > { %v13144_v24 = vpack.c.bf16 %v10630_v13, %v10630_v13  ;;  %v10635_v53 = vadd.f32 %v13613_v26, %v9867_v21  ;;  %v9865_v42 = vadd.f32 %v20377_v41, %v9602_v16  ;;  %9350 = vst.msk [vmem:[#allocation2 + $0x680] sm:$0xff] %vm5177_vm5, %v9094_v17  ;;  %7378 = vst.msk [vmem:[#allocation2 + $0x6d0] sm:$0xff] %vm5177_vm5, %v7122_v22  ;;  %v13618_v13 = vunpack.c.h.bf16 %v20456_v1 }
 0x4fc   : > { %v9605_v7 = vld [vmem:[#allocation2 + $0x678] sm:$0xff]  ;;  %9353 = vst.msk [vmem:[#allocation2 + $0x698] sm:$0xff] %vm5177_vm5, %v9097_v40  ;;  %v9095_v23 = vadd.f32 %v8839_v6, %v8442_v54  ;;  %7376 = vst.msk [vmem:[#allocation2 + $0x6c0] sm:$0xff] %vm5177_vm5, %v7120_v38  ;;  %v7123_v46 = vadd.f32 %v14739_v9, %v6867_v37  ;;  %v15002_v11 = vpop.f32.mrf.mxu0  ;;  %v6492_v28 = vpop.f32.mrf.mxu1  ;;  %v8842_v62 = vld [vmem:[#allocation2 + $0x6a0] sm:$0xff] }
 0x4fd   : > { %11911 = vst.msk [vmem:[%s18394_s8 + $0x324] sm:$0xf] %vm11709_vm6, %v13144_v24  ;;  %v13149_v33 = vpack.c.bf16 %v10635_v53, %v10635_v53  ;;  %v10633_v32 = vadd.f32 %v13609_v61, %v9865_v42  ;;  %v9868_v14 = vadd.f32 %v20377_v41, %v9605_v7  ;;  %v9100_v51 = vadd.f32 %v15002_v11, %v8844_v63  ;;  %v6871_v24 = vld [vmem:[#allocation2 + $0x6f8] sm:$0xff]  ;;  %v6869_v9 = vld [vmem:[#allocation2 + $0x6e8] sm:$0xff]  ;;  %v6874_v63 = vld [vmem:[#allocation2 + $0x710] sm:$0xff] }
 0x4fe   : > { %v9603_v57 = vld [vmem:[#allocation2 + $0x668] sm:$0xff]  ;;  %9351 = vst.msk [vmem:[#allocation2 + $0x688] sm:$0xff] %vm5177_vm5, %v9095_v23  ;;  %7379 = vst.msk [vmem:[#allocation2 + $0x6d8] sm:$0xff] %vm5177_vm5, %v7123_v46  ;;  %v7121_v45 = vadd.f32 %v6865_v59, %v6492_v28  ;;  %v8455_v31 = vpop.f32.mrf.mxu0  ;;  %v14742_v48 = vpop.f32.mrf.mxu1  ;;  %v8845_v8 = vld [vmem:[#allocation2 + $0x6b8] sm:$0xff]  ;;  %v13629_v42 = vunpack.c.l.bf16 %v20477_v27 }
 0x4ff   : > { %11916 = vst.msk [vmem:[%s18394_s8 + $0x338] sm:$0xf] %vm11709_vm6, %v13149_v33  ;;  %v13147_v43 = vpack.c.bf16 %v10633_v32, %v10633_v32  ;;  %v10636_v5 = vadd.f32 %v13614_v49, %v9868_v14  ;;  %v9866_v60 = vadd.f32 %v20377_v41, %v9603_v57  ;;  %v9098_v58 = vadd.f32 %v8842_v62, %v8455_v31  ;;  %v20507_v31 = vld [vmem:[%s18346_s27 + $0x368] sm:$0xff]  }
 0x500   : > { %v9608_v35 = vld [vmem:[#allocation2 + $0x690] sm:$0xff]  ;;  %9356 = vst.msk [vmem:[#allocation2 + $0x6b0] sm:$0xff] %vm5177_vm5, %v9100_v51  ;;  %7377 = vst.msk [vmem:[#allocation2 + $0x6c8] sm:$0xff] %vm5177_vm5, %v7121_v45  ;;  %v7126_v18 = vadd.f32 %v14742_v48, %v6870_v29  ;;  %v15003_v34 = vpop.f32.mrf.mxu0  ;;  %v6505_v19 = vpop.f32.mrf.mxu1  ;;  %v8843_v44 = vld [vmem:[#allocation2 + $0x6a8] sm:$0xff]  ;;  %v13625_v32 = vunpack.c.l.bf16 %v20486_v55 }
 0x501   : > { %11914 = vst.msk [vmem:[%s18394_s8 + $0x330] sm:$0xf] %vm11709_vm6, %v13147_v43  ;;  %v13150_v3 = vpack.c.bf16 %v10636_v5, %v10636_v5  ;;  %v10634_v26 = vadd.f32 %v13610_v20, %v9866_v60  ;;  %v9871_v25 = vadd.f32 %v20377_v41, %v9608_v35  ;;  %v9101_v39 = vadd.f32 %v15003_v34, %v8845_v8  ;;  %v6872_v48 = vld [vmem:[#allocation2 + $0x700] sm:$0xff] }
 0x502   : > { %v9606_v10 = vld [vmem:[#allocation2 + $0x680] sm:$0xff]  ;;  %9354 = vst.msk [vmem:[#allocation2 + $0x6a0] sm:$0xff] %vm5177_vm5, %v9098_v58  ;;  %7382 = vst.msk [vmem:[#allocation2 + $0x6f0] sm:$0xff] %vm5177_vm5, %v7126_v18  ;;  %v7124_v21 = vadd.f32 %v6868_v2, %v6505_v19  ;;  %v8458_v17 = vpop.f32.mrf.mxu0  ;;  %v14743_v16 = vpop.f32.mrf.mxu1  ;;  %v8848_v0 = vld [vmem:[#allocation2 + $0x6d0] sm:$0xff]  ;;  %v13630_v43 = vunpack.c.h.bf16 %v20477_v27 }
 0x503   : > { %11917 = vst.msk [vmem:[%s18394_s8 + $0x33c] sm:$0xf] %vm11709_vm6, %v13150_v3  ;;  %v13148_v47 = vpack.c.bf16 %v10634_v26, %v10634_v26  ;;  %v10639_v61 = vadd.f32 %v13621_v4, %v9871_v25  ;;  %v9869_v56 = vadd.f32 %v20377_v41, %v9606_v10  ;;  %v9609_v15 = vld [vmem:[#allocation2 + $0x698] sm:$0xff]  ;;  %v9099_v30 = vadd.f32 %v8843_v44, %v8458_v17  ;;  %v8846_v23 = vld [vmem:[#allocation2 + $0x6c0] sm:$0xff] }
 0x504   : > { %v9872_v52 = vadd.f32 %v20377_v41, %v9609_v15  ;;  %9357 = vst.msk [vmem:[#allocation2 + $0x6b8] sm:$0xff] %vm5177_vm5, %v9101_v39  ;;  %7380 = vst.msk [vmem:[#allocation2 + $0x6e0] sm:$0xff] %vm5177_vm5, %v7124_v21  ;;  %v7127_v12 = vadd.f32 %v14743_v16, %v6871_v24  ;;  %v15006_v40 = vpop.f32.mrf.mxu0  ;;  %v6508_v7 = vpop.f32.mrf.mxu1  ;;  %v13626_v26 = vunpack.c.h.bf16 %v20486_v55  ;;  %v20516_v8 = vld [vmem:[%s18346_s27 + $0x360] sm:$0xff]   ;;  %v6873_v16 = vld [vmem:[#allocation2 + $0x708] sm:$0xff] }
 0x505   : > { %11915 = vst.msk [vmem:[%s18394_s8 + $0x334] sm:$0xf] %vm11709_vm6, %v13148_v47  ;;  %v13153_v49 = vpack.c.bf16 %v10639_v61, %v10639_v61  ;;  %v10637_v22 = vadd.f32 %v13617_v50, %v9869_v56  ;;  %v9607_v53 = vld [vmem:[#allocation2 + $0x688] sm:$0xff]  ;;  %v9104_v6 = vadd.f32 %v15006_v40, %v8848_v0  ;;  %v7125_v14 = vadd.f32 %v6869_v9, %v6508_v7  ;;  %v8849_v51 = vld [vmem:[#allocation2 + $0x6d8] sm:$0xff]  ;;  %v6878_v0 = vld [vmem:[#allocation2 + $0x730] sm:$0xff] }
 0x506   : > { %v10640_v38 = vadd.f32 %v13622_v36, %v9872_v52  ;;  %v9870_v54 = vadd.f32 %v20377_v41, %v9607_v53  ;;  %9355 = vst.msk [vmem:[#allocation2 + $0x6a8] sm:$0xff] %vm5177_vm5, %v9099_v30  ;;  %7383 = vst.msk [vmem:[#allocation2 + $0x6f8] sm:$0xff] %vm5177_vm5, %v7127_v12  ;;  %v8471_v1 = vpop.f32.mrf.mxu0  ;;  %v14746_v37 = vpop.f32.mrf.mxu1  ;;  %v6875_v47 = vld [vmem:[#allocation2 + $0x718] sm:$0xff]  ;;  %v13637_v56 = vunpack.c.l.bf16 %v20507_v31 }
 0x507   : > { %11920 = vst.msk [vmem:[%s18394_s8 + $0x348] sm:$0xf] %vm11709_vm6, %v13153_v49  ;;  %v13151_v20 = vpack.c.bf16 %v10637_v22, %v10637_v22  ;;  %v9612_v33 = vld [vmem:[#allocation2 + $0x6b0] sm:$0xff]  ;;  %v9102_v11 = vadd.f32 %v8846_v23, %v8471_v1  ;;  %v7130_v5 = vadd.f32 %v14746_v37, %v6874_v63  ;;  %v8847_v29 = vld [vmem:[#allocation2 + $0x6c8] sm:$0xff]  ;;  %v13633_v22 = vunpack.c.l.bf16 %v20516_v8  ;;  %v20537_v1 = vld [vmem:[%s18346_s27 + $0x378] sm:$0xff]  }
 0x508   : > { %v13154_v57 = vpack.c.bf16 %v10640_v38, %v10640_v38  ;;  %v10638_v4 = vadd.f32 %v13618_v13, %v9870_v54  ;;  %v9875_v46 = vadd.f32 %v20377_v41, %v9612_v33  ;;  %9360 = vst.msk [vmem:[#allocation2 + $0x6d0] sm:$0xff] %vm5177_vm5, %v9104_v6  ;;  %7381 = vst.msk [vmem:[#allocation2 + $0x6e8] sm:$0xff] %vm5177_vm5, %v7125_v14  ;;  %v15007_v60 = vpop.f32.mrf.mxu0  ;;  %v6521_v59 = vpop.f32.mrf.mxu1  ;;  %v6876_v37 = vld [vmem:[#allocation2 + $0x720] sm:$0xff] }
 0x509   : > { %11918 = vst.msk [vmem:[%s18394_s8 + $0x340] sm:$0xf] %vm11709_vm6, %v13151_v20  ;;  %v9610_v28 = vld [vmem:[#allocation2 + $0x6a0] sm:$0xff]  ;;  %v9105_v62 = vadd.f32 %v15007_v60, %v8849_v51  ;;  %v7128_v25 = vadd.f32 %v6872_v48, %v6521_v59  ;;  %v8852_v2 = vld [vmem:[#allocation2 + $0x6f0] sm:$0xff]  ;;  %v13638_v20 = vunpack.c.h.bf16 %v20507_v31 }
 0x50a   : > { %11921 = vst.msk [vmem:[%s18394_s8 + $0x34c] sm:$0xf] %vm11709_vm6, %v13154_v57  ;;  %v13152_v35 = vpack.c.bf16 %v10638_v4, %v10638_v4  ;;  %v10643_v50 = vadd.f32 %v13629_v42, %v9875_v46  ;;  %v9873_v45 = vadd.f32 %v20377_v41, %v9610_v28  ;;  %v8474_v58 = vpop.f32.mrf.mxu0  ;;  %v14747_v10 = vpop.f32.mrf.mxu1  ;;  %v13634_v4 = vunpack.c.h.bf16 %v20516_v8  ;;  %v20546_v51 = vld [vmem:[%s18346_s27 + $0x370] sm:$0xff]  }
 0x50b   : > { %9358 = vst.msk [vmem:[#allocation2 + $0x6c0] sm:$0xff] %vm5177_vm5, %v9102_v11  ;;  %v9613_v3 = vld [vmem:[#allocation2 + $0x6b8] sm:$0xff]  ;;  %7386 = vst.msk [vmem:[#allocation2 + $0x710] sm:$0xff] %vm5177_vm5, %v7130_v5  ;;  %v9103_v19 = vadd.f32 %v8847_v29, %v8474_v58  ;;  %v7131_v27 = vadd.f32 %v14747_v10, %v6875_v47  ;;  %v8850_v30 = vld [vmem:[#allocation2 + $0x6e0] sm:$0xff] }
 0x50c   : > { %11919 = vst.msk [vmem:[%s18394_s8 + $0x344] sm:$0xf] %vm11709_vm6, %v13152_v35  ;;  %v13157_v36 = vpack.c.bf16 %v10643_v50, %v10643_v50  ;;  %v10641_v18 = vadd.f32 %v13625_v32, %v9873_v45  ;;  %v9876_v34 = vadd.f32 %v20377_v41, %v9613_v3  ;;  %v15010_v39 = vpop.f32.mrf.mxu0  ;;  %v6524_v15 = vpop.f32.mrf.mxu1  ;;  %v6879_v35 = vld [vmem:[#allocation2 + $0x738] sm:$0xff]  ;;  %v13645_v45 = vunpack.c.l.bf16 %v20537_v1  ;;  %v6877_v10 = vld [vmem:[#allocation2 + $0x728] sm:$0xff] }
 0x50d   : > { %9361 = vst.msk [vmem:[#allocation2 + $0x6d8] sm:$0xff] %vm5177_vm5, %v9105_v62  ;;  %v9611_v61 = vld [vmem:[#allocation2 + $0x6a8] sm:$0xff]  ;;  %7384 = vst.msk [vmem:[#allocation2 + $0x700] sm:$0xff] %vm5177_vm5, %v7128_v25  ;;  %v9108_v44 = vadd.f32 %v15010_v39, %v8852_v2  ;;  %v7129_v52 = vadd.f32 %v6873_v16, %v6524_v15  ;;  %v8853_v6 = vld [vmem:[#allocation2 + $0x6f8] sm:$0xff] }
 0x50e   : > { %11924 = vst.msk [vmem:[%s18394_s8 + $0x358] sm:$0xf] %vm11709_vm6, %v13157_v36  ;;  %v13155_v13 = vpack.c.bf16 %v10641_v18, %v10641_v18  ;;  %v10644_v21 = vadd.f32 %v13630_v43, %v9876_v34  ;;  %v9874_v17 = vadd.f32 %v20377_v41, %v9611_v61  ;;  %v8487_v55 = vpop.f32.mrf.mxu0  ;;  %v14750_v24 = vpop.f32.mrf.mxu1  ;;  %v13641_v18 = vunpack.c.l.bf16 %v20546_v51  ;;  %v6882_v2 = vld [vmem:[#allocation2 + $0x750] sm:$0xff] }
 0x50f   : > { %9359 = vst.msk [vmem:[#allocation2 + $0x6c8] sm:$0xff] %vm5177_vm5, %v9103_v19  ;;  %v9616_v49 = vld [vmem:[#allocation2 + $0x6d0] sm:$0xff]  ;;  %7387 = vst.msk [vmem:[#allocation2 + $0x718] sm:$0xff] %vm5177_vm5, %v7131_v27  ;;  %v9106_v40 = vadd.f32 %v8850_v30, %v8487_v55  ;;  %v7134_v38 = vadd.f32 %v14750_v24, %v6878_v0  ;;  %v8851_v63 = vld [vmem:[#allocation2 + $0x6e8] sm:$0xff] }
 0x510   : > { %11922 = vst.msk [vmem:[%s18394_s8 + $0x350] sm:$0xf] %vm11709_vm6, %v13155_v13  ;;  %v13158_v53 = vpack.c.bf16 %v10644_v21, %v10644_v21  ;;  %v10642_v42 = vadd.f32 %v13626_v26, %v9874_v17  ;;  %v9879_v12 = vadd.f32 %v20377_v41, %v9616_v49  ;;  %v15011_v54 = vpop.f32.mrf.mxu0  ;;  %v6537_v9 = vpop.f32.mrf.mxu1  ;;  %v13646_v13 = vunpack.c.h.bf16 %v20537_v1  ;;  %v20567_v55 = vld [vmem:[%s18346_s27 + $0x388] sm:$0xff]   ;;  %v6880_v24 = vld [vmem:[#allocation2 + $0x740] sm:$0xff] }
 0x511   : > { %9364 = vst.msk [vmem:[#allocation2 + $0x6f0] sm:$0xff] %vm5177_vm5, %v9108_v44  ;;  %7385 = vst.msk [vmem:[#allocation2 + $0x708] sm:$0xff] %vm5177_vm5, %v7129_v52  ;;  %v9109_v23 = vadd.f32 %v15011_v54, %v8853_v6  ;;  %v7132_v46 = vadd.f32 %v6876_v37, %v6537_v9  ;;  %v20576_v6 = vld [vmem:[%s18346_s27 + $0x380] sm:$0xff]  }
 0x512   : > { %v9614_v7 = vld [vmem:[#allocation2 + $0x6c0] sm:$0xff]  ;;  %11925 = vst.msk [vmem:[%s18394_s8 + $0x35c] sm:$0xf] %vm11709_vm6, %v13158_v53  ;;  %v13156_v33 = vpack.c.bf16 %v10642_v42, %v10642_v42  ;;  %v10647_v32 = vadd.f32 %v13637_v56, %v9879_v12  ;;  %v8490_v11 = vpop.f32.mrf.mxu0  ;;  %v14751_v28 = vpop.f32.mrf.mxu1  ;;  %v8856_v48 = vld [vmem:[#allocation2 + $0x710] sm:$0xff]  ;;  %v13642_v42 = vunpack.c.h.bf16 %v20546_v51 }
 0x513   : > { %v9877_v14 = vadd.f32 %v20377_v41, %v9614_v7  ;;  %9362 = vst.msk [vmem:[#allocation2 + $0x6e0] sm:$0xff] %vm5177_vm5, %v9106_v40  ;;  %7390 = vst.msk [vmem:[#allocation2 + $0x730] sm:$0xff] %vm5177_vm5, %v7134_v38  ;;  %v9107_v59 = vadd.f32 %v8851_v63, %v8490_v11  ;;  %v7135_v31 = vadd.f32 %v14751_v28, %v6879_v35  ;;  %v6881_v28 = vld [vmem:[#allocation2 + $0x748] sm:$0xff] }
 0x514   : > { %v9617_v57 = vld [vmem:[#allocation2 + $0x6d8] sm:$0xff]  ;;  %11923 = vst.msk [vmem:[%s18394_s8 + $0x354] sm:$0xf] %vm11709_vm6, %v13156_v33  ;;  %v13161_v43 = vpack.c.bf16 %v10647_v32, %v10647_v32  ;;  %v15014_v62 = vpop.f32.mrf.mxu0  ;;  %v6540_v3 = vpop.f32.mrf.mxu1  ;;  %v8854_v19 = vld [vmem:[#allocation2 + $0x700] sm:$0xff] }
 0x515   : > { %v10645_v5 = vadd.f32 %v13633_v22, %v9877_v14  ;;  %v9880_v60 = vadd.f32 %v20377_v41, %v9617_v57  ;;  %9365 = vst.msk [vmem:[#allocation2 + $0x6f8] sm:$0xff] %vm5177_vm5, %v9109_v23  ;;  %7388 = vst.msk [vmem:[#allocation2 + $0x720] sm:$0xff] %vm5177_vm5, %v7132_v46  ;;  %v9112_v29 = vadd.f32 %v15014_v62, %v8856_v48  ;;  %v6883_v33 = vld [vmem:[#allocation2 + $0x758] sm:$0xff]  ;;  %v13653_v14 = vunpack.c.l.bf16 %v20567_v55  ;;  %v6886_v48 = vld [vmem:[#allocation2 + $0x770] sm:$0xff] }
 0x516   : > { %v9615_v50 = vld [vmem:[#allocation2 + $0x6c8] sm:$0xff]  ;;  %11928 = vst.msk [vmem:[%s18394_s8 + $0x368] sm:$0xf] %vm11709_vm6, %v13161_v43  ;;  %v7133_v34 = vadd.f32 %v6877_v10, %v6540_v3  ;;  %v8503_v8 = vpop.f32.mrf.mxu0  ;;  %v14754_v47 = vpop.f32.mrf.mxu1  ;;  %v8857_v44 = vld [vmem:[#allocation2 + $0x718] sm:$0xff] }
 0x517   : > { %v13159_v26 = vpack.c.bf16 %v10645_v5, %v10645_v5  ;;  %v10648_v25 = vadd.f32 %v13638_v20, %v9880_v60  ;;  %v9878_v58 = vadd.f32 %v20377_v41, %v9615_v50  ;;  %9363 = vst.msk [vmem:[#allocation2 + $0x6e8] sm:$0xff] %vm5177_vm5, %v9107_v59  ;;  %7391 = vst.msk [vmem:[#allocation2 + $0x738] sm:$0xff] %vm5177_vm5, %v7135_v31  ;;  %v13649_v5 = vunpack.c.l.bf16 %v20576_v6 }
 0x518   : > { %v9620_v36 = vld [vmem:[#allocation2 + $0x6f0] sm:$0xff]  ;;  %9368 = vst.msk [vmem:[#allocation2 + $0x710] sm:$0xff] %vm5177_vm5, %v9112_v29  ;;  %v9110_v39 = vadd.f32 %v8854_v19, %v8503_v8  ;;  %7389 = vst.msk [vmem:[#allocation2 + $0x728] sm:$0xff] %vm5177_vm5, %v7133_v34  ;;  %v7138_v21 = vadd.f32 %v14754_v47, %v6882_v2  ;;  %v15015_v17 = vpop.f32.mrf.mxu0  ;;  %v6553_v16 = vpop.f32.mrf.mxu1  ;;  %v8855_v0 = vld [vmem:[#allocation2 + $0x708] sm:$0xff] }
 0x519   : > { %11926 = vst.msk [vmem:[%s18394_s8 + $0x360] sm:$0xf] %vm11709_vm6, %v13159_v26  ;;  %v13162_v61 = vpack.c.bf16 %v10648_v25, %v10648_v25  ;;  %v10646_v56 = vadd.f32 %v13634_v4, %v9878_v58  ;;  %v9883_v27 = vadd.f32 %v20377_v41, %v9620_v36  ;;  %v9113_v30 = vadd.f32 %v15015_v17, %v8857_v44  ;;  %v20597_v8 = vld [vmem:[%s18346_s27 + $0x398] sm:$0xff]   ;;  %v6884_v47 = vld [vmem:[#allocation2 + $0x760] sm:$0xff]  ;;  %v20606_v44 = vld [vmem:[%s18346_s27 + $0x390] sm:$0xff]  }
 0x51a   : > { %v9618_v15 = vld [vmem:[#allocation2 + $0x6e0] sm:$0xff]  ;;  %9366 = vst.msk [vmem:[#allocation2 + $0x700] sm:$0xff] %vm5177_vm5, %v9110_v39  ;;  %7394 = vst.msk [vmem:[#allocation2 + $0x750] sm:$0xff] %vm5177_vm5, %v7138_v21  ;;  %v7136_v12 = vadd.f32 %v6880_v24, %v6553_v16  ;;  %v8506_v40 = vpop.f32.mrf.mxu0  ;;  %v14755_v7 = vpop.f32.mrf.mxu1  ;;  %v8860_v37 = vld [vmem:[#allocation2 + $0x730] sm:$0xff]  ;;  %v13654_v26 = vunpack.c.h.bf16 %v20567_v55 }
 0x51b   : > { %11929 = vst.msk [vmem:[%s18394_s8 + $0x36c] sm:$0xf] %vm11709_vm6, %v13162_v61  ;;  %v13160_v49 = vpack.c.bf16 %v10646_v56, %v10646_v56  ;;  %v10651_v22 = vadd.f32 %v13645_v45, %v9883_v27  ;;  %v9881_v52 = vadd.f32 %v20377_v41, %v9618_v15  ;;  %v9111_v9 = vadd.f32 %v8855_v0, %v8506_v40 }
 0x51c   : > { %v9621_v53 = vld [vmem:[#allocation2 + $0x6f8] sm:$0xff]  ;;  %9369 = vst.msk [vmem:[#allocation2 + $0x718] sm:$0xff] %vm5177_vm5, %v9113_v30  ;;  %7392 = vst.msk [vmem:[#allocation2 + $0x740] sm:$0xff] %vm5177_vm5, %v7136_v12  ;;  %v7139_v1 = vadd.f32 %v14755_v7, %v6883_v33  ;;  %v15018_v23 = vpop.f32.mrf.mxu0  ;;  %v6556_v57 = vpop.f32.mrf.mxu1  ;;  %v8858_v59 = vld [vmem:[#allocation2 + $0x720] sm:$0xff]  ;;  %v13650_v56 = vunpack.c.h.bf16 %v20576_v6 }
 0x51d   : > { %11927 = vst.msk [vmem:[%s18394_s8 + $0x364] sm:$0xf] %vm11709_vm6, %v13160_v49  ;;  %v13165_v20 = vpack.c.bf16 %v10651_v22, %v10651_v22  ;;  %v10649_v38 = vadd.f32 %v13641_v18, %v9881_v52  ;;  %v9884_v54 = vadd.f32 %v20377_v41, %v9621_v53  ;;  %v9116_v63 = vadd.f32 %v15018_v23, %v8860_v37  ;;  %v6887_v49 = vld [vmem:[#allocation2 + $0x778] sm:$0xff]  ;;  %v6885_v7 = vld [vmem:[#allocation2 + $0x768] sm:$0xff]  ;;  %v6890_v37 = vld [vmem:[#allocation2 + $0x790] sm:$0xff] }
 0x51e   : > { %v9619_v32 = vld [vmem:[#allocation2 + $0x6e8] sm:$0xff]  ;;  %9367 = vst.msk [vmem:[#allocation2 + $0x708] sm:$0xff] %vm5177_vm5, %v9111_v9  ;;  %7395 = vst.msk [vmem:[#allocation2 + $0x758] sm:$0xff] %vm5177_vm5, %v7139_v1  ;;  %v7137_v60 = vadd.f32 %v6881_v28, %v6556_v57  ;;  %v8519_v51 = vpop.f32.mrf.mxu0  ;;  %v14758_v35 = vpop.f32.mrf.mxu1  ;;  %v8861_v29 = vld [vmem:[#allocation2 + $0x738] sm:$0xff]  ;;  %v13661_v52 = vunpack.c.l.bf16 %v20597_v8 }
 0x51f   : > { %11932 = vst.msk [vmem:[%s18394_s8 + $0x378] sm:$0xf] %vm11709_vm6, %v13165_v20  ;;  %v13163_v4 = vpack.c.bf16 %v10649_v38, %v10649_v38  ;;  %v10652_v46 = vadd.f32 %v13646_v13, %v9884_v54  ;;  %v9882_v11 = vadd.f32 %v20377_v41, %v9619_v32  ;;  %v9624_v43 = vld [vmem:[#allocation2 + $0x710] sm:$0xff]  ;;  %v9114_v62 = vadd.f32 %v8858_v59, %v8519_v51  ;;  %v8859_v2 = vld [vmem:[#allocation2 + $0x728] sm:$0xff] }
 0x520   : > { %v9887_v31 = vadd.f32 %v20377_v41, %v9624_v43  ;;  %9372 = vst.msk [vmem:[#allocation2 + $0x730] sm:$0xff] %vm5177_vm5, %v9116_v63  ;;  %7393 = vst.msk [vmem:[#allocation2 + $0x748] sm:$0xff] %vm5177_vm5, %v7137_v60  ;;  %v7142_v25 = vadd.f32 %v14758_v35, %v6886_v48  ;;  %v15019_v58 = vpop.f32.mrf.mxu0  ;;  %v6569_v10 = vpop.f32.mrf.mxu1  ;;  %v13657_v38 = vunpack.c.l.bf16 %v20606_v44  ;;  %v20627_v51 = vld [vmem:[%s18346_s27 + $0x3a8] sm:$0xff]   ;;  %v6888_v35 = vld [vmem:[#allocation2 + $0x780] sm:$0xff] }
 0x521   : > { %11930 = vst.msk [vmem:[%s18394_s8 + $0x370] sm:$0xf] %vm11709_vm6, %v13163_v4  ;;  %v13166_v50 = vpack.c.bf16 %v10652_v46, %v10652_v46  ;;  %v10650_v45 = vadd.f32 %v13642_v42, %v9882_v11  ;;  %v9622_v3 = vld [vmem:[#allocation2 + $0x700] sm:$0xff]  ;;  %v9117_v19 = vadd.f32 %v15019_v58, %v8861_v29  ;;  %v7140_v27 = vadd.f32 %v6884_v47, %v6569_v10  ;;  %v8864_v24 = vld [vmem:[#allocation2 + $0x750] sm:$0xff] }
 0x522   : > { %v10655_v18 = vadd.f32 %v13653_v14, %v9887_v31  ;;  %v9885_v34 = vadd.f32 %v20377_v41, %v9622_v3  ;;  %9370 = vst.msk [vmem:[#allocation2 + $0x720] sm:$0xff] %vm5177_vm5, %v9114_v62  ;;  %7398 = vst.msk [vmem:[#allocation2 + $0x770] sm:$0xff] %vm5177_vm5, %v7142_v25  ;;  %v8522_v39 = vpop.f32.mrf.mxu0  ;;  %v14759_v15 = vpop.f32.mrf.mxu1  ;;  %v13662_v4 = vunpack.c.h.bf16 %v20597_v8  ;;  %v20636_v29 = vld [vmem:[%s18346_s27 + $0x3a0] sm:$0xff]  }
 0x523   : > { %11933 = vst.msk [vmem:[%s18394_s8 + $0x37c] sm:$0xf] %vm11709_vm6, %v13166_v50  ;;  %v13164_v36 = vpack.c.bf16 %v10650_v45, %v10650_v45  ;;  %v9625_v61 = vld [vmem:[#allocation2 + $0x718] sm:$0xff]  ;;  %v9115_v16 = vadd.f32 %v8859_v2, %v8522_v39  ;;  %v7143_v55 = vadd.f32 %v14759_v15, %v6887_v49  ;;  %v8862_v9 = vld [vmem:[#allocation2 + $0x740] sm:$0xff]  ;;  %v13658_v45 = vunpack.c.h.bf16 %v20606_v44  ;;  %v6889_v15 = vld [vmem:[#allocation2 + $0x788] sm:$0xff] }
 0x524   : > { %v13169_v13 = vpack.c.bf16 %v10655_v18, %v10655_v18  ;;  %v10653_v21 = vadd.f32 %v13649_v5, %v9885_v34  ;;  %v9888_v17 = vadd.f32 %v20377_v41, %v9625_v61  ;;  %9373 = vst.msk [vmem:[#allocation2 + $0x738] sm:$0xff] %vm5177_vm5, %v9117_v19  ;;  %7396 = vst.msk [vmem:[#allocation2 + $0x760] sm:$0xff] %vm5177_vm5, %v7140_v27  ;;  %v15022_v30 = vpop.f32.mrf.mxu0  ;;  %v6572_v53 = vpop.f32.mrf.mxu1  ;;  %v13669_v34 = vunpack.c.l.bf16 %v20627_v51 }
 0x525   : > { %11931 = vst.msk [vmem:[%s18394_s8 + $0x374] sm:$0xf] %vm11709_vm6, %v13164_v36  ;;  %v9623_v22 = vld [vmem:[#allocation2 + $0x708] sm:$0xff]  ;;  %v9120_v0 = vadd.f32 %v15022_v30, %v8864_v24  ;;  %v7141_v54 = vadd.f32 %v6885_v7, %v6572_v53  ;;  %v8865_v63 = vld [vmem:[#allocation2 + $0x758] sm:$0xff]  ;;  %v6894_v24 = vld [vmem:[#allocation2 + $0x7b0] sm:$0xff] }
 0x526   : > { %11936 = vst.msk [vmem:[%s18394_s8 + $0x388] sm:$0xf] %vm11709_vm6, %v13169_v13  ;;  %v13167_v42 = vpack.c.bf16 %v10653_v21, %v10653_v21  ;;  %v10656_v12 = vadd.f32 %v13654_v26, %v9888_v17  ;;  %v9886_v40 = vadd.f32 %v20377_v41, %v9623_v22  ;;  %v8535_v6 = vpop.f32.mrf.mxu0  ;;  %v14762_v33 = vpop.f32.mrf.mxu1  ;;  %v6891_v36 = vld [vmem:[#allocation2 + $0x798] sm:$0xff]  ;;  %v13665_v21 = vunpack.c.l.bf16 %v20636_v29 }
 0x527   : > { %9371 = vst.msk [vmem:[#allocation2 + $0x728] sm:$0xff] %vm5177_vm5, %v9115_v16  ;;  %v9628_v20 = vld [vmem:[#allocation2 + $0x730] sm:$0xff]  ;;  %7399 = vst.msk [vmem:[#allocation2 + $0x778] sm:$0xff] %vm5177_vm5, %v7143_v55  ;;  %v9118_v23 = vadd.f32 %v8862_v9, %v8535_v6  ;;  %v7146_v46 = vadd.f32 %v14762_v33, %v6890_v37  ;;  %v8863_v48 = vld [vmem:[#allocation2 + $0x748] sm:$0xff] }
 0x528   : > { %11934 = vst.msk [vmem:[%s18394_s8 + $0x380] sm:$0xf] %vm11709_vm6, %v13167_v42  ;;  %v13170_v32 = vpack.c.bf16 %v10656_v12, %v10656_v12  ;;  %v10654_v14 = vadd.f32 %v13650_v56, %v9886_v40  ;;  %v9891_v1 = vadd.f32 %v20377_v41, %v9628_v20  ;;  %v15023_v11 = vpop.f32.mrf.mxu0  ;;  %v6585_v28 = vpop.f32.mrf.mxu1  ;;  %v13670_v42 = vunpack.c.h.bf16 %v20627_v51  ;;  %v20662_v6 = vld [vmem:[%s18346_s27 + $0x3b8] sm:$0xff]   ;;  %v6892_v33 = vld [vmem:[#allocation2 + $0x7a0] sm:$0xff] }
 0x529   : > { %9376 = vst.msk [vmem:[#allocation2 + $0x750] sm:$0xff] %vm5177_vm5, %v9120_v0  ;;  %v9626_v57 = vld [vmem:[#allocation2 + $0x720] sm:$0xff]  ;;  %7397 = vst.msk [vmem:[#allocation2 + $0x768] sm:$0xff] %vm5177_vm5, %v7141_v54  ;;  %v9121_v59 = vadd.f32 %v15023_v11, %v8865_v63  ;;  %v7144_v31 = vadd.f32 %v6888_v35, %v6585_v28  ;;  %v8868_v47 = vld [vmem:[#allocation2 + $0x770] sm:$0xff] }
 0x52a   : > { %11937 = vst.msk [vmem:[%s18394_s8 + $0x38c] sm:$0xf] %vm11709_vm6, %v13170_v32  ;;  %v13168_v43 = vpack.c.bf16 %v10654_v14, %v10654_v14  ;;  %v10659_v5 = vadd.f32 %v13661_v52, %v9891_v1  ;;  %v9889_v60 = vadd.f32 %v20377_v41, %v9626_v57  ;;  %v8538_v62 = vpop.f32.mrf.mxu0  ;;  %v14763_v3 = vpop.f32.mrf.mxu1  ;;  %v13666_v14 = vunpack.c.h.bf16 %v20636_v29  ;;  %v20671_v63 = vld [vmem:[%s18346_s27 + $0x3b0] sm:$0xff]  }
 0x52b   : > { %9374 = vst.msk [vmem:[#allocation2 + $0x740] sm:$0xff] %vm5177_vm5, %v9118_v23  ;;  %v9629_v50 = vld [vmem:[#allocation2 + $0x738] sm:$0xff]  ;;  %7402 = vst.msk [vmem:[#allocation2 + $0x790] sm:$0xff] %vm5177_vm5, %v7146_v46  ;;  %v9119_v10 = vadd.f32 %v8863_v48, %v8538_v62  ;;  %v7147_v8 = vadd.f32 %v14763_v3, %v6891_v36  ;;  %v8866_v16 = vld [vmem:[#allocation2 + $0x760] sm:$0xff] }
 0x52c   : > { %11935 = vst.msk [vmem:[%s18394_s8 + $0x384] sm:$0xf] %vm11709_vm6, %v13168_v43  ;;  %v13173_v26 = vpack.c.bf16 %v10659_v5, %v10659_v5  ;;  %v10657_v25 = vadd.f32 %v13657_v38, %v9889_v60  ;;  %v9892_v58 = vadd.f32 %v20377_v41, %v9629_v50  ;;  %v15026_v19 = vpop.f32.mrf.mxu0  ;;  %v6588_v61 = vpop.f32.mrf.mxu1  ;;  %v6895_v43 = vld [vmem:[#allocation2 + $0x7b8] sm:$0xff]  ;;  %v13677_v60 = vunpack.c.l.bf16 %v20662_v6  ;;  %v6893_v3 = vld [vmem:[#allocation2 + $0x7a8] sm:$0xff] }
 0x52d   : > { %9377 = vst.msk [vmem:[#allocation2 + $0x758] sm:$0xff] %vm5177_vm5, %v9121_v59  ;;  %7400 = vst.msk [vmem:[#allocation2 + $0x780] sm:$0xff] %vm5177_vm5, %v7144_v31  ;;  %v9124_v2 = vadd.f32 %v15026_v19, %v8868_v47  ;;  %v7145_v17 = vadd.f32 %v6889_v15, %v6588_v61  ;;  %v6898_v47 = vld [vmem:[#allocation2 + $0x7d0] sm:$0xff] }
 0x52e   : > { %v9627_v18 = vld [vmem:[#allocation2 + $0x728] sm:$0xff]  ;;  %11940 = vst.msk [vmem:[%s18394_s8 + $0x398] sm:$0xf] %vm11709_vm6, %v13173_v26  ;;  %v13171_v56 = vpack.c.bf16 %v10657_v25, %v10657_v25  ;;  %v10660_v27 = vadd.f32 %v13662_v4, %v9892_v58  ;;  %v8551_v44 = vpop.f32.mrf.mxu0  ;;  %v14766_v49 = vpop.f32.mrf.mxu1  ;;  %v8869_v0 = vld [vmem:[#allocation2 + $0x778] sm:$0xff]  ;;  %v13673_v25 = vunpack.c.l.bf16 %v20671_v63 }
 0x52f   : > { %v9890_v39 = vadd.f32 %v20377_v41, %v9627_v18  ;;  %9375 = vst.msk [vmem:[#allocation2 + $0x748] sm:$0xff] %vm5177_vm5, %v9119_v10  ;;  %7403 = vst.msk [vmem:[#allocation2 + $0x798] sm:$0xff] %vm5177_vm5, %v7147_v8  ;;  %v20652_v41 = vld [vmem:[%s20810_s2] ss:$0 sm:$0xff]  ;;  %v9122_v30 = vadd.f32 %v8866_v16, %v8551_v44  ;;  %v7150_v12 = vadd.f32 %v14766_v49, %v6894_v24  ;;  %v20692_v44 = vld [vmem:[%s18346_s27 + $0x3c8] sm:$0xff]  }
 0x530   : > { %v9632_v13 = vld [vmem:[#allocation2 + $0x750] sm:$0xff]  ;;  %11938 = vst.msk [vmem:[%s18394_s8 + $0x390] sm:$0xf] %vm11709_vm6, %v13171_v56  ;;  %v13174_v22 = vpack.c.bf16 %v10660_v27, %v10660_v27  ;;  %v15027_v40 = vpop.f32.mrf.mxu0  ;;  %v6601_v7 = vpop.f32.mrf.mxu1  ;;  %v8867_v37 = vld [vmem:[#allocation2 + $0x768] sm:$0xff]  ;;  %v13678_v56 = vunpack.c.h.bf16 %v20662_v6  ;;  %v6896_v49 = vld [vmem:[#allocation2 + $0x7c0] sm:$0xff] }
 0x531   : > { %v10658_v52 = vadd.f32 %v13658_v45, %v9890_v39  ;;  %v9895_v55 = vadd.f32 %v20652_v41, %v9632_v13  ;;  %9380 = vst.msk [vmem:[#allocation2 + $0x770] sm:$0xff] %vm5177_vm5, %v9124_v2  ;;  %7401 = vst.msk [vmem:[#allocation2 + $0x788] sm:$0xff] %vm5177_vm5, %v7145_v17  ;;  %v9125_v9 = vadd.f32 %v15027_v40, %v8869_v0  ;;  %v20701_v0 = vld [vmem:[%s18346_s27 + $0x3c0] sm:$0xff]  }
 0x532   : > { %v9630_v53 = vld [vmem:[#allocation2 + $0x740] sm:$0xff]  ;;  %11941 = vst.msk [vmem:[%s18394_s8 + $0x39c] sm:$0xf] %vm11709_vm6, %v13174_v22  ;;  %v7148_v1 = vadd.f32 %v6892_v33, %v6601_v7  ;;  %v8554_v23 = vpop.f32.mrf.mxu0  ;;  %v14767_v57 = vpop.f32.mrf.mxu1  ;;  %v8872_v35 = vld [vmem:[#allocation2 + $0x790] sm:$0xff] }
 0x533   : > { %v13172_v20 = vpack.c.bf16 %v10658_v52, %v10658_v52  ;;  %v10663_v38 = vadd.f32 %v13669_v34, %v9895_v55  ;;  %v9893_v54 = vadd.f32 %v20652_v41, %v9630_v53  ;;  %9378 = vst.msk [vmem:[#allocation2 + $0x760] sm:$0xff] %vm5177_vm5, %v9122_v30  ;;  %7406 = vst.msk [vmem:[#allocation2 + $0x7b0] sm:$0xff] %vm5177_vm5, %v7150_v12  ;;  %v13674_v52 = vunpack.c.h.bf16 %v20671_v63 }
 0x534   : > { %v9633_v32 = vld [vmem:[#allocation2 + $0x758] sm:$0xff]  ;;  %9381 = vst.msk [vmem:[#allocation2 + $0x778] sm:$0xff] %vm5177_vm5, %v9125_v9  ;;  %v9123_v28 = vadd.f32 %v8867_v37, %v8554_v23  ;;  %7404 = vst.msk [vmem:[#allocation2 + $0x7a0] sm:$0xff] %vm5177_vm5, %v7148_v1  ;;  %v7151_v51 = vadd.f32 %v14767_v57, %v6895_v43  ;;  %v15030_v59 = vpop.f32.mrf.mxu0  ;;  %v6604_v50 = vpop.f32.mrf.mxu1  ;;  %v8870_v10 = vld [vmem:[#allocation2 + $0x780] sm:$0xff] }
 0x535   : > { %11939 = vst.msk [vmem:[%s18394_s8 + $0x394] sm:$0xf] %vm11709_vm6, %v13172_v20  ;;  %v13177_v4 = vpack.c.bf16 %v10663_v38, %v10663_v38  ;;  %v10661_v46 = vadd.f32 %v13665_v21, %v9893_v54  ;;  %v9896_v11 = vadd.f32 %v20652_v41, %v9633_v32  ;;  %v9128_v48 = vadd.f32 %v15030_v59, %v8872_v35  ;;  %v6899_v20 = vld [vmem:[#allocation2 + $0x7d8] sm:$0xff]  ;;  %v6897_v57 = vld [vmem:[#allocation2 + $0x7c8] sm:$0xff]  ;;  %v6902_v35 = vld [vmem:[#allocation2 + $0x7f0] sm:$0xff] }
 0x536   : > { %v9631_v5 = vld [vmem:[#allocation2 + $0x748] sm:$0xff]  ;;  %9379 = vst.msk [vmem:[#allocation2 + $0x768] sm:$0xff] %vm5177_vm5, %v9123_v28  ;;  %7407 = vst.msk [vmem:[#allocation2 + $0x7b8] sm:$0xff] %vm5177_vm5, %v7151_v51  ;;  %v7149_v58 = vadd.f32 %v6893_v3, %v6604_v50  ;;  %v8567_v29 = vpop.f32.mrf.mxu0  ;;  %v14770_v36 = vpop.f32.mrf.mxu1  ;;  %v8873_v2 = vld [vmem:[#allocation2 + $0x798] sm:$0xff]  ;;  %v13685_v54 = vunpack.c.l.bf16 %v20692_v44 }
 0x537   : > { %11944 = vst.msk [vmem:[%s18394_s8 + $0x3a8] sm:$0xf] %vm11709_vm6, %v13177_v4  ;;  %v13175_v45 = vpack.c.bf16 %v10661_v46, %v10661_v46  ;;  %v10664_v31 = vadd.f32 %v13670_v42, %v9896_v11  ;;  %v9894_v62 = vadd.f32 %v20652_v41, %v9631_v5  ;;  %v9126_v19 = vadd.f32 %v8870_v10, %v8567_v29  ;;  %v20722_v29 = vld [vmem:[%s18346_s27 + $0x3d8] sm:$0xff]  }
 0x538   : > { %v9636_v26 = vld [vmem:[#allocation2 + $0x770] sm:$0xff]  ;;  %9384 = vst.msk [vmem:[#allocation2 + $0x790] sm:$0xff] %vm5177_vm5, %v9128_v48  ;;  %7405 = vst.msk [vmem:[#allocation2 + $0x7a8] sm:$0xff] %vm5177_vm5, %v7149_v58  ;;  %v7154_v27 = vadd.f32 %v14770_v36, %v6898_v47  ;;  %v15031_v39 = vpop.f32.mrf.mxu0  ;;  %v6617_v15 = vpop.f32.mrf.mxu1  ;;  %v8871_v24 = vld [vmem:[#allocation2 + $0x788] sm:$0xff]  ;;  %v13681_v46 = vunpack.c.l.bf16 %v20701_v0 }
 0x539   : > { %11942 = vst.msk [vmem:[%s18394_s8 + $0x3a0] sm:$0xf] %vm11709_vm6, %v13175_v45  ;;  %v13178_v18 = vpack.c.bf16 %v10664_v31, %v10664_v31  ;;  %v10662_v34 = vadd.f32 %v13666_v14, %v9894_v62  ;;  %v9899_v8 = vadd.f32 %v20652_v41, %v9636_v26  ;;  %v9129_v16 = vadd.f32 %v15031_v39, %v8873_v2  ;;  %v6900_v36 = vld [vmem:[#allocation2 + $0x7e0] sm:$0xff]  ;;  %v20731_v2 = vld [vmem:[%s18346_s27 + $0x3d0] sm:$0xff]  }
 0x53a   : > { %v9634_v61 = vld [vmem:[#allocation2 + $0x760] sm:$0xff]  ;;  %9382 = vst.msk [vmem:[#allocation2 + $0x780] sm:$0xff] %vm5177_vm5, %v9126_v19  ;;  %7410 = vst.msk [vmem:[#allocation2 + $0x7d0] sm:$0xff] %vm5177_vm5, %v7154_v27  ;;  %v7152_v55 = vadd.f32 %v6896_v49, %v6617_v15  ;;  %v8570_v30 = vpop.f32.mrf.mxu0  ;;  %v14771_v53 = vpop.f32.mrf.mxu1  ;;  %v8876_v33 = vld [vmem:[#allocation2 + $0x7b0] sm:$0xff]  ;;  %v13686_v45 = vunpack.c.h.bf16 %v20692_v44 }
 0x53b   : > { %11945 = vst.msk [vmem:[%s18394_s8 + $0x3ac] sm:$0xf] %vm11709_vm6, %v13178_v18  ;;  %v13176_v13 = vpack.c.bf16 %v10662_v34, %v10662_v34  ;;  %v10667_v21 = vadd.f32 %v13677_v60, %v9899_v8  ;;  %v9897_v17 = vadd.f32 %v20652_v41, %v9634_v61  ;;  %v9637_v22 = vld [vmem:[#allocation2 + $0x778] sm:$0xff]  ;;  %v9127_v7 = vadd.f32 %v8871_v24, %v8570_v30  ;;  %v8874_v28 = vld [vmem:[#allocation2 + $0x7a0] sm:$0xff] }
 0x53c   : > { %v9900_v40 = vadd.f32 %v20652_v41, %v9637_v22  ;;  %9385 = vst.msk [vmem:[#allocation2 + $0x798] sm:$0xff] %vm5177_vm5, %v9129_v16  ;;  %7408 = vst.msk [vmem:[#allocation2 + $0x7c0] sm:$0xff] %vm5177_vm5, %v7152_v55  ;;  %v7155_v6 = vadd.f32 %v14771_v53, %v6899_v20  ;;  %v15034_v9 = vpop.f32.mrf.mxu0  ;;  %v6620_v32 = vpop.f32.mrf.mxu1  ;;  %v13682_v34 = vunpack.c.h.bf16 %v20701_v0  ;;  %v6901_v53 = vld [vmem:[#allocation2 + $0x7e8] sm:$0xff] }
 0x53d   : > { %11943 = vst.msk [vmem:[%s18394_s8 + $0x3a4] sm:$0xf] %vm11709_vm6, %v13176_v13  ;;  %v13181_v42 = vpack.c.bf16 %v10667_v21, %v10667_v21  ;;  %v10665_v12 = vadd.f32 %v13673_v25, %v9897_v17  ;;  %v9635_v38 = vld [vmem:[#allocation2 + $0x768] sm:$0xff]  ;;  %v9132_v37 = vadd.f32 %v15034_v9, %v8876_v33  ;;  %v7153_v11 = vadd.f32 %v6897_v57, %v6620_v32  ;;  %v8877_v48 = vld [vmem:[#allocation2 + $0x7b8] sm:$0xff] }
 0x53e   : > { %v10668_v1 = vadd.f32 %v13678_v56, %v9900_v40  ;;  %v9898_v23 = vadd.f32 %v20652_v41, %v9635_v38  ;;  %9383 = vst.msk [vmem:[#allocation2 + $0x788] sm:$0xff] %vm5177_vm5, %v9127_v7  ;;  %7411 = vst.msk [vmem:[#allocation2 + $0x7d8] sm:$0xff] %vm5177_vm5, %v7155_v6  ;;  %v8583_v63 = vpop.f32.mrf.mxu0  ;;  %v14774_v43 = vpop.f32.mrf.mxu1  ;;  %v6903_v13 = vld [vmem:[#allocation2 + $0x7f8] sm:$0xff]  ;;  %v13693_v17 = vunpack.c.l.bf16 %v20722_v29  ;;  %v13694_v33 = vunpack.c.h.bf16 %v20722_v29  ;;  %v13835_v57 = vld [vmem:[%s18346_s27 + $0x3e8] sm:$0xff]  }
 0x53f   : > { %11948 = vst.msk [vmem:[%s18394_s8 + $0x3b8] sm:$0xf] %vm11709_vm6, %v13181_v42  ;;  %v13179_v14 = vpack.c.bf16 %v10665_v12, %v10665_v12  ;;  %v9640_v4 = vld [vmem:[#allocation2 + $0x790] sm:$0xff]  ;;  %v9130_v59 = vadd.f32 %v8874_v28, %v8583_v63  ;;  %v7158_v31 = vadd.f32 %v14774_v43, %v6902_v35  ;;  %v8875_v47 = vld [vmem:[#allocation2 + $0x7a8] sm:$0xff]  ;;  %v13689_v12 = vunpack.c.l.bf16 %v20731_v2 }
 0x540   : > { %v13182_v5 = vpack.c.bf16 %v10668_v1, %v10668_v1  ;;  %v10666_v60 = vadd.f32 %v13674_v52, %v9898_v23  ;;  %v9903_v51 = vadd.f32 %v20652_v41, %v9640_v4  ;;  %9388 = vst.msk [vmem:[#allocation2 + $0x7b0] sm:$0xff] %vm5177_vm5, %v9132_v37  ;;  %7409 = vst.msk [vmem:[#allocation2 + $0x7c8] sm:$0xff] %vm5177_vm5, %v7153_v11  ;;  %v15035_v62 = vpop.f32.mrf.mxu0  ;;  %v6633_v3 = vpop.f32.mrf.mxu1  ;;  %v13690_v11 = vunpack.c.h.bf16 %v20731_v2 }
 0x541   : > { %11946 = vst.msk [vmem:[%s18394_s8 + $0x3b0] sm:$0xf] %vm11709_vm6, %v13179_v14  ;;  %v9638_v50 = vld [vmem:[#allocation2 + $0x780] sm:$0xff]  ;;  %v9133_v10 = vadd.f32 %v15035_v62, %v8877_v48  ;;  %v7156_v8 = vadd.f32 %v6900_v36, %v6633_v3  ;;  %v8880_v49 = vld [vmem:[#allocation2 + $0x7d0] sm:$0xff] }
 0x542   : > { %11949 = vst.msk [vmem:[%s18394_s8 + $0x3bc] sm:$0xf] %vm11709_vm6, %v13182_v5  ;;  %v13180_v26 = vpack.c.bf16 %v10666_v60, %v10666_v60  ;;  %v10671_v25 = vadd.f32 %v13685_v54, %v9903_v51  ;;  %v9901_v58 = vadd.f32 %v20652_v41, %v9638_v50  ;;  %v8586_v19 = vpop.f32.mrf.mxu0  ;;  %v14775_v61 = vpop.f32.mrf.mxu1  ;;  %v13834_v51 = vld [vmem:[%s18346_s27 + $0x3e0] sm:$0xff]   ;;  %v13701_v50 = vunpack.c.l.bf16 %v13835_v57 }
 0x543   : > { %9386 = vst.msk [vmem:[#allocation2 + $0x7a0] sm:$0xff] %vm5177_vm5, %v9130_v59  ;;  %v9641_v18 = vld [vmem:[#allocation2 + $0x798] sm:$0xff]  ;;  %7414 = vst.msk [vmem:[#allocation2 + $0x7f0] sm:$0xff] %vm5177_vm5, %v7158_v31  ;;  %v9131_v15 = vadd.f32 %v8875_v47, %v8586_v19  ;;  %v7159_v44 = vadd.f32 %v14775_v61, %v6903_v13  ;;  %v8878_v7 = vld [vmem:[#allocation2 + $0x7c0] sm:$0xff]  ;;  %v13702_v47 = vunpack.c.h.bf16 %v13835_v57 }
 0x544   : > { %11947 = vst.msk [vmem:[%s18394_s8 + $0x3b4] sm:$0xf] %vm11709_vm6, %v13180_v26  ;;  %v13185_v56 = vpack.c.bf16 %v10671_v25, %v10671_v25  ;;  %v10669_v27 = vadd.f32 %v13681_v46, %v9901_v58  ;;  %v9904_v39 = vadd.f32 %v20652_v41, %v9641_v18  ;;  %v15038_v16 = vpop.f32.mrf.mxu0  ;;  %v6636_v22 = vpop.f32.mrf.mxu1  ;;  %v13697_v58 = vunpack.c.l.bf16 %v13834_v51 }
 0x545   : > { %9389 = vst.msk [vmem:[#allocation2 + $0x7b8] sm:$0xff] %vm5177_vm5, %v9133_v10  ;;  %v9639_v21 = vld [vmem:[#allocation2 + $0x788] sm:$0xff]  ;;  %7412 = vst.msk [vmem:[#allocation2 + $0x7e0] sm:$0xff] %vm5177_vm5, %v7156_v8  ;;  %v9136_v24 = vadd.f32 %v15038_v16, %v8880_v49  ;;  %v7157_v40 = vadd.f32 %v6901_v53, %v6636_v22  ;;  %v8881_v14 = vld [vmem:[#allocation2 + $0x7d8] sm:$0xff] }
 0x546   : > { %11952 = vst.msk [vmem:[%s18394_s8 + $0x3c8] sm:$0xf] %vm11709_vm6, %v13185_v56  ;;  %v13183_v52 = vpack.c.bf16 %v10669_v27, %v10669_v27  ;;  %v10672_v55 = vadd.f32 %v13686_v45, %v9904_v39  ;;  %v9902_v30 = vadd.f32 %v20652_v41, %v9639_v21  ;;  %v8599_v0 = vpop.f32.mrf.mxu0  ;;  %v13698_v21 = vunpack.c.h.bf16 %v13834_v51 }
 0x547   : > { %9387 = vst.msk [vmem:[#allocation2 + $0x7a8] sm:$0xff] %vm5177_vm5, %v9131_v15  ;;  %v9644_v42 = vld [vmem:[#allocation2 + $0x7b0] sm:$0xff]  ;;  %7415 = vst.msk [vmem:[#allocation2 + $0x7f8] sm:$0xff] %vm5177_vm5, %v7159_v44  ;;  %v9134_v6 = vadd.f32 %v8878_v7, %v8599_v0  ;;  %v8879_v28 = vld [vmem:[#allocation2 + $0x7c8] sm:$0xff] }
 0x548   : > { %11950 = vst.msk [vmem:[%s18394_s8 + $0x3c0] sm:$0xf] %vm11709_vm6, %v13183_v52  ;;  %v13186_v20 = vpack.c.bf16 %v10672_v55, %v10672_v55  ;;  %v10670_v38 = vadd.f32 %v13682_v34, %v9902_v30  ;;  %v9907_v54 = vadd.f32 %v20652_v41, %v9644_v42  ;;  %v15039_v32 = vpop.f32.mrf.mxu0 }
 0x549   : > { %9392 = vst.msk [vmem:[#allocation2 + $0x7d0] sm:$0xff] %vm5177_vm5, %v9136_v24  ;;  %7413 = vst.msk [vmem:[#allocation2 + $0x7e8] sm:$0xff] %vm5177_vm5, %v7157_v40  ;;  %v9137_v4 = vadd.f32 %v15039_v32, %v8881_v14  ;;  %v13836_v24 = vld [vmem:[%s18346_s27 + $0x3f0] sm:$0xff]  }
 0x54a   : > { %v9642_v9 = vld [vmem:[#allocation2 + $0x7a0] sm:$0xff]  ;;  %11953 = vst.msk [vmem:[%s18394_s8 + $0x3cc] sm:$0xf] %vm11709_vm6, %v13186_v20  ;;  %v13184_v1 = vpack.c.bf16 %v10670_v38, %v10670_v38  ;;  %v10675_v23 = vadd.f32 %v13693_v17, %v9907_v54  ;;  %v8602_v63 = vpop.f32.mrf.mxu0  ;;  %v8884_v31 = vld [vmem:[#allocation2 + $0x7f0] sm:$0xff]  ;;  %v13837_v17 = vld [vmem:[%s18346_s27 + $0x3f8] sm:$0xff]   ;;  %v13705_v54 = vunpack.c.l.bf16 %v13836_v24 }
 0x54b   : > { %v9905_v37 = vadd.f32 %v20652_v41, %v9642_v9  ;;  %9390 = vst.msk [vmem:[#allocation2 + $0x7c0] sm:$0xff] %vm5177_vm5, %v9134_v6  ;;  %9393 = vst.msk [vmem:[#allocation2 + $0x7d8] sm:$0xff] %vm5177_vm5, %v9137_v4  ;;  %v9135_v59 = vadd.f32 %v8879_v28, %v8602_v63  ;;  %v13709_v40 = vunpack.c.l.bf16 %v13837_v17  ;;  %v13710_v14 = vunpack.c.h.bf16 %v13837_v17 }
 0x54c   : > { %v9645_v46 = vld [vmem:[#allocation2 + $0x7b8] sm:$0xff]  ;;  %11951 = vst.msk [vmem:[%s18394_s8 + $0x3c4] sm:$0xf] %vm11709_vm6, %v13184_v1  ;;  %v13189_v43 = vpack.c.bf16 %v10675_v23, %v10675_v23  ;;  %v15042_v45 = vpop.f32.mrf.mxu0  ;;  %v8882_v10 = vld [vmem:[#allocation2 + $0x7e0] sm:$0xff]  ;;  %v13706_v4 = vunpack.c.h.bf16 %v13836_v24 }
 0x54d   : > { %v10673_v5 = vadd.f32 %v13689_v12, %v9905_v37  ;;  %v9908_v60 = vadd.f32 %v20652_v41, %v9645_v46  ;;  %9391 = vst.msk [vmem:[#allocation2 + $0x7c8] sm:$0xff] %vm5177_vm5, %v9135_v59  ;;  %v9140_v26 = vadd.f32 %v15042_v45, %v8884_v31 }
 0x54e   : > { %v9643_v35 = vld [vmem:[#allocation2 + $0x7a8] sm:$0xff]  ;;  %11956 = vst.msk [vmem:[%s18394_s8 + $0x3d8] sm:$0xf] %vm11709_vm6, %v13189_v43  ;;  %v8615_v29 = vpop.f32.mrf.mxu0  ;;  %v8885_v56 = vld [vmem:[#allocation2 + $0x7f8] sm:$0xff] }
 0x54f   : > { %v13187_v62 = vpack.c.bf16 %v10673_v5, %v10673_v5  ;;  %v10676_v48 = vadd.f32 %v13694_v33, %v9908_v60  ;;  %v9906_v3 = vadd.f32 %v20652_v41, %v9643_v35  ;;  %9396 = vst.msk [vmem:[#allocation2 + $0x7f0] sm:$0xff] %vm5177_vm5, %v9140_v26  ;;  %v9138_v8 = vadd.f32 %v8882_v10, %v8615_v29 }
 0x550   : > { %v9648_v25 = vld [vmem:[#allocation2 + $0x7d0] sm:$0xff]  ;;  %v15043_v61 = vpop.f32.mrf.mxu0  ;;  %v8883_v16 = vld [vmem:[#allocation2 + $0x7e8] sm:$0xff] }
 0x551   : > { %11954 = vst.msk [vmem:[%s18394_s8 + $0x3d0] sm:$0xf] %vm11709_vm6, %v13187_v62  ;;  %v13190_v36 = vpack.c.bf16 %v10676_v48, %v10676_v48  ;;  %v10674_v18 = vadd.f32 %v13690_v11, %v9906_v3  ;;  %v9911_v34 = vadd.f32 %v20652_v41, %v9648_v25  ;;  %v9141_v15 = vadd.f32 %v15043_v61, %v8885_v56 }
 0x552   : > { %v9646_v19 = vld [vmem:[#allocation2 + $0x7c0] sm:$0xff]  ;;  %9394 = vst.msk [vmem:[#allocation2 + $0x7e0] sm:$0xff] %vm5177_vm5, %v9138_v8  ;;  %v9649_v13 = vld [vmem:[#allocation2 + $0x7d8] sm:$0xff]  ;;  %v8618_v44 = vpop.f32.mrf.mxu0 }
 0x553   : > { %11957 = vst.msk [vmem:[%s18394_s8 + $0x3dc] sm:$0xf] %vm11709_vm6, %v13190_v36  ;;  %v13188_v27 = vpack.c.bf16 %v10674_v18, %v10674_v18  ;;  %v10679_v39 = vadd.f32 %v13701_v50, %v9911_v34  ;;  %v9909_v2 = vadd.f32 %v20652_v41, %v9646_v19  ;;  %v9912_v52 = vadd.f32 %v20652_v41, %v9649_v13 }
 0x554   : > { %9397 = vst.msk [vmem:[#allocation2 + $0x7f8] sm:$0xff] %vm5177_vm5, %v9141_v15  ;;  %v9139_v55 = vadd.f32 %v8883_v16, %v8618_v44  ;;  %v9647_v30 = vld [vmem:[#allocation2 + $0x7c8] sm:$0xff] }
 0x555   : > { %11955 = vst.msk [vmem:[%s18394_s8 + $0x3d4] sm:$0xf] %vm11709_vm6, %v13188_v27  ;;  %v13193_v49 = vpack.c.bf16 %v10679_v39, %v10679_v39  ;;  %v10677_v22 = vadd.f32 %v13697_v58, %v9909_v2  ;;  %v10680_v42 = vadd.f32 %v13702_v47, %v9912_v52  ;;  %v9910_v12 = vadd.f32 %v20652_v41, %v9647_v30 }
 0x556   : > { %9395 = vst.msk [vmem:[#allocation2 + $0x7e8] sm:$0xff] %vm5177_vm5, %v9139_v55  ;;  %v9652_v0 = vld [vmem:[#allocation2 + $0x7f0] sm:$0xff] }
 0x557   : > { %11960 = vst.msk [vmem:[%s18394_s8 + $0x3e8] sm:$0xf] %vm11709_vm6, %v13193_v49  ;;  %v13191_v53 = vpack.c.bf16 %v10677_v22, %v10677_v22  ;;  %v13194_v7 = vpack.c.bf16 %v10680_v42, %v10680_v42  ;;  %v10678_v20 = vadd.f32 %v13698_v21, %v9910_v12  ;;  %v9915_v38 = vadd.f32 %v20652_v41, %v9652_v0 }
 0x559   : > { %11958 = vst.msk [vmem:[%s18394_s8 + $0x3e0] sm:$0xf] %vm11709_vm6, %v13191_v53  ;;  %v9650_v6 = vld [vmem:[#allocation2 + $0x7e0] sm:$0xff]  ;;  %11961 = vst.msk [vmem:[%s18394_s8 + $0x3ec] sm:$0xf] %vm11709_vm6, %v13194_v7  ;;  %v13192_v9 = vpack.c.bf16 %v10678_v20, %v10678_v20  ;;  %v10683_v33 = vadd.f32 %v13709_v40, %v9915_v38 }
 0x55a   : > { %v9913_v32 = vadd.f32 %v20652_v41, %v9650_v6 }
 0x55b   : > { %v9653_v1 = vld [vmem:[#allocation2 + $0x7f8] sm:$0xff]  ;;  %11959 = vst.msk [vmem:[%s18394_s8 + $0x3e4] sm:$0xf] %vm11709_vm6, %v13192_v9  ;;  %v13197_v23 = vpack.c.bf16 %v10683_v33, %v10683_v33 }
 0x55c   : > { %v10681_v37 = vadd.f32 %v13705_v54, %v9913_v32  ;;  %v9916_v57 = vadd.f32 %v20652_v41, %v9653_v1 }
 0x55d   : > { %v9651_v46 = vld [vmem:[#allocation2 + $0x7e8] sm:$0xff]  ;;  %11964 = vst.msk [vmem:[%s18394_s8 + $0x3f8] sm:$0xf] %vm11709_vm6, %v13197_v23 }
 0x55e   : > { %v13195_v11 = vpack.c.bf16 %v10681_v37, %v10681_v37  ;;  %v10684_v63 = vadd.f32 %v13710_v14, %v9916_v57  ;;  %v9914_v28 = vadd.f32 %v20652_v41, %v9651_v46 }
 0x560   : > { %11962 = vst.msk [vmem:[%s18394_s8 + $0x3f0] sm:$0xf] %vm11709_vm6, %v13195_v11  ;;  %v13198_v43 = vpack.c.bf16 %v10684_v63, %v10684_v63  ;;  %v10682_v5 = vadd.f32 %v13706_v4, %v9914_v28 }
 0x562   : > { %11965 = vst.msk [vmem:[%s18394_s8 + $0x3fc] sm:$0xf] %vm11709_vm6, %v13198_v43  ;;  %v13196_v60 = vpack.c.bf16 %v10682_v5, %v10682_v5 }
 0x564   : > { %11963 = vst.msk [vmem:[%s18394_s8 + $0x3f4] sm:$0xf] %vm11709_vm6, %v13196_v60 }
 0x565 PF: > { %s16_s20 = sadd.s32 1, %s15422_s20   ;;  %s21127_s18 = smov %s15418_s19 }
 0x566   : > { %p13_p6 = scmp.ge.s32.totalorder %s16_s20, 4   ;;  %s21128_s19 = smov %s21130_s3 }
 0x568   :  { %15 = sbr.rel (!%p13_p6) target bundleno = 2 (0x2), region = 75 }

</bundles_post_ra>
